<compile_context>
chip_gen: v5e
topology: v5e:2x2
jax: 0.10.0
libtpu: 0.0.40
codegen_flags: <defaults>
</compile_context>

<pallas_src>
import functools
import math

import jax
import jax.numpy as jnp
from jax import lax
from jax.experimental import pallas as pl
from jax.experimental.pallas import tpu as pltpu

BN_EPS = 1e-5
LANE = 128            # vreg lane width -> channel padding target
SUBLANE = 8
BIG = 1e30            # distance sentinel
INT_BIG = 2_147_483_647
VMEM_LIMIT = 32 * 1024 * 1024   # explicit scoped-VMEM request (safe on v5e/v6e/v7x)


def _round_up(x, m):
    return ((x + m - 1) // m) * m


# ---------------------------------------------------------------------------
# Feature path kernels (row-tiled, two-pass BatchNorm via partial sums)
# ---------------------------------------------------------------------------
def _row_keep(t, n_valid):
    """[t, 1] bool mask: True for real point rows (False for row padding)."""
    row0 = pl.program_id(0) * t
    rows = row0 + lax.broadcasted_iota(jnp.int32, (t, 1), 0)
    return rows < n_valid


def _col_sums(h):
    """Single-sweep per-channel (sum, sum_of_squares) -> [1, 2, CP]."""
    s = jnp.sum(h, axis=0, keepdims=True)
    q = jnp.sum(h * h, axis=0, keepdims=True)
    return jnp.concatenate([s, q], axis=0)[None]


def _mm_stats_kernel(x_ref, w_ref, h_ref, ps_ref):
    # x is already masked (padded rows are zero), so stats stay exact.
    h = jnp.dot(x_ref[...].astype(jnp.bfloat16), w_ref[...],
                preferred_element_type=jnp.float32)
    h_ref[...] = h
    ps_ref[...] = _col_sums(h)


def _bn_relu_stats_kernel(h_ref, ss_ref, a_ref, ps_ref, *, n_valid):
    t = h_ref.shape[0]
    ss = ss_ref[...]                                   # [2, CP]  (scale, shift)
    a = jnp.maximum(h_ref[...] * ss[0:1, :] + ss[1:2, :], 0.0)
    a = jnp.where(_row_keep(t, n_valid), a, 0.0)       # keep padded rows at 0
    a_ref[...] = a
    ps_ref[...] = _col_sums(a)


def _bn_relu_mm_stats_kernel(h_ref, ss_ref, w_ref, *out_refs, n_valid, write_a):
    t = h_ref.shape[0]
    ss = ss_ref[...]
    a = jnp.maximum(h_ref[...] * ss[0:1, :] + ss[1:2, :], 0.0)
    a = jnp.where(_row_keep(t, n_valid), a, 0.0)
    if write_a:
        a_ref, hout_ref, ps_ref = out_refs
        a_ref[...] = a                                  # materialize block identity
    else:
        hout_ref, ps_ref = out_refs
    h = jnp.dot(a.astype(jnp.bfloat16), w_ref[...],
                preferred_element_type=jnp.float32)
    hout_ref[...] = h
    ps_ref[...] = _col_sums(h)


def _residual_kernel(x_ref, h_ref, ss_ref, out_ref, *, n_valid):
    t = x_ref.shape[0]
    ss = ss_ref[...]
    y = jnp.maximum(x_ref[...] + h_ref[...] * ss[0:1, :] + ss[1:2, :], 0.0)
    out_ref[...] = jnp.where(_row_keep(t, n_valid), y, 0.0)


def _finalize_stats(psum, gamma, beta, n):
    """Reduce per-tile partial sums -> fused BN affine (scale, shift). Tiny XLA op."""
    s = jnp.sum(psum, axis=0)                                   # [2, CP]
    mean = s[0] * (1.0 / n)
    var = jnp.maximum(s[1] * (1.0 / n) - mean * mean, 0.0)       # biased (PyTorch BN)
    scale = gamma * lax.rsqrt(var + BN_EPS)
    shift = beta - mean * scale
    return jnp.stack([scale, shift], axis=0)                     # [2, CP] f32


def embed_forward(packed, feat, *, row_tile=None):
    """proj + residual blocks, row-tiled. Returns lane-padded [N, CP] f32
    (padded channels are exactly zero; consume the slab directly downstream)."""
    n, cin = feat.shape
    cin_p, cp = packed["proj_w"].shape
    depth = packed["depth"]
    assert depth >= 1
    pgb = packed["proj_gb"]                 # [2, CP]  (gamma, beta) of proj BN
    gb = packed["gb"]                       # [D, 6, CP]

    if row_tile is None:
        # v7x: 256-512 rows; v6e/v5e have VMEM headroom for 512-1024.
        row_tile = 512 if n >= 512 else _round_up(n, SUBLANE)
    row_tile = max(SUBLANE, _round_up(row_tile, SUBLANE))
    n_pad = _round_up(n, row_tile)
    nt = n_pad // row_tile

    cparams = pltpu.CompilerParams(
        dimension_semantics=("parallel",),          # independent row tiles (megacore)
        vmem_limit_bytes=VMEM_LIMIT)

    act = jax.ShapeDtypeStruct((n_pad, cp), jnp.float32)
    ps = jax.ShapeDtypeStruct((nt, 2, cp), jnp.float32)
    row_spec = pl.BlockSpec((row_tile, cp), lambda i: (i, 0))
    ss_spec = pl.BlockSpec((2, cp), lambda i: (0, 0))
    w_spec = pl.BlockSpec((cp, cp), lambda i: (0, 0))      # constant map: DMA'd once
    ps_spec = pl.BlockSpec((1, 2, cp), lambda i: (i, 0, 0))

    def mm_stats(x, w):
        kin = x.shape[1]
        return pl.pallas_call(
            _mm_stats_kernel,
            out_shape=(act, ps),
            grid=(nt,),
            in_specs=[pl.BlockSpec((row_tile, kin), lambda i: (i, 0)),
                      pl.BlockSpec((kin, cp), lambda i: (0, 0))],
            out_specs=(row_spec, ps_spec),
            compiler_params=cparams,
        )(x, w)

    def bn_relu_stats(h, ss):
        return pl.pallas_call(
            functools.partial(_bn_relu_stats_kernel, n_valid=n),
            out_shape=(act, ps),
            grid=(nt,),
            in_specs=[row_spec, ss_spec],
            out_specs=(row_spec, ps_spec),
            compiler_params=cparams,
        )(h, ss)

    def bn_relu_mm_stats(h, ss, w, write_a):
        out_shape = (act, act, ps) if write_a else (act, ps)
        out_specs = (row_spec, row_spec, ps_spec) if write_a else (row_spec, ps_spec)
        return pl.pallas_call(
            functools.partial(_bn_relu_mm_stats_kernel, n_valid=n, write_a=write_a),
            out_shape=out_shape,
            grid=(nt,),
            in_specs=[row_spec, ss_spec, w_spec],
            out_specs=out_specs,
            compiler_params=cparams,
        )(h, ss, w)

    def residual(x, h, ss):
        return pl.pallas_call(
            functools.partial(_residual_kernel, n_valid=n),
            out_shape=act,
            grid=(nt,),
            in_specs=[row_spec, row_spec, ss_spec],
            out_specs=row_spec,
            compiler_params=cparams,
        )(x, h, ss)

    feat_pad = jnp.zeros((n_pad, cin_p), jnp.float32).at[:n, :cin].set(feat)

    # --- proj Linear(no bias) + stats for proj BN -----------------------------
    h0, ps0 = mm_stats(feat_pad, packed["proj_w"])
    ss0 = _finalize_stats(ps0, pgb[0], pgb[1], n)

    x = None
    for i in range(depth):
        w1 = packed["w1"][i]
        w3 = packed["w3"][i]
        if i == 0:
            # fused: x0 = ReLU(BN_proj(h0)); h1 = fc1(x0); stats(h1)
            x, h1, ps1 = bn_relu_mm_stats(h0, ss0, w1, write_a=True)
        else:
            # x is already normalized / masked (previous block's output)
            h1, ps1 = mm_stats(x, w1)
        ss1 = _finalize_stats(ps1, gb[i, 0], gb[i, 1], n)

        # norm1 -> ReLU ; KPConv pass-through ; stats for norm2
        # TODO(synk): KPConvD / KPConvX kernel-point convolution over
        #             reference_index has no source in the reference module;
        #             identity pass-through.
        a1, ps2 = bn_relu_stats(h1, ss1)
        ss2 = _finalize_stats(ps2, gb[i, 2], gb[i, 3], n)

        # norm2 -> ReLU -> fc3 ; stats for norm3
        h3, ps3 = bn_relu_mm_stats(a1, ss2, w3, write_a=False)
        ss3 = _finalize_stats(ps3, gb[i, 4], gb[i, 5], n)

        # norm3 -> +identity -> ReLU  (DropPath(0.0) == Identity)
        x = residual(x, h3, ss3)

    return x[:n]


# ---------------------------------------------------------------------------
# Kernel: brute-force kNN (knn_query replacement), row + column tiled with a
# running top-k merge so the working set is bounded regardless of N.
# ---------------------------------------------------------------------------
def _knn_kernel(rows_ref, rsq_ref, colsT_ref, csq_ref, idx_ref,
                best_d_ref, best_i_ref, *, k, n_valid, col_tile):
    c = pl.program_id(1)

    @pl.when(c == 0)
    def _():
        best_d_ref[...] = jnp.full(best_d_ref.shape, BIG, best_d_ref.dtype)
        best_i_ref[...] = jnp.zeros(best_i_ref.shape, best_i_ref.dtype)

    # d2[i, j] = |r_i|^2 + |c_j|^2 - 2 <r_i, c_j>  (gram on the MXU, lane-dense RHS)
    gram = jnp.dot(rows_ref[...], colsT_ref[...],
                   preferred_element_type=jnp.float32)            # [tq, tc]
    d = jnp.maximum(rsq_ref[...] + csq_ref[...] - 2.0 * gram, 0.0)

    ids = c * col_tile + lax.broadcasted_iota(jnp.int32, d.shape, 1)
    d = jnp.where(ids < n_valid, d, BIG)                          # mask padded columns

    # merge this column tile with the running best-k (streaming top-k)
    cat_d = jnp.concatenate([best_d_ref[...], d], axis=1)         # [tq, k+tc]
    cat_i = jnp.concatenate([best_i_ref[...], ids], axis=1)

    d_cols, i_cols = [], []
    for _ in range(k):                                            # static unroll
        m = jnp.min(cat_d, axis=1, keepdims=True)
        masked = jnp.where(cat_d <= m, cat_i, INT_BIG)            # reused twice below
        sel = jnp.min(masked, axis=1, keepdims=True)              # smallest index at min
        d_cols.append(m)
        i_cols.append(sel)
        cat_d = jnp.where(masked == sel, BIG, cat_d)              # knock it out

    new_d = jnp.concatenate(d_cols, axis=1)
    new_i = jnp.concatenate(i_cols, axis=1)
    best_d_ref[...] = new_d
    best_i_ref[...] = new_i

    @pl.when(c == pl.num_programs(1) - 1)
    def _():
        idx_ref[...] = new_i


def knn_reference_index(coord, k, *, row_tile=None, col_tile=None):
    """k nearest neighbour indices (self included), shape [N, k] int32."""
    n, dim = coord.shape
    assert k <= n
    if row_tile is None:
        row_tile = 256 if n >= 256 else _round_up(n, SUBLANE)
    row_tile = max(SUBLANE, _round_up(row_tile, SUBLANE))
    if col_tile is None:
        # v7x: ~4096; v5e/v6e can go larger. Bounded so the [tq, tc] tile stays small.
        col_tile = min(4096, _round_up(n, LANE))
    col_tile = max(LANE, _round_up(col_tile, LANE))

    n_row_pad = _round_up(n, row_tile)
    n_col_pad = _round_up(n, col_tile)
    dp = SUBLANE                                      # contraction dim 3 -> 8

    rows = jnp.zeros((n_row_pad, dp), jnp.float32).at[:n, :dim].set(coord)
    # candidates transposed: coords in sublanes, points in lanes (lane-dense, 32 B/pt)
    cols_t = jnp.zeros((dp, n_col_pad), jnp.float32).at[:dim, :n].set(coord.T)
    r_sq = jnp.sum(rows * rows, axis=1, keepdims=True)            # [n_row_pad, 1]
    c_sq = jnp.sum(cols_t * cols_t, axis=0, keepdims=True)        # [1, n_col_pad]

    grid = (n_row_pad // row_tile, n_col_pad // col_tile)

    idx = pl.pallas_call(
        functools.partial(_knn_kernel, k=k, n_valid=n, col_tile=col_tile),
        out_shape=jax.ShapeDtypeStruct((n_row_pad, k), jnp.int32),
        grid=grid,
        in_specs=[
            pl.BlockSpec((row_tile, dp), lambda r, c: (r, 0)),    # query rows
            pl.BlockSpec((row_tile, 1), lambda r, c: (r, 0)),     # |r|^2
            pl.BlockSpec((dp, col_tile), lambda r, c: (0, c)),    # candidate cols (T)
            pl.BlockSpec((1, col_tile), lambda r, c: (0, c)),     # |c|^2
        ],
        out_specs=pl.BlockSpec((row_tile, k), lambda r, c: (r, 0)),
        scratch_shapes=[pltpu.VMEM((row_tile, k), jnp.float32),   # running best dists
                        pltpu.VMEM((row_tile, k), jnp.int32)],    # running best ids
        compiler_params=pltpu.CompilerParams(
            dimension_semantics=("parallel", "arbitrary"),        # rows megacore, cols reduce
            vmem_limit_bytes=VMEM_LIMIT),
    )(rows, r_sq, cols_t, c_sq)

    return idx[:n]            # padded query rows hold garbage and are dropped here


# ---------------------------------------------------------------------------
# GVAPatchEmbed forward
# ---------------------------------------------------------------------------
def gva_patch_embed_forward(packed_params, coord, feat, offset, *, neighbours,
                            embed_row_tile=None, knn_row_tile=None, knn_col_tile=None):
    # knn_query: -1 padding only occurs for ragged multi-batch inputs, which are
    # not modelled here (single dense batch).
    # TODO(synk): per-batch neighbour masking driven by `offset` for B > 1.
    reference_index = knn_reference_index(coord, neighbours,
                                          row_tile=knn_row_tile, col_tile=knn_col_tile)
    feat = embed_forward(packed_params, feat, row_tile=embed_row_tile)
    return coord, feat, offset, reference_index


# ---------------------------------------------------------------------------
# Parameters: logical (PyTorch-shaped, pre-transposed [in, out]) init, plus a
# packing step that zero-pads channels to 128 lanes, casts weights to bf16 and
# stacks per-block tensors.
# ---------------------------------------------------------------------------
def init_params(key, in_channels, embed_channels, depth):
    keys = jax.random.split(key, 1 + 2 * depth)
    s_in = 1.0 / math.sqrt(in_channels)
    s_em = 1.0 / math.sqrt(embed_channels)

    params = {
        "proj_w": jax.random.uniform(keys[0], (in_channels, embed_channels),
                                     jnp.float32, -s_in, s_in),
        "proj_g": jnp.ones((embed_channels,), jnp.float32),
        "proj_b": jnp.zeros((embed_channels,), jnp.float32),
        "blocks": [],
    }
    for i in range(depth):
        params["blocks"].append({
            "fc1_w": jax.random.uniform(keys[1 + 2 * i], (embed_channels, embed_channels),
                                        jnp.float32, -s_em, s_em),
            "fc3_w": jax.random.uniform(keys[2 + 2 * i], (embed_channels, embed_channels),
                                        jnp.float32, -s_em, s_em),
            "norm1_g": jnp.ones((embed_channels,), jnp.float32),
            "norm1_b": jnp.zeros((embed_channels,), jnp.float32),
            "norm2_g": jnp.ones((embed_channels,), jnp.float32),
            "norm2_b": jnp.zeros((embed_channels,), jnp.float32),
            "norm3_g": jnp.ones((embed_channels,), jnp.float32),
            "norm3_b": jnp.zeros((embed_channels,), jnp.float32),
        })
    return params


def pack_params(params):
    cin, cemb = params["proj_w"].shape
    cp = _round_up(cemb, LANE)            # if production cemb > 128, pad to 256 (v6e/v7x MXU)
    cin_p = _round_up(cin, SUBLANE)

    def pad_vec(v):
        return jnp.zeros((cp,), jnp.float32).at[:cemb].set(v)

    def pad_mat(w, rows):
        return jnp.zeros((rows, cp), jnp.float32).at[:w.shape[0], :cemb].set(w)

    proj_w = pad_mat(params["proj_w"], cin_p).astype(jnp.bfloat16)
    proj_gb = jnp.stack([pad_vec(params["proj_g"]), pad_vec(params["proj_b"])], axis=0)

    w1, w3, gb = [], [], []
    for blk in params["blocks"]:
        w1.append(pad_mat(blk["fc1_w"], cp).astype(jnp.bfloat16))
        w3.append(pad_mat(blk["fc3_w"], cp).astype(jnp.bfloat16))
        gb.append(jnp.stack([pad_vec(blk["norm1_g"]), pad_vec(blk["norm1_b"]),
                             pad_vec(blk["norm2_g"]), pad_vec(blk["norm2_b"]),
                             pad_vec(blk["norm3_g"]), pad_vec(blk["norm3_b"])], axis=0))

    return {
        "cemb": cemb, "depth": len(w1),
        "proj_w": proj_w, "proj_gb": proj_gb,
        "w1": jnp.stack(w1, axis=0),          # [D, CP, CP] bf16
        "w3": jnp.stack(w3, axis=0),          # [D, CP, CP] bf16
        "gb": jnp.stack(gb, axis=0),          # [D, 6, CP]  f32
    }


# ---------------------------------------------------------------------------
# Pure-JAX reference (same bf16-matmul / f32-BN recipe) for validation.
# ---------------------------------------------------------------------------
def _embed_reference(params, feat):
    def bn(h, g, b, relu):
        mean = jnp.mean(h, axis=0, keepdims=True)
        var = jnp.mean((h - mean) ** 2, axis=0, keepdims=True)
        y = (h - mean) * (lax.rsqrt(var + BN_EPS) * g) + b
        return jnp.maximum(y, 0.0) if relu else y

    bf = lambda a: a.astype(jnp.bfloat16)
    h = jnp.dot(bf(feat), bf(params["proj_w"]), preferred_element_type=jnp.float32)
    x = bn(h, params["proj_g"], params["proj_b"], True)
    for blk in params["blocks"]:
        identity = x
        h = jnp.dot(bf(x), bf(blk["fc1_w"]), preferred_element_type=jnp.float32)
        h = bn(h, blk["norm1_g"], blk["norm1_b"], True)
        h = bn(h, blk["norm2_g"], blk["norm2_b"], True)
        h = jnp.dot(bf(h), bf(blk["fc3_w"]), preferred_element_type=jnp.float32)
        h = bn(h, blk["norm3_g"], blk["norm3_b"], False)
        x = jnp.maximum(identity + h, 0.0)
    return x


# ---------------------------------------------------------------------------
if __name__ == "__main__":
    N = 200            # number of points (chosen so multi-tile + masking paths run)
    IN_CHANNELS = 6    # e.g. color + normal
    EMBED_CHANNELS = 32
    DEPTH = 2
    NEIGHBOURS = 16

    key = jax.random.PRNGKey(0)
    k_coord, k_feat, k_param = jax.random.split(key, 3)

    coord = jax.random.normal(k_coord, (N, 3), jnp.float32)
    feat = jax.random.normal(k_feat, (N, IN_CHANNELS), jnp.float32)
    offset = jnp.array([N], jnp.int32)

    params = init_params(k_param, IN_CHANNELS, EMBED_CHANNELS, DEPTH)
    packed = pack_params(params)

    # Small tiles so the toy N=200 run exercises multi-row-tile grids, padded-row
    # masking, and the multi-column-tile running top-k merge.
    coord_out, feat_pad_out, offset_out, ref_idx = gva_patch_embed_forward(
        packed, coord, feat, offset, neighbours=NEIGHBOURS,
        embed_row_tile=64, knn_row_tile=64, knn_col_tile=128)

    jax.block_until_ready(feat_pad_out)
    jax.block_until_ready(ref_idx)

    # shape / sanity checks
    assert coord_out.shape == (N, 3)
    assert feat_pad_out.shape == (N, LANE)          # lane-padded feature slab
    assert ref_idx.shape == (N, NEIGHBOURS)
    assert offset_out.shape == (1,)
    assert bool(jnp.all(feat_pad_out[:, EMBED_CHANNELS:] == 0.0))   # padding stays zero

    feat_out = feat_pad_out[:, :EMBED_CHANNELS]
    assert bool(jnp.all(jnp.isfinite(feat_out)))

    # correctness vs. pure-JAX references
    feat_ref = _embed_reference(params, feat)
    assert bool(jnp.allclose(feat_out, feat_ref, rtol=1e-2, atol=1e-2))

    d2_ref = jnp.sum((coord[:, None, :] - coord[None, :, :]) ** 2, axis=-1)
    _, idx_top = lax.top_k(-d2_ref, NEIGHBOURS)
    sets_equal = bool(jnp.all(jnp.sort(ref_idx, axis=1) == jnp.sort(idx_top, axis=1)))
    # fp-robust fallback: the selected neighbour distances must match the true k-NN set
    d_sel = jnp.sort(jnp.take_along_axis(d2_ref, ref_idx, axis=1), axis=1)
    d_top = jnp.sort(jnp.take_along_axis(d2_ref, idx_top, axis=1), axis=1)
    dists_close = bool(jnp.allclose(d_sel, d_top, rtol=1e-4, atol=1e-3))
    assert sets_equal or dists_close

    print("KERNEL_OK")
</pallas_src>

<mosaic_0001>
module attributes {stable_mosaic.version = 11 : i64} {
  func.func @_knn_kernel(%arg0: i32, %arg1: i32, %arg2: memref<64x8xf32, #tpu.memory_space<vmem>>, %arg3: memref<64x1xf32, #tpu.memory_space<vmem>>, %arg4: memref<8x128xf32, #tpu.memory_space<vmem>>, %arg5: memref<1x128xf32, #tpu.memory_space<vmem>>, %arg6: memref<64x16xi32, #tpu.memory_space<vmem>>, %arg7: memref<64x16xf32, #tpu.memory_space<vmem>>, %arg8: memref<64x16xi32, #tpu.memory_space<vmem>>) attributes {dimension_semantics = [#tpu.dimension_semantics<parallel>, #tpu.dimension_semantics<arbitrary>], iteration_bounds = array<i64: 4, 2>, scalar_prefetch = 0 : i64, scratch_operands = 2 : i64, tpu.core_type = #tpu.core_type<tc>, window_params = [{transform_indices = @transform_0, window_bounds = array<i64: 64, 8>}, {transform_indices = @transform_1, window_bounds = array<i64: 64, 1>}, {transform_indices = @transform_2, window_bounds = array<i64: 8, 128>}, {transform_indices = @transform_3, window_bounds = array<i64: 1, 128>}, {transform_indices = @transform_4, window_bounds = array<i64: 64, 16>}]} {
    %c0_i32 = arith.constant 0 : i32
    %0 = arith.cmpi eq, %arg1, %c0_i32 : i32
    %1 = arith.extui %0 : i1 to i32
    %c0_i32_0 = arith.constant 0 : i32
    %2 = arith.cmpi ne, %1, %c0_i32_0 : i32
    scf.if %2 {
      %cst_82 = arith.constant 1.000000e+30 : f32
      %223 = vector.broadcast %cst_82 : f32 to vector<64x16xf32>
      %c0_83 = arith.constant 0 : index
      %c0_84 = arith.constant 0 : index
      %224 = vector.load %arg7[%c0_83, %c0_84] : memref<64x16xf32, #tpu.memory_space<vmem>>, vector<64x16xf32>
      tpu.vector_store %arg7[%c0_83, %c0_84], %223 {strides = array<i32>} : memref<64x16xf32, #tpu.memory_space<vmem>>, vector<64x16xf32>,
      %c0_i32_85 = arith.constant 0 : i32
      %225 = vector.broadcast %c0_i32_85 : i32 to vector<64x16xi32>
      %c0_86 = arith.constant 0 : index
      %c0_87 = arith.constant 0 : index
      %226 = vector.load %arg8[%c0_86, %c0_87] : memref<64x16xi32, #tpu.memory_space<vmem>>, vector<64x16xi32>
      tpu.vector_store %arg8[%c0_86, %c0_87], %225 {strides = array<i32>} : memref<64x16xi32, #tpu.memory_space<vmem>>, vector<64x16xi32>,
    } else {
    }
    %c0 = arith.constant 0 : index
    %c0_1 = arith.constant 0 : index
    %3 = vector.load %arg2[%c0, %c0_1] : memref<64x8xf32, #tpu.memory_space<vmem>>, vector<64x8xf32>
    %c0_2 = arith.constant 0 : index
    %c0_3 = arith.constant 0 : index
    %4 = vector.load %arg4[%c0_2, %c0_3] : memref<8x128xf32, #tpu.memory_space<vmem>>, vector<8x128xf32>
    %cst = arith.constant dense<0.000000e+00> : vector<64x128xf32>
    %5 = tpu.matmul %3, %4, %cst {dimension_numbers = #tpu.dot_dimension_numbers<[1], [0], [0], [1], [0, 0, 1, 1], [], []>} : vector<64x8xf32>, vector<8x128xf32>, vector<64x128xf32> -> vector<64x128xf32>
    %c0_4 = arith.constant 0 : index
    %c0_5 = arith.constant 0 : index
    %6 = vector.load %arg3[%c0_4, %c0_5] : memref<64x1xf32, #tpu.memory_space<vmem>>, vector<64x1xf32>
    %c0_6 = arith.constant 0 : index
    %c0_7 = arith.constant 0 : index
    %7 = vector.load %arg5[%c0_6, %c0_7] : memref<1x128xf32, #tpu.memory_space<vmem>>, vector<1x128xf32>
    %8 = vector.broadcast %6 : vector<64x1xf32> to vector<64x128xf32>
    %9 = vector.broadcast %7 : vector<1x128xf32> to vector<64x128xf32>
    %10 = arith.addf %8, %9 : vector<64x128xf32>
    %cst_8 = arith.constant 2.000000e+00 : f32
    %11 = vector.broadcast %cst_8 : f32 to vector<64x128xf32>
    %12 = arith.mulf %11, %5 : vector<64x128xf32>
    %13 = arith.subf %10, %12 : vector<64x128xf32>
    %cst_9 = arith.constant 0.000000e+00 : f32
    %14 = vector.broadcast %cst_9 : f32 to vector<64x128xf32>
    %15 = arith.maximumf %13, %14 : vector<64x128xf32>
    %c128_i32 = arith.constant 128 : i32
    %16 = arith.muli %arg1, %c128_i32 : i32
    %17 = tpu.iota {dimensions = array<i32: 1>} : vector<64x128xi32>
    %18 = vector.broadcast %16 : i32 to vector<64x128xi32>
    %19 = arith.addi %18, %17 : vector<64x128xi32>
    %c200_i32 = arith.constant 200 : i32
    %20 = vector.broadcast %c200_i32 : i32 to vector<64x128xi32>
    %21 = arith.cmpi slt, %19, %20 : vector<64x128xi32>
    %cst_10 = arith.constant 1.000000e+30 : f32
    %22 = vector.broadcast %cst_10 : f32 to vector<64x128xf32>
    %23 = arith.select %21, %15, %22 : vector<64x128xi1>, vector<64x128xf32>
    %c0_11 = arith.constant 0 : index
    %c0_12 = arith.constant 0 : index
    %24 = vector.load %arg7[%c0_11, %c0_12] : memref<64x16xf32, #tpu.memory_space<vmem>>, vector<64x16xf32>
    %25 = tpu.concatenate %24, %23 in 1 : vector<64x16xf32>, vector<64x128xf32> -> vector<64x144xf32>
    %c0_13 = arith.constant 0 : index
    %c0_14 = arith.constant 0 : index
    %26 = vector.load %arg8[%c0_13, %c0_14] : memref<64x16xi32, #tpu.memory_space<vmem>>, vector<64x16xi32>
    %27 = tpu.concatenate %26, %19 in 1 : vector<64x16xi32>, vector<64x128xi32> -> vector<64x144xi32>
    %cst_15 = arith.constant dense<0x7F800000> : vector<64xf32>
    %28 = vector.multi_reduction <minimumf>, %25, %cst_15 [1] : vector<64x144xf32> to vector<64xf32>
    %29 = vector.shape_cast %28 : vector<64xf32> to vector<64x1xf32>
    %30 = vector.broadcast %29 : vector<64x1xf32> to vector<64x144xf32>
    %31 = arith.cmpf ole, %25, %30 : vector<64x144xf32>
    %c2147483647_i32 = arith.constant 2147483647 : i32
    %32 = vector.broadcast %c2147483647_i32 : i32 to vector<64x144xi32>
    %33 = arith.select %31, %27, %32 : vector<64x144xi1>, vector<64x144xi32>
    %cst_16 = arith.constant dense<2147483647> : vector<64xi32>
    %34 = vector.multi_reduction <minsi>, %33, %cst_16 [1] : vector<64x144xi32> to vector<64xi32>
    %35 = vector.shape_cast %34 : vector<64xi32> to vector<64x1xi32>
    %36 = vector.broadcast %35 : vector<64x1xi32> to vector<64x144xi32>
    %37 = arith.cmpi eq, %33, %36 : vector<64x144xi32>
    %cst_17 = arith.constant 1.000000e+30 : f32
    %38 = vector.broadcast %cst_17 : f32 to vector<64x144xf32>
    %39 = arith.select %37, %38, %25 : vector<64x144xi1>, vector<64x144xf32>
    %cst_18 = arith.constant dense<0x7F800000> : vector<64xf32>
    %40 = vector.multi_reduction <minimumf>, %39, %cst_18 [1] : vector<64x144xf32> to vector<64xf32>
    %41 = vector.shape_cast %40 : vector<64xf32> to vector<64x1xf32>
    %42 = vector.broadcast %41 : vector<64x1xf32> to vector<64x144xf32>
    %43 = arith.cmpf ole, %39, %42 : vector<64x144xf32>
    %c2147483647_i32_19 = arith.constant 2147483647 : i32
    %44 = vector.broadcast %c2147483647_i32_19 : i32 to vector<64x144xi32>
    %45 = arith.select %43, %27, %44 : vector<64x144xi1>, vector<64x144xi32>
    %cst_20 = arith.constant dense<2147483647> : vector<64xi32>
    %46 = vector.multi_reduction <minsi>, %45, %cst_20 [1] : vector<64x144xi32> to vector<64xi32>
    %47 = vector.shape_cast %46 : vector<64xi32> to vector<64x1xi32>
    %48 = vector.broadcast %47 : vector<64x1xi32> to vector<64x144xi32>
    %49 = arith.cmpi eq, %45, %48 : vector<64x144xi32>
    %cst_21 = arith.constant 1.000000e+30 : f32
    %50 = vector.broadcast %cst_21 : f32 to vector<64x144xf32>
    %51 = arith.select %49, %50, %39 : vector<64x144xi1>, vector<64x144xf32>
    %cst_22 = arith.constant dense<0x7F800000> : vector<64xf32>
    %52 = vector.multi_reduction <minimumf>, %51, %cst_22 [1] : vector<64x144xf32> to vector<64xf32>
    %53 = vector.shape_cast %52 : vector<64xf32> to vector<64x1xf32>
    %54 = vector.broadcast %53 : vector<64x1xf32> to vector<64x144xf32>
    %55 = arith.cmpf ole, %51, %54 : vector<64x144xf32>
    %c2147483647_i32_23 = arith.constant 2147483647 : i32
    %56 = vector.broadcast %c2147483647_i32_23 : i32 to vector<64x144xi32>
    %57 = arith.select %55, %27, %56 : vector<64x144xi1>, vector<64x144xi32>
    %cst_24 = arith.constant dense<2147483647> : vector<64xi32>
    %58 = vector.multi_reduction <minsi>, %57, %cst_24 [1] : vector<64x144xi32> to vector<64xi32>
    %59 = vector.shape_cast %58 : vector<64xi32> to vector<64x1xi32>
    %60 = vector.broadcast %59 : vector<64x1xi32> to vector<64x144xi32>
    %61 = arith.cmpi eq, %57, %60 : vector<64x144xi32>
    %cst_25 = arith.constant 1.000000e+30 : f32
    %62 = vector.broadcast %cst_25 : f32 to vector<64x144xf32>
    %63 = arith.select %61, %62, %51 : vector<64x144xi1>, vector<64x144xf32>
    %cst_26 = arith.constant dense<0x7F800000> : vector<64xf32>
    %64 = vector.multi_reduction <minimumf>, %63, %cst_26 [1] : vector<64x144xf32> to vector<64xf32>
    %65 = vector.shape_cast %64 : vector<64xf32> to vector<64x1xf32>
    %66 = vector.broadcast %65 : vector<64x1xf32> to vector<64x144xf32>
    %67 = arith.cmpf ole, %63, %66 : vector<64x144xf32>
    %c2147483647_i32_27 = arith.constant 2147483647 : i32
    %68 = vector.broadcast %c2147483647_i32_27 : i32 to vector<64x144xi32>
    %69 = arith.select %67, %27, %68 : vector<64x144xi1>, vector<64x144xi32>
    %cst_28 = arith.constant dense<2147483647> : vector<64xi32>
    %70 = vector.multi_reduction <minsi>, %69, %cst_28 [1] : vector<64x144xi32> to vector<64xi32>
    %71 = vector.shape_cast %70 : vector<64xi32> to vector<64x1xi32>
    %72 = vector.broadcast %71 : vector<64x1xi32> to vector<64x144xi32>
    %73 = arith.cmpi eq, %69, %72 : vector<64x144xi32>
    %cst_29 = arith.constant 1.000000e+30 : f32
    %74 = vector.broadcast %cst_29 : f32 to vector<64x144xf32>
    %75 = arith.select %73, %74, %63 : vector<64x144xi1>, vector<64x144xf32>
    %cst_30 = arith.constant dense<0x7F800000> : vector<64xf32>
    %76 = vector.multi_reduction <minimumf>, %75, %cst_30 [1] : vector<64x144xf32> to vector<64xf32>
    %77 = vector.shape_cast %76 : vector<64xf32> to vector<64x1xf32>
    %78 = vector.broadcast %77 : vector<64x1xf32> to vector<64x144xf32>
    %79 = arith.cmpf ole, %75, %78 : vector<64x144xf32>
    %c2147483647_i32_31 = arith.constant 2147483647 : i32
    %80 = vector.broadcast %c2147483647_i32_31 : i32 to vector<64x144xi32>
    %81 = arith.select %79, %27, %80 : vector<64x144xi1>, vector<64x144xi32>
    %cst_32 = arith.constant dense<2147483647> : vector<64xi32>
    %82 = vector.multi_reduction <minsi>, %81, %cst_32 [1] : vector<64x144xi32> to vector<64xi32>
    %83 = vector.shape_cast %82 : vector<64xi32> to vector<64x1xi32>
    %84 = vector.broadcast %83 : vector<64x1xi32> to vector<64x144xi32>
    %85 = arith.cmpi eq, %81, %84 : vector<64x144xi32>
    %cst_33 = arith.constant 1.000000e+30 : f32
    %86 = vector.broadcast %cst_33 : f32 to vector<64x144xf32>
    %87 = arith.select %85, %86, %75 : vector<64x144xi1>, vector<64x144xf32>
    %cst_34 = arith.constant dense<0x7F800000> : vector<64xf32>
    %88 = vector.multi_reduction <minimumf>, %87, %cst_34 [1] : vector<64x144xf32> to vector<64xf32>
    %89 = vector.shape_cast %88 : vector<64xf32> to vector<64x1xf32>
    %90 = vector.broadcast %89 : vector<64x1xf32> to vector<64x144xf32>
    %91 = arith.cmpf ole, %87, %90 : vector<64x144xf32>
    %c2147483647_i32_35 = arith.constant 2147483647 : i32
    %92 = vector.broadcast %c2147483647_i32_35 : i32 to vector<64x144xi32>
    %93 = arith.select %91, %27, %92 : vector<64x144xi1>, vector<64x144xi32>
    %cst_36 = arith.constant dense<2147483647> : vector<64xi32>
    %94 = vector.multi_reduction <minsi>, %93, %cst_36 [1] : vector<64x144xi32> to vector<64xi32>
    %95 = vector.shape_cast %94 : vector<64xi32> to vector<64x1xi32>
    %96 = vector.broadcast %95 : vector<64x1xi32> to vector<64x144xi32>
    %97 = arith.cmpi eq, %93, %96 : vector<64x144xi32>
    %cst_37 = arith.constant 1.000000e+30 : f32
    %98 = vector.broadcast %cst_37 : f32 to vector<64x144xf32>
    %99 = arith.select %97, %98, %87 : vector<64x144xi1>, vector<64x144xf32>
    %cst_38 = arith.constant dense<0x7F800000> : vector<64xf32>
    %100 = vector.multi_reduction <minimumf>, %99, %cst_38 [1] : vector<64x144xf32> to vector<64xf32>
    %101 = vector.shape_cast %100 : vector<64xf32> to vector<64x1xf32>
    %102 = vector.broadcast %101 : vector<64x1xf32> to vector<64x144xf32>
    %103 = arith.cmpf ole, %99, %102 : vector<64x144xf32>
    %c2147483647_i32_39 = arith.constant 2147483647 : i32
    %104 = vector.broadcast %c2147483647_i32_39 : i32 to vector<64x144xi32>
    %105 = arith.select %103, %27, %104 : vector<64x144xi1>, vector<64x144xi32>
    %cst_40 = arith.constant dense<2147483647> : vector<64xi32>
    %106 = vector.multi_reduction <minsi>, %105, %cst_40 [1] : vector<64x144xi32> to vector<64xi32>
    %107 = vector.shape_cast %106 : vector<64xi32> to vector<64x1xi32>
    %108 = vector.broadcast %107 : vector<64x1xi32> to vector<64x144xi32>
    %109 = arith.cmpi eq, %105, %108 : vector<64x144xi32>
    %cst_41 = arith.constant 1.000000e+30 : f32
    %110 = vector.broadcast %cst_41 : f32 to vector<64x144xf32>
    %111 = arith.select %109, %110, %99 : vector<64x144xi1>, vector<64x144xf32>
    %cst_42 = arith.constant dense<0x7F800000> : vector<64xf32>
    %112 = vector.multi_reduction <minimumf>, %111, %cst_42 [1] : vector<64x144xf32> to vector<64xf32>
    %113 = vector.shape_cast %112 : vector<64xf32> to vector<64x1xf32>
    %114 = vector.broadcast %113 : vector<64x1xf32> to vector<64x144xf32>
    %115 = arith.cmpf ole, %111, %114 : vector<64x144xf32>
    %c2147483647_i32_43 = arith.constant 2147483647 : i32
    %116 = vector.broadcast %c2147483647_i32_43 : i32 to vector<64x144xi32>
    %117 = arith.select %115, %27, %116 : vector<64x144xi1>, vector<64x144xi32>
    %cst_44 = arith.constant dense<2147483647> : vector<64xi32>
    %118 = vector.multi_reduction <minsi>, %117, %cst_44 [1] : vector<64x144xi32> to vector<64xi32>
    %119 = vector.shape_cast %118 : vector<64xi32> to vector<64x1xi32>
    %120 = vector.broadcast %119 : vector<64x1xi32> to vector<64x144xi32>
    %121 = arith.cmpi eq, %117, %120 : vector<64x144xi32>
    %cst_45 = arith.constant 1.000000e+30 : f32
    %122 = vector.broadcast %cst_45 : f32 to vector<64x144xf32>
    %123 = arith.select %121, %122, %111 : vector<64x144xi1>, vector<64x144xf32>
    %cst_46 = arith.constant dense<0x7F800000> : vector<64xf32>
    %124 = vector.multi_reduction <minimumf>, %123, %cst_46 [1] : vector<64x144xf32> to vector<64xf32>
    %125 = vector.shape_cast %124 : vector<64xf32> to vector<64x1xf32>
    %126 = vector.broadcast %125 : vector<64x1xf32> to vector<64x144xf32>
    %127 = arith.cmpf ole, %123, %126 : vector<64x144xf32>
    %c2147483647_i32_47 = arith.constant 2147483647 : i32
    %128 = vector.broadcast %c2147483647_i32_47 : i32 to vector<64x144xi32>
    %129 = arith.select %127, %27, %128 : vector<64x144xi1>, vector<64x144xi32>
    %cst_48 = arith.constant dense<2147483647> : vector<64xi32>
    %130 = vector.multi_reduction <minsi>, %129, %cst_48 [1] : vector<64x144xi32> to vector<64xi32>
    %131 = vector.shape_cast %130 : vector<64xi32> to vector<64x1xi32>
    %132 = vector.broadcast %131 : vector<64x1xi32> to vector<64x144xi32>
    %133 = arith.cmpi eq, %129, %132 : vector<64x144xi32>
    %cst_49 = arith.constant 1.000000e+30 : f32
    %134 = vector.broadcast %cst_49 : f32 to vector<64x144xf32>
    %135 = arith.select %133, %134, %123 : vector<64x144xi1>, vector<64x144xf32>
    %cst_50 = arith.constant dense<0x7F800000> : vector<64xf32>
    %136 = vector.multi_reduction <minimumf>, %135, %cst_50 [1] : vector<64x144xf32> to vector<64xf32>
    %137 = vector.shape_cast %136 : vector<64xf32> to vector<64x1xf32>
    %138 = vector.broadcast %137 : vector<64x1xf32> to vector<64x144xf32>
    %139 = arith.cmpf ole, %135, %138 : vector<64x144xf32>
    %c2147483647_i32_51 = arith.constant 2147483647 : i32
    %140 = vector.broadcast %c2147483647_i32_51 : i32 to vector<64x144xi32>
    %141 = arith.select %139, %27, %140 : vector<64x144xi1>, vector<64x144xi32>
    %cst_52 = arith.constant dense<2147483647> : vector<64xi32>
    %142 = vector.multi_reduction <minsi>, %141, %cst_52 [1] : vector<64x144xi32> to vector<64xi32>
    %143 = vector.shape_cast %142 : vector<64xi32> to vector<64x1xi32>
    %144 = vector.broadcast %143 : vector<64x1xi32> to vector<64x144xi32>
    %145 = arith.cmpi eq, %141, %144 : vector<64x144xi32>
    %cst_53 = arith.constant 1.000000e+30 : f32
    %146 = vector.broadcast %cst_53 : f32 to vector<64x144xf32>
    %147 = arith.select %145, %146, %135 : vector<64x144xi1>, vector<64x144xf32>
    %cst_54 = arith.constant dense<0x7F800000> : vector<64xf32>
    %148 = vector.multi_reduction <minimumf>, %147, %cst_54 [1] : vector<64x144xf32> to vector<64xf32>
    %149 = vector.shape_cast %148 : vector<64xf32> to vector<64x1xf32>
    %150 = vector.broadcast %149 : vector<64x1xf32> to vector<64x144xf32>
    %151 = arith.cmpf ole, %147, %150 : vector<64x144xf32>
    %c2147483647_i32_55 = arith.constant 2147483647 : i32
    %152 = vector.broadcast %c2147483647_i32_55 : i32 to vector<64x144xi32>
    %153 = arith.select %151, %27, %152 : vector<64x144xi1>, vector<64x144xi32>
    %cst_56 = arith.constant dense<2147483647> : vector<64xi32>
    %154 = vector.multi_reduction <minsi>, %153, %cst_56 [1] : vector<64x144xi32> to vector<64xi32>
    %155 = vector.shape_cast %154 : vector<64xi32> to vector<64x1xi32>
    %156 = vector.broadcast %155 : vector<64x1xi32> to vector<64x144xi32>
    %157 = arith.cmpi eq, %153, %156 : vector<64x144xi32>
    %cst_57 = arith.constant 1.000000e+30 : f32
    %158 = vector.broadcast %cst_57 : f32 to vector<64x144xf32>
    %159 = arith.select %157, %158, %147 : vector<64x144xi1>, vector<64x144xf32>
    %cst_58 = arith.constant dense<0x7F800000> : vector<64xf32>
    %160 = vector.multi_reduction <minimumf>, %159, %cst_58 [1] : vector<64x144xf32> to vector<64xf32>
    %161 = vector.shape_cast %160 : vector<64xf32> to vector<64x1xf32>
    %162 = vector.broadcast %161 : vector<64x1xf32> to vector<64x144xf32>
    %163 = arith.cmpf ole, %159, %162 : vector<64x144xf32>
    %c2147483647_i32_59 = arith.constant 2147483647 : i32
    %164 = vector.broadcast %c2147483647_i32_59 : i32 to vector<64x144xi32>
    %165 = arith.select %163, %27, %164 : vector<64x144xi1>, vector<64x144xi32>
    %cst_60 = arith.constant dense<2147483647> : vector<64xi32>
    %166 = vector.multi_reduction <minsi>, %165, %cst_60 [1] : vector<64x144xi32> to vector<64xi32>
    %167 = vector.shape_cast %166 : vector<64xi32> to vector<64x1xi32>
    %168 = vector.broadcast %167 : vector<64x1xi32> to vector<64x144xi32>
    %169 = arith.cmpi eq, %165, %168 : vector<64x144xi32>
    %cst_61 = arith.constant 1.000000e+30 : f32
    %170 = vector.broadcast %cst_61 : f32 to vector<64x144xf32>
    %171 = arith.select %169, %170, %159 : vector<64x144xi1>, vector<64x144xf32>
    %cst_62 = arith.constant dense<0x7F800000> : vector<64xf32>
    %172 = vector.multi_reduction <minimumf>, %171, %cst_62 [1] : vector<64x144xf32> to vector<64xf32>
    %173 = vector.shape_cast %172 : vector<64xf32> to vector<64x1xf32>
    %174 = vector.broadcast %173 : vector<64x1xf32> to vector<64x144xf32>
    %175 = arith.cmpf ole, %171, %174 : vector<64x144xf32>
    %c2147483647_i32_63 = arith.constant 2147483647 : i32
    %176 = vector.broadcast %c2147483647_i32_63 : i32 to vector<64x144xi32>
    %177 = arith.select %175, %27, %176 : vector<64x144xi1>, vector<64x144xi32>
    %cst_64 = arith.constant dense<2147483647> : vector<64xi32>
    %178 = vector.multi_reduction <minsi>, %177, %cst_64 [1] : vector<64x144xi32> to vector<64xi32>
    %179 = vector.shape_cast %178 : vector<64xi32> to vector<64x1xi32>
    %180 = vector.broadcast %179 : vector<64x1xi32> to vector<64x144xi32>
    %181 = arith.cmpi eq, %177, %180 : vector<64x144xi32>
    %cst_65 = arith.constant 1.000000e+30 : f32
    %182 = vector.broadcast %cst_65 : f32 to vector<64x144xf32>
    %183 = arith.select %181, %182, %171 : vector<64x144xi1>, vector<64x144xf32>
    %cst_66 = arith.constant dense<0x7F800000> : vector<64xf32>
    %184 = vector.multi_reduction <minimumf>, %183, %cst_66 [1] : vector<64x144xf32> to vector<64xf32>
    %185 = vector.shape_cast %184 : vector<64xf32> to vector<64x1xf32>
    %186 = vector.broadcast %185 : vector<64x1xf32> to vector<64x144xf32>
    %187 = arith.cmpf ole, %183, %186 : vector<64x144xf32>
    %c2147483647_i32_67 = arith.constant 2147483647 : i32
    %188 = vector.broadcast %c2147483647_i32_67 : i32 to vector<64x144xi32>
    %189 = arith.select %187, %27, %188 : vector<64x144xi1>, vector<64x144xi32>
    %cst_68 = arith.constant dense<2147483647> : vector<64xi32>
    %190 = vector.multi_reduction <minsi>, %189, %cst_68 [1] : vector<64x144xi32> to vector<64xi32>
    %191 = vector.shape_cast %190 : vector<64xi32> to vector<64x1xi32>
    %192 = vector.broadcast %191 : vector<64x1xi32> to vector<64x144xi32>
    %193 = arith.cmpi eq, %189, %192 : vector<64x144xi32>
    %cst_69 = arith.constant 1.000000e+30 : f32
    %194 = vector.broadcast %cst_69 : f32 to vector<64x144xf32>
    %195 = arith.select %193, %194, %183 : vector<64x144xi1>, vector<64x144xf32>
    %cst_70 = arith.constant dense<0x7F800000> : vector<64xf32>
    %196 = vector.multi_reduction <minimumf>, %195, %cst_70 [1] : vector<64x144xf32> to vector<64xf32>
    %197 = vector.shape_cast %196 : vector<64xf32> to vector<64x1xf32>
    %198 = vector.broadcast %197 : vector<64x1xf32> to vector<64x144xf32>
    %199 = arith.cmpf ole, %195, %198 : vector<64x144xf32>
    %c2147483647_i32_71 = arith.constant 2147483647 : i32
    %200 = vector.broadcast %c2147483647_i32_71 : i32 to vector<64x144xi32>
    %201 = arith.select %199, %27, %200 : vector<64x144xi1>, vector<64x144xi32>
    %cst_72 = arith.constant dense<2147483647> : vector<64xi32>
    %202 = vector.multi_reduction <minsi>, %201, %cst_72 [1] : vector<64x144xi32> to vector<64xi32>
    %203 = vector.shape_cast %202 : vector<64xi32> to vector<64x1xi32>
    %204 = vector.broadcast %203 : vector<64x1xi32> to vector<64x144xi32>
    %205 = arith.cmpi eq, %201, %204 : vector<64x144xi32>
    %cst_73 = arith.constant 1.000000e+30 : f32
    %206 = vector.broadcast %cst_73 : f32 to vector<64x144xf32>
    %207 = arith.select %205, %206, %195 : vector<64x144xi1>, vector<64x144xf32>
    %cst_74 = arith.constant dense<0x7F800000> : vector<64xf32>
    %208 = vector.multi_reduction <minimumf>, %207, %cst_74 [1] : vector<64x144xf32> to vector<64xf32>
    %209 = vector.shape_cast %208 : vector<64xf32> to vector<64x1xf32>
    %210 = vector.broadcast %209 : vector<64x1xf32> to vector<64x144xf32>
    %211 = arith.cmpf ole, %207, %210 : vector<64x144xf32>
    %c2147483647_i32_75 = arith.constant 2147483647 : i32
    %212 = vector.broadcast %c2147483647_i32_75 : i32 to vector<64x144xi32>
    %213 = arith.select %211, %27, %212 : vector<64x144xi1>, vector<64x144xi32>
    %cst_76 = arith.constant dense<2147483647> : vector<64xi32>
    %214 = vector.multi_reduction <minsi>, %213, %cst_76 [1] : vector<64x144xi32> to vector<64xi32>
    %215 = vector.shape_cast %214 : vector<64xi32> to vector<64x1xi32>
    %216 = tpu.concatenate %29, %41, %53, %65, %77, %89, %101, %113, %125, %137, %149, %161, %173, %185, %197, %209 in 1 : vector<64x1xf32>, vector<64x1xf32>, vector<64x1xf32>, vector<64x1xf32>, vector<64x1xf32>, vector<64x1xf32>, vector<64x1xf32>, vector<64x1xf32>, vector<64x1xf32>, vector<64x1xf32>, vector<64x1xf32>, vector<64x1xf32>, vector<64x1xf32>, vector<64x1xf32>, vector<64x1xf32>, vector<64x1xf32> -> vector<64x16xf32>
    %217 = tpu.concatenate %35, %47, %59, %71, %83, %95, %107, %119, %131, %143, %155, %167, %179, %191, %203, %215 in 1 : vector<64x1xi32>, vector<64x1xi32>, vector<64x1xi32>, vector<64x1xi32>, vector<64x1xi32>, vector<64x1xi32>, vector<64x1xi32>, vector<64x1xi32>, vector<64x1xi32>, vector<64x1xi32>, vector<64x1xi32>, vector<64x1xi32>, vector<64x1xi32>, vector<64x1xi32>, vector<64x1xi32>, vector<64x1xi32> -> vector<64x16xi32>
    %c0_77 = arith.constant 0 : index
    %c0_78 = arith.constant 0 : index
    %218 = vector.load %arg7[%c0_77, %c0_78] : memref<64x16xf32, #tpu.memory_space<vmem>>, vector<64x16xf32>
    tpu.vector_store %arg7[%c0_77, %c0_78], %216 {strides = array<i32>} : memref<64x16xf32, #tpu.memory_space<vmem>>, vector<64x16xf32>,
    %c0_79 = arith.constant 0 : index
    %c0_80 = arith.constant 0 : index
    %219 = vector.load %arg8[%c0_79, %c0_80] : memref<64x16xi32, #tpu.memory_space<vmem>>, vector<64x16xi32>
    tpu.vector_store %arg8[%c0_79, %c0_80], %217 {strides = array<i32>} : memref<64x16xi32, #tpu.memory_space<vmem>>, vector<64x16xi32>,
    %c1_i32 = arith.constant 1 : i32
    %220 = arith.cmpi eq, %arg1, %c1_i32 : i32
    %221 = arith.extui %220 : i1 to i32
    %c0_i32_81 = arith.constant 0 : i32
    %222 = arith.cmpi ne, %221, %c0_i32_81 : i32
    scf.if %222 {
      %c0_82 = arith.constant 0 : index
      %c0_83 = arith.constant 0 : index
      %223 = vector.load %arg6[%c0_82, %c0_83] : memref<64x16xi32, #tpu.memory_space<vmem>>, vector<64x16xi32>
      tpu.vector_store %arg6[%c0_82, %c0_83], %217 {strides = array<i32>} : memref<64x16xi32, #tpu.memory_space<vmem>>, vector<64x16xi32>,
    } else {
    }
    return
  }
  func.func @transform_0(%arg0: i32, %arg1: i32) -> (i32, i32) {
    %c0_i32 = arith.constant 0 : i32
    %c0_i32_0 = arith.constant 0 : i32
    return %arg0, %c0_i32 : i32, i32
  }
  func.func @transform_1(%arg0: i32, %arg1: i32) -> (i32, i32) {
    %c0_i32 = arith.constant 0 : i32
    %c0_i32_0 = arith.constant 0 : i32
    return %arg0, %c0_i32 : i32, i32
  }
  func.func @transform_2(%arg0: i32, %arg1: i32) -> (i32, i32) {
    %c0_i32 = arith.constant 0 : i32
    %c0_i32_0 = arith.constant 0 : i32
    return %c0_i32, %arg1 : i32, i32
  }
  func.func @transform_3(%arg0: i32, %arg1: i32) -> (i32, i32) {
    %c0_i32 = arith.constant 0 : i32
    %c0_i32_0 = arith.constant 0 : i32
    return %c0_i32, %arg1 : i32, i32
  }
  func.func @transform_4(%arg0: i32, %arg1: i32) -> (i32, i32) {
    %c0_i32 = arith.constant 0 : i32
    %c0_i32_0 = arith.constant 0 : i32
    return %arg0, %c0_i32 : i32, i32
  }
}

</mosaic_0001>

<bundles_post_ra>
// kernel: tpu_custom_call.1
= control target key start
LH: loop header
LB: loop body
LE: loop exit
PB: predicated region body
PF: predicated region fallthrough
CT: control target
= control target key end

     0   :  { %s4735_s15 = smov 0   ;;  %s4737_s16 = smov 0   ;;  %s9772_s0 = inlined_call_operand.vmem [shape: f32[256,8], index: 0, kind: input, shape index: {}]   ;;  %s9773_s1 = inlined_call_operand.vmem [shape: f32[256,1], index: 1, kind: input, shape index: {}]   ;;  %s9774_s2 = inlined_call_operand.vmem [shape: f32[8,256], index: 2, kind: input, shape index: {}]   ;;  %s9775_s3 = inlined_call_operand.vmem [shape: f32[1,256], index: 3, kind: input, shape index: {}]   ;;  %s9776_s4 = inlined_call_operand.vmem [shape: s32[256,16], index: 4, kind: output, shape index: {}]  }
   0x1   :  { %s4739_s17 = smov 0   ;;  %s4741_s18 = smov 0  }
   0x2   :  { %s4743_s19 = smov 0  }
   0x3 LB: > { %s23_s20 = sadd.s32 1, %s4696_s17  ;;  %s26_s21 = sadd.s32 1, %s4700_s18  ;;  %s4704_s19 = sphi %s4743_s19, %s14_s19   ;;  %s4700_s18 = sphi %s4741_s18, %s10456_s18   ;;  %s4696_s17 = sphi %s4739_s17, %s10455_s17   ;;  %s4692_s16 = sphi %s4737_s16, %s10454_s16   ;;  %s4688_s15 = sphi %s4735_s15, %s10453_s15  }
   0x4   : > { %p24_p0 = scmp.ge.s32.totalorder %s23_s20, 2  ;;  %p4594_p1 = scmp.ge.s32.totalorder %s4704_s19, 1 }
   0x5   : > { %p203_p2 = scmp.lt.s32.totalorder %s4704_s19, 9 }
   0x6   : > { %s10458_s20 = smov (%p24_p0, %s23_s20), 0  ;;  %s10460_s21 = smov (!%p24_p0, %s26_s21), %s4700_s18 }
   0x7   : > { %p204_p3 = pnand %p4594_p1, %p203_p2  ;;  %p28_p4 = scmp.ge.s32.totalorder %s10460_s21, 4 }
   0x9   : > { %s10462_s21 = smov (%p28_p4, %s10460_s21), 0  ;;  %207 = sbr.rel (%p204_p3) target bundleno = 6270 (0x187e), region = 36 }
   0xe   : > { %s4595_s22 = sshll.u32 %s4692_s16, 3  ;;  %p253_p5 = scmp.lt.s32.totalorder %s4688_s15, 1 }
   0xf   : > { %p242_p6 = scmp.lt.s32.totalorder %s4595_s22, 31  ;;  %p4602_p7 = scmp.ne.s32.totalorder %s4688_s15, 0 }
  0x10   : > { %s4769_s23 = scalar_select %p253_p5, %s4688_s15, 1 }
  0x11   : > { %s10464_s22 = smov (!%p242_p6, %s4595_s22), 31  ;;  %269 = sbr.rel (%p4602_p7) target bundleno = 39 (0x27), region = 40 }
  0x12   : > { %s4599_s24 = sshll.u32 %s4769_s23, 3  ;;  %s259_s27 = scalar_lea.vmem %s9775_s3, %s4769_s23 }
  0x13   : > { %s4596_s28 = sshll.u32 %s10464_s22, 3  ;;  %s256_s5 = scalar_lea.vmem %s9774_s2, %s4599_s24 }
  0x14   : > { %s4782_s8 = scalar_lea.vmem %s9772_s0, %s4596_s28  ;;  %s4787_s11 = scalar_lea.vmem %s9773_s1, %s4596_s28 }
  0x15   : > { %s4792_s14 = scalar_lea.vmem %s9776_s4, %s4596_s28 }
  0x16   : > { %vm270_vm0 = vcmask 130048   ;;  %v4706_v0 = vmov 1e+30   ;;  %v4707_v1 = vmov 0  }
  0x17   : > { %271 = vst.msk [vmem:[#allocation2] sm:$0xff] %vm270_vm0, %v4706_v0 }
  0x18   : > { %272 = vst.msk [vmem:[#allocation2 + $0x8] sm:$0xff] %vm270_vm0, %v4706_v0 }
  0x19   : > { %273 = vst.msk [vmem:[#allocation2 + $0x10] sm:$0xff] %vm270_vm0, %v4706_v0 }
  0x1a   : > { %274 = vst.msk [vmem:[#allocation2 + $0x18] sm:$0xff] %vm270_vm0, %v4706_v0 }
  0x1b   : > { %275 = vst.msk [vmem:[#allocation2 + $0x20] sm:$0xff] %vm270_vm0, %v4706_v0 }
  0x1c   : > { %276 = vst.msk [vmem:[#allocation2 + $0x28] sm:$0xff] %vm270_vm0, %v4706_v0 }
  0x1d   : > { %277 = vst.msk [vmem:[#allocation2 + $0x30] sm:$0xff] %vm270_vm0, %v4706_v0 }
  0x1e   : > { %278 = vst.msk [vmem:[#allocation2 + $0x38] sm:$0xff] %vm270_vm0, %v4706_v0 }
  0x1f   : > { %279 = vst.msk [vmem:[#allocation3] sm:$0xff] %vm270_vm0, %v4707_v1 }
  0x20   : > { %280 = vst.msk [vmem:[#allocation3 + $0x8] sm:$0xff] %vm270_vm0, %v4707_v1 }
  0x21   : > { %281 = vst.msk [vmem:[#allocation3 + $0x10] sm:$0xff] %vm270_vm0, %v4707_v1 }
  0x22   : > { %282 = vst.msk [vmem:[#allocation3 + $0x18] sm:$0xff] %vm270_vm0, %v4707_v1 }
  0x23   : > { %283 = vst.msk [vmem:[#allocation3 + $0x20] sm:$0xff] %vm270_vm0, %v4707_v1 }
  0x24   : > { %284 = vst.msk [vmem:[#allocation3 + $0x28] sm:$0xff] %vm270_vm0, %v4707_v1 }
  0x25   : > { %285 = vst.msk [vmem:[#allocation3 + $0x30] sm:$0xff] %vm270_vm0, %v4707_v1 }
  0x26   : > { %286 = vst.msk [vmem:[#allocation3 + $0x38] sm:$0xff] %vm270_vm0, %v4707_v1 }
  0x27 PF: > { %v295_v2 = vld [vmem:[%s256_s5] sm:$0xff]  ;;  %vm296_vm1 = vcmask 64512   ;;  %v289_v4 = vld [vmem:[%s4782_s8 + $0x10] sm:$0xff]  ;;  %v4708_v8 = vmov 0   ;;  %v288_v11 = vld [vmem:[%s4782_s8 + $0x8] sm:$0xff]  ;;  %v447_v21 = vlaneseq  ;;  %s4611_s16 = sshll.u32 %s4688_s15, 7 }
  0x28   : > { %v287_v3 = vld [vmem:[%s4782_s8] sm:$0xff]  ;;  %336 = vmatpush.msra.mxu0 %v295_v2  ;;  %4615 = vmatpush.msra.mxu1 %v295_v2  ;;  %v293_v6 = vld [vmem:[%s4782_s8 + $0x30] sm:$0xff]  ;;  %v290_v12 = vld [vmem:[%s4782_s8 + $0x18] sm:$0xff]  ;;  %v449_v25 = vstv %s4611_s16  ;;  %s4709_s23 = smov 16   ;;  %vm500_vm3 = vcmask 130048   ;;  %p4612_p8 = scmp.ne.s32.totalorder %s4688_s15, 1 }
  0x29   : > { %v291_v5 = vld [vmem:[%s4782_s8 + $0x20] sm:$0xff]  ;;  %4616 = vmatpush.msra.mxu2 %v295_v2  ;;  %4617 = vmatpush.msra.mxu3 %v295_v2  ;;  %v364_v9 = vld [vmem:[%s4787_s11 + $0x10] sm:$0xff]  ;;  %v292_v13 = vld [vmem:[%s4782_s8 + $0x28] sm:$0xff]  ;;  %v448_v24 = vand.u32 127, %v447_v21 }
  0x2a   : > { %v362_v7 = vld [vmem:[%s4787_s11] sm:$0xff]  ;;  %4662 = vset.pattern.permute.xlu0 %v4708_v8  ;;  %4603 = vmatmul.msk.f32.vlgmr.msra.gmra.mxu0 %vm296_vm1, %v287_v3  ;;  %v363_v14 = vld [vmem:[%s4787_s11 + $0x8] sm:$0xff]  ;;  %v294_v15 = vld [vmem:[%s4782_s8 + $0x38] sm:$0xff] }
  0x2b   : > { %4605 = vmatmul.msk.f32.vlgmr.msra.gmra.mxu1 %vm296_vm1, %v289_v4  ;;  %4607 = vmatmul.msk.f32.vlgmr.msra.gmra.mxu2 %vm296_vm1, %v291_v5  ;;  %v366_v10 = vld [vmem:[%s4787_s11 + $0x20] sm:$0xff]  ;;  %v365_v16 = vld [vmem:[%s4787_s11 + $0x18] sm:$0xff]  ;;  %v367_v17 = vld [vmem:[%s4787_s11 + $0x28] sm:$0xff]  ;;  %v4841_v30 = vadd.s32 %v449_v25, %v448_v24 }
  0x2c   : > { %4609 = vmatmul.msk.f32.vlgmr.msra.gmra.mxu3 %vm296_vm1, %v293_v6  ;;  %373 = vperm.xlu0 %4662, %v362_v7   ;;  %v368_v18 = vld [vmem:[%s4787_s11 + $0x30] sm:$0xff]  ;;  %v369_v19 = vld [vmem:[%s4787_s11 + $0x38] sm:$0xff]  ;;  %v4665_v22 = vld [vmem:[%s259_s27] ss:$0 sm:$0xff] }
  0x2d   : > { %4663 = vset.pattern.permute.xlu1 %v4708_v8  ;;  %4664 = vset.pattern.permute.xlu2 %v4708_v8  ;;  %vm451_vm2 = vcmp.lt.s32.totalorder %v4841_v30, 200 }
  0x2e   : > { %383 = vperm.xlu1 %4663, %v364_v9   ;;  %393 = vperm.xlu2 %4664, %v366_v10  }
  0x32   : > { %4604 = vmatmul.msk.f32.gmra.mxu0 %vm296_vm1, %v288_v11 }
  0x33   : > { %4606 = vmatmul.msk.f32.gmra.mxu1 %vm296_vm1, %v290_v12  ;;  %4608 = vmatmul.msk.f32.gmra.mxu2 %vm296_vm1, %v292_v13 }
  0x34   : > { %378 = vperm.xlu0 %4662, %v363_v14   ;;  %4610 = vmatmul.msk.f32.gmra.mxu3 %vm296_vm1, %v294_v15 }
  0x36   : > { %388 = vperm.xlu1 %4663, %v365_v16   ;;  %398 = vperm.xlu2 %4664, %v367_v17   ;;  %v460_v17 = vld [vmem:[#allocation2] sm:$0xff] }
  0x3c   : > { %403 = vperm.xlu0 %4662, %v368_v18  }
  0x3e   : > { %408 = vperm.xlu1 %4663, %v369_v19  }
  0x88   : > { %v394_v33 = vpop.permute.xlu2 %393 }
  0x89   : > { %v418_v39 = vadd.f32 %v4665_v22, %v394_v33 }
  0x90   : > { %v399_v54 = vpop.permute.xlu2 %398 }
  0x91   : > { %v419_v63 = vadd.f32 %v4665_v22, %v399_v54  ;;  %v465_v54 = vld [vmem:[#allocation2 + $0x28] sm:$0xff] }
  0x9e   : > { %v374_v20 = vpop.permute.xlu0 %373 }
  0x9f   : > { %v414_v26 = vadd.f32 %v4665_v22, %v374_v20 }
  0xa0   : > { %v384_v23 = vpop.permute.xlu1 %383 }
  0xa1   : > { %v416_v28 = vadd.f32 %v4665_v22, %v384_v23  ;;  %v462_v23 = vld [vmem:[#allocation2 + $0x10] sm:$0xff] }
  0xa6   : > { %v379_v27 = vpop.permute.xlu0 %378 }
  0xa7   : > { %v338_v29 = vpop.f32.mrf.mxu0  ;;  %v415_v53 = vadd.f32 %v4665_v22, %v379_v27 }
  0xa8   : > { %v422_v31 = vmul.f32 2.0, %v338_v29  ;;  %v344_v32 = vpop.f32.mrf.mxu1  ;;  %v389_v38 = vpop.permute.xlu1 %388  ;;  %v464_v29 = vld [vmem:[#allocation2 + $0x20] sm:$0xff] }
  0xa9   : > { %v424_v34 = vmul.f32 2.0, %v344_v32  ;;  %v417_v45 = vadd.f32 %v4665_v22, %v389_v38 }
  0xaa   : > { %v430_v35 = vsub.f32 %v414_v26, %v422_v31  ;;  %v466_v31 = vld [vmem:[#allocation2 + $0x30] sm:$0xff] }
  0xab   : > { %v432_v36 = vsub.f32 %v416_v28, %v424_v34 }
  0xac   : > { %v438_v37 = vmax.f32 %v430_v35, 0.0 }
  0xad   : > { %v440_v40 = vmax.f32 %v432_v36, 0.0 }
  0xae   : > { %v350_v41 = vpop.f32.mrf.mxu2  ;;  %v452_v42 = vsel %vm451_vm2, %v438_v37, 1e+30  ;;  %v404_v48 = vpop.permute.xlu0 %403 }
  0xaf   : > { %v426_v43 = vmul.f32 2.0, %v350_v41  ;;  %v356_v44 = vpop.f32.mrf.mxu3  ;;  %v454_v46 = vsel %vm451_vm2, %v440_v40, 1e+30  ;;  %476 = vrot.lane.b32.xlu2 %v452_v42, %s4709_s23  ;;  %v341_v47 = vpop.f32.mrf.mxu0  ;;  %v420_v55 = vadd.f32 %v4665_v22, %v404_v48 }
  0xb0   : > { %480 = vrot.lane.b32.xlu1 %v454_v46, %s4709_s23  ;;  %v347_v49 = vpop.f32.mrf.mxu1  ;;  %v423_v52 = vmul.f32 2.0, %v341_v47  ;;  %v428_v57 = vmul.f32 2.0, %v356_v44  ;;  %v409_v59 = vpop.permute.xlu1 %408  ;;  %v463_v44 = vld [vmem:[#allocation2 + $0x18] sm:$0xff] }
  0xb1   : > { %v434_v50 = vsub.f32 %v418_v39, %v426_v43  ;;  %v425_v51 = vmul.f32 2.0, %v347_v49  ;;  %v421_v4 = vadd.f32 %v4665_v22, %v409_v59  ;;  %v461_v39 = vld [vmem:[#allocation2 + $0x8] sm:$0xff] }
  0xb2   : > { %v431_v61 = vsub.f32 %v415_v53, %v423_v52  ;;  %v436_v1 = vsub.f32 %v420_v55, %v428_v57 }
  0xb3   : > { %v442_v56 = vmax.f32 %v434_v50, 0.0  ;;  %v433_v58 = vsub.f32 %v417_v45, %v425_v51  ;;  %v467_v45 = vld [vmem:[#allocation2 + $0x38] sm:$0xff] }
  0xb4   : > { %v439_v7 = vmax.f32 %v431_v61, 0.0  ;;  %v444_v9 = vmax.f32 %v436_v1, 0.0 }
  0xb5   : > { %v441_v60 = vmax.f32 %v433_v58, 0.0  ;;  %v456_v62 = vsel %vm451_vm2, %v442_v56, 1e+30 }
  0xb6   : > { %484 = vrot.lane.b32.xlu0 %v456_v62, %s4709_s23  ;;  %v353_v0 = vpop.f32.mrf.mxu2  ;;  %v453_v13 = vsel %vm451_vm2, %v439_v7, 1e+30  ;;  %v458_v15 = vsel %vm451_vm2, %v444_v9, 1e+30  ;;  %v511_v9 = vld [vmem:[#allocation3 + $0x10] sm:$0xff] }
  0xb7   : > { %v427_v2 = vmul.f32 2.0, %v353_v0  ;;  %v455_v3 = vsel %vm451_vm2, %v441_v60, 1e+30  ;;  %v359_v5 = vpop.f32.mrf.mxu3  ;;  %v509_v0 = vld [vmem:[#allocation3] sm:$0xff] }
  0xb8   : > { %482 = vrot.lane.b32.xlu2 %v455_v3, %s4709_s23  ;;  %v429_v6 = vmul.f32 2.0, %v359_v5 }
  0xb9   : > { %v435_v8 = vsub.f32 %v419_v63, %v427_v2  ;;  %v515_v2 = vld [vmem:[#allocation3 + $0x30] sm:$0xff] }
  0xba   : > { %v437_v11 = vsub.f32 %v421_v4, %v429_v6 }
  0xbb   : > { %v443_v10 = vmax.f32 %v435_v8, 0.0  ;;  %v512_v8 = vld [vmem:[#allocation3 + $0x18] sm:$0xff] }
  0xbc   : > { %v445_v14 = vmax.f32 %v437_v11, 0.0 }
  0xbd   : > { %v457_v12 = vsel %vm451_vm2, %v443_v10, 1e+30 }
  0xbe   : > { %486 = vrot.lane.b32.xlu1 %v457_v12, %s4709_s23  ;;  %478 = vrot.lane.b32.xlu0 %v453_v13, %s4709_s23  ;;  %v459_v16 = vsel %vm451_vm2, %v445_v14, 1e+30 }
  0xc0   : > { %488 = vrot.lane.b32.xlu2 %v458_v15, %s4709_s23 }
  0xc6   : > { %490 = vrot.lane.b32.xlu0 %v459_v16, %s4709_s23 }
 0x109   : > { %v4868_v18 = vpop.permute.xlu2 %476 }
 0x10a   : > { %v4872_v19 = vsel %vm500_vm3, %v460_v17, %v4868_v18  ;;  %v527_v20 = vsel %vm500_vm3, %v4868_v18, inf }
 0x10b   : > { %v528_v21 = vmin.f32 %v4872_v19, %v527_v20 }
 0x10d   : > { %529 = vmin.xlane.f32.xlu1 %v528_v21 }
 0x112   : > { %v4877_v22 = vpop.permute.xlu2 %482 }
 0x113   : > { %v4917_v46 = vsel %vm500_vm3, %v463_v44, %v4877_v22  ;;  %v539_v47 = vsel %vm500_vm3, %v4877_v22, inf  ;;  %v513_v44 = vld [vmem:[#allocation3 + $0x20] sm:$0xff] }
 0x114   : > { %v540_v51 = vmin.f32 %v4917_v46, %v539_v47 }
 0x11a   : > { %v4888_v28 = vpop.permute.xlu2 %488 }
 0x11b   : > { %v4900_v35 = vsel %vm500_vm3, %v466_v31, %v4888_v28  ;;  %v551_v36 = vsel %vm500_vm3, %v4888_v28, inf }
 0x11c   : > { %v552_v38 = vmin.f32 %v4900_v35, %v551_v36 }
 0x122   : > { %v4879_v24 = vpop.permute.xlu1 %480 }
 0x123   : > { %v4883_v25 = vsel %vm500_vm3, %v462_v23, %v4879_v24  ;;  %v535_v26 = vsel %vm500_vm3, %v4879_v24, inf }
 0x124   : > { %v536_v27 = vmin.f32 %v4883_v25, %v535_v26 }
 0x126   : > { %537 = vmin.xlane.f32.xlu0 %v536_v27 }
 0x128   : > { %v4890_v32 = vpop.permute.xlu0 %484 }
 0x129   : > { %v4894_v33 = vsel %vm500_vm3, %v464_v29, %v4890_v32  ;;  %v543_v34 = vsel %vm500_vm3, %v4890_v32, inf  ;;  %v514_v29 = vld [vmem:[#allocation3 + $0x28] sm:$0xff] }
 0x12a   : > { %v544_v37 = vmin.f32 %v4894_v33, %v543_v34 }
 0x12c   : > { %545 = vmin.xlane.f32.xlu1 %v544_v37 }
 0x12e   : > { %553 = vmin.xlane.f32.xlu0 %v552_v38 }
 0x130   : > { %v4906_v40 = vpop.permute.xlu0 %478  ;;  %v4931_v53 = vpop.permute.xlu1 %486 }
 0x131   : > { %v4910_v41 = vsel %vm500_vm3, %v461_v39, %v4906_v40  ;;  %v531_v42 = vsel %vm500_vm3, %v4906_v40, inf  ;;  %v4935_v55 = vsel %vm500_vm3, %v465_v54, %v4931_v53  ;;  %v547_v56 = vsel %vm500_vm3, %v4931_v53, inf }
 0x132   : > { %v532_v43 = vmin.f32 %v4910_v41, %v531_v42  ;;  %v548_v57 = vmin.f32 %v4935_v55, %v547_v56 }
 0x134   : > { %533 = vmin.xlane.f32.xlu2 %v532_v43 }
 0x138   : > { %v4921_v48 = vpop.permute.xlu0 %490 }
 0x139   : > { %v4925_v49 = vsel %vm500_vm3, %v467_v45, %v4921_v48  ;;  %v555_v50 = vsel %vm500_vm3, %v4921_v48, inf }
 0x13a   : > { %v556_v52 = vmin.f32 %v4925_v49, %v555_v50 }
 0x13c   : > { %541 = vmin.xlane.f32.xlu2 %v540_v51  ;;  %557 = vmin.xlane.f32.xlu1 %v556_v52 }
 0x144   : > { %549 = vmin.xlane.f32.xlu2 %v548_v57 }
 0x15c   : > { %517 = vrot.lane.b32.xlu2 %v4841_v30, %s4709_s23  ;;  %v510_v30 = vld [vmem:[#allocation3 + $0x8] sm:$0xff] }
 0x180   : > { %v4948_v61 = vpop.xlane.xlu1 %529 }
 0x181   : > { %9963 = vst [vmem:[#allocation7_spill] sm:$0xff] %v4948_v61  ;;  %vm559_vm4 = vcmp.le.f32.partialorder %v4872_v19, %v4948_v61  ;;  %vm560_vm5 = vcmp.le.f32.partialorder %v4868_v18, %v4948_v61 }
 0x199   : > { %v4946_v60 = vpop.xlane.xlu0 %537 }
 0x19a   : > { %9962 = vst [vmem:[#allocation6_spill] sm:$0xff] %v4946_v60  ;;  %vm563_vm6 = vcmp.le.f32.partialorder %v4883_v25, %v4946_v60  ;;  %vm564_vm7 = vcmp.le.f32.partialorder %v4879_v24, %v4946_v60 }
 0x19f   : > { %v4962_v1 = vpop.xlane.xlu1 %545 }
 0x1a0   : > { %9966 = vst [vmem:[#allocation10_spill] sm:$0xff] %v4962_v1  ;;  %vm567_vm15 = vcmp.le.f32.partialorder %v4894_v33, %v4962_v1  ;;  %vm568_vm0 = vcmp.le.f32.partialorder %v4890_v32, %v4962_v1 }
 0x1a1   : > { %v4952_v63 = vpop.xlane.xlu0 %553 }
 0x1a2   : > { %9965 = vst [vmem:[#allocation9_spill] sm:$0xff] %v4952_v63  ;;  %vm571_vm8 = vcmp.le.f32.partialorder %v4900_v35, %v4952_v63  ;;  %vm572_vm9 = vcmp.le.f32.partialorder %v4888_v28, %v4952_v63 }
 0x1a7   : > { %v4942_v58 = vpop.xlane.xlu2 %533 }
 0x1a8   : > { %9960 = vst [vmem:[#allocation4_spill] sm:$0xff] %v4942_v58  ;;  %vm561_vm10 = vcmp.le.f32.partialorder %v4910_v41, %v4942_v58  ;;  %vm562_vm11 = vcmp.le.f32.partialorder %v4906_v40, %v4942_v58 }
 0x1af   : > { %v4944_v59 = vpop.xlane.xlu2 %541 }
 0x1b0   : > { %9961 = vst [vmem:[#allocation5_spill] sm:$0xff] %v4944_v59  ;;  %vm565_vm12 = vcmp.le.f32.partialorder %v4917_v46, %v4944_v59  ;;  %vm566_vm13 = vcmp.le.f32.partialorder %v4877_v22, %v4944_v59 }
 0x1b7   : > { %v4950_v62 = vpop.xlane.xlu2 %549 }
 0x1b8   : > { %9964 = vst [vmem:[#allocation8_spill] sm:$0xff] %v4950_v62  ;;  %vm569_vm14 = vcmp.le.f32.partialorder %v4935_v55, %v4950_v62 }
 0x1bf   : > { %v4976_v3 = vpop.permute.xlu2 %517 }
 0x1c0   : > { %9967 = vst [vmem:[#allocation11_spill] sm:$0xff] %v4976_v3  ;;  %v4982_v4 = vsel %vm500_vm3, %v509_v0, %v4976_v3  ;;  %v4988_v5 = vsel %vm560_vm5, %v4976_v3, 2147483647  ;;  %v4992_v6 = vsel %vm500_vm3, %v510_v30, %v4976_v3  ;;  %v4995_v7 = vsel %vm562_vm11, %v4976_v3, 2147483647  ;;  %v5113_v30 = vpop.xlane.xlu1 %557 }
 0x1c1   : > { %9968 = vst [vmem:[#allocation12_spill] sm:$0xff] %v4982_v4  ;;  %v5005_v10 = vsel %vm559_vm4, %v4982_v4, 2147483647  ;;  %v591_v11 = vsel %vm500_vm3, %v4988_v5, 2147483647  ;;  %v5017_v13 = vsel %vm500_vm3, %v515_v2, %v4976_v3  ;;  %v5042_v21 = vsel %vm500_vm3, %v512_v8, %v4976_v3 }
 0x1c2   : > { %9969 = vst [vmem:[#allocation13_spill] sm:$0xff] %v4992_v6  ;;  %v5013_v12 = vsel %vm561_vm10, %v4992_v6, 2147483647  ;;  %vm592_vm2 = vcmp.lt.s32.totalorder %v5005_v10, %v591_v11  ;;  %v608_v14 = vsel %vm500_vm3, %v4995_v7, 2147483647  ;;  %v5067_v37 = vsel %vm500_vm3, %v511_v9, %v4976_v3 }
 0x1c3   : > { %9970 = vst [vmem:[#allocation14_spill] sm:$0xff] %v5017_v13  ;;  %v5026_v15 = vsel %vm571_vm8, %v5017_v13, 2147483647  ;;  %v5032_v16 = vsel %vm572_vm9, %v4976_v3, 2147483647  ;;  %v5035_v17 = vsel %vm592_vm2, %v5005_v10, %v591_v11  ;;  %vm609_vm4 = vcmp.lt.s32.totalorder %v5013_v12, %v608_v14 }
 0x1c4   : > { %v693_v20 = vsel %vm500_vm3, %v5032_v16, 2147483647  ;;  %9971 = vst [vmem:[#allocation15_spill] sm:$0xff] %v5042_v21  ;;  %v595_v23 = vshra.s32 %v5035_v17, 16  ;;  %v5046_v26 = vsel %vm609_vm4, %v5013_v12, %v608_v14  ;;  %v5053_v27 = vsel %vm565_vm12, %v5042_v21, 2147483647 }
 0x1c5   : > { %vm694_vm5 = vcmp.lt.s32.totalorder %v5026_v15, %v693_v20  ;;  %v612_v31 = vshra.s32 %v5046_v26, 16  ;;  %v5063_v36 = vsel %vm566_vm13, %v4976_v3, 2147483647  ;;  %9972 = vst [vmem:[#allocation16_spill] sm:$0xff] %v5067_v37  ;;  %v5078_v43 = vsel %vm563_vm6, %v5067_v37, 2147483647 }
 0x1c6   : > { %v5057_v34 = vsel %vm694_vm5, %v5026_v15, %v693_v20  ;;  %v5069_v38 = vcvt.s32.f32 %v595_v23  ;;  %v642_v42 = vsel %vm500_vm3, %v5063_v36, 2147483647  ;;  %v5085_v47 = vsel %vm564_vm7, %v4976_v3, 2147483647  ;;  %9975 = vst [vmem:[#allocation19_spill] sm:$0xff] %v5113_v30 }
 0x1c7   : > { %v697_v39 = vshra.s32 %v5057_v34, 16  ;;  %v614_v45 = vcvt.s32.f32 %v612_v31  ;;  %vm643_vm8 = vcmp.lt.s32.totalorder %v5053_v27, %v642_v42  ;;  %v5089_v50 = vsel %vm500_vm3, %v514_v29, %v4976_v3  ;;  %v516_v29 = vld [vmem:[#allocation3 + $0x38] sm:$0xff] }
 0x1c8   : > { %9973 = vst [vmem:[#allocation17_spill] sm:$0xff] %v5089_v50  ;;  %vm570_vm9 = vcmp.le.f32.partialorder %v4931_v53, %v4950_v62  ;;  %598 = vmin.xlane.f32.xlu0 %v5069_v38  ;;  %v644_v52 = vsel %vm643_vm8, %v5053_v27, %v642_v42  ;;  %v625_v54 = vsel %vm500_vm3, %v5085_v47, 2147483647  ;;  %v5104_v56 = vsel %vm569_vm14, %v5089_v50, 2147483647 }
 0x1c9   : > { %v5094_v51 = vcvt.s32.f32 %v697_v39  ;;  %615 = vmin.xlane.f32.xlu1 %v614_v45  ;;  %vm626_vm6 = vcmp.lt.s32.totalorder %v5078_v43, %v625_v54  ;;  %v5107_v57 = vsel %vm570_vm9, %v4976_v3, 2147483647  ;;  %v5111_v0 = vsel %vm500_vm3, %v513_v44, %v4976_v3 }
 0x1ca   : > { %9974 = vst [vmem:[#allocation18_spill] sm:$0xff] %v5111_v0  ;;  %v627_v2 = vsel %vm626_vm6, %v5078_v43, %v625_v54  ;;  %v676_v8 = vsel %vm500_vm3, %v5107_v57, 2147483647  ;;  %v5123_v9 = vsel %vm567_vm15, %v5111_v0, 2147483647  ;;  %v646_v14 = vshra.s32 %v644_v52, 16 }
 0x1cb   : > { %700 = vmin.xlane.f32.xlu2 %v5094_v51  ;;  %v5129_v11 = vsel %vm568_vm0, %v4976_v3, 2147483647  ;;  %v629_v20 = vshra.s32 %v627_v2, 16  ;;  %vm574_vm10 = vcmp.le.f32.partialorder %v4921_v48, %v5113_v30  ;;  %vm677_vm11 = vcmp.lt.s32.totalorder %v5104_v56, %v676_v8 }
 0x1cc   : > { %v659_v23 = vsel %vm500_vm3, %v5129_v11, 2147483647  ;;  %v5139_v39 = vsel %vm500_vm3, %v516_v29, %v4976_v3  ;;  %v5142_v42 = vsel %vm574_vm10, %v4976_v3, 2147483647  ;;  %v648_v44 = vcvt.s32.f32 %v646_v14 }
 0x1cd   : > { %vm660_vm7 = vcmp.lt.s32.totalorder %v5123_v9, %v659_v23  ;;  %v631_v31 = vcvt.s32.f32 %v629_v20  ;;  %9976 = vst [vmem:[#allocation20_spill] sm:$0xff] %v5139_v39  ;;  %vm573_vm12 = vcmp.le.f32.partialorder %v4925_v49, %v5113_v30  ;;  %v678_v63 = vsel %vm677_vm11, %v5104_v56, %v676_v8 }
 0x1ce   : > { %v661_v54 = vsel %vm660_vm7, %v5123_v9, %v659_v23  ;;  %v5149_v62 = vsel %vm573_vm12, %v5139_v39, 2147483647  ;;  %v710_v20 = vsel %vm500_vm3, %v5142_v42, 2147483647  ;;  %v680_v58 = vshra.s32 %v678_v63, 16 }
 0x1cf   : > { %v663_v29 = vshra.s32 %v661_v54, 16  ;;  %vm711_vm13 = vcmp.lt.s32.totalorder %v5149_v62, %v710_v20  ;;  %v594_v8 = vand.u32 65535, %v5035_v17  ;;  %v611_v60 = vand.u32 65535, %v5046_v26 }
 0x1d0   : > { %632 = vmin.xlane.f32.xlu0 %v631_v31  ;;  %v682_v1 = vcvt.s32.f32 %v680_v58  ;;  %v712_v23 = vsel %vm711_vm13, %v5149_v62, %v710_v20 }
 0x1d1   : > { %649 = vmin.xlane.f32.xlu1 %v648_v44  ;;  %v665_v14 = vcvt.s32.f32 %v663_v29  ;;  %v714_v30 = vshra.s32 %v712_v23, 16  ;;  %v596_v39 = vcvt.s32.f32 %v594_v8  ;;  %v613_v13 = vcvt.s32.f32 %v611_v60 }
 0x1d2   : > { %v628_v29 = vand.u32 65535, %v627_v2  ;;  %v662_v60 = vand.u32 65535, %v661_v54 }
 0x1d3   : > { %v716_v59 = vcvt.s32.f32 %v714_v30  ;;  %v645_v30 = vand.u32 65535, %v644_v52 }
 0x1d4   : > { %v630_v50 = vcvt.s32.f32 %v628_v29 }
 0x1d5   : > { %v647_v21 = vcvt.s32.f32 %v645_v30 }
 0x1d8   : > { %666 = vmin.xlane.f32.xlu0 %v665_v14 }
 0x1d9   : > { %683 = vmin.xlane.f32.xlu1 %v682_v1 }
 0x1e0   : > { %717 = vmin.xlane.f32.xlu0 %v716_v59 }
 0x23b   : > { %v599_v61 = vpop.xlane.xlu0 %598 }
 0x23c   : > { %v5157_v6 = vpop.xlane.xlu1 %615  ;;  %vm600_vm14 = vcmp.eq.f32.partialorder %v5069_v38, %v599_v61  ;;  %v679_v38 = vand.u32 65535, %v678_v63 }
 0x23d   : > { %vm617_vm15 = vcmp.eq.f32.partialorder %v614_v45, %v5157_v6  ;;  %v601_v58 = vsel %vm600_vm14, %v596_v39, inf  ;;  %v664_v45 = vcvt.s32.f32 %v662_v60 }
 0x23e   : > { %v618_v20 = vsel %vm617_vm15, %v613_v13, inf  ;;  %602 = vmin.xlane.f32.xlu1 %v601_v58  ;;  %v681_v13 = vcvt.s32.f32 %v679_v38  ;;  %v5164_v58 = vpop.xlane.xlu2 %700 }
 0x23f   : > { %619 = vmin.xlane.f32.xlu0 %v618_v20  ;;  %vm702_vm8 = vcmp.eq.f32.partialorder %v5094_v51, %v5164_v58 }
 0x243   : > { %v633_v0 = vpop.xlane.xlu0 %632 }
 0x244   : > { %v650_v17 = vpop.xlane.xlu1 %649  ;;  %vm634_vm0 = vcmp.eq.f32.partialorder %v631_v31, %v633_v0 }
 0x245   : > { %vm651_vm2 = vcmp.eq.f32.partialorder %v648_v44, %v650_v17  ;;  %v635_v26 = vsel %vm634_vm0, %v630_v50, inf  ;;  %v713_v50 = vand.u32 65535, %v712_v23  ;;  %v639_v23 = vcvt.f32.s32 %v633_v0 }
 0x246   : > { %v652_v8 = vsel %vm651_vm2, %v647_v21, inf  ;;  %636 = vmin.xlane.f32.xlu1 %v635_v26  ;;  %v696_v21 = vand.u32 65535, %v5057_v34  ;;  %v656_v51 = vcvt.f32.s32 %v650_v17 }
 0x247   : > { %653 = vmin.xlane.f32.xlu0 %v652_v8  ;;  %v715_v44 = vcvt.s32.f32 %v713_v50  ;;  %v640_v0 = vshll.u32 %v639_v23, 16 }
 0x248   : > { %v698_v31 = vcvt.s32.f32 %v696_v21 }
 0x24a   : > { %v703_v54 = vsel %vm702_vm8, %v698_v31, inf }
 0x24b   : > { %v667_v37 = vpop.xlane.xlu0 %666 }
 0x24c   : > { %v5161_v39 = vpop.xlane.xlu1 %683  ;;  %vm668_vm4 = vcmp.eq.f32.partialorder %v665_v14, %v667_v37  ;;  %v605_v14 = vcvt.f32.s32 %v599_v61 }
 0x24d   : > { %vm685_vm5 = vcmp.eq.f32.partialorder %v682_v1, %v5161_v39  ;;  %v669_v52 = vsel %vm668_vm4, %v664_v45, inf }
 0x24e   : > { %v686_v2 = vsel %vm685_vm5, %v681_v13, inf  ;;  %670 = vmin.xlane.f32.xlu1 %v669_v52  ;;  %v606_v29 = vshll.u32 %v605_v14, 16 }
 0x24f   : > { %687 = vmin.xlane.f32.xlu0 %v686_v2  ;;  %v673_v2 = vcvt.f32.s32 %v667_v37 }
 0x251   : > { %v674_v31 = vshll.u32 %v673_v2, 16 }
 0x253   : > { %v5169_v63 = vpop.xlane.xlu0 %717 }
 0x254   : > { %vm719_vm9 = vcmp.eq.f32.partialorder %v716_v59, %v5169_v63 }
 0x255   : > { %v720_v1 = vsel %vm719_vm9, %v715_v44, inf }
 0x256   : > { %704 = vmin.xlane.f32.xlu1 %v703_v54 }
 0x257   : > { %721 = vmin.xlane.f32.xlu0 %v720_v1 }
 0x2b1   : > { %v603_v20 = vpop.xlane.xlu1 %602 }
 0x2b2   : > { %v604_v30 = vcvt.f32.s32 %v603_v20  ;;  %v620_v26 = vpop.xlane.xlu0 %619 }
 0x2b4   : > { %v5172_v34 = vadd.s32 %v606_v29, %v604_v30  ;;  %v707_v29 = vcvt.f32.s32 %v5164_v58  ;;  %v724_v30 = vcvt.f32.s32 %v5169_v63 }
 0x2b6   : > { %9977 = vst [vmem:[#allocation21_spill] sm:$0xff] %v5172_v34  ;;  %vm727_vm6 = vcmp.eq.s32.totalorder %v5005_v10, %v5172_v34  ;;  %vm728_vm7 = vcmp.eq.s32.totalorder %v4988_v5, %v5172_v34  ;;  %v657_v10 = vshll.u32 %v656_v51, 16  ;;  %v708_v63 = vshll.u32 %v707_v29, 16 }
 0x2b7   : > { %v5179_v59 = vsel %vm727_vm6, 1e+30, %v4872_v19  ;;  %v5182_v8 = vsel %vm728_vm7, 1e+30, %v4868_v18  ;;  %v622_v19 = vcvt.f32.s32 %v5157_v6  ;;  %v690_v18 = vcvt.f32.s32 %v5161_v39 }
 0x2b8   : > { %v759_v61 = vsel %vm500_vm3, %v5182_v8, inf  ;;  %v621_v6 = vcvt.f32.s32 %v620_v26 }
 0x2b9   : > { %v637_v60 = vpop.xlane.xlu1 %636  ;;  %v760_v38 = vmin.f32 %v5179_v59, %v759_v61  ;;  %v691_v1 = vshll.u32 %v690_v18, 16 }
 0x2ba   : > { %v638_v45 = vcvt.f32.s32 %v637_v60  ;;  %v654_v13 = vpop.xlane.xlu0 %653  ;;  %v725_v60 = vshll.u32 %v724_v30, 16 }
 0x2bb   : > { %v655_v52 = vcvt.f32.s32 %v654_v13  ;;  %761 = vmin.xlane.f32.xlu1 %v760_v38 }
 0x2bc   : > { %v5187_v5 = vadd.s32 %v640_v0, %v638_v45 }
 0x2bd   : > { %v5190_v17 = vadd.s32 %v657_v10, %v655_v52 }
 0x2be   : > { %9978 = vst [vmem:[#allocation22_spill] sm:$0xff] %v5187_v5  ;;  %vm731_vm10 = vcmp.eq.s32.totalorder %v5078_v43, %v5187_v5  ;;  %vm732_vm11 = vcmp.eq.s32.totalorder %v5085_v47, %v5187_v5 }
 0x2bf   : > { %9979 = vst [vmem:[#allocation23_spill] sm:$0xff] %v5190_v17  ;;  %v5198_v21 = vsel %vm731_vm10, 1e+30, %v4883_v25  ;;  %v5201_v50 = vsel %vm732_vm11, 1e+30, %v4879_v24  ;;  %vm733_vm12 = vcmp.eq.s32.totalorder %v5053_v27, %v5190_v17  ;;  %vm734_vm13 = vcmp.eq.s32.totalorder %v5063_v36, %v5190_v17 }
 0x2c0   : > { %v767_v37 = vsel %vm500_vm3, %v5201_v50, inf  ;;  %v5210_v43 = vsel %vm733_vm12, 1e+30, %v4917_v46  ;;  %v5213_v47 = vsel %vm734_vm13, 1e+30, %v4877_v22  ;;  %v623_v27 = vshll.u32 %v622_v19, 16 }
 0x2c1   : > { %v671_v25 = vpop.xlane.xlu1 %670  ;;  %v768_v24 = vmin.f32 %v5198_v21, %v767_v37  ;;  %v771_v39 = vsel %vm500_vm3, %v5213_v47, inf  ;;  %v9988_v37 = vld [vmem:[#allocation16_spill] sm:$0xff] }
 0x2c2   : > { %v672_v44 = vcvt.f32.s32 %v671_v25  ;;  %v688_v36 = vpop.xlane.xlu0 %687  ;;  %v772_v54 = vmin.f32 %v5210_v43, %v771_v39  ;;  %v5219_v46 = vadd.s32 %v623_v27, %v621_v6 }
 0x2c3   : > { %v689_v14 = vcvt.f32.s32 %v688_v36  ;;  %769 = vmin.xlane.f32.xlu1 %v768_v24  ;;  %v9989_v24 = vld [vmem:[#allocation15_spill] sm:$0xff] }
 0x2c4   : > { %9980 = vst [vmem:[#allocation24_spill] sm:$0xff] %v5219_v46  ;;  %v5221_v20 = vadd.s32 %v674_v31, %v672_v44  ;;  %773 = vmin.xlane.f32.xlu2 %v772_v54  ;;  %vm730_vm4 = vcmp.eq.s32.totalorder %v4995_v7, %v5219_v46  ;;  %vm729_vm5 = vcmp.eq.s32.totalorder %v5013_v12, %v5219_v46 }
 0x2c5   : > { %v5223_v22 = vadd.s32 %v691_v1, %v689_v14  ;;  %v5265_v0 = vsel %vm729_vm5, 1e+30, %v4910_v41 }
 0x2c6   : > { %9981 = vst [vmem:[#allocation25_spill] sm:$0xff] %v5221_v20  ;;  %vm735_vm14 = vcmp.eq.s32.totalorder %v5123_v9, %v5221_v20  ;;  %vm736_vm15 = vcmp.eq.s32.totalorder %v5129_v11, %v5221_v20 }
 0x2c7   : > { %9982 = vst [vmem:[#allocation26_spill] sm:$0xff] %v5223_v22  ;;  %v5232_v26 = vsel %vm735_vm14, 1e+30, %v4894_v33  ;;  %v5235_v23 = vsel %vm736_vm15, 1e+30, %v4890_v32  ;;  %vm737_vm0 = vcmp.eq.s32.totalorder %v5104_v56, %v5223_v22  ;;  %vm738_vm2 = vcmp.eq.s32.totalorder %v5107_v57, %v5223_v22 }
 0x2c8   : > { %v775_v58 = vsel %vm500_vm3, %v5235_v23, inf  ;;  %v5244_v9 = vsel %vm737_vm0, 1e+30, %v4935_v55  ;;  %v5247_v11 = vsel %vm738_vm2, 1e+30, %v4931_v53 }
 0x2c9   : > { %v705_v32 = vpop.xlane.xlu1 %704  ;;  %v776_v33 = vmin.f32 %v5232_v26, %v775_v58  ;;  %v779_v56 = vsel %vm500_vm3, %v5247_v11, inf  ;;  %v5258_v53 = vsel %vm730_vm4, 1e+30, %v4906_v40 }
 0x2ca   : > { %v706_v57 = vcvt.f32.s32 %v705_v32  ;;  %v722_v51 = vpop.xlane.xlu0 %721  ;;  %v780_v61 = vmin.f32 %v5244_v9, %v779_v56  ;;  %v763_v45 = vsel %vm500_vm3, %v5258_v53, inf  ;;  %v9992_v56 = vld [vmem:[#allocation17_spill] sm:$0xff] }
 0x2cb   : > { %v723_v55 = vcvt.f32.s32 %v722_v51  ;;  %777 = vmin.xlane.f32.xlu0 %v776_v33  ;;  %v764_v41 = vmin.f32 %v5265_v0, %v763_v45  ;;  %v9993_v51 = vld [vmem:[#allocation18_spill] sm:$0xff] }
 0x2cc   : > { %v5260_v7 = vadd.s32 %v708_v63, %v706_v57  ;;  %781 = vmin.xlane.f32.xlu1 %v780_v61 }
 0x2cd   : > { %v5262_v38 = vadd.s32 %v725_v60, %v723_v55 }
 0x2ce   : > { %9983 = vst [vmem:[#allocation27_spill] sm:$0xff] %v5260_v7  ;;  %vm739_vm8 = vcmp.eq.s32.totalorder %v5026_v15, %v5260_v7  ;;  %vm740_vm9 = vcmp.eq.s32.totalorder %v5032_v16, %v5260_v7  ;;  %v9999_v7 = vld [vmem:[#allocation20_spill] sm:$0xff] }
 0x2cf   : > { %9984 = vst [vmem:[#allocation28_spill] sm:$0xff] %v5262_v38  ;;  %v5274_v40 = vsel %vm739_vm8, 1e+30, %v4900_v35  ;;  %v5277_v12 = vsel %vm740_vm9, 1e+30, %v4888_v28  ;;  %vm742_vm6 = vcmp.eq.s32.totalorder %v5142_v42, %v5262_v38  ;;  %vm741_vm7 = vcmp.eq.s32.totalorder %v5149_v62, %v5262_v38 }
 0x2d0   : > { %v783_v13 = vsel %vm500_vm3, %v5277_v12, inf  ;;  %v5288_v35 = vsel %vm742_vm6, 1e+30, %v4921_v48  ;;  %v5291_v28 = vsel %vm741_vm7, 1e+30, %v4925_v49 }
 0x2d1   : > { %v784_v10 = vmin.f32 %v5274_v40, %v783_v13  ;;  %v787_v15 = vsel %vm500_vm3, %v5288_v35, inf }
 0x2d2   : > { %v788_v16 = vmin.f32 %v5291_v28, %v787_v15 }
 0x2d3   : > { %765 = vmin.xlane.f32.xlu0 %v764_v41  ;;  %785 = vmin.xlane.f32.xlu2 %v784_v10 }
 0x2db   : > { %789 = vmin.xlane.f32.xlu0 %v788_v16 }
 0x32e   : > { %v5296_v42 = vpop.xlane.xlu1 %761 }
 0x32f   : > { %9985 = vst [vmem:[#allocation29_spill] sm:$0xff] %v5296_v42  ;;  %vm791_vm10 = vcmp.le.f32.partialorder %v5179_v59, %v5296_v42  ;;  %vm792_vm11 = vcmp.le.f32.partialorder %v5182_v8, %v5296_v42 }
 0x330   : > { %v5303_v48 = vsel %vm791_vm10, %v4982_v4, 2147483647  ;;  %v5306_v49 = vsel %vm792_vm11, %v4976_v3, 2147483647 }
 0x331   : > { %v823_v62 = vsel %vm500_vm3, %v5306_v49, 2147483647 }
 0x332   : > { %vm824_vm12 = vcmp.lt.s32.totalorder %v5303_v48, %v823_v62 }
 0x333   : > { %v5312_v52 = vsel %vm824_vm12, %v5303_v48, %v823_v62 }
 0x334   : > { %v827_v19 = vshra.s32 %v5312_v52, 16 }
 0x336   : > { %v5315_v18 = vpop.xlane.xlu1 %769  ;;  %v5317_v2 = vcvt.s32.f32 %v827_v19 }
 0x337   : > { %9986 = vst [vmem:[#allocation30_spill] sm:$0xff] %v5315_v18  ;;  %vm795_vm13 = vcmp.le.f32.partialorder %v5198_v21, %v5315_v18  ;;  %vm796_vm14 = vcmp.le.f32.partialorder %v5201_v50, %v5315_v18  ;;  %v5323_v6 = vpop.xlane.xlu2 %773 }
 0x338   : > { %9987 = vst [vmem:[#allocation31_spill] sm:$0xff] %v5323_v6  ;;  %vm797_vm15 = vcmp.le.f32.partialorder %v5210_v43, %v5323_v6  ;;  %vm798_vm0 = vcmp.le.f32.partialorder %v5213_v47, %v5323_v6  ;;  %830 = vmin.xlane.f32.xlu1 %v5317_v2  ;;  %v5331_v25 = vsel %vm795_vm13, %v9988_v37, 2147483647  ;;  %v5340_v31 = vsel %vm796_vm14, %v4976_v3, 2147483647 }
 0x339   : > { %v5334_v39 = vsel %vm797_vm15, %v9989_v24, 2147483647  ;;  %v5337_v27 = vsel %vm798_vm0, %v4976_v3, 2147483647  ;;  %v857_v36 = vsel %vm500_vm3, %v5340_v31, 2147483647 }
 0x33a   : > { %v874_v44 = vsel %vm500_vm3, %v5337_v27, 2147483647  ;;  %vm858_vm4 = vcmp.lt.s32.totalorder %v5331_v25, %v857_v36 }
 0x33b   : > { %vm875_vm2 = vcmp.lt.s32.totalorder %v5334_v39, %v874_v44  ;;  %v5352_v1 = vsel %vm858_vm4, %v5331_v25, %v857_v36  ;;  %v9996_v36 = vld [vmem:[#allocation14_spill] sm:$0xff] }
 0x33c   : > { %v5349_v54 = vsel %vm875_vm2, %v5334_v39, %v874_v44  ;;  %v861_v29 = vshra.s32 %v5352_v1, 16 }
 0x33d   : > { %v878_v14 = vshra.s32 %v5349_v54, 16  ;;  %v877_v34 = vand.u32 65535, %v5349_v54 }
 0x33e   : > { %v5356_v30 = vpop.xlane.xlu0 %777  ;;  %v5370_v33 = vcvt.s32.f32 %v861_v29 }
 0x33f   : > { %9990 = vst [vmem:[#allocation32_spill] sm:$0xff] %v5356_v30  ;;  %v5358_v58 = vpop.xlane.xlu1 %781  ;;  %vm799_vm5 = vcmp.le.f32.partialorder %v5232_v26, %v5356_v30  ;;  %vm800_vm8 = vcmp.le.f32.partialorder %v5235_v23, %v5356_v30  ;;  %v5364_v32 = vcvt.s32.f32 %v878_v14 }
 0x340   : > { %9991 = vst [vmem:[#allocation33_spill] sm:$0xff] %v5358_v58  ;;  %vm801_vm9 = vcmp.le.f32.partialorder %v5244_v9, %v5358_v58  ;;  %vm802_vm6 = vcmp.le.f32.partialorder %v5247_v11, %v5358_v58  ;;  %v5380_v61 = vsel %vm799_vm5, %v9993_v51, 2147483647  ;;  %864 = vmin.xlane.f32.xlu0 %v5370_v33  ;;  %v5386_v55 = vsel %vm800_vm8, %v4976_v3, 2147483647 }
 0x341   : > { %881 = vmin.xlane.f32.xlu1 %v5364_v32  ;;  %v5374_v63 = vsel %vm801_vm9, %v9992_v56, 2147483647  ;;  %v5377_v57 = vsel %vm802_vm6, %v4976_v3, 2147483647  ;;  %v891_v45 = vsel %vm500_vm3, %v5386_v55, 2147483647 }
 0x342   : > { %v908_v60 = vsel %vm500_vm3, %v5377_v57, 2147483647  ;;  %vm892_vm10 = vcmp.lt.s32.totalorder %v5380_v61, %v891_v45 }
 0x343   : > { %vm909_vm7 = vcmp.lt.s32.totalorder %v5374_v63, %v908_v60  ;;  %v893_v10 = vsel %vm892_vm10, %v5380_v61, %v891_v45 }
 0x344   : > { %v5392_v13 = vsel %vm909_vm7, %v5374_v63, %v908_v60  ;;  %v895_v62 = vshra.s32 %v893_v10, 16  ;;  %v9997_v60 = vld [vmem:[#allocation13_spill] sm:$0xff] }
 0x345   : > { %v912_v41 = vshra.s32 %v5392_v13, 16 }
 0x346   : > { %v5397_v15 = vpop.xlane.xlu2 %785  ;;  %v5399_v16 = vpop.xlane.xlu0 %765  ;;  %v897_v44 = vcvt.s32.f32 %v895_v62 }
 0x347   : > { %9994 = vst [vmem:[#allocation34_spill] sm:$0xff] %v5397_v15  ;;  %vm803_vm11 = vcmp.le.f32.partialorder %v5274_v40, %v5397_v15  ;;  %vm804_vm12 = vcmp.le.f32.partialorder %v5277_v12, %v5397_v15  ;;  %vm793_vm13 = vcmp.le.f32.partialorder %v5265_v0, %v5399_v16  ;;  %vm794_vm14 = vcmp.le.f32.partialorder %v5258_v53, %v5399_v16 }
 0x348   : > { %9995 = vst [vmem:[#allocation35_spill] sm:$0xff] %v5399_v16  ;;  %v914_v19 = vcvt.s32.f32 %v912_v41  ;;  %v5410_v14 = vsel %vm803_vm11, %v9996_v36, 2147483647  ;;  %v5413_v29 = vsel %vm804_vm12, %v4976_v3, 2147483647  ;;  %898 = vmin.xlane.f32.xlu2 %v897_v44  ;;  %v879_v36 = vcvt.s32.f32 %v877_v34 }
 0x349   : > { %v5416_v45 = vsel %vm793_vm13, %v9997_v60, 2147483647  ;;  %v925_v15 = vsel %vm500_vm3, %v5413_v29, 2147483647  ;;  %v5421_v58 = vsel %vm794_vm14, %v4976_v3, 2147483647 }
 0x34a   : > { %915 = vmin.xlane.f32.xlu0 %v914_v19  ;;  %vm926_vm15 = vcmp.lt.s32.totalorder %v5410_v14, %v925_v15  ;;  %v840_v41 = vsel %vm500_vm3, %v5421_v58, 2147483647 }
 0x34b   : > { %v927_v62 = vsel %vm926_vm15, %v5410_v14, %v925_v15  ;;  %vm841_vm0 = vcmp.lt.s32.totalorder %v5416_v45, %v840_v41 }
 0x34c   : > { %v929_v16 = vshra.s32 %v927_v62, 16  ;;  %v842_v30 = vsel %vm841_vm0, %v5416_v45, %v840_v41 }
 0x34d   : > { %v844_v18 = vshra.s32 %v842_v30, 16 }
 0x34e   : > { %v5429_v6 = vpop.xlane.xlu0 %789  ;;  %v931_v42 = vcvt.s32.f32 %v929_v16 }
 0x34f   : > { %9998 = vst [vmem:[#allocation36_spill] sm:$0xff] %v5429_v6  ;;  %vm805_vm2 = vcmp.le.f32.partialorder %v5291_v28, %v5429_v6  ;;  %vm806_vm4 = vcmp.le.f32.partialorder %v5288_v35, %v5429_v6  ;;  %v846_v38 = vcvt.s32.f32 %v844_v18  ;;  %v826_v18 = vand.u32 65535, %v5312_v52 }
 0x350   : > { %v5436_v46 = vsel %vm805_vm2, %v9999_v7, 2147483647  ;;  %v5439_v15 = vsel %vm806_vm4, %v4976_v3, 2147483647  ;;  %932 = vmin.xlane.f32.xlu1 %v931_v42  ;;  %v860_v7 = vand.u32 65535, %v5352_v1 }
 0x351   : > { %v942_v41 = vsel %vm500_vm3, %v5439_v15, 2147483647  ;;  %847 = vmin.xlane.f32.xlu2 %v846_v38  ;;  %v828_v6 = vcvt.s32.f32 %v826_v18  ;;  %v894_v18 = vand.u32 65535, %v893_v10 }
 0x352   : > { %vm943_vm5 = vcmp.lt.s32.totalorder %v5436_v46, %v942_v41 }
 0x353   : > { %v944_v22 = vsel %vm943_vm5, %v5436_v46, %v942_v41  ;;  %v862_v41 = vcvt.s32.f32 %v860_v7  ;;  %v896_v54 = vcvt.s32.f32 %v894_v18 }
 0x354   : > { %v946_v20 = vshra.s32 %v944_v22, 16 }
 0x356   : > { %v948_v17 = vcvt.s32.f32 %v946_v20 }
 0x359   : > { %949 = vmin.xlane.f32.xlu2 %v948_v17 }
 0x3ab   : > { %v831_v16 = vpop.xlane.xlu1 %830 }
 0x3ac   : > { %vm832_vm8 = vcmp.eq.f32.partialorder %v5317_v2, %v831_v16  ;;  %v911_v2 = vand.u32 65535, %v5392_v13 }
 0x3ad   : > { %v833_v5 = vsel %vm832_vm8, %v828_v6, inf }
 0x3ae   : > { %834 = vmin.xlane.f32.xlu0 %v833_v5  ;;  %v913_v1 = vcvt.s32.f32 %v911_v2 }
 0x3b3   : > { %v865_v56 = vpop.xlane.xlu0 %864 }
 0x3b4   : > { %v882_v60 = vpop.xlane.xlu1 %881  ;;  %vm866_vm6 = vcmp.eq.f32.partialorder %v5370_v33, %v865_v56  ;;  %v843_v33 = vand.u32 65535, %v842_v30 }
 0x3b5   : > { %vm883_vm9 = vcmp.eq.f32.partialorder %v5364_v32, %v882_v60  ;;  %v867_v52 = vsel %vm866_vm6, %v862_v41, inf  ;;  %v928_v32 = vand.u32 65535, %v927_v62  ;;  %v837_v62 = vcvt.f32.s32 %v831_v16 }
 0x3b6   : > { %v884_v20 = vsel %vm883_vm9, %v879_v36, inf  ;;  %868 = vmin.xlane.f32.xlu2 %v867_v52  ;;  %v845_v41 = vcvt.s32.f32 %v843_v33 }
 0x3b7   : > { %885 = vmin.xlane.f32.xlu0 %v884_v20  ;;  %v930_v10 = vcvt.s32.f32 %v928_v32 }
 0x3bb   : > { %v5452_v5 = vpop.xlane.xlu2 %898 }
 0x3bc   : > { %vm900_vm7 = vcmp.eq.f32.partialorder %v897_v44, %v5452_v5 }
 0x3bd   : > { %v5454_v6 = vpop.xlane.xlu0 %915  ;;  %v901_v34 = vsel %vm900_vm7, %v896_v54, inf  ;;  %v838_v54 = vshll.u32 %v837_v62, 16 }
 0x3be   : > { %vm917_vm10 = vcmp.eq.f32.partialorder %v914_v19, %v5454_v6  ;;  %902 = vmin.xlane.f32.xlu1 %v901_v34  ;;  %v945_v19 = vand.u32 65535, %v944_v22  ;;  %v888_v22 = vcvt.f32.s32 %v882_v60  ;;  %v871_v34 = vcvt.f32.s32 %v865_v56 }
 0x3bf   : > { %v918_v7 = vsel %vm917_vm10, %v913_v1, inf  ;;  %v922_v56 = vcvt.f32.s32 %v5454_v6 }
 0x3c0   : > { %919 = vmin.xlane.f32.xlu2 %v918_v7  ;;  %v947_v18 = vcvt.s32.f32 %v945_v19  ;;  %v889_v33 = vshll.u32 %v888_v22, 16 }
 0x3c3   : > { %v5458_v36 = vpop.xlane.xlu1 %932 }
 0x3c4   : > { %v5460_v13 = vpop.xlane.xlu2 %847  ;;  %vm934_vm11 = vcmp.eq.f32.partialorder %v931_v42, %v5458_v36 }
 0x3c5   : > { %v935_v20 = vsel %vm934_vm11, %v930_v10, inf  ;;  %vm849_vm12 = vcmp.eq.f32.partialorder %v846_v38, %v5460_v13 }
 0x3c6   : > { %936 = vmin.xlane.f32.xlu0 %v935_v20  ;;  %v850_v44 = vsel %vm849_vm12, %v845_v41, inf  ;;  %v872_v41 = vshll.u32 %v871_v34, 16 }
 0x3c7   : > { %851 = vmin.xlane.f32.xlu1 %v850_v44 }
 0x3cc   : > { %v5464_v52 = vpop.xlane.xlu2 %949 }
 0x3cd   : > { %vm951_vm13 = vcmp.eq.f32.partialorder %v948_v17, %v5464_v52 }
 0x3ce   : > { %v952_v30 = vsel %vm951_vm13, %v947_v18, inf  ;;  %v923_v18 = vshll.u32 %v922_v56, 16 }
 0x3cf   : > { %953 = vmin.xlane.f32.xlu1 %v952_v30 }
 0x421   : > { %v835_v2 = vpop.xlane.xlu0 %834 }
 0x422   : > { %v836_v1 = vcvt.f32.s32 %v835_v2  ;;  %v939_v2 = vcvt.f32.s32 %v5458_v36 }
 0x424   : > { %v5467_v42 = vadd.s32 %v838_v54, %v836_v1  ;;  %v854_v54 = vcvt.f32.s32 %v5460_v13 }
 0x426   : > { %vm959_vm14 = vcmp.eq.s32.totalorder %v5303_v48, %v5467_v42  ;;  %vm960_vm15 = vcmp.eq.s32.totalorder %v5306_v49, %v5467_v42 }
 0x427   : > { %v5474_v38 = vsel %vm959_vm14, 1e+30, %v5179_v59  ;;  %v5477_v17 = vsel %vm960_vm15, 1e+30, %v5182_v8  ;;  %v905_v8 = vcvt.f32.s32 %v5452_v5 }
 0x428   : > { %v991_v16 = vsel %vm500_vm3, %v5477_v17, inf }
 0x429   : > { %v992_v7 = vmin.f32 %v5474_v38, %v991_v16  ;;  %v869_v10 = vpop.xlane.xlu2 %868 }
 0x42a   : > { %v886_v32 = vpop.xlane.xlu0 %885  ;;  %v870_v49 = vcvt.f32.s32 %v869_v10 }
 0x42b   : > { %v887_v48 = vcvt.f32.s32 %v886_v32  ;;  %993 = vmin.xlane.f32.xlu2 %v992_v7  ;;  %v855_v7 = vshll.u32 %v854_v54, 16 }
 0x42c   : > { %v5484_v59 = vadd.s32 %v872_v41, %v870_v49 }
 0x42d   : > { %v5482_v60 = vadd.s32 %v889_v33, %v887_v48 }
 0x42e   : > { %vm963_vm4 = vcmp.eq.s32.totalorder %v5331_v25, %v5484_v59  ;;  %vm964_vm5 = vcmp.eq.s32.totalorder %v5340_v31, %v5484_v59 }
 0x42f   : > { %vm965_vm0 = vcmp.eq.s32.totalorder %v5334_v39, %v5482_v60  ;;  %vm966_vm2 = vcmp.eq.s32.totalorder %v5337_v27, %v5482_v60  ;;  %v5500_v44 = vsel %vm963_vm4, 1e+30, %v5198_v21  ;;  %v5503_v5 = vsel %vm964_vm5, 1e+30, %v5201_v50 }
 0x430   : > { %v5497_v20 = vsel %vm965_vm0, 1e+30, %v5210_v43  ;;  %v5506_v39 = vsel %vm966_vm2, 1e+30, %v5213_v47  ;;  %v999_v27 = vsel %vm500_vm3, %v5503_v5, inf  ;;  %v906_v21 = vshll.u32 %v905_v8, 16 }
 0x431   : > { %v1003_v25 = vsel %vm500_vm3, %v5506_v39, inf  ;;  %v903_v6 = vpop.xlane.xlu1 %902  ;;  %v1000_v43 = vmin.f32 %v5500_v44, %v999_v27 }
 0x432   : > { %v1004_v19 = vmin.f32 %v5497_v20, %v1003_v25  ;;  %v904_v30 = vcvt.f32.s32 %v903_v6 }
 0x433   : > { %v920_v31 = vpop.xlane.xlu2 %919  ;;  %1001 = vmin.xlane.f32.xlu1 %v1000_v43 }
 0x434   : > { %v921_v50 = vcvt.f32.s32 %v920_v31  ;;  %1005 = vmin.xlane.f32.xlu2 %v1004_v19  ;;  %v5514_v47 = vadd.s32 %v906_v21, %v904_v30 }
 0x436   : > { %v5516_v62 = vadd.s32 %v923_v18, %v921_v50  ;;  %vm967_vm8 = vcmp.eq.s32.totalorder %v5380_v61, %v5514_v47  ;;  %vm968_vm9 = vcmp.eq.s32.totalorder %v5386_v55, %v5514_v47 }
 0x437   : > { %v5525_v1 = vsel %vm967_vm8, 1e+30, %v5232_v26  ;;  %v5528_v22 = vsel %vm968_vm9, 1e+30, %v5235_v23  ;;  %v940_v26 = vshll.u32 %v939_v2, 16 }
 0x438   : > { %vm969_vm6 = vcmp.eq.s32.totalorder %v5374_v63, %v5516_v62  ;;  %vm970_vm7 = vcmp.eq.s32.totalorder %v5377_v57, %v5516_v62  ;;  %v1007_v13 = vsel %vm500_vm3, %v5528_v22, inf }
 0x439   : > { %v937_v36 = vpop.xlane.xlu0 %936  ;;  %v5537_v61 = vsel %vm969_vm6, 1e+30, %v5244_v9  ;;  %v5540_v55 = vsel %vm970_vm7, 1e+30, %v5247_v11  ;;  %v1008_v16 = vmin.f32 %v5525_v1, %v1007_v13  ;;  %v956_v11 = vcvt.f32.s32 %v5464_v52 }
 0x43a   : > { %v852_v34 = vpop.xlane.xlu1 %851  ;;  %v938_v23 = vcvt.f32.s32 %v937_v36  ;;  %v1011_v63 = vsel %vm500_vm3, %v5540_v55, inf }
 0x43b   : > { %v853_v57 = vcvt.f32.s32 %v852_v34  ;;  %v1012_v32 = vmin.f32 %v5537_v61, %v1011_v63  ;;  %1009 = vmin.xlane.f32.xlu0 %v1008_v16  ;;  %v957_v49 = vshll.u32 %v956_v11, 16 }
 0x43c   : > { %v5546_v33 = vadd.s32 %v940_v26, %v938_v23 }
 0x43d   : > { %v5548_v9 = vadd.s32 %v855_v7, %v853_v57  ;;  %1013 = vmin.xlane.f32.xlu1 %v1012_v32  ;;  %v10008_v32 = vld [vmem:[#allocation17_spill] sm:$0xff] }
 0x43e   : > { %vm971_vm10 = vcmp.eq.s32.totalorder %v5410_v14, %v5546_v33  ;;  %vm972_vm11 = vcmp.eq.s32.totalorder %v5413_v29, %v5546_v33 }
 0x43f   : > { %vm961_vm12 = vcmp.eq.s32.totalorder %v5416_v45, %v5548_v9  ;;  %vm962_vm13 = vcmp.eq.s32.totalorder %v5421_v58, %v5548_v9  ;;  %v5560_v10 = vsel %vm971_vm10, 1e+30, %v5274_v40  ;;  %v5569_v14 = vsel %vm972_vm11, 1e+30, %v5277_v12 }
 0x440   : > { %v5563_v48 = vsel %vm961_vm12, 1e+30, %v5265_v0  ;;  %v5566_v41 = vsel %vm962_vm13, 1e+30, %v5258_v53  ;;  %v1015_v45 = vsel %vm500_vm3, %v5569_v14, inf }
 0x441   : > { %v995_v29 = vsel %vm500_vm3, %v5566_v41, inf  ;;  %v1016_v40 = vmin.f32 %v5560_v10, %v1015_v45 }
 0x442   : > { %v954_v52 = vpop.xlane.xlu1 %953  ;;  %v996_v58 = vmin.f32 %v5563_v48, %v995_v29 }
 0x443   : > { %v955_v0 = vcvt.f32.s32 %v954_v52  ;;  %1017 = vmin.xlane.f32.xlu2 %v1016_v40 }
 0x444   : > { %997 = vmin.xlane.f32.xlu0 %v996_v58 }
 0x445   : > { %v5577_v53 = vadd.s32 %v957_v49, %v955_v0 }
 0x447   : > { %10000 = vst [vmem:[#allocation37_spill] sm:$0xff] %v5577_v53  ;;  %vm973_vm14 = vcmp.eq.s32.totalorder %v5436_v46, %v5577_v53  ;;  %vm974_vm15 = vcmp.eq.s32.totalorder %v5439_v15, %v5577_v53 }
 0x448   : > { %v5584_v12 = vsel %vm973_vm14, 1e+30, %v5291_v28  ;;  %v5587_v8 = vsel %vm974_vm15, 1e+30, %v5288_v35 }
 0x449   : > { %10001 = vst [vmem:[#allocation38_spill] sm:$0xff] %v5584_v12  ;;  %v1019_v56 = vsel %vm500_vm3, %v5587_v8, inf }
 0x44a   : > { %10002 = vst [vmem:[#allocation39_spill] sm:$0xff] %v5587_v8  ;;  %v1020_v27 = vmin.f32 %v5584_v12, %v1019_v56 }
 0x44c   : > { %1021 = vmin.xlane.f32.xlu0 %v1020_v27 }
 0x49e   : > { %v5592_v25 = vpop.xlane.xlu2 %993 }
 0x49f   : > { %10003 = vst [vmem:[#allocation40_spill] sm:$0xff] %v5592_v25  ;;  %vm1023_vm0 = vcmp.le.f32.partialorder %v5474_v38, %v5592_v25  ;;  %vm1024_vm2 = vcmp.le.f32.partialorder %v5477_v17, %v5592_v25 }
 0x4a0   : > { %v5599_v46 = vsel %vm1023_vm0, %v4982_v4, 2147483647  ;;  %v5602_v35 = vsel %vm1024_vm2, %v4976_v3, 2147483647 }
 0x4a1   : > { %v1055_v28 = vsel %vm500_vm3, %v5602_v35, 2147483647 }
 0x4a2   : > { %vm1056_vm4 = vcmp.lt.s32.totalorder %v5599_v46, %v1055_v28 }
 0x4a3   : > { %v5608_v15 = vsel %vm1056_vm4, %v5599_v46, %v1055_v28 }
 0x4a4   : > { %v1059_v6 = vshra.s32 %v5608_v15, 16 }
 0x4a6   : > { %v5611_v31 = vcvt.s32.f32 %v1059_v6  ;;  %v5613_v43 = vpop.xlane.xlu1 %1001 }
 0x4a7   : > { %10004 = vst [vmem:[#allocation41_spill] sm:$0xff] %v5613_v43  ;;  %v5615_v19 = vpop.xlane.xlu2 %1005  ;;  %vm1027_vm5 = vcmp.le.f32.partialorder %v5500_v44, %v5613_v43  ;;  %vm1028_vm8 = vcmp.le.f32.partialorder %v5503_v5, %v5613_v43 }
 0x4a8   : > { %10005 = vst [vmem:[#allocation42_spill] sm:$0xff] %v5615_v19  ;;  %1062 = vmin.xlane.f32.xlu1 %v5611_v31  ;;  %vm1029_vm9 = vcmp.le.f32.partialorder %v5497_v20, %v5615_v19  ;;  %vm1030_vm6 = vcmp.le.f32.partialorder %v5506_v39, %v5615_v19  ;;  %v5627_v21 = vsel %vm1027_vm5, %v9988_v37, 2147483647  ;;  %v5630_v18 = vsel %vm1028_vm8, %v4976_v3, 2147483647 }
 0x4a9   : > { %v1089_v30 = vsel %vm500_vm3, %v5630_v18, 2147483647  ;;  %v5635_v50 = vsel %vm1029_vm9, %v9989_v24, 2147483647  ;;  %v5638_v2 = vsel %vm1030_vm6, %v4976_v3, 2147483647 }
 0x4aa   : > { %vm1090_vm7 = vcmp.lt.s32.totalorder %v5627_v21, %v1089_v30  ;;  %v1106_v54 = vsel %vm500_vm3, %v5638_v2, 2147483647 }
 0x4ab   : > { %v5644_v36 = vsel %vm1090_vm7, %v5627_v21, %v1089_v30  ;;  %vm1107_vm10 = vcmp.lt.s32.totalorder %v5635_v50, %v1106_v54 }
 0x4ac   : > { %v1093_v13 = vshra.s32 %v5644_v36, 16  ;;  %v5649_v26 = vsel %vm1107_vm10, %v5635_v50, %v1106_v54  ;;  %v10011_v54 = vld [vmem:[#allocation14_spill] sm:$0xff] }
 0x4ad   : > { %v1110_v34 = vshra.s32 %v5649_v26, 16  ;;  %v1109_v4 = vand.u32 65535, %v5649_v26 }
 0x4ae   : > { %v5652_v23 = vpop.xlane.xlu0 %1009  ;;  %v5654_v16 = vcvt.s32.f32 %v1093_v13 }
 0x4af   : > { %10006 = vst [vmem:[#allocation43_spill] sm:$0xff] %v5652_v23  ;;  %vm1031_vm11 = vcmp.le.f32.partialorder %v5525_v1, %v5652_v23  ;;  %vm1032_vm12 = vcmp.le.f32.partialorder %v5528_v22, %v5652_v23  ;;  %v5662_v7 = vcvt.s32.f32 %v1110_v34  ;;  %v1111_v53 = vcvt.s32.f32 %v1109_v4 }
 0x4b0   : > { %v5656_v63 = vpop.xlane.xlu1 %1013  ;;  %1096 = vmin.xlane.f32.xlu0 %v5654_v16  ;;  %v5670_v57 = vsel %vm1031_vm11, %v9993_v51, 2147483647  ;;  %v5680_v45 = vsel %vm1032_vm12, %v4976_v3, 2147483647 }
 0x4b1   : > { %10007 = vst [vmem:[#allocation44_spill] sm:$0xff] %v5656_v63  ;;  %vm1033_vm13 = vcmp.le.f32.partialorder %v5537_v61, %v5656_v63  ;;  %vm1034_vm14 = vcmp.le.f32.partialorder %v5540_v55, %v5656_v63  ;;  %1113 = vmin.xlane.f32.xlu1 %v5662_v7  ;;  %v1123_v58 = vsel %vm500_vm3, %v5680_v45, 2147483647 }
 0x4b2   : > { %v5674_v11 = vsel %vm1033_vm13, %v10008_v32, 2147483647  ;;  %v5677_v29 = vsel %vm1034_vm14, %v4976_v3, 2147483647  ;;  %vm1124_vm0 = vcmp.lt.s32.totalorder %v5670_v57, %v1123_v58 }
 0x4b3   : > { %v1140_v52 = vsel %vm500_vm3, %v5677_v29, 2147483647  ;;  %v1125_v49 = vsel %vm1124_vm0, %v5670_v57, %v1123_v58 }
 0x4b4   : > { %vm1141_vm15 = vcmp.lt.s32.totalorder %v5674_v11, %v1140_v52  ;;  %v1127_v56 = vshra.s32 %v1125_v49, 16 }
 0x4b5   : > { %v5689_v40 = vsel %vm1141_vm15, %v5674_v11, %v1140_v52  ;;  %v10012_v52 = vld [vmem:[#allocation13_spill] sm:$0xff] }
 0x4b6   : > { %v1144_v0 = vshra.s32 %v5689_v40, 16  ;;  %v5693_v27 = vpop.xlane.xlu2 %1017  ;;  %v1129_v30 = vcvt.s32.f32 %v1127_v56 }
 0x4b7   : > { %10009 = vst [vmem:[#allocation45_spill] sm:$0xff] %v5693_v27  ;;  %v5695_v28 = vpop.xlane.xlu0 %997  ;;  %vm1035_vm2 = vcmp.le.f32.partialorder %v5560_v10, %v5693_v27  ;;  %vm1036_vm4 = vcmp.le.f32.partialorder %v5569_v14, %v5693_v27 }
 0x4b8   : > { %10010 = vst [vmem:[#allocation46_spill] sm:$0xff] %v5695_v28  ;;  %vm1025_vm5 = vcmp.le.f32.partialorder %v5563_v48, %v5695_v28  ;;  %vm1026_vm8 = vcmp.le.f32.partialorder %v5566_v41, %v5695_v28  ;;  %v1146_v6 = vcvt.s32.f32 %v1144_v0  ;;  %v5706_v13 = vsel %vm1035_vm2, %v10011_v54, 2147483647  ;;  %1130 = vmin.xlane.f32.xlu2 %v1129_v30  ;;  %v10014_v54 = vld [vmem:[#allocation20_spill] sm:$0xff] }
 0x4b9   : > { %v5709_v34 = vsel %vm1036_vm4, %v4976_v3, 2147483647  ;;  %v5712_v58 = vsel %vm1025_vm5, %v10012_v52, 2147483647  ;;  %v5717_v63 = vsel %vm1026_vm8, %v4976_v3, 2147483647 }
 0x4ba   : > { %1147 = vmin.xlane.f32.xlu0 %v1146_v6  ;;  %v1157_v27 = vsel %vm500_vm3, %v5709_v34, 2147483647  ;;  %v1072_v0 = vsel %vm500_vm3, %v5717_v63, 2147483647  ;;  %vm4207_vm8 = vcmask 7168  }
 0x4bb   : > { %vm1158_vm9 = vcmp.lt.s32.totalorder %v5706_v13, %v1157_v27  ;;  %vm1073_vm6 = vcmp.lt.s32.totalorder %v5712_v58, %v1072_v0 }
 0x4bc   : > { %v1159_v56 = vsel %vm1158_vm9, %v5706_v13, %v1157_v27  ;;  %v1074_v23 = vsel %vm1073_vm6, %v5712_v58, %v1072_v0  ;;  %vm4216_vm9 = vcmask 15360  }
 0x4bd   : > { %v1161_v28 = vshra.s32 %v1159_v56, 16  ;;  %v1076_v43 = vshra.s32 %v1074_v23, 16 }
 0x4bf   : > { %v5725_v19 = vpop.xlane.xlu0 %1021  ;;  %v1163_v25 = vcvt.s32.f32 %v1161_v28  ;;  %v1078_v52 = vcvt.s32.f32 %v1076_v43  ;;  %v1058_v43 = vand.u32 65535, %v5608_v15 }
 0x4c0   : > { %10013 = vst [vmem:[#allocation47_spill] sm:$0xff] %v5725_v19  ;;  %vm1037_vm7 = vcmp.le.f32.partialorder %v5584_v12, %v5725_v19  ;;  %vm1038_vm10 = vcmp.le.f32.partialorder %v5587_v8, %v5725_v19 }
 0x4c1   : > { %v5732_v32 = vsel %vm1037_vm7, %v10014_v54, 2147483647  ;;  %v5735_v27 = vsel %vm1038_vm10, %v4976_v3, 2147483647  ;;  %1164 = vmin.xlane.f32.xlu1 %v1163_v25  ;;  %1079 = vmin.xlane.f32.xlu2 %v1078_v52  ;;  %v1060_v19 = vcvt.s32.f32 %v1058_v43  ;;  %v1092_v3 = vand.u32 65535, %v5644_v36 }
 0x4c2   : > { %10015 = vst [vmem:[#allocation48_spill] sm:$0xff] %v5735_v27  ;;  %v1174_v0 = vsel %vm500_vm3, %v5735_v27, 2147483647 }
 0x4c3   : > { %vm1175_vm11 = vcmp.lt.s32.totalorder %v5732_v32, %v1174_v0  ;;  %v1094_v12 = vcvt.s32.f32 %v1092_v3 }
 0x4c4   : > { %v1176_v51 = vsel %vm1175_vm11, %v5732_v32, %v1174_v0  ;;  %v1126_v0 = vand.u32 65535, %v1125_v49 }
 0x4c5   : > { %v1178_v24 = vshra.s32 %v1176_v51, 16 }
 0x4c6   : > { %v1128_v26 = vcvt.s32.f32 %v1126_v0 }
 0x4c7   : > { %v1180_v37 = vcvt.s32.f32 %v1178_v24 }
 0x4c9   : > { %1181 = vmin.xlane.f32.xlu2 %v1180_v37 }
 0x51b   : > { %v1063_v28 = vpop.xlane.xlu1 %1062 }
 0x51c   : > { %vm1064_vm12 = vcmp.eq.f32.partialorder %v5611_v31, %v1063_v28  ;;  %v1143_v31 = vand.u32 65535, %v5689_v40 }
 0x51d   : > { %v1065_v54 = vsel %vm1064_vm12, %v1060_v19, inf }
 0x51e   : > { %1066 = vmin.xlane.f32.xlu0 %v1065_v54  ;;  %v1145_v54 = vcvt.s32.f32 %v1143_v31 }
 0x523   : > { %v1097_v8 = vpop.xlane.xlu0 %1096 }
 0x524   : > { %v1114_v27 = vpop.xlane.xlu1 %1113  ;;  %vm1098_vm13 = vcmp.eq.f32.partialorder %v5654_v16, %v1097_v8 }
 0x525   : > { %vm1115_vm14 = vcmp.eq.f32.partialorder %v5662_v7, %v1114_v27  ;;  %v1099_v24 = vsel %vm1098_vm13, %v1094_v12, inf  ;;  %v1075_v12 = vand.u32 65535, %v1074_v23 }
 0x526   : > { %v1116_v15 = vsel %vm1115_vm14, %v1111_v53, inf  ;;  %1100 = vmin.xlane.f32.xlu2 %v1099_v24  ;;  %v1160_v53 = vand.u32 65535, %v1159_v56  ;;  %v1069_v56 = vcvt.f32.s32 %v1063_v28 }
 0x527   : > { %1117 = vmin.xlane.f32.xlu0 %v1116_v15  ;;  %v1077_v49 = vcvt.s32.f32 %v1075_v12 }
 0x528   : > { %v1162_v7 = vcvt.s32.f32 %v1160_v53  ;;  %v1070_v31 = vshll.u32 %v1069_v56, 16  ;;  %v1120_v53 = vcvt.f32.s32 %v1114_v27 }
 0x52b   : > { %v5748_v19 = vpop.xlane.xlu2 %1130 }
 0x52c   : > { %vm1132_vm15 = vcmp.eq.f32.partialorder %v1129_v30, %v5748_v19  ;;  %v1137_v27 = vcvt.f32.s32 %v5748_v19 }
 0x52d   : > { %v5750_v36 = vpop.xlane.xlu0 %1147  ;;  %v1133_v3 = vsel %vm1132_vm15, %v1128_v26, inf }
 0x52e   : > { %vm1149_vm0 = vcmp.eq.f32.partialorder %v1146_v6, %v5750_v36  ;;  %1134 = vmin.xlane.f32.xlu1 %v1133_v3  ;;  %v1177_v6 = vand.u32 65535, %v1176_v51  ;;  %v1103_v3 = vcvt.f32.s32 %v1097_v8  ;;  %v10018_v8 = vld [vmem:[#allocation23_spill] sm:$0xff] }
 0x52f   : > { %v1150_v4 = vsel %vm1149_vm0, %v1145_v54, inf  ;;  %v10016_v54 = vld [vmem:[#allocation21_spill] sm:$0xff] }
 0x530   : > { %1151 = vmin.xlane.f32.xlu2 %v1150_v4  ;;  %v1179_v15 = vcvt.s32.f32 %v1177_v6  ;;  %v4344_v6 = vsel %vm4207_vm8, %v10018_v8, %v5482_v60  ;;  %v1154_v60 = vcvt.f32.s32 %v5750_v36 }
 0x534   : > { %v5754_v16 = vpop.xlane.xlu1 %1164  ;;  %v5756_v40 = vpop.xlane.xlu2 %1079 }
 0x535   : > { %vm1166_vm2 = vcmp.eq.f32.partialorder %v1163_v25, %v5754_v16  ;;  %vm1081_vm4 = vcmp.eq.f32.partialorder %v1078_v52, %v5756_v40  ;;  %v4341_v52 = vsel %vm4207_vm8, %v10016_v54, %v5467_v42 }
 0x536   : > { %v1167_v43 = vsel %vm1166_vm2, %v1162_v7, inf  ;;  %v1082_v30 = vsel %vm1081_vm4, %v1077_v49, inf  ;;  %v1104_v7 = vshll.u32 %v1103_v3, 16  ;;  %v10019_v3 = vld [vmem:[#allocation25_spill] sm:$0xff] }
 0x537   : > { %1168 = vmin.xlane.f32.xlu0 %v1167_v43  ;;  %1083 = vmin.xlane.f32.xlu1 %v1082_v30  ;;  %v1121_v43 = vshll.u32 %v1120_v53, 16 }
 0x53c   : > { %v5760_v24 = vpop.xlane.xlu2 %1181 }
 0x53d   : > { %vm1183_vm5 = vcmp.eq.f32.partialorder %v1180_v37, %v5760_v24 }
 0x53e   : > { %v1184_v23 = vsel %vm1183_vm5, %v1179_v15, inf }
 0x53f   : > { %1185 = vmin.xlane.f32.xlu1 %v1184_v23 }
 0x591   : > { %v1067_v0 = vpop.xlane.xlu0 %1066 }
 0x592   : > { %v1068_v26 = vcvt.f32.s32 %v1067_v0 }
 0x594   : > { %v1071_v25 = vadd.s32 %v1070_v31, %v1068_v26  ;;  %v1138_v26 = vshll.u32 %v1137_v27, 16 }
 0x596   : > { %v5767_v51 = vsel %vm4216_vm9, %v4341_v52, %v1071_v25  ;;  %vm1191_vm6 = vcmp.eq.s32.totalorder %v5599_v46, %v1071_v25  ;;  %vm1192_vm7 = vcmp.eq.s32.totalorder %v5602_v35, %v1071_v25  ;;  %v1155_v25 = vshll.u32 %v1154_v60, 16 }
 0x597   : > { %v5772_v37 = vsel %vm1191_vm6, 1e+30, %v5474_v38  ;;  %v5775_v28 = vsel %vm1192_vm7, 1e+30, %v5477_v17  ;;  %v10017_v38 = vld [vmem:[#allocation22_spill] sm:$0xff] }
 0x598   : > { %v1223_v4 = vsel %vm500_vm3, %v5775_v28, inf  ;;  %v4343_v17 = vsel %vm4207_vm8, %v10017_v38, %v5484_v59 }
 0x599   : > { %v1224_v42 = vmin.f32 %v5772_v37, %v1223_v4  ;;  %v1101_v12 = vpop.xlane.xlu2 %1100  ;;  %v10020_v4 = vld [vmem:[#allocation26_spill] sm:$0xff] }
 0x59a   : > { %v1102_v49 = vcvt.f32.s32 %v1101_v12  ;;  %v1118_v46 = vpop.xlane.xlu0 %1117  ;;  %v4346_v53 = vsel %vm4207_vm8, %v10020_v4, %v5516_v62  ;;  %v1086_v12 = vcvt.f32.s32 %v5756_v40  ;;  %v10032_v4 = vld [vmem:[#allocation11_spill] sm:$0xff] }
 0x59b   : > { %1225 = vmin.xlane.f32.xlu2 %v1224_v42  ;;  %v1119_v35 = vcvt.f32.s32 %v1118_v46  ;;  %v1171_v42 = vcvt.f32.s32 %v5754_v16 }
 0x59c   : > { %v1105_v30 = vadd.s32 %v1104_v7, %v1102_v49 }
 0x59d   : > { %v1122_v15 = vadd.s32 %v1121_v43, %v1119_v35  ;;  %v1087_v35 = vshll.u32 %v1086_v12, 16 }
 0x59e   : > { %v5788_v23 = vsel %vm4216_vm9, %v4343_v17, %v1105_v30  ;;  %vm1195_vm10 = vcmp.eq.s32.totalorder %v5627_v21, %v1105_v30  ;;  %vm1196_vm11 = vcmp.eq.s32.totalorder %v5630_v18, %v1105_v30 }
 0x59f   : > { %v5793_v56 = vsel %vm4216_vm9, %v4344_v6, %v1122_v15  ;;  %v5796_v0 = vsel %vm1195_vm10, 1e+30, %v5500_v44  ;;  %v5799_v59 = vsel %vm1196_vm11, 1e+30, %v5503_v5  ;;  %vm1197_vm12 = vcmp.eq.s32.totalorder %v5635_v50, %v1122_v15 }
 0x5a0   : > { %v1231_v19 = vsel %vm500_vm3, %v5799_v59, inf  ;;  %vm1198_vm13 = vcmp.eq.s32.totalorder %v5638_v2, %v1122_v15  ;;  %v5807_v21 = vsel %vm1197_vm12, 1e+30, %v5497_v20  ;;  %v1188_v15 = vcvt.f32.s32 %v5760_v24 }
 0x5a1   : > { %v1232_v18 = vmin.f32 %v5796_v0, %v1231_v19  ;;  %v5811_v44 = vsel %vm1198_vm13, 1e+30, %v5506_v39  ;;  %v1135_v31 = vpop.xlane.xlu1 %1134  ;;  %v4345_v39 = vsel %vm4207_vm8, %v10019_v3, %v5514_v47 }
 0x5a2   : > { %v1235_v5 = vsel %vm500_vm3, %v5811_v44, inf  ;;  %v1136_v54 = vcvt.f32.s32 %v1135_v31  ;;  %v10024_v31 = vld [vmem:[#allocation28_spill] sm:$0xff] }
 0x5a3   : > { %v1152_v50 = vpop.xlane.xlu2 %1151  ;;  %1233 = vmin.xlane.f32.xlu1 %v1232_v18  ;;  %v1236_v36 = vmin.f32 %v5807_v21, %v1235_v5  ;;  %v1189_v18 = vshll.u32 %v1188_v15, 16  ;;  %v10023_v5 = vld [vmem:[#allocation37_spill] sm:$0xff] }
 0x5a4   : > { %v1153_v2 = vcvt.f32.s32 %v1152_v50  ;;  %v1139_v20 = vadd.s32 %v1138_v26, %v1136_v54  ;;  %v10026_v26 = vld [vmem:[#allocation38_spill] sm:$0xff]  ;;  %v10028_v54 = vld [vmem:[#allocation39_spill] sm:$0xff] }
 0x5a5   : > { %1237 = vmin.xlane.f32.xlu2 %v1236_v36  ;;  %v10025_v36 = vld [vmem:[#allocation48_spill] sm:$0xff] }
 0x5a6   : > { %v1156_v52 = vadd.s32 %v1155_v25, %v1153_v2  ;;  %v5825_v7 = vsel %vm4216_vm9, %v4345_v39, %v1139_v20  ;;  %vm1199_vm14 = vcmp.eq.s32.totalorder %v5670_v57, %v1139_v20  ;;  %vm1200_vm15 = vcmp.eq.s32.totalorder %v5680_v45, %v1139_v20 }
 0x5a7   : > { %v5833_v47 = vsel %vm1199_vm14, 1e+30, %v5525_v1  ;;  %v5836_v46 = vsel %vm1200_vm15, 1e+30, %v5528_v22  ;;  %v1172_v45 = vshll.u32 %v1171_v42, 16 }
 0x5a8   : > { %v5828_v49 = vsel %vm4216_vm9, %v4346_v53, %v1156_v52  ;;  %vm1201_vm0 = vcmp.eq.s32.totalorder %v5674_v11, %v1156_v52  ;;  %vm1202_vm2 = vcmp.eq.s32.totalorder %v5677_v29, %v1156_v52  ;;  %v1239_v16 = vsel %vm500_vm3, %v5836_v46, inf }
 0x5a9   : > { %v5843_v40 = vsel %vm1201_vm0, 1e+30, %v5537_v61  ;;  %v5846_v57 = vsel %vm1202_vm2, 1e+30, %v5540_v55  ;;  %v1240_v22 = vmin.f32 %v5833_v47, %v1239_v16  ;;  %v10021_v61 = vld [vmem:[#allocation24_spill] sm:$0xff]  ;;  %v10022_v55 = vld [vmem:[#allocation27_spill] sm:$0xff] }
 0x5aa   : > { %v1169_v62 = vpop.xlane.xlu0 %1168  ;;  %v1084_v1 = vpop.xlane.xlu1 %1083  ;;  %v1243_v11 = vsel %vm500_vm3, %v5846_v57, inf  ;;  %v4342_v17 = vsel %vm4207_vm8, %v10021_v61, %v5548_v9  ;;  %v4347_v8 = vsel %vm4207_vm8, %v10022_v55, %v5546_v33 }
 0x5ab   : > { %v1170_v43 = vcvt.f32.s32 %v1169_v62  ;;  %v1085_v29 = vcvt.f32.s32 %v1084_v1  ;;  %v1244_v30 = vmin.f32 %v5843_v40, %v1243_v11  ;;  %1241 = vmin.xlane.f32.xlu0 %v1240_v22 }
 0x5ad   : > { %v1173_v38 = vadd.s32 %v1172_v45, %v1170_v43  ;;  %v1088_v6 = vadd.s32 %v1087_v35, %v1085_v29  ;;  %1245 = vmin.xlane.f32.xlu1 %v1244_v30  ;;  %v10035_v43 = vld [vmem:[#allocation16_spill] sm:$0xff]  ;;  %v10036_v29 = vld [vmem:[#allocation15_spill] sm:$0xff] }
 0x5af   : > { %v5860_v27 = vsel %vm4216_vm9, %v4347_v8, %v1173_v38  ;;  %vm1203_vm4 = vcmp.eq.s32.totalorder %v5706_v13, %v1173_v38  ;;  %vm1204_vm5 = vcmp.eq.s32.totalorder %v5709_v34, %v1173_v38  ;;  %v5865_v60 = vsel %vm4216_vm9, %v4342_v17, %v1088_v6 }
 0x5b0   : > { %vm1193_vm6 = vcmp.eq.s32.totalorder %v5712_v58, %v1088_v6  ;;  %vm1194_vm7 = vcmp.eq.s32.totalorder %v5717_v63, %v1088_v6  ;;  %v5870_v33 = vsel %vm1203_vm4, 1e+30, %v5560_v10  ;;  %v5879_v13 = vsel %vm1204_vm5, 1e+30, %v5569_v14 }
 0x5b1   : > { %v5873_v9 = vsel %vm1193_vm6, 1e+30, %v5563_v48  ;;  %v5876_v24 = vsel %vm1194_vm7, 1e+30, %v5566_v41  ;;  %v1247_v58 = vsel %vm500_vm3, %v5879_v13, inf  ;;  %v4348_v14 = vsel %vm4207_vm8, %v10024_v31, %v10023_v5 }
 0x5b2   : > { %v1227_v34 = vsel %vm500_vm3, %v5876_v24, inf  ;;  %v1186_v19 = vpop.xlane.xlu1 %1185  ;;  %v1248_v10 = vmin.f32 %v5870_v33, %v1247_v58 }
 0x5b3   : > { %v1228_v63 = vmin.f32 %v5873_v9, %v1227_v34  ;;  %v1187_v48 = vcvt.f32.s32 %v1186_v19 }
 0x5b4   : > { %1249 = vmin.xlane.f32.xlu2 %v1248_v10 }
 0x5b5   : > { %1229 = vmin.xlane.f32.xlu0 %v1228_v63  ;;  %v1190_v41 = vadd.s32 %v1189_v18, %v1187_v48  ;;  %v10039_v63 = vld [vmem:[#allocation18_spill] sm:$0xff]  ;;  %v10040_v18 = vld [vmem:[#allocation17_spill] sm:$0xff] }
 0x5b7   : > { %v5891_v50 = vsel %vm4216_vm9, %v4348_v14, %v1190_v41  ;;  %vm1205_vm10 = vcmp.eq.s32.totalorder %v5732_v32, %v1190_v41  ;;  %vm1206_vm11 = vcmp.eq.s32.totalorder %v10025_v36, %v1190_v41  ;;  %v10031_v32 = vld [vmem:[#allocation12_spill] sm:$0xff] }
 0x5b8   : > { %v5896_v25 = vsel %vm1205_vm10, 1e+30, %v10026_v26  ;;  %v5899_v2 = vsel %vm1206_vm11, 1e+30, %v10028_v54 }
 0x5b9   : > { %10027 = vst [vmem:[#allocation21_spill] sm:$0xff] %v5896_v25  ;;  %v1251_v20 = vsel %vm500_vm3, %v5899_v2, inf }
 0x5ba   : > { %10029 = vst [vmem:[#allocation22_spill] sm:$0xff] %v5899_v2  ;;  %v1252_v52 = vmin.f32 %v5896_v25, %v1251_v20 }
 0x5bd   : > { %1253 = vmin.xlane.f32.xlu0 %v1252_v52 }
 0x60e   : > { %v5904_v3 = vpop.xlane.xlu2 %1225 }
 0x60f   : > { %10030 = vst [vmem:[#allocation23_spill] sm:$0xff] %v5904_v3  ;;  %vm1255_vm12 = vcmp.le.f32.partialorder %v5772_v37, %v5904_v3  ;;  %vm1256_vm13 = vcmp.le.f32.partialorder %v5775_v28, %v5904_v3 }
 0x610   : > { %v5911_v39 = vsel %vm1255_vm12, %v10031_v32, 2147483647  ;;  %v5914_v53 = vsel %vm1256_vm13, %v10032_v4, 2147483647 }
 0x611   : > { %v1287_v42 = vsel %vm500_vm3, %v5914_v53, 2147483647 }
 0x612   : > { %vm1288_vm14 = vcmp.lt.s32.totalorder %v5911_v39, %v1287_v42 }
 0x613   : > { %v5920_v12 = vsel %vm1288_vm14, %v5911_v39, %v1287_v42 }
 0x614   : > { %v1291_v62 = vshra.s32 %v5920_v12, 16 }
 0x616   : > { %v5923_v16 = vcvt.s32.f32 %v1291_v62  ;;  %v5925_v45 = vpop.xlane.xlu1 %1233 }
 0x617   : > { %10033 = vst [vmem:[#allocation25_spill] sm:$0xff] %v5925_v45  ;;  %vm1259_vm15 = vcmp.le.f32.partialorder %v5796_v0, %v5925_v45  ;;  %vm1260_vm0 = vcmp.le.f32.partialorder %v5799_v59, %v5925_v45 }
 0x618   : > { %1294 = vmin.xlane.f32.xlu1 %v5923_v16  ;;  %v5932_v1 = vpop.xlane.xlu2 %1237  ;;  %v5935_v22 = vsel %vm1259_vm15, %v10035_v43, 2147483647  ;;  %v5938_v11 = vsel %vm1260_vm0, %v10032_v4, 2147483647 }
 0x619   : > { %10034 = vst [vmem:[#allocation26_spill] sm:$0xff] %v5932_v1  ;;  %vm1261_vm2 = vcmp.le.f32.partialorder %v5807_v21, %v5932_v1  ;;  %vm1262_vm4 = vcmp.le.f32.partialorder %v5811_v44, %v5932_v1  ;;  %v1321_v35 = vsel %vm500_vm3, %v5938_v11, 2147483647 }
 0x61a   : > { %vm1322_vm5 = vcmp.lt.s32.totalorder %v5935_v22, %v1321_v35  ;;  %v5948_v30 = vsel %vm1261_vm2, %v10036_v29, 2147483647  ;;  %v5951_v38 = vsel %vm1262_vm4, %v10032_v4, 2147483647 }
 0x61b   : > { %v5954_v61 = vsel %vm1322_vm5, %v5935_v22, %v1321_v35  ;;  %v1338_v17 = vsel %vm500_vm3, %v5951_v38, 2147483647 }
 0x61c   : > { %v1325_v55 = vshra.s32 %v5954_v61, 16  ;;  %vm1339_vm6 = vcmp.lt.s32.totalorder %v5948_v30, %v1338_v17 }
 0x61d   : > { %v5961_v8 = vsel %vm1339_vm6, %v5948_v30, %v1338_v17  ;;  %v10043_v17 = vld [vmem:[#allocation14_spill] sm:$0xff] }
 0x61e   : > { %v5963_v6 = vcvt.s32.f32 %v1325_v55  ;;  %v1342_v15 = vshra.s32 %v5961_v8, 16  ;;  %v5966_v34 = vpop.xlane.xlu0 %1241  ;;  %v1341_v32 = vand.u32 65535, %v5961_v8 }
 0x61f   : > { %10037 = vst [vmem:[#allocation24_spill] sm:$0xff] %v5966_v34  ;;  %vm1263_vm7 = vcmp.le.f32.partialorder %v5833_v47, %v5966_v34  ;;  %vm1264_vm10 = vcmp.le.f32.partialorder %v5836_v46, %v5966_v34 }
 0x620   : > { %1328 = vmin.xlane.f32.xlu0 %v5963_v6  ;;  %v5969_v58 = vcvt.s32.f32 %v1342_v15  ;;  %v5971_v19 = vpop.xlane.xlu1 %1245  ;;  %v5983_v10 = vsel %vm1263_vm7, %v10039_v63, 2147483647  ;;  %v5992_v5 = vsel %vm1264_vm10, %v10032_v4, 2147483647 }
 0x621   : > { %10038 = vst [vmem:[#allocation27_spill] sm:$0xff] %v5971_v19  ;;  %vm1265_vm11 = vcmp.le.f32.partialorder %v5843_v40, %v5971_v19  ;;  %vm1266_vm12 = vcmp.le.f32.partialorder %v5846_v57, %v5971_v19  ;;  %v1355_v14 = vsel %vm500_vm3, %v5992_v5, 2147483647 }
 0x622   : > { %1345 = vmin.xlane.f32.xlu1 %v5969_v58  ;;  %v5986_v48 = vsel %vm1265_vm11, %v10040_v18, 2147483647  ;;  %v5989_v41 = vsel %vm1266_vm12, %v10032_v4, 2147483647  ;;  %vm1356_vm14 = vcmp.lt.s32.totalorder %v5983_v10, %v1355_v14 }
 0x623   : > { %v1372_v31 = vsel %vm500_vm3, %v5989_v41, 2147483647  ;;  %v1357_v26 = vsel %vm1356_vm14, %v5983_v10, %v1355_v14 }
 0x624   : > { %vm1373_vm13 = vcmp.lt.s32.totalorder %v5986_v48, %v1372_v31  ;;  %v1359_v20 = vshra.s32 %v1357_v26, 16 }
 0x625   : > { %v6001_v36 = vsel %vm1373_vm13, %v5986_v48, %v1372_v31  ;;  %v10044_v31 = vld [vmem:[#allocation13_spill] sm:$0xff] }
 0x626   : > { %v1376_v54 = vshra.s32 %v6001_v36, 16  ;;  %v1361_v35 = vcvt.s32.f32 %v1359_v20 }
 0x627   : > { %v6005_v52 = vpop.xlane.xlu2 %1249 }
 0x628   : > { %10041 = vst [vmem:[#allocation37_spill] sm:$0xff] %v6005_v52  ;;  %v6007_v42 = vpop.xlane.xlu0 %1229  ;;  %vm1267_vm15 = vcmp.le.f32.partialorder %v5870_v33, %v6005_v52  ;;  %vm1268_vm0 = vcmp.le.f32.partialorder %v5879_v13, %v6005_v52  ;;  %v1378_v62 = vcvt.s32.f32 %v1376_v54  ;;  %1362 = vmin.xlane.f32.xlu2 %v1361_v35 }
 0x629   : > { %10042 = vst [vmem:[#allocation28_spill] sm:$0xff] %v6007_v42  ;;  %vm1257_vm2 = vcmp.le.f32.partialorder %v5873_v9, %v6007_v42  ;;  %vm1258_vm4 = vcmp.le.f32.partialorder %v5876_v24, %v6007_v42  ;;  %v6018_v55 = vsel %vm1267_vm15, %v10043_v17, 2147483647  ;;  %v6021_v15 = vsel %vm1268_vm0, %v10032_v4, 2147483647  ;;  %v10046_v17 = vld [vmem:[#allocation20_spill] sm:$0xff] }
 0x62a   : > { %v6024_v14 = vsel %vm1257_vm2, %v10044_v31, 2147483647  ;;  %1379 = vmin.xlane.f32.xlu0 %v1378_v62  ;;  %v1389_v52 = vsel %vm500_vm3, %v6021_v15, 2147483647  ;;  %v6029_v19 = vsel %vm1258_vm4, %v10032_v4, 2147483647 }
 0x62b   : > { %vm1390_vm5 = vcmp.lt.s32.totalorder %v6018_v55, %v1389_v52  ;;  %v1304_v54 = vsel %vm500_vm3, %v6029_v19, 2147483647 }
 0x62c   : > { %v1391_v20 = vsel %vm1390_vm5, %v6018_v55, %v1389_v52  ;;  %vm1305_vm6 = vcmp.lt.s32.totalorder %v6024_v14, %v1304_v54 }
 0x62d   : > { %v1393_v42 = vshra.s32 %v1391_v20, 16  ;;  %v1306_v34 = vsel %vm1305_vm6, %v6024_v14, %v1304_v54  ;;  %vm4225_vm6 = vcmask 23552  }
 0x62e   : > { %v1308_v45 = vshra.s32 %v1306_v34, 16 }
 0x62f   : > { %v1395_v3 = vcvt.s32.f32 %v1393_v42 }
 0x630   : > { %v6037_v1 = vpop.xlane.xlu0 %1253  ;;  %v1310_v31 = vcvt.s32.f32 %v1308_v45  ;;  %v1290_v45 = vand.u32 65535, %v5920_v12 }
 0x631   : > { %10045 = vst [vmem:[#allocation48_spill] sm:$0xff] %v6037_v1  ;;  %vm1269_vm7 = vcmp.le.f32.partialorder %v5896_v25, %v6037_v1  ;;  %vm1270_vm10 = vcmp.le.f32.partialorder %v5899_v2, %v6037_v1  ;;  %1396 = vmin.xlane.f32.xlu1 %v1395_v3 }
 0x632   : > { %v6044_v18 = vsel %vm1269_vm7, %v10046_v17, 2147483647  ;;  %v6047_v52 = vsel %vm1270_vm10, %v10032_v4, 2147483647  ;;  %1311 = vmin.xlane.f32.xlu2 %v1310_v31  ;;  %v1292_v1 = vcvt.s32.f32 %v1290_v45  ;;  %v1324_v4 = vand.u32 65535, %v5954_v61 }
 0x633   : > { %10047 = vst [vmem:[#allocation38_spill] sm:$0xff] %v6047_v52  ;;  %v1406_v54 = vsel %vm500_vm3, %v6047_v52, 2147483647  ;;  %v1343_v52 = vcvt.s32.f32 %v1341_v32  ;;  %v1358_v45 = vand.u32 65535, %v1357_v26 }
 0x634   : > { %vm1407_vm11 = vcmp.lt.s32.totalorder %v6044_v18, %v1406_v54  ;;  %v1326_v25 = vcvt.s32.f32 %v1324_v4  ;;  %v1392_v4 = vand.u32 65535, %v1391_v20 }
 0x635   : > { %v1408_v63 = vsel %vm1407_vm11, %v6044_v18, %v1406_v54  ;;  %v1360_v8 = vcvt.s32.f32 %v1358_v45 }
 0x636   : > { %v1410_v29 = vshra.s32 %v1408_v63, 16  ;;  %v1394_v26 = vcvt.s32.f32 %v1392_v4 }
 0x638   : > { %v1412_v43 = vcvt.s32.f32 %v1410_v29 }
 0x63a   : > { %1413 = vmin.xlane.f32.xlu2 %v1412_v43 }
 0x68b   : > { %v1295_v42 = vpop.xlane.xlu1 %1294 }
 0x68c   : > { %vm1296_vm12 = vcmp.eq.f32.partialorder %v5923_v16, %v1295_v42  ;;  %v1375_v16 = vand.u32 65535, %v6001_v36  ;;  %v1301_v20 = vcvt.f32.s32 %v1295_v42 }
 0x68d   : > { %v1297_v17 = vsel %vm1296_vm12, %v1292_v1, inf }
 0x68e   : > { %1298 = vmin.xlane.f32.xlu0 %v1297_v17  ;;  %v1377_v17 = vcvt.s32.f32 %v1375_v16 }
 0x693   : > { %v1329_v2 = vpop.xlane.xlu0 %1328 }
 0x694   : > { %vm1330_vm13 = vcmp.eq.f32.partialorder %v5963_v6, %v1329_v2  ;;  %v1307_v6 = vand.u32 65535, %v1306_v34  ;;  %v1335_v42 = vcvt.f32.s32 %v1329_v2 }
 0x695   : > { %v1346_v54 = vpop.xlane.xlu1 %1345  ;;  %v1331_v29 = vsel %vm1330_vm13, %v1326_v25, inf }
 0x696   : > { %vm1347_vm14 = vcmp.eq.f32.partialorder %v5969_v58, %v1346_v54  ;;  %1332 = vmin.xlane.f32.xlu2 %v1331_v29  ;;  %v1352_v4 = vcvt.f32.s32 %v1346_v54 }
 0x697   : > { %v1348_v12 = vsel %vm1347_vm14, %v1343_v52, inf  ;;  %v1309_v52 = vcvt.s32.f32 %v1307_v6 }
 0x698   : > { %1349 = vmin.xlane.f32.xlu0 %v1348_v12 }
 0x69b   : > { %v6060_v1 = vpop.xlane.xlu2 %1362 }
 0x69c   : > { %vm1364_vm15 = vcmp.eq.f32.partialorder %v1361_v35, %v6060_v1 }
 0x69d   : > { %v6062_v61 = vpop.xlane.xlu0 %1379  ;;  %v1365_v32 = vsel %vm1364_vm15, %v1360_v8, inf  ;;  %v1302_v8 = vshll.u32 %v1301_v20, 16 }
 0x69e   : > { %vm1381_vm0 = vcmp.eq.f32.partialorder %v1378_v62, %v6062_v61  ;;  %1366 = vmin.xlane.f32.xlu1 %v1365_v32  ;;  %v1409_v62 = vand.u32 65535, %v1408_v63 }
 0x69f   : > { %v1382_v25 = vsel %vm1381_vm0, %v1377_v17, inf }
 0x6a0   : > { %1383 = vmin.xlane.f32.xlu2 %v1382_v25  ;;  %v1411_v45 = vcvt.s32.f32 %v1409_v62 }
 0x6a4   : > { %v6066_v58 = vpop.xlane.xlu1 %1396 }
 0x6a5   : > { %v6068_v36 = vpop.xlane.xlu2 %1311  ;;  %vm1398_vm2 = vcmp.eq.f32.partialorder %v1395_v3, %v6066_v58 }
 0x6a6   : > { %v1399_v29 = vsel %vm1398_vm2, %v1394_v26, inf  ;;  %vm1313_vm4 = vcmp.eq.f32.partialorder %v1310_v31, %v6068_v36 }
 0x6a7   : > { %1400 = vmin.xlane.f32.xlu0 %v1399_v29  ;;  %v1314_v35 = vsel %vm1313_vm4, %v1309_v52, inf  ;;  %v1353_v52 = vshll.u32 %v1352_v4, 16 }
 0x6a8   : > { %1315 = vmin.xlane.f32.xlu1 %v1314_v35 }
 0x6ad   : > { %v6072_v12 = vpop.xlane.xlu2 %1413 }
 0x6ae   : > { %vm1415_vm5 = vcmp.eq.f32.partialorder %v1412_v43, %v6072_v12 }
 0x6af   : > { %v1416_v34 = vsel %vm1415_vm5, %v1411_v45, inf }
 0x6b0   : > { %1417 = vmin.xlane.f32.xlu1 %v1416_v34 }
 0x701   : > { %v1299_v16 = vpop.xlane.xlu0 %1298 }
 0x702   : > { %v1300_v17 = vcvt.f32.s32 %v1299_v16 }
 0x704   : > { %v1303_v3 = vadd.s32 %v1302_v8, %v1300_v17  ;;  %v1403_v17 = vcvt.f32.s32 %v6066_v58 }
 0x706   : > { %v6077_v31 = vsel %vm4225_vm6, %v5767_v51, %v1303_v3  ;;  %vm1423_vm7 = vcmp.eq.s32.totalorder %v5911_v39, %v1303_v3  ;;  %vm1424_vm10 = vcmp.eq.s32.totalorder %v5914_v53, %v1303_v3  ;;  %v1336_v51 = vshll.u32 %v1335_v42, 16 }
 0x707   : > { %v6082_v63 = vsel %vm1423_vm7, 1e+30, %v5772_v37  ;;  %v6085_v43 = vsel %vm1424_vm10, 1e+30, %v5775_v28 }
 0x708   : > { %v1455_v32 = vsel %vm500_vm3, %v6085_v43, inf }
 0x709   : > { %v1456_v25 = vmin.f32 %v6082_v63, %v1455_v32  ;;  %v1333_v6 = vpop.xlane.xlu2 %1332 }
 0x70a   : > { %v1334_v26 = vcvt.f32.s32 %v1333_v6 }
 0x70b   : > { %1457 = vmin.xlane.f32.xlu2 %v1456_v25  ;;  %v1350_v39 = vpop.xlane.xlu0 %1349 }
 0x70c   : > { %v1337_v53 = vadd.s32 %v1336_v51, %v1334_v26  ;;  %v1351_v29 = vcvt.f32.s32 %v1350_v39 }
 0x70e   : > { %v6092_v37 = vsel %vm4225_vm6, %v5788_v23, %v1337_v53  ;;  %v1354_v28 = vadd.s32 %v1353_v52, %v1351_v29  ;;  %vm1427_vm11 = vcmp.eq.s32.totalorder %v5935_v22, %v1337_v53  ;;  %vm1428_vm12 = vcmp.eq.s32.totalorder %v5938_v11, %v1337_v53  ;;  %v10048_v53 = vld [vmem:[#allocation38_spill] sm:$0xff]  ;;  %v10049_v29 = vld [vmem:[#allocation21_spill] sm:$0xff] }
 0x70f   : > { %v6097_v2 = vsel %vm1427_vm11, 1e+30, %v5796_v0  ;;  %v6100_v54 = vsel %vm1428_vm12, 1e+30, %v5799_v59  ;;  %v1369_v59 = vcvt.f32.s32 %v6060_v1  ;;  %v1318_v1 = vcvt.f32.s32 %v6068_v36 }
 0x710   : > { %v6104_v35 = vsel %vm4225_vm6, %v5793_v56, %v1354_v28  ;;  %v1463_v62 = vsel %vm500_vm3, %v6100_v54, inf  ;;  %vm1429_vm13 = vcmp.eq.s32.totalorder %v5948_v30, %v1354_v28  ;;  %vm1430_vm14 = vcmp.eq.s32.totalorder %v5951_v38, %v1354_v28 }
 0x711   : > { %v1464_v23 = vmin.f32 %v6097_v2, %v1463_v62  ;;  %v6112_v22 = vsel %vm1429_vm13, 1e+30, %v5807_v21  ;;  %v6115_v0 = vsel %vm1430_vm14, 1e+30, %v5811_v44  ;;  %v1386_v56 = vcvt.f32.s32 %v6062_v61  ;;  %v1367_v45 = vpop.xlane.xlu1 %1366  ;;  %v10051_v62 = vld [vmem:[#allocation22_spill] sm:$0xff] }
 0x712   : > { %v1467_v11 = vsel %vm500_vm3, %v6115_v0, inf  ;;  %v1370_v34 = vshll.u32 %v1369_v59, 16  ;;  %v1368_v21 = vcvt.f32.s32 %v1367_v45  ;;  %v1319_v25 = vshll.u32 %v1318_v1, 16 }
 0x713   : > { %1465 = vmin.xlane.f32.xlu1 %v1464_v23  ;;  %v1468_v30 = vmin.f32 %v6112_v22, %v1467_v11  ;;  %v1384_v38 = vpop.xlane.xlu2 %1383  ;;  %v1387_v20 = vshll.u32 %v1386_v56, 16 }
 0x714   : > { %v1385_v16 = vcvt.f32.s32 %v1384_v38  ;;  %v1371_v8 = vadd.s32 %v1370_v34, %v1368_v21 }
 0x715   : > { %1469 = vmin.xlane.f32.xlu2 %v1468_v30  ;;  %v10055_v30 = vld [vmem:[#allocation11_spill] sm:$0xff] }
 0x716   : > { %v1388_v44 = vadd.s32 %v1387_v20, %v1385_v16  ;;  %v6126_v61 = vsel %vm4225_vm6, %v5825_v7, %v1371_v8  ;;  %vm1431_vm15 = vcmp.eq.s32.totalorder %v5983_v10, %v1371_v8  ;;  %vm1432_vm0 = vcmp.eq.s32.totalorder %v5992_v5, %v1371_v8 }
 0x717   : > { %v6135_v42 = vsel %vm1431_vm15, 1e+30, %v5833_v47  ;;  %v6138_v32 = vsel %vm1432_vm0, 1e+30, %v5836_v46  ;;  %v1404_v5 = vshll.u32 %v1403_v17, 16 }
 0x718   : > { %v6130_v3 = vsel %vm4225_vm6, %v5828_v49, %v1388_v44  ;;  %vm1433_vm2 = vcmp.eq.s32.totalorder %v5986_v48, %v1388_v44  ;;  %vm1434_vm4 = vcmp.eq.s32.totalorder %v5989_v41, %v1388_v44  ;;  %v1471_v58 = vsel %vm500_vm3, %v6138_v32, inf  ;;  %v10058_v44 = vld [vmem:[#allocation16_spill] sm:$0xff] }
 0x719   : > { %v6145_v49 = vsel %vm1433_vm2, 1e+30, %v5843_v40  ;;  %v6148_v10 = vsel %vm1434_vm4, 1e+30, %v5846_v57  ;;  %v1472_v46 = vmin.f32 %v6135_v42, %v1471_v58  ;;  %v1420_v40 = vcvt.f32.s32 %v6072_v12  ;;  %v10059_v58 = vld [vmem:[#allocation15_spill] sm:$0xff] }
 0x71a   : > { %v1401_v7 = vpop.xlane.xlu0 %1400  ;;  %v1475_v48 = vsel %vm500_vm3, %v6148_v10, inf }
 0x71b   : > { %v1316_v47 = vpop.xlane.xlu1 %1315  ;;  %v1402_v36 = vcvt.f32.s32 %v1401_v7  ;;  %v1476_v4 = vmin.f32 %v6145_v49, %v1475_v48  ;;  %1473 = vmin.xlane.f32.xlu0 %v1472_v46  ;;  %v1421_v52 = vshll.u32 %v1420_v40, 16 }
 0x71c   : > { %v1317_v41 = vcvt.f32.s32 %v1316_v47 }
 0x71d   : > { %v1405_v6 = vadd.s32 %v1404_v5, %v1402_v36  ;;  %1477 = vmin.xlane.f32.xlu1 %v1476_v4 }
 0x71e   : > { %v1320_v51 = vadd.s32 %v1319_v25, %v1317_v41 }
 0x71f   : > { %v6157_v57 = vsel %vm4225_vm6, %v5860_v27, %v1405_v6  ;;  %vm1435_vm5 = vcmp.eq.s32.totalorder %v6018_v55, %v1405_v6  ;;  %vm1436_vm7 = vcmp.eq.s32.totalorder %v6021_v15, %v1405_v6 }
 0x720   : > { %v6163_v26 = vsel %vm4225_vm6, %v5865_v60, %v1320_v51  ;;  %vm1425_vm10 = vcmp.eq.s32.totalorder %v6024_v14, %v1320_v51  ;;  %vm1426_vm11 = vcmp.eq.s32.totalorder %v6029_v19, %v1320_v51  ;;  %v6168_v39 = vsel %vm1435_vm5, 1e+30, %v5870_v33 }
 0x721   : > { %v6171_v12 = vsel %vm1425_vm10, 1e+30, %v5873_v9  ;;  %v6174_v27 = vsel %vm1426_vm11, 1e+30, %v5876_v24  ;;  %v6177_v55 = vsel %vm1436_vm7, 1e+30, %v5879_v13 }
 0x722   : > { %v1459_v60 = vsel %vm500_vm3, %v6174_v27, inf  ;;  %v1479_v15 = vsel %vm500_vm3, %v6177_v55, inf }
 0x723   : > { %v1418_v14 = vpop.xlane.xlu1 %1417  ;;  %v1460_v19 = vmin.f32 %v6171_v12, %v1459_v60  ;;  %v1480_v33 = vmin.f32 %v6168_v39, %v1479_v15  ;;  %v10062_v60 = vld [vmem:[#allocation18_spill] sm:$0xff] }
 0x724   : > { %v1419_v9 = vcvt.f32.s32 %v1418_v14  ;;  %v10063_v14 = vld [vmem:[#allocation17_spill] sm:$0xff] }
 0x725   : > { %1461 = vmin.xlane.f32.xlu0 %v1460_v19  ;;  %1481 = vmin.xlane.f32.xlu2 %v1480_v33 }
 0x726   : > { %v1422_v24 = vadd.s32 %v1421_v52, %v1419_v9 }
 0x728   : > { %v6187_v13 = vsel %vm4225_vm6, %v5891_v50, %v1422_v24  ;;  %vm1437_vm12 = vcmp.eq.s32.totalorder %v6044_v18, %v1422_v24  ;;  %vm1438_vm13 = vcmp.eq.s32.totalorder %v10048_v53, %v1422_v24  ;;  %v10054_v50 = vld [vmem:[#allocation12_spill] sm:$0xff] }
 0x729   : > { %v6192_v28 = vsel %vm1437_vm12, 1e+30, %v10049_v29  ;;  %v6195_v23 = vsel %vm1438_vm13, 1e+30, %v10051_v62 }
 0x72a   : > { %10050 = vst [vmem:[#allocation39_spill] sm:$0xff] %v6192_v28  ;;  %v1483_v59 = vsel %vm500_vm3, %v6195_v23, inf }
 0x72b   : > { %10052 = vst [vmem:[#allocation38_spill] sm:$0xff] %v6195_v23  ;;  %v1484_v56 = vmin.f32 %v6192_v28, %v1483_v59 }
 0x72d   : > { %1485 = vmin.xlane.f32.xlu0 %v1484_v56 }
 0x77e   : > { %v6200_v11 = vpop.xlane.xlu2 %1457 }
 0x77f   : > { %10053 = vst [vmem:[#allocation21_spill] sm:$0xff] %v6200_v11  ;;  %vm1487_vm14 = vcmp.le.f32.partialorder %v6082_v63, %v6200_v11  ;;  %vm1488_vm15 = vcmp.le.f32.partialorder %v6085_v43, %v6200_v11 }
 0x780   : > { %v6207_v18 = vsel %vm1487_vm14, %v10054_v50, 2147483647  ;;  %v6210_v45 = vsel %vm1488_vm15, %v10055_v30, 2147483647 }
 0x781   : > { %v1519_v38 = vsel %vm500_vm3, %v6210_v45, 2147483647 }
 0x782   : > { %vm1520_vm0 = vcmp.lt.s32.totalorder %v6207_v18, %v1519_v38 }
 0x783   : > { %v6216_v34 = vsel %vm1520_vm0, %v6207_v18, %v1519_v38 }
 0x784   : > { %v1523_v20 = vshra.s32 %v6216_v34, 16 }
 0x786   : > { %v6219_v21 = vcvt.s32.f32 %v1523_v20  ;;  %v6221_v16 = vpop.xlane.xlu1 %1465 }
 0x787   : > { %10056 = vst [vmem:[#allocation22_spill] sm:$0xff] %v6221_v16  ;;  %vm1491_vm2 = vcmp.le.f32.partialorder %v6097_v2, %v6221_v16  ;;  %vm1492_vm4 = vcmp.le.f32.partialorder %v6100_v54, %v6221_v16 }
 0x788   : > { %1526 = vmin.xlane.f32.xlu1 %v6219_v21  ;;  %v6228_v8 = vpop.xlane.xlu2 %1469  ;;  %v6231_v17 = vsel %vm1491_vm2, %v10058_v44, 2147483647  ;;  %v6234_v1 = vsel %vm1492_vm4, %v10055_v30, 2147483647 }
 0x789   : > { %10057 = vst [vmem:[#allocation49_spill] sm:$0xff] %v6228_v8  ;;  %vm1493_vm5 = vcmp.le.f32.partialorder %v6112_v22, %v6228_v8  ;;  %vm1494_vm7 = vcmp.le.f32.partialorder %v6115_v0, %v6228_v8  ;;  %v1553_v7 = vsel %vm500_vm3, %v6234_v1, 2147483647 }
 0x78a   : > { %vm1554_vm10 = vcmp.lt.s32.totalorder %v6231_v17, %v1553_v7  ;;  %v6244_v5 = vsel %vm1493_vm5, %v10059_v58, 2147483647  ;;  %v6247_v47 = vsel %vm1494_vm7, %v10055_v30, 2147483647 }
 0x78b   : > { %v6250_v36 = vsel %vm1554_vm10, %v6231_v17, %v1553_v7  ;;  %v1570_v46 = vsel %vm500_vm3, %v6247_v47, 2147483647 }
 0x78c   : > { %v1557_v48 = vshra.s32 %v6250_v36, 16  ;;  %vm1571_vm11 = vcmp.lt.s32.totalorder %v6244_v5, %v1570_v46 }
 0x78d   : > { %v6257_v25 = vsel %vm1571_vm11, %v6244_v5, %v1570_v46  ;;  %v10066_v46 = vld [vmem:[#allocation14_spill] sm:$0xff] }
 0x78e   : > { %v6259_v41 = vcvt.s32.f32 %v1557_v48  ;;  %v1574_v4 = vshra.s32 %v6257_v25, 16  ;;  %v6265_v51 = vpop.xlane.xlu0 %1473  ;;  %v1573_v50 = vand.u32 65535, %v6257_v25 }
 0x78f   : > { %10060 = vst [vmem:[#allocation50_spill] sm:$0xff] %v6265_v51  ;;  %vm1495_vm12 = vcmp.le.f32.partialorder %v6135_v42, %v6265_v51  ;;  %vm1496_vm13 = vcmp.le.f32.partialorder %v6138_v32, %v6265_v51 }
 0x790   : > { %1560 = vmin.xlane.f32.xlu0 %v6259_v41  ;;  %v6263_v6 = vcvt.s32.f32 %v1574_v4  ;;  %v6268_v40 = vpop.xlane.xlu1 %1477  ;;  %v6279_v15 = vsel %vm1495_vm12, %v10062_v60, 2147483647  ;;  %v6288_v52 = vsel %vm1496_vm13, %v10055_v30, 2147483647 }
 0x791   : > { %10061 = vst [vmem:[#allocation51_spill] sm:$0xff] %v6268_v40  ;;  %vm1497_vm14 = vcmp.le.f32.partialorder %v6145_v49, %v6268_v40  ;;  %vm1498_vm15 = vcmp.le.f32.partialorder %v6148_v10, %v6268_v40  ;;  %v1587_v24 = vsel %vm500_vm3, %v6288_v52, 2147483647 }
 0x792   : > { %1577 = vmin.xlane.f32.xlu1 %v6263_v6  ;;  %v6282_v19 = vsel %vm1497_vm14, %v10063_v14, 2147483647  ;;  %v6285_v33 = vsel %vm1498_vm15, %v10055_v30, 2147483647  ;;  %vm1588_vm2 = vcmp.lt.s32.totalorder %v6279_v15, %v1587_v24 }
 0x793   : > { %v1604_v9 = vsel %vm500_vm3, %v6285_v33, 2147483647  ;;  %v1589_v29 = vsel %vm1588_vm2, %v6279_v15, %v1587_v24 }
 0x794   : > { %vm1605_vm0 = vcmp.lt.s32.totalorder %v6282_v19, %v1604_v9  ;;  %v1591_v59 = vshra.s32 %v1589_v29, 16 }
 0x795   : > { %v6297_v53 = vsel %vm1605_vm0, %v6282_v19, %v1604_v9  ;;  %v10067_v9 = vld [vmem:[#allocation13_spill] sm:$0xff] }
 0x796   : > { %v1608_v62 = vshra.s32 %v6297_v53, 16  ;;  %v1593_v7 = vcvt.s32.f32 %v1591_v59 }
 0x798   : > { %v6301_v56 = vpop.xlane.xlu2 %1481  ;;  %v6303_v38 = vpop.xlane.xlu0 %1461  ;;  %v1610_v20 = vcvt.s32.f32 %v1608_v62  ;;  %1594 = vmin.xlane.f32.xlu2 %v1593_v7 }
 0x799   : > { %10064 = vst [vmem:[#allocation52_spill] sm:$0xff] %v6301_v56  ;;  %vm1499_vm4 = vcmp.le.f32.partialorder %v6168_v39, %v6301_v56  ;;  %vm1500_vm5 = vcmp.le.f32.partialorder %v6177_v55, %v6301_v56  ;;  %vm1489_vm7 = vcmp.le.f32.partialorder %v6171_v12, %v6303_v38  ;;  %vm1490_vm10 = vcmp.le.f32.partialorder %v6174_v27, %v6303_v38 }
 0x79a   : > { %10065 = vst [vmem:[#allocation53_spill] sm:$0xff] %v6303_v38  ;;  %v6314_v48 = vsel %vm1499_vm4, %v10066_v46, 2147483647  ;;  %v6317_v4 = vsel %vm1500_vm5, %v10055_v30, 2147483647  ;;  %1611 = vmin.xlane.f32.xlu0 %v1610_v20  ;;  %v10069_v46 = vld [vmem:[#allocation20_spill] sm:$0xff] }
 0x79b   : > { %v6320_v24 = vsel %vm1489_vm7, %v10067_v9, 2147483647  ;;  %v1621_v56 = vsel %vm500_vm3, %v6317_v4, 2147483647  ;;  %v6325_v40 = vsel %vm1490_vm10, %v10055_v30, 2147483647 }
 0x79c   : > { %vm1622_vm11 = vcmp.lt.s32.totalorder %v6314_v48, %v1621_v56  ;;  %v1536_v62 = vsel %vm500_vm3, %v6325_v40, 2147483647 }
 0x79d   : > { %v1623_v59 = vsel %vm1622_vm11, %v6314_v48, %v1621_v56  ;;  %vm1537_vm12 = vcmp.lt.s32.totalorder %v6320_v24, %v1536_v62 }
 0x79e   : > { %v1625_v38 = vshra.s32 %v1623_v59, 16  ;;  %v1538_v51 = vsel %vm1537_vm12, %v6320_v24, %v1536_v62 }
 0x79f   : > { %v1540_v16 = vshra.s32 %v1538_v51, 16 }
 0x7a0   : > { %v6333_v8 = vpop.xlane.xlu0 %1485  ;;  %v1627_v11 = vcvt.s32.f32 %v1625_v38 }
 0x7a1   : > { %10068 = vst [vmem:[#allocation54_spill] sm:$0xff] %v6333_v8  ;;  %vm1501_vm13 = vcmp.le.f32.partialorder %v6192_v28, %v6333_v8  ;;  %vm1502_vm14 = vcmp.le.f32.partialorder %v6195_v23, %v6333_v8  ;;  %v1542_v9 = vcvt.s32.f32 %v1540_v16  ;;  %v1522_v16 = vand.u32 65535, %v6216_v34 }
 0x7a2   : > { %v6340_v14 = vsel %vm1501_vm13, %v10069_v46, 2147483647  ;;  %v6343_v56 = vsel %vm1502_vm14, %v10055_v30, 2147483647  ;;  %1628 = vmin.xlane.f32.xlu1 %v1627_v11  ;;  %v1556_v30 = vand.u32 65535, %v6250_v36  ;;  %vm4234_vm13 = vcmask 31744  }
 0x7a3   : > { %10070 = vst [vmem:[#allocation55_spill] sm:$0xff] %v6343_v56  ;;  %v1638_v62 = vsel %vm500_vm3, %v6343_v56, 2147483647  ;;  %1543 = vmin.xlane.f32.xlu2 %v1542_v9  ;;  %v1524_v8 = vcvt.s32.f32 %v1522_v16  ;;  %v1575_v56 = vcvt.s32.f32 %v1573_v50  ;;  %v1590_v16 = vand.u32 65535, %v1589_v29 }
 0x7a4   : > { %vm1639_vm15 = vcmp.lt.s32.totalorder %v6340_v14, %v1638_v62  ;;  %v1558_v28 = vcvt.s32.f32 %v1556_v30  ;;  %v1624_v30 = vand.u32 65535, %v1623_v59 }
 0x7a5   : > { %v1640_v60 = vsel %vm1639_vm15, %v6340_v14, %v1638_v62  ;;  %v1592_v25 = vcvt.s32.f32 %v1590_v16 }
 0x7a6   : > { %v1642_v58 = vshra.s32 %v1640_v60, 16  ;;  %v1626_v29 = vcvt.s32.f32 %v1624_v30 }
 0x7a8   : > { %v1644_v44 = vcvt.s32.f32 %v1642_v58 }
 0x7ab   : > { %1645 = vmin.xlane.f32.xlu2 %v1644_v44 }
 0x7fb   : > { %v1527_v38 = vpop.xlane.xlu1 %1526 }
 0x7fc   : > { %vm1528_vm0 = vcmp.eq.f32.partialorder %v6219_v21, %v1527_v38  ;;  %v1607_v21 = vand.u32 65535, %v6297_v53  ;;  %v1533_v59 = vcvt.f32.s32 %v1527_v38 }
 0x7fd   : > { %v1529_v46 = vsel %vm1528_vm0, %v1524_v8, inf }
 0x7fe   : > { %1530 = vmin.xlane.f32.xlu0 %v1529_v46  ;;  %v1609_v46 = vcvt.s32.f32 %v1607_v21 }
 0x803   : > { %v1561_v23 = vpop.xlane.xlu0 %1560 }
 0x804   : > { %vm1562_vm2 = vcmp.eq.f32.partialorder %v6259_v41, %v1561_v23  ;;  %v1539_v41 = vand.u32 65535, %v1538_v51  ;;  %v1567_v38 = vcvt.f32.s32 %v1561_v23 }
 0x805   : > { %v1578_v62 = vpop.xlane.xlu1 %1577  ;;  %v1563_v58 = vsel %vm1562_vm2, %v1558_v28, inf }
 0x806   : > { %vm1579_vm4 = vcmp.eq.f32.partialorder %v6263_v6, %v1578_v62  ;;  %1564 = vmin.xlane.f32.xlu2 %v1563_v58  ;;  %v1584_v30 = vcvt.f32.s32 %v1578_v62 }
 0x807   : > { %v1580_v34 = vsel %vm1579_vm4, %v1575_v56, inf  ;;  %v1541_v56 = vcvt.s32.f32 %v1539_v41 }
 0x808   : > { %1581 = vmin.xlane.f32.xlu0 %v1580_v34 }
 0x80b   : > { %v6356_v8 = vpop.xlane.xlu2 %1594 }
 0x80c   : > { %vm1596_vm5 = vcmp.eq.f32.partialorder %v1593_v7, %v6356_v8 }
 0x80d   : > { %v6358_v36 = vpop.xlane.xlu0 %1611  ;;  %v1597_v50 = vsel %vm1596_vm5, %v1592_v25, inf  ;;  %v1534_v25 = vshll.u32 %v1533_v59, 16 }
 0x80e   : > { %vm1613_vm7 = vcmp.eq.f32.partialorder %v1610_v20, %v6358_v36  ;;  %1598 = vmin.xlane.f32.xlu1 %v1597_v50  ;;  %v1641_v20 = vand.u32 65535, %v1640_v60 }
 0x80f   : > { %v1614_v28 = vsel %vm1613_vm7, %v1609_v46, inf }
 0x810   : > { %1615 = vmin.xlane.f32.xlu2 %v1614_v28  ;;  %v1643_v16 = vcvt.s32.f32 %v1641_v20 }
 0x815   : > { %v6362_v6 = vpop.xlane.xlu1 %1628 }
 0x816   : > { %v6364_v53 = vpop.xlane.xlu2 %1543  ;;  %vm1630_vm10 = vcmp.eq.f32.partialorder %v1627_v11, %v6362_v6 }
 0x817   : > { %v1631_v58 = vsel %vm1630_vm10, %v1626_v29, inf  ;;  %vm1545_vm11 = vcmp.eq.f32.partialorder %v1542_v9, %v6364_v53 }
 0x818   : > { %1632 = vmin.xlane.f32.xlu0 %v1631_v58  ;;  %v1546_v7 = vsel %vm1545_vm11, %v1541_v56, inf  ;;  %v1585_v56 = vshll.u32 %v1584_v30, 16 }
 0x819   : > { %1547 = vmin.xlane.f32.xlu1 %v1546_v7 }
 0x81e   : > { %v6368_v34 = vpop.xlane.xlu2 %1645 }
 0x81f   : > { %vm1647_vm12 = vcmp.eq.f32.partialorder %v1644_v44, %v6368_v34 }
 0x820   : > { %v1648_v51 = vsel %vm1647_vm12, %v1643_v16, inf }
 0x821   : > { %1649 = vmin.xlane.f32.xlu1 %v1648_v51 }
 0x871   : > { %v1531_v21 = vpop.xlane.xlu0 %1530 }
 0x872   : > { %v1532_v46 = vcvt.f32.s32 %v1531_v21 }
 0x874   : > { %v1535_v11 = vadd.s32 %v1534_v25, %v1532_v46  ;;  %v1635_v46 = vcvt.f32.s32 %v6362_v6 }
 0x876   : > { %v6373_v9 = vsel %vm4234_vm13, %v6077_v31, %v1535_v11  ;;  %vm1655_vm14 = vcmp.eq.s32.totalorder %v6207_v18, %v1535_v11  ;;  %vm1656_vm15 = vcmp.eq.s32.totalorder %v6210_v45, %v1535_v11  ;;  %v1568_v31 = vshll.u32 %v1567_v38, 16 }
 0x877   : > { %v6378_v60 = vsel %vm1655_vm14, 1e+30, %v6082_v63  ;;  %v6381_v44 = vsel %vm1656_vm15, 1e+30, %v6085_v43  ;;  %v1550_v11 = vcvt.f32.s32 %v6364_v53 }
 0x878   : > { %v1687_v50 = vsel %vm500_vm3, %v6381_v44, inf }
 0x879   : > { %v1688_v28 = vmin.f32 %v6378_v60, %v1687_v50  ;;  %v1565_v41 = vpop.xlane.xlu2 %1564 }
 0x87a   : > { %v1566_v29 = vcvt.f32.s32 %v1565_v41 }
 0x87b   : > { %1689 = vmin.xlane.f32.xlu2 %v1688_v28  ;;  %v1582_v18 = vpop.xlane.xlu0 %1581  ;;  %v1551_v28 = vshll.u32 %v1550_v11, 16 }
 0x87c   : > { %v1569_v45 = vadd.s32 %v1568_v31, %v1566_v29  ;;  %v1583_v58 = vcvt.f32.s32 %v1582_v18 }
 0x87e   : > { %v6388_v63 = vsel %vm4234_vm13, %v6092_v37, %v1569_v45  ;;  %v1586_v43 = vadd.s32 %v1585_v56, %v1583_v58  ;;  %vm1659_vm0 = vcmp.eq.s32.totalorder %v6231_v17, %v1569_v45  ;;  %vm1660_vm2 = vcmp.eq.s32.totalorder %v6234_v1, %v1569_v45  ;;  %v10071_v45 = vld [vmem:[#allocation55_spill] sm:$0xff] }
 0x87f   : > { %v6393_v23 = vsel %vm1659_vm0, 1e+30, %v6097_v2  ;;  %v6396_v62 = vsel %vm1660_vm2, 1e+30, %v6100_v54  ;;  %v1601_v1 = vcvt.f32.s32 %v6356_v8  ;;  %v10072_v58 = vld [vmem:[#allocation39_spill] sm:$0xff] }
 0x880   : > { %v6400_v7 = vsel %vm4234_vm13, %v6104_v35, %v1586_v43  ;;  %v1695_v20 = vsel %vm500_vm3, %v6396_v62, inf  ;;  %vm1661_vm4 = vcmp.eq.s32.totalorder %v6244_v5, %v1586_v43  ;;  %vm1662_vm5 = vcmp.eq.s32.totalorder %v6247_v47, %v1586_v43 }
 0x881   : > { %v1696_v37 = vmin.f32 %v6393_v23, %v1695_v20  ;;  %v6408_v17 = vsel %vm1661_vm4, 1e+30, %v6112_v22  ;;  %v6411_v2 = vsel %vm1662_vm5, 1e+30, %v6115_v0  ;;  %v1618_v5 = vcvt.f32.s32 %v6358_v36  ;;  %v1599_v47 = vpop.xlane.xlu1 %1598  ;;  %v10074_v20 = vld [vmem:[#allocation38_spill] sm:$0xff] }
 0x882   : > { %v1699_v54 = vsel %vm500_vm3, %v6411_v2, inf  ;;  %v1602_v51 = vshll.u32 %v1601_v1, 16  ;;  %v1600_v22 = vcvt.f32.s32 %v1599_v47 }
 0x883   : > { %1697 = vmin.xlane.f32.xlu1 %v1696_v37  ;;  %v1700_v35 = vmin.f32 %v6408_v17, %v1699_v54  ;;  %v1616_v16 = vpop.xlane.xlu2 %1615  ;;  %v1619_v59 = vshll.u32 %v1618_v5, 16  ;;  %v10078_v5 = vld [vmem:[#allocation11_spill] sm:$0xff] }
 0x884   : > { %v1617_v21 = vcvt.f32.s32 %v1616_v16  ;;  %v1603_v25 = vadd.s32 %v1602_v51, %v1600_v22 }
 0x885   : > { %1701 = vmin.xlane.f32.xlu2 %v1700_v35 }
 0x886   : > { %v1620_v0 = vadd.s32 %v1619_v59, %v1617_v21  ;;  %v6422_v38 = vsel %vm4234_vm13, %v6126_v61, %v1603_v25  ;;  %vm1663_vm7 = vcmp.eq.s32.totalorder %v6279_v15, %v1603_v25  ;;  %vm1664_vm10 = vcmp.eq.s32.totalorder %v6288_v52, %v1603_v25  ;;  %v10080_v25 = vld [vmem:[#allocation16_spill] sm:$0xff] }
 0x887   : > { %v6431_v36 = vsel %vm1663_vm7, 1e+30, %v6135_v42  ;;  %v6434_v50 = vsel %vm1664_vm10, 1e+30, %v6138_v32  ;;  %v1636_v52 = vshll.u32 %v1635_v46, 16 }
 0x888   : > { %v6426_v8 = vsel %vm4234_vm13, %v6130_v3, %v1620_v0  ;;  %vm1665_vm11 = vcmp.eq.s32.totalorder %v6282_v19, %v1620_v0  ;;  %vm1666_vm12 = vcmp.eq.s32.totalorder %v6285_v33, %v1620_v0  ;;  %v1703_v6 = vsel %vm500_vm3, %v6434_v50, inf }
 0x889   : > { %v6441_v3 = vsel %vm1665_vm11, 1e+30, %v6145_v49  ;;  %v6444_v15 = vsel %vm1666_vm12, 1e+30, %v6148_v10  ;;  %v1704_v32 = vmin.f32 %v6431_v36, %v1703_v6  ;;  %v1652_v49 = vcvt.f32.s32 %v6368_v34  ;;  %v10082_v6 = vld [vmem:[#allocation15_spill] sm:$0xff] }
 0x88a   : > { %v1707_v19 = vsel %vm500_vm3, %v6444_v15, inf }
 0x88b   : > { %v1633_v61 = vpop.xlane.xlu0 %1632  ;;  %v1708_v30 = vmin.f32 %v6441_v3, %v1707_v19  ;;  %1705 = vmin.xlane.f32.xlu0 %v1704_v32  ;;  %v1653_v56 = vshll.u32 %v1652_v49, 16 }
 0x88c   : > { %v1548_v42 = vpop.xlane.xlu1 %1547  ;;  %v1634_v53 = vcvt.f32.s32 %v1633_v61 }
 0x88d   : > { %v1549_v33 = vcvt.f32.s32 %v1548_v42  ;;  %1709 = vmin.xlane.f32.xlu1 %v1708_v30 }
 0x88e   : > { %v1637_v41 = vadd.s32 %v1636_v52, %v1634_v53 }
 0x88f   : > { %v1552_v31 = vadd.s32 %v1551_v28, %v1549_v33 }
 0x890   : > { %v6453_v10 = vsel %vm4234_vm13, %v6157_v57, %v1637_v41  ;;  %vm1667_vm14 = vcmp.eq.s32.totalorder %v6314_v48, %v1637_v41  ;;  %vm1668_vm15 = vcmp.eq.s32.totalorder %v6317_v4, %v1637_v41 }
 0x891   : > { %v6459_v29 = vsel %vm4234_vm13, %v6163_v26, %v1552_v31  ;;  %vm1657_vm0 = vcmp.eq.s32.totalorder %v6320_v24, %v1552_v31  ;;  %vm1658_vm2 = vcmp.eq.s32.totalorder %v6325_v40, %v1552_v31  ;;  %v6464_v18 = vsel %vm1667_vm14, 1e+30, %v6168_v39 }
 0x892   : > { %v6467_v34 = vsel %vm1657_vm0, 1e+30, %v6171_v12  ;;  %v6470_v57 = vsel %vm1658_vm2, 1e+30, %v6174_v27  ;;  %v6473_v48 = vsel %vm1668_vm15, 1e+30, %v6177_v55 }
 0x893   : > { %v1691_v26 = vsel %vm500_vm3, %v6470_v57, inf  ;;  %v1711_v4 = vsel %vm500_vm3, %v6473_v48, inf }
 0x894   : > { %v1650_v24 = vpop.xlane.xlu1 %1649  ;;  %v1692_v40 = vmin.f32 %v6467_v34, %v1691_v26  ;;  %v1712_v39 = vmin.f32 %v6464_v18, %v1711_v4  ;;  %v10085_v26 = vld [vmem:[#allocation18_spill] sm:$0xff] }
 0x895   : > { %v1651_v12 = vcvt.f32.s32 %v1650_v24  ;;  %v10086_v24 = vld [vmem:[#allocation17_spill] sm:$0xff] }
 0x896   : > { %1693 = vmin.xlane.f32.xlu0 %v1692_v40  ;;  %1713 = vmin.xlane.f32.xlu2 %v1712_v39 }
 0x897   : > { %v1654_v27 = vadd.s32 %v1653_v56, %v1651_v12 }
 0x899   : > { %v6483_v55 = vsel %vm4234_vm13, %v6187_v13, %v1654_v27  ;;  %vm1669_vm4 = vcmp.eq.s32.totalorder %v6340_v14, %v1654_v27  ;;  %vm1670_vm5 = vcmp.eq.s32.totalorder %v10071_v45, %v1654_v27  ;;  %v10077_v13 = vld [vmem:[#allocation12_spill] sm:$0xff] }
 0x89a   : > { %v6488_v43 = vsel %vm1669_vm4, 1e+30, %v10072_v58  ;;  %v6491_v37 = vsel %vm1670_vm5, 1e+30, %v10074_v20 }
 0x89b   : > { %10073 = vst [vmem:[#allocation55_spill] sm:$0xff] %v6488_v43  ;;  %v1715_v54 = vsel %vm500_vm3, %v6491_v37, inf }
 0x89c   : > { %10075 = vst [vmem:[#allocation39_spill] sm:$0xff] %v6491_v37  ;;  %v1716_v35 = vmin.f32 %v6488_v43, %v1715_v54 }
 0x89e   : > { %1717 = vmin.xlane.f32.xlu0 %v1716_v35 }
 0x8ee   : > { %v6496_v1 = vpop.xlane.xlu2 %1689 }
 0x8ef   : > { %10076 = vst [vmem:[#allocation38_spill] sm:$0xff] %v6496_v1  ;;  %vm1719_vm7 = vcmp.le.f32.partialorder %v6378_v60, %v6496_v1  ;;  %vm1720_vm10 = vcmp.le.f32.partialorder %v6381_v44, %v6496_v1 }
 0x8f0   : > { %v6503_v14 = vsel %vm1719_vm7, %v10077_v13, 2147483647  ;;  %v6506_v47 = vsel %vm1720_vm10, %v10078_v5, 2147483647 }
 0x8f1   : > { %v1751_v16 = vsel %vm500_vm3, %v6506_v47, 2147483647 }
 0x8f2   : > { %vm1752_vm11 = vcmp.lt.s32.totalorder %v6503_v14, %v1751_v16 }
 0x8f3   : > { %v6512_v51 = vsel %vm1752_vm11, %v6503_v14, %v1751_v16 }
 0x8f4   : > { %v1755_v59 = vshra.s32 %v6512_v51, 16 }
 0x8f6   : > { %v6515_v22 = vcvt.s32.f32 %v1755_v59  ;;  %v6517_v21 = vpop.xlane.xlu1 %1697  ;;  %v10089_v59 = vld [vmem:[#allocation14_spill] sm:$0xff] }
 0x8f7   : > { %10079 = vst [vmem:[#allocation56_spill] sm:$0xff] %v6517_v21  ;;  %vm1723_vm12 = vcmp.le.f32.partialorder %v6393_v23, %v6517_v21  ;;  %vm1724_vm14 = vcmp.le.f32.partialorder %v6396_v62, %v6517_v21 }
 0x8f8   : > { %1758 = vmin.xlane.f32.xlu1 %v6515_v22  ;;  %v6525_v0 = vsel %vm1723_vm12, %v10080_v25, 2147483647  ;;  %v6528_v46 = vsel %vm1724_vm14, %v10078_v5, 2147483647  ;;  %v6530_v11 = vpop.xlane.xlu2 %1701 }
 0x8f9   : > { %10081 = vst [vmem:[#allocation57_spill] sm:$0xff] %v6530_v11  ;;  %vm1725_vm15 = vcmp.le.f32.partialorder %v6408_v17, %v6530_v11  ;;  %vm1726_vm0 = vcmp.le.f32.partialorder %v6411_v2, %v6530_v11  ;;  %v1785_v61 = vsel %vm500_vm3, %v6528_v46, 2147483647 }
 0x8fa   : > { %v6539_v52 = vsel %vm1725_vm15, %v10082_v6, 2147483647  ;;  %v6542_v42 = vsel %vm1726_vm0, %v10078_v5, 2147483647  ;;  %vm1786_vm2 = vcmp.lt.s32.totalorder %v6525_v0, %v1785_v61 }
 0x8fb   : > { %v6546_v53 = vsel %vm1786_vm2, %v6525_v0, %v1785_v61  ;;  %v1802_v32 = vsel %vm500_vm3, %v6542_v42, 2147483647 }
 0x8fc   : > { %v1789_v19 = vshra.s32 %v6546_v53, 16  ;;  %vm1803_vm4 = vcmp.lt.s32.totalorder %v6539_v52, %v1802_v32 }
 0x8fd   : > { %v6553_v28 = vsel %vm1803_vm4, %v6539_v52, %v1802_v32 }
 0x8fe   : > { %v6555_v33 = vcvt.s32.f32 %v1789_v19  ;;  %v1806_v30 = vshra.s32 %v6553_v28, 16  ;;  %v6562_v31 = vpop.xlane.xlu0 %1705  ;;  %v1805_v13 = vand.u32 65535, %v6553_v28 }
 0x8ff   : > { %10083 = vst [vmem:[#allocation58_spill] sm:$0xff] %v6562_v31  ;;  %vm1727_vm5 = vcmp.le.f32.partialorder %v6431_v36, %v6562_v31  ;;  %vm1728_vm7 = vcmp.le.f32.partialorder %v6434_v50, %v6562_v31 }
 0x900   : > { %1792 = vmin.xlane.f32.xlu0 %v6555_v33  ;;  %v6559_v41 = vcvt.s32.f32 %v1806_v30  ;;  %v6564_v49 = vpop.xlane.xlu1 %1709  ;;  %v6575_v4 = vsel %vm1727_vm5, %v10085_v26, 2147483647  ;;  %v6584_v56 = vsel %vm1728_vm7, %v10078_v5, 2147483647 }
 0x901   : > { %10084 = vst [vmem:[#allocation59_spill] sm:$0xff] %v6564_v49  ;;  %vm1729_vm10 = vcmp.le.f32.partialorder %v6441_v3, %v6564_v49  ;;  %vm1730_vm11 = vcmp.le.f32.partialorder %v6444_v15, %v6564_v49  ;;  %v1819_v27 = vsel %vm500_vm3, %v6584_v56, 2147483647 }
 0x902   : > { %1809 = vmin.xlane.f32.xlu1 %v6559_v41  ;;  %v6578_v40 = vsel %vm1729_vm10, %v10086_v24, 2147483647  ;;  %v6581_v39 = vsel %vm1730_vm11, %v10078_v5, 2147483647  ;;  %vm1820_vm14 = vcmp.lt.s32.totalorder %v6575_v4, %v1819_v27 }
 0x903   : > { %v1836_v12 = vsel %vm500_vm3, %v6581_v39, 2147483647  ;;  %v1821_v58 = vsel %vm1820_vm14, %v6575_v4, %v1819_v27  ;;  %v10090_v27 = vld [vmem:[#allocation13_spill] sm:$0xff] }
 0x904   : > { %vm1837_vm12 = vcmp.lt.s32.totalorder %v6578_v40, %v1836_v12  ;;  %v1823_v54 = vshra.s32 %v1821_v58, 16 }
 0x905   : > { %v6593_v45 = vsel %vm1837_vm12, %v6578_v40, %v1836_v12 }
 0x906   : > { %v1840_v20 = vshra.s32 %v6593_v45, 16  ;;  %v1825_v30 = vcvt.s32.f32 %v1823_v54 }
 0x908   : > { %v1842_v19 = vcvt.s32.f32 %v1840_v20  ;;  %1826 = vmin.xlane.f32.xlu2 %v1825_v30 }
 0x909   : > { %v6597_v35 = vpop.xlane.xlu2 %1713  ;;  %v6599_v16 = vpop.xlane.xlu0 %1693 }
 0x90a   : > { %10087 = vst [vmem:[#allocation60_spill] sm:$0xff] %v6597_v35  ;;  %vm1731_vm15 = vcmp.le.f32.partialorder %v6464_v18, %v6597_v35  ;;  %vm1732_vm0 = vcmp.le.f32.partialorder %v6473_v48, %v6597_v35  ;;  %vm1721_vm2 = vcmp.le.f32.partialorder %v6467_v34, %v6599_v16  ;;  %vm1722_vm4 = vcmp.le.f32.partialorder %v6470_v57, %v6599_v16 }
 0x90b   : > { %10088 = vst [vmem:[#allocation61_spill] sm:$0xff] %v6599_v16  ;;  %v6608_v61 = vsel %vm1731_vm15, %v10089_v59, 2147483647  ;;  %v6611_v32 = vsel %vm1732_vm0, %v10078_v5, 2147483647  ;;  %1843 = vmin.xlane.f32.xlu0 %v1842_v19 }
 0x90c   : > { %v1853_v12 = vsel %vm500_vm3, %v6611_v32, 2147483647  ;;  %v6618_v49 = vsel %vm1721_vm2, %v10090_v27, 2147483647  ;;  %v6622_v35 = vsel %vm1722_vm4, %v10078_v5, 2147483647 }
 0x90d   : > { %vm1854_vm5 = vcmp.lt.s32.totalorder %v6608_v61, %v1853_v12  ;;  %v1768_v16 = vsel %vm500_vm3, %v6622_v35, 2147483647  ;;  %v10092_v27 = vld [vmem:[#allocation20_spill] sm:$0xff] }
 0x90e   : > { %v1855_v31 = vsel %vm1854_vm5, %v6608_v61, %v1853_v12  ;;  %vm1769_vm7 = vcmp.lt.s32.totalorder %v6618_v49, %v1768_v16 }
 0x90f   : > { %v1857_v20 = vshra.s32 %v1855_v31, 16  ;;  %v1770_v54 = vsel %vm1769_vm7, %v6618_v49, %v1768_v16 }
 0x910   : > { %v1772_v1 = vshra.s32 %v1770_v54, 16 }
 0x911   : > { %v6629_v11 = vpop.xlane.xlu0 %1717  ;;  %v1859_v21 = vcvt.s32.f32 %v1857_v20 }
 0x912   : > { %10091 = vst [vmem:[#allocation62_spill] sm:$0xff] %v6629_v11  ;;  %vm1733_vm10 = vcmp.le.f32.partialorder %v6488_v43, %v6629_v11  ;;  %vm1734_vm11 = vcmp.le.f32.partialorder %v6491_v37, %v6629_v11  ;;  %v1774_v12 = vcvt.s32.f32 %v1772_v1  ;;  %v1754_v11 = vand.u32 65535, %v6512_v51 }
 0x913   : > { %1860 = vmin.xlane.f32.xlu1 %v1859_v21  ;;  %v6636_v59 = vsel %vm1733_vm10, %v10092_v27, 2147483647  ;;  %v6639_v24 = vsel %vm1734_vm11, %v10078_v5, 2147483647  ;;  %v1788_v5 = vand.u32 65535, %v6546_v53  ;;  %vm4243_vm11 = vcmask 39936  }
 0x914   : > { %10093 = vst [vmem:[#allocation63_spill] sm:$0xff] %v6639_v24  ;;  %v1870_v16 = vsel %vm500_vm3, %v6639_v24, 2147483647  ;;  %1775 = vmin.xlane.f32.xlu2 %v1774_v12  ;;  %v1756_v25 = vcvt.s32.f32 %v1754_v11  ;;  %v1807_v24 = vcvt.s32.f32 %v1805_v13  ;;  %v1822_v11 = vand.u32 65535, %v1821_v58 }
 0x915   : > { %vm1871_vm12 = vcmp.lt.s32.totalorder %v6636_v59, %v1870_v16  ;;  %v1790_v43 = vcvt.s32.f32 %v1788_v5  ;;  %v1856_v13 = vand.u32 65535, %v1855_v31 }
 0x916   : > { %v1872_v20 = vsel %vm1871_vm12, %v6636_v59, %v1870_v16  ;;  %v1824_v28 = vcvt.s32.f32 %v1822_v11 }
 0x917   : > { %v1874_v26 = vshra.s32 %v1872_v20, 16  ;;  %v1873_v31 = vand.u32 65535, %v1872_v20 }
 0x919   : > { %v1876_v6 = vcvt.s32.f32 %v1874_v26 }
 0x91c   : > { %1877 = vmin.xlane.f32.xlu2 %v1876_v6 }
 0x96b   : > { %v1759_v1 = vpop.xlane.xlu1 %1758 }
 0x96c   : > { %vm1760_vm14 = vcmp.eq.f32.partialorder %v6515_v22, %v1759_v1  ;;  %v1839_v22 = vand.u32 65535, %v6593_v45  ;;  %v1765_v11 = vcvt.f32.s32 %v1759_v1 }
 0x96d   : > { %v1761_v27 = vsel %vm1760_vm14, %v1756_v25, inf }
 0x96e   : > { %1762 = vmin.xlane.f32.xlu0 %v1761_v27  ;;  %v1841_v27 = vcvt.s32.f32 %v1839_v22 }
 0x973   : > { %v1793_v37 = vpop.xlane.xlu0 %1792 }
 0x974   : > { %vm1794_vm15 = vcmp.eq.f32.partialorder %v6555_v33, %v1793_v37  ;;  %v1771_v33 = vand.u32 65535, %v1770_v54  ;;  %v1799_v20 = vcvt.f32.s32 %v1793_v37 }
 0x975   : > { %v1810_v16 = vpop.xlane.xlu1 %1809  ;;  %v1795_v26 = vsel %vm1794_vm15, %v1790_v43, inf }
 0x976   : > { %vm1811_vm0 = vcmp.eq.f32.partialorder %v6559_v41, %v1810_v16  ;;  %1796 = vmin.xlane.f32.xlu2 %v1795_v26  ;;  %v1773_v26 = vcvt.s32.f32 %v1771_v33 }
 0x977   : > { %v1812_v51 = vsel %vm1811_vm0, %v1807_v24, inf  ;;  %v1858_v24 = vcvt.s32.f32 %v1856_v13 }
 0x978   : > { %1813 = vmin.xlane.f32.xlu0 %v1812_v51  ;;  %v1875_v51 = vcvt.s32.f32 %v1873_v31 }
 0x97b   : > { %v6652_v25 = vpop.xlane.xlu2 %1826 }
 0x97c   : > { %vm1828_vm2 = vcmp.eq.f32.partialorder %v1825_v30, %v6652_v25 }
 0x97d   : > { %v1829_v43 = vsel %vm1828_vm2, %v1824_v28, inf }
 0x97e   : > { %v6654_v53 = vpop.xlane.xlu0 %1843  ;;  %1830 = vmin.xlane.f32.xlu1 %v1829_v43 }
 0x97f   : > { %vm1845_vm4 = vcmp.eq.f32.partialorder %v1842_v19, %v6654_v53 }
 0x980   : > { %v1846_v5 = vsel %vm1845_vm4, %v1841_v27, inf }
 0x981   : > { %1847 = vmin.xlane.f32.xlu2 %v1846_v5  ;;  %v1816_v5 = vcvt.f32.s32 %v1810_v16 }
 0x986   : > { %v6658_v41 = vpop.xlane.xlu1 %1860 }
 0x987   : > { %vm1862_vm5 = vcmp.eq.f32.partialorder %v1859_v21, %v6658_v41  ;;  %v6661_v58 = vpop.xlane.xlu2 %1775  ;;  %v1766_v21 = vshll.u32 %v1765_v11, 16 }
 0x988   : > { %v1863_v45 = vsel %vm1862_vm5, %v1858_v24, inf  ;;  %vm1777_vm7 = vcmp.eq.f32.partialorder %v1774_v12, %v6661_v58 }
 0x989   : > { %1864 = vmin.xlane.f32.xlu0 %v1863_v45  ;;  %v1778_v30 = vsel %vm1777_vm7, %v1773_v26, inf  ;;  %v1817_v45 = vshll.u32 %v1816_v5, 16 }
 0x98a   : > { %1779 = vmin.xlane.f32.xlu1 %v1778_v30 }
 0x98f   : > { %v6664_v19 = vpop.xlane.xlu2 %1877 }
 0x990   : > { %vm1879_vm10 = vcmp.eq.f32.partialorder %v1876_v6, %v6664_v19 }
 0x991   : > { %v1880_v54 = vsel %vm1879_vm10, %v1875_v51, inf }
 0x992   : > { %1881 = vmin.xlane.f32.xlu1 %v1880_v54 }
 0x9e1   : > { %v1763_v22 = vpop.xlane.xlu0 %1762 }
 0x9e2   : > { %v1764_v28 = vcvt.f32.s32 %v1763_v22 }
 0x9e4   : > { %v1767_v27 = vadd.s32 %v1766_v21, %v1764_v28 }
 0x9e6   : > { %v6669_v13 = vsel %vm4243_vm11, %v6373_v9, %v1767_v27  ;;  %vm1887_vm12 = vcmp.eq.s32.totalorder %v6503_v14, %v1767_v27  ;;  %vm1888_vm14 = vcmp.eq.s32.totalorder %v6506_v47, %v1767_v27  ;;  %v1800_v9 = vshll.u32 %v1799_v20, 16 }
 0x9e7   : > { %v6674_v12 = vsel %vm1887_vm12, 1e+30, %v6378_v60  ;;  %v6677_v6 = vsel %vm1888_vm14, 1e+30, %v6381_v44  ;;  %v1782_v20 = vcvt.f32.s32 %v6661_v58 }
 0x9e8   : > { %v1919_v1 = vsel %vm500_vm3, %v6677_v6, inf }
 0x9e9   : > { %v1920_v43 = vmin.f32 %v6674_v12, %v1919_v1  ;;  %v1797_v33 = vpop.xlane.xlu2 %1796 }
 0x9ea   : > { %v1798_v24 = vcvt.f32.s32 %v1797_v33  ;;  %v1783_v33 = vshll.u32 %v1782_v20, 16 }
 0x9eb   : > { %1921 = vmin.xlane.f32.xlu2 %v1920_v43  ;;  %v1814_v14 = vpop.xlane.xlu0 %1813 }
 0x9ec   : > { %v1801_v47 = vadd.s32 %v1800_v9, %v1798_v24  ;;  %v1815_v26 = vcvt.f32.s32 %v1814_v14  ;;  %v1884_v14 = vcvt.f32.s32 %v6664_v19 }
 0x9ee   : > { %v6684_v60 = vsel %vm4243_vm11, %v6388_v63, %v1801_v47  ;;  %v1818_v44 = vadd.s32 %v1817_v45, %v1815_v26  ;;  %vm1891_vm15 = vcmp.eq.s32.totalorder %v6525_v0, %v1801_v47  ;;  %vm1892_vm0 = vcmp.eq.s32.totalorder %v6528_v46, %v1801_v47 }
 0x9ef   : > { %v6689_v37 = vsel %vm1891_vm15, 1e+30, %v6393_v23  ;;  %v6692_v16 = vsel %vm1892_vm0, 1e+30, %v6396_v62  ;;  %v1833_v46 = vcvt.f32.s32 %v6652_v25  ;;  %v1885_v47 = vshll.u32 %v1884_v14, 16 }
 0x9f0   : > { %v6696_v30 = vsel %vm4243_vm11, %v6400_v7, %v1818_v44  ;;  %v1927_v31 = vsel %vm500_vm3, %v6692_v16, inf  ;;  %vm1893_vm2 = vcmp.eq.s32.totalorder %v6539_v52, %v1818_v44  ;;  %vm1894_vm4 = vcmp.eq.s32.totalorder %v6542_v42, %v1818_v44 }
 0x9f1   : > { %v1928_v63 = vmin.f32 %v6689_v37, %v1927_v31  ;;  %v6704_v0 = vsel %vm1893_vm2, 1e+30, %v6408_v17  ;;  %v6707_v23 = vsel %vm1894_vm4, 1e+30, %v6411_v2  ;;  %v1850_v52 = vcvt.f32.s32 %v6654_v53  ;;  %v1831_v51 = vpop.xlane.xlu1 %1830  ;;  %v10097_v31 = vld [vmem:[#allocation39_spill] sm:$0xff] }
 0x9f2   : > { %v1931_v62 = vsel %vm500_vm3, %v6707_v23, inf  ;;  %v1867_v42 = vcvt.f32.s32 %v6658_v41  ;;  %v1834_v17 = vshll.u32 %v1833_v46, 16  ;;  %v1832_v22 = vcvt.f32.s32 %v1831_v51 }
 0x9f3   : > { %1929 = vmin.xlane.f32.xlu1 %v1928_v63  ;;  %v1932_v7 = vmin.f32 %v6704_v0, %v1931_v62  ;;  %v1851_v11 = vshll.u32 %v1850_v52, 16  ;;  %v10101_v52 = vld [vmem:[#allocation11_spill] sm:$0xff] }
 0x9f4   : > { %v1848_v54 = vpop.xlane.xlu2 %1847  ;;  %v1835_v21 = vadd.s32 %v1834_v17, %v1832_v22  ;;  %v1868_v27 = vshll.u32 %v1867_v42, 16 }
 0x9f5   : > { %1933 = vmin.xlane.f32.xlu2 %v1932_v7  ;;  %v1849_v2 = vcvt.f32.s32 %v1848_v54 }
 0x9f6   : > { %v6718_v1 = vsel %vm4243_vm11, %v6422_v38, %v1835_v21  ;;  %vm1895_vm5 = vcmp.eq.s32.totalorder %v6575_v4, %v1835_v21  ;;  %vm1896_vm7 = vcmp.eq.s32.totalorder %v6584_v56, %v1835_v21 }
 0x9f7   : > { %v1852_v28 = vadd.s32 %v1851_v11, %v1849_v2  ;;  %v6727_v43 = vsel %vm1895_vm5, 1e+30, %v6431_v36  ;;  %v6730_v5 = vsel %vm1896_vm7, 1e+30, %v6434_v50  ;;  %v10103_v2 = vld [vmem:[#allocation16_spill] sm:$0xff] }
 0x9f8   : > { %v1935_v38 = vsel %vm500_vm3, %v6730_v5, inf }
 0x9f9   : > { %v6722_v25 = vsel %vm4243_vm11, %v6426_v8, %v1852_v28  ;;  %vm1897_vm10 = vcmp.eq.s32.totalorder %v6578_v40, %v1852_v28  ;;  %vm1898_vm12 = vcmp.eq.s32.totalorder %v6581_v39, %v1852_v28  ;;  %v1936_v56 = vmin.f32 %v6727_v43, %v1935_v38 }
 0x9fa   : > { %v6737_v8 = vsel %vm1897_vm10, 1e+30, %v6441_v3  ;;  %v6741_v36 = vsel %vm1898_vm12, 1e+30, %v6444_v15 }
 0x9fb   : > { %v1939_v40 = vsel %vm500_vm3, %v6741_v36, inf  ;;  %1937 = vmin.xlane.f32.xlu0 %v1936_v56 }
 0x9fc   : > { %v1865_v53 = vpop.xlane.xlu0 %1864  ;;  %v1940_v3 = vmin.f32 %v6737_v8, %v1939_v40 }
 0x9fd   : > { %v1866_v41 = vcvt.f32.s32 %v1865_v53  ;;  %v1780_v4 = vpop.xlane.xlu1 %1779  ;;  %v10105_v53 = vld [vmem:[#allocation15_spill] sm:$0xff] }
 0x9fe   : > { %v1781_v50 = vcvt.f32.s32 %v1780_v4  ;;  %1941 = vmin.xlane.f32.xlu1 %v1940_v3 }
 0x9ff   : > { %v1869_v58 = vadd.s32 %v1868_v27, %v1866_v41 }
 0xa00   : > { %v1784_v39 = vadd.s32 %v1783_v33, %v1781_v50 }
 0xa01   : > { %v6747_v9 = vsel %vm4243_vm11, %v6453_v10, %v1869_v58  ;;  %vm1899_vm14 = vcmp.eq.s32.totalorder %v6608_v61, %v1869_v58  ;;  %vm1900_vm15 = vcmp.eq.s32.totalorder %v6611_v32, %v1869_v58 }
 0xa02   : > { %v6753_v15 = vsel %vm1899_vm14, 1e+30, %v6464_v18  ;;  %v6756_v24 = vsel %vm1900_vm15, 1e+30, %v6473_v48  ;;  %v6763_v45 = vsel %vm4243_vm11, %v6459_v29, %v1784_v39  ;;  %vm1889_vm0 = vcmp.eq.s32.totalorder %v6618_v49, %v1784_v39 }
 0xa03   : > { %v1943_v10 = vsel %vm500_vm3, %v6756_v24, inf  ;;  %vm1890_vm2 = vcmp.eq.s32.totalorder %v6622_v35, %v1784_v39  ;;  %v6769_v61 = vsel %vm1889_vm0, 1e+30, %v6467_v34  ;;  %v10094_v34 = vld [vmem:[#allocation63_spill] sm:$0xff] }
 0xa04   : > { %v1944_v18 = vmin.f32 %v6753_v15, %v1943_v10  ;;  %v6772_v48 = vsel %vm1890_vm2, 1e+30, %v6470_v57  ;;  %v10095_v57 = vld [vmem:[#allocation55_spill] sm:$0xff]  ;;  %v10108_v10 = vld [vmem:[#allocation18_spill] sm:$0xff] }
 0xa05   : > { %v1923_v32 = vsel %vm500_vm3, %v6772_v48, inf  ;;  %v1882_v19 = vpop.xlane.xlu1 %1881 }
 0xa06   : > { %1945 = vmin.xlane.f32.xlu2 %v1944_v18  ;;  %v1924_v29 = vmin.f32 %v6769_v61, %v1923_v32  ;;  %v1883_v26 = vcvt.f32.s32 %v1882_v19 }
 0xa08   : > { %1925 = vmin.xlane.f32.xlu0 %v1924_v29  ;;  %v1886_v49 = vadd.s32 %v1885_v47, %v1883_v26  ;;  %v10109_v29 = vld [vmem:[#allocation17_spill] sm:$0xff] }
 0xa0a   : > { %v6779_v35 = vsel %vm4243_vm11, %v6483_v55, %v1886_v49  ;;  %vm1901_vm4 = vcmp.eq.s32.totalorder %v6636_v59, %v1886_v49  ;;  %vm1902_vm5 = vcmp.eq.s32.totalorder %v10094_v34, %v1886_v49  ;;  %v10100_v55 = vld [vmem:[#allocation12_spill] sm:$0xff] }
 0xa0b   : > { %v6784_v44 = vsel %vm1901_vm4, 1e+30, %v10095_v57  ;;  %v6787_v63 = vsel %vm1902_vm5, 1e+30, %v10097_v31  ;;  %v10111_v31 = vld [vmem:[#allocation14_spill] sm:$0xff] }
 0xa0c   : > { %10096 = vst [vmem:[#allocation63_spill] sm:$0xff] %v6784_v44  ;;  %v1947_v62 = vsel %vm500_vm3, %v6787_v63, inf }
 0xa0d   : > { %10098 = vst [vmem:[#allocation55_spill] sm:$0xff] %v6787_v63  ;;  %v1948_v7 = vmin.f32 %v6784_v44, %v1947_v62 }
 0xa10   : > { %1949 = vmin.xlane.f32.xlu0 %v1948_v7 }
 0xa5e   : > { %v6792_v46 = vpop.xlane.xlu2 %1921 }
 0xa5f   : > { %10099 = vst [vmem:[#allocation39_spill] sm:$0xff] %v6792_v46  ;;  %vm1951_vm7 = vcmp.le.f32.partialorder %v6674_v12, %v6792_v46  ;;  %vm1952_vm10 = vcmp.le.f32.partialorder %v6677_v6, %v6792_v46 }
 0xa60   : > { %v6799_v59 = vsel %vm1951_vm7, %v10100_v55, 2147483647  ;;  %v6802_v42 = vsel %vm1952_vm10, %v10101_v52, 2147483647 }
 0xa61   : > { %v1983_v51 = vsel %vm500_vm3, %v6802_v42, 2147483647 }
 0xa62   : > { %vm1984_vm12 = vcmp.lt.s32.totalorder %v6799_v59, %v1983_v51 }
 0xa63   : > { %v6808_v54 = vsel %vm1984_vm12, %v6799_v59, %v1983_v51 }
 0xa64   : > { %v1987_v17 = vshra.s32 %v6808_v54, 16 }
 0xa66   : > { %v6811_v11 = vcvt.s32.f32 %v1987_v17  ;;  %v6813_v22 = vpop.xlane.xlu1 %1929 }
 0xa67   : > { %10102 = vst [vmem:[#allocation64_spill] sm:$0xff] %v6813_v22  ;;  %vm1955_vm14 = vcmp.le.f32.partialorder %v6689_v37, %v6813_v22  ;;  %vm1956_vm15 = vcmp.le.f32.partialorder %v6692_v16, %v6813_v22 }
 0xa68   : > { %1990 = vmin.xlane.f32.xlu1 %v6811_v11  ;;  %v6821_v21 = vsel %vm1955_vm14, %v10103_v2, 2147483647  ;;  %v6824_v28 = vsel %vm1956_vm15, %v10101_v52, 2147483647  ;;  %v6826_v27 = vpop.xlane.xlu2 %1933 }
 0xa69   : > { %10104 = vst [vmem:[#allocation65_spill] sm:$0xff] %v6826_v27  ;;  %vm1957_vm0 = vcmp.le.f32.partialorder %v6704_v0, %v6826_v27  ;;  %vm1958_vm2 = vcmp.le.f32.partialorder %v6707_v23, %v6826_v27  ;;  %v2017_v20 = vsel %vm500_vm3, %v6824_v28, 2147483647 }
 0xa6a   : > { %v6835_v41 = vsel %vm1957_vm0, %v10105_v53, 2147483647  ;;  %v6838_v38 = vsel %vm1958_vm2, %v10101_v52, 2147483647  ;;  %vm2018_vm4 = vcmp.lt.s32.totalorder %v6821_v21, %v2017_v20  ;;  %v1986_v53 = vand.u32 65535, %v6808_v54 }
 0xa6b   : > { %v6842_v4 = vsel %vm2018_vm4, %v6821_v21, %v2017_v20  ;;  %v2034_v58 = vsel %vm500_vm3, %v6838_v38, 2147483647 }
 0xa6c   : > { %v2021_v56 = vshra.s32 %v6842_v4, 16  ;;  %vm2035_vm5 = vcmp.lt.s32.totalorder %v6835_v41, %v2034_v58  ;;  %v1988_v2 = vcvt.s32.f32 %v1986_v53 }
 0xa6d   : > { %v6849_v33 = vsel %vm2035_vm5, %v6835_v41, %v2034_v58 }
 0xa6e   : > { %v6851_v50 = vcvt.s32.f32 %v2021_v56  ;;  %v2038_v40 = vshra.s32 %v6849_v33, 16  ;;  %v6858_v39 = vpop.xlane.xlu0 %1937  ;;  %v2037_v55 = vand.u32 65535, %v6849_v33 }
 0xa6f   : > { %10106 = vst [vmem:[#allocation66_spill] sm:$0xff] %v6858_v39  ;;  %vm1959_vm7 = vcmp.le.f32.partialorder %v6727_v43, %v6858_v39  ;;  %vm1960_vm10 = vcmp.le.f32.partialorder %v6730_v5, %v6858_v39 }
 0xa70   : > { %2024 = vmin.xlane.f32.xlu0 %v6851_v50  ;;  %v6855_v3 = vcvt.s32.f32 %v2038_v40  ;;  %v6867_v18 = vsel %vm1959_vm7, %v10108_v10, 2147483647  ;;  %v6870_v32 = vsel %vm1960_vm10, %v10101_v52, 2147483647 }
 0xa71   : > { %v6864_v14 = vpop.xlane.xlu1 %1941  ;;  %v2051_v19 = vsel %vm500_vm3, %v6870_v32, 2147483647 }
 0xa72   : > { %2041 = vmin.xlane.f32.xlu1 %v6855_v3  ;;  %10107 = vst [vmem:[#allocation67_spill] sm:$0xff] %v6864_v14  ;;  %vm1961_vm12 = vcmp.le.f32.partialorder %v6737_v8, %v6864_v14  ;;  %vm1962_vm14 = vcmp.le.f32.partialorder %v6741_v36, %v6864_v14  ;;  %vm2052_vm15 = vcmp.lt.s32.totalorder %v6867_v18, %v2051_v19 }
 0xa73   : > { %v6879_v47 = vsel %vm1961_vm12, %v10109_v29, 2147483647  ;;  %v6882_v26 = vsel %vm1962_vm14, %v10101_v52, 2147483647  ;;  %v2053_v57 = vsel %vm2052_vm15, %v6867_v18, %v2051_v19  ;;  %v10113_v19 = vld [vmem:[#allocation13_spill] sm:$0xff] }
 0xa74   : > { %v2068_v34 = vsel %vm500_vm3, %v6882_v26, 2147483647  ;;  %v2055_v17 = vshra.s32 %v2053_v57, 16  ;;  %v2054_v53 = vand.u32 65535, %v2053_v57 }
 0xa75   : > { %vm2069_vm4 = vcmp.lt.s32.totalorder %v6879_v47, %v2068_v34 }
 0xa76   : > { %v2070_v51 = vsel %vm2069_vm4, %v6879_v47, %v2068_v34  ;;  %v2057_v40 = vcvt.s32.f32 %v2055_v17 }
 0xa77   : > { %v2072_v58 = vshra.s32 %v2070_v51, 16 }
 0xa78   : > { %2058 = vmin.xlane.f32.xlu2 %v2057_v40 }
 0xa79   : > { %v6885_v49 = vpop.xlane.xlu2 %1945  ;;  %v2074_v34 = vcvt.s32.f32 %v2072_v58 }
 0xa7a   : > { %10110 = vst [vmem:[#allocation68_spill] sm:$0xff] %v6885_v49  ;;  %vm1963_vm0 = vcmp.le.f32.partialorder %v6753_v15, %v6885_v49  ;;  %vm1964_vm2 = vcmp.le.f32.partialorder %v6756_v24, %v6885_v49 }
 0xa7b   : > { %v6896_v62 = vsel %vm1963_vm0, %v10111_v31, 2147483647  ;;  %v6899_v7 = vsel %vm1964_vm2, %v10101_v52, 2147483647  ;;  %v6902_v20 = vpop.xlane.xlu0 %1925  ;;  %2075 = vmin.xlane.f32.xlu0 %v2074_v34 }
 0xa7c   : > { %10112 = vst [vmem:[#allocation69_spill] sm:$0xff] %v6902_v20  ;;  %v2085_v56 = vsel %vm500_vm3, %v6899_v7, 2147483647  ;;  %vm1953_vm5 = vcmp.le.f32.partialorder %v6769_v61, %v6902_v20  ;;  %vm1954_vm7 = vcmp.le.f32.partialorder %v6772_v48, %v6902_v20 }
 0xa7d   : > { %v6911_v49 = vsel %vm1953_vm5, %v10113_v19, 2147483647  ;;  %v6914_v14 = vsel %vm1954_vm7, %v10101_v52, 2147483647  ;;  %vm2086_vm10 = vcmp.lt.s32.totalorder %v6896_v62, %v2085_v56 }
 0xa7e   : > { %v2087_v39 = vsel %vm2086_vm10, %v6896_v62, %v2085_v56  ;;  %v2000_v27 = vsel %vm500_vm3, %v6914_v14, 2147483647  ;;  %v10115_v56 = vld [vmem:[#allocation20_spill] sm:$0xff] }
 0xa7f   : > { %v2089_v22 = vshra.s32 %v2087_v39, 16  ;;  %vm2001_vm12 = vcmp.lt.s32.totalorder %v6911_v49, %v2000_v27  ;;  %v2088_v33 = vand.u32 65535, %v2087_v39 }
 0xa80   : > { %v2002_v17 = vsel %vm2001_vm12, %v6911_v49, %v2000_v27 }
 0xa81   : > { %v2091_v20 = vcvt.s32.f32 %v2089_v22  ;;  %v2004_v46 = vshra.s32 %v2002_v17, 16 }
 0xa83   : > { %v6922_v19 = vpop.xlane.xlu0 %1949  ;;  %2092 = vmin.xlane.f32.xlu1 %v2091_v20  ;;  %v2006_v58 = vcvt.s32.f32 %v2004_v46 }
 0xa84   : > { %10114 = vst [vmem:[#allocation70_spill] sm:$0xff] %v6922_v19  ;;  %vm1965_vm14 = vcmp.le.f32.partialorder %v6784_v44, %v6922_v19  ;;  %vm1966_vm15 = vcmp.le.f32.partialorder %v6787_v63, %v6922_v19 }
 0xa85   : > { %v6929_v31 = vsel %vm1965_vm14, %v10115_v56, 2147483647  ;;  %v6932_v29 = vsel %vm1966_vm15, %v10101_v52, 2147483647  ;;  %2007 = vmin.xlane.f32.xlu2 %v2006_v58  ;;  %v2020_v52 = vand.u32 65535, %v6842_v4 }
 0xa86   : > { %10116 = vst [vmem:[#allocation71_spill] sm:$0xff] %v6932_v29  ;;  %v2102_v22 = vsel %vm500_vm3, %v6932_v29, 2147483647  ;;  %v2039_v29 = vcvt.s32.f32 %v2037_v55  ;;  %v2003_v55 = vand.u32 65535, %v2002_v17 }
 0xa87   : > { %vm2103_vm0 = vcmp.lt.s32.totalorder %v6929_v31, %v2102_v22  ;;  %v2022_v44 = vcvt.s32.f32 %v2020_v52 }
 0xa88   : > { %v2104_v46 = vsel %vm2103_vm0, %v6929_v31, %v2102_v22  ;;  %vm4252_vm0 = vcmask 48128  }
 0xa89   : > { %v2106_v27 = vshra.s32 %v2104_v46, 16 }
 0xa8b   : > { %v2108_v10 = vcvt.s32.f32 %v2106_v27 }
 0xa8d   : > { %2109 = vmin.xlane.f32.xlu2 %v2108_v10 }
 0xadb   : > { %v1991_v19 = vpop.xlane.xlu1 %1990 }
 0xadc   : > { %vm1992_vm2 = vcmp.eq.f32.partialorder %v6811_v11, %v1991_v19  ;;  %v2071_v11 = vand.u32 65535, %v2070_v51 }
 0xadd   : > { %v1993_v56 = vsel %vm1992_vm2, %v1988_v2, inf }
 0xade   : > { %1994 = vmin.xlane.f32.xlu0 %v1993_v56  ;;  %v2056_v56 = vcvt.s32.f32 %v2054_v53  ;;  %v2073_v52 = vcvt.s32.f32 %v2071_v11  ;;  %v1997_v53 = vcvt.f32.s32 %v1991_v19 }
 0xae3   : > { %v2025_v63 = vpop.xlane.xlu0 %2024 }
 0xae4   : > { %vm2026_vm4 = vcmp.eq.f32.partialorder %v6851_v50, %v2025_v63  ;;  %v2031_v19 = vcvt.f32.s32 %v2025_v63 }
 0xae5   : > { %v2042_v22 = vpop.xlane.xlu1 %2041  ;;  %v2027_v27 = vsel %vm2026_vm4, %v2022_v44, inf }
 0xae6   : > { %vm2043_vm5 = vcmp.eq.f32.partialorder %v6855_v3, %v2042_v22  ;;  %2028 = vmin.xlane.f32.xlu2 %v2027_v27  ;;  %v2005_v27 = vcvt.s32.f32 %v2003_v55 }
 0xae7   : > { %v2044_v54 = vsel %vm2043_vm5, %v2039_v29, inf  ;;  %v2090_v29 = vcvt.s32.f32 %v2088_v33 }
 0xae8   : > { %2045 = vmin.xlane.f32.xlu0 %v2044_v54 }
 0xaeb   : > { %v6944_v2 = vpop.xlane.xlu2 %2058 }
 0xaec   : > { %vm2060_vm7 = vcmp.eq.f32.partialorder %v2057_v40, %v6944_v2  ;;  %v2105_v40 = vand.u32 65535, %v2104_v46 }
 0xaed   : > { %v2061_v50 = vsel %vm2060_vm7, %v2056_v56, inf }
 0xaee   : > { %v6946_v4 = vpop.xlane.xlu0 %2075  ;;  %2062 = vmin.xlane.f32.xlu1 %v2061_v50  ;;  %v2107_v54 = vcvt.s32.f32 %v2105_v40 }
 0xaef   : > { %vm2077_vm10 = vcmp.eq.f32.partialorder %v2074_v34, %v6946_v4 }
 0xaf0   : > { %v2078_v44 = vsel %vm2077_vm10, %v2073_v52, inf }
 0xaf1   : > { %2079 = vmin.xlane.f32.xlu2 %v2078_v44  ;;  %v2048_v44 = vcvt.f32.s32 %v2042_v22 }
 0xaf6   : > { %v6950_v3 = vpop.xlane.xlu1 %2092 }
 0xaf7   : > { %vm2094_vm12 = vcmp.eq.f32.partialorder %v2091_v20, %v6950_v3  ;;  %v1998_v20 = vshll.u32 %v1997_v53, 16 }
 0xaf8   : > { %v2095_v57 = vsel %vm2094_vm12, %v2090_v29, inf  ;;  %v6953_v51 = vpop.xlane.xlu2 %2007 }
 0xaf9   : > { %2096 = vmin.xlane.f32.xlu0 %v2095_v57  ;;  %vm2009_vm14 = vcmp.eq.f32.partialorder %v2006_v58, %v6953_v51  ;;  %v2049_v57 = vshll.u32 %v2048_v44, 16 }
 0xafa   : > { %v2010_v39 = vsel %vm2009_vm14, %v2005_v27, inf }
 0xafb   : > { %2011 = vmin.xlane.f32.xlu1 %v2010_v39 }
 0xb00   : > { %v6956_v34 = vpop.xlane.xlu2 %2109 }
 0xb01   : > { %vm2111_vm15 = vcmp.eq.f32.partialorder %v2108_v10, %v6956_v34 }
 0xb02   : > { %v2112_v17 = vsel %vm2111_vm15, %v2107_v54, inf }
 0xb03   : > { %2113 = vmin.xlane.f32.xlu1 %v2112_v17 }
 0xb51   : > { %v1995_v11 = vpop.xlane.xlu0 %1994 }
 0xb52   : > { %v1996_v56 = vcvt.f32.s32 %v1995_v11 }
 0xb54   : > { %v1999_v52 = vadd.s32 %v1998_v20, %v1996_v56 }
 0xb56   : > { %v6961_v33 = vsel %vm4252_vm0, %v6669_v13, %v1999_v52  ;;  %vm2119_vm2 = vcmp.eq.s32.totalorder %v6799_v59, %v1999_v52  ;;  %vm2120_vm4 = vcmp.eq.s32.totalorder %v6802_v42, %v1999_v52  ;;  %v2032_v13 = vshll.u32 %v2031_v19, 16 }
 0xb57   : > { %v6966_v58 = vsel %vm2119_vm2, 1e+30, %v6674_v12  ;;  %v6969_v10 = vsel %vm2120_vm4, 1e+30, %v6677_v6  ;;  %v2014_v19 = vcvt.f32.s32 %v6953_v51 }
 0xb58   : > { %v2151_v46 = vsel %vm500_vm3, %v6969_v10, inf }
 0xb59   : > { %v2152_v50 = vmin.f32 %v6966_v58, %v2151_v46  ;;  %v2029_v55 = vpop.xlane.xlu2 %2028 }
 0xb5a   : > { %v2030_v29 = vcvt.f32.s32 %v2029_v55  ;;  %v2015_v55 = vshll.u32 %v2014_v19, 16 }
 0xb5b   : > { %2153 = vmin.xlane.f32.xlu2 %v2152_v50  ;;  %v2046_v59 = vpop.xlane.xlu0 %2045 }
 0xb5c   : > { %v2033_v42 = vadd.s32 %v2032_v13, %v2030_v29  ;;  %v2047_v27 = vcvt.f32.s32 %v2046_v59  ;;  %v2116_v59 = vcvt.f32.s32 %v6956_v34 }
 0xb5e   : > { %v6976_v12 = vsel %vm4252_vm0, %v6684_v60, %v2033_v42  ;;  %v2050_v6 = vadd.s32 %v2049_v57, %v2047_v27  ;;  %vm2123_vm5 = vcmp.eq.s32.totalorder %v6821_v21, %v2033_v42  ;;  %vm2124_vm7 = vcmp.eq.s32.totalorder %v6824_v28, %v2033_v42 }
 0xb5f   : > { %v6981_v63 = vsel %vm2123_vm5, 1e+30, %v6689_v37  ;;  %v6984_v22 = vsel %vm2124_vm7, 1e+30, %v6692_v16  ;;  %v2065_v28 = vcvt.f32.s32 %v6944_v2  ;;  %v2117_v42 = vshll.u32 %v2116_v59, 16 }
 0xb60   : > { %v6988_v39 = vsel %vm4252_vm0, %v6696_v30, %v2050_v6  ;;  %v2159_v40 = vsel %vm500_vm3, %v6984_v22, inf  ;;  %vm2125_vm10 = vcmp.eq.s32.totalorder %v6835_v41, %v2050_v6  ;;  %vm2126_vm12 = vcmp.eq.s32.totalorder %v6838_v38, %v2050_v6 }
 0xb61   : > { %v2160_v60 = vmin.f32 %v6981_v63, %v2159_v40  ;;  %v6996_v21 = vsel %vm2125_vm10, 1e+30, %v6704_v0  ;;  %v6999_v37 = vsel %vm2126_vm12, 1e+30, %v6707_v23  ;;  %v2082_v41 = vcvt.f32.s32 %v6946_v4  ;;  %v2063_v54 = vpop.xlane.xlu1 %2062  ;;  %v10120_v40 = vld [vmem:[#allocation55_spill] sm:$0xff] }
 0xb62   : > { %v2163_v16 = vsel %vm500_vm3, %v6999_v37, inf  ;;  %v2099_v38 = vcvt.f32.s32 %v6950_v3  ;;  %v2066_v17 = vshll.u32 %v2065_v28, 16  ;;  %v2064_v0 = vcvt.f32.s32 %v2063_v54 }
 0xb63   : > { %2161 = vmin.xlane.f32.xlu1 %v2160_v60  ;;  %v2164_v30 = vmin.f32 %v6996_v21, %v2163_v16  ;;  %v2083_v11 = vshll.u32 %v2082_v41, 16  ;;  %v10124_v41 = vld [vmem:[#allocation11_spill] sm:$0xff] }
 0xb64   : > { %v2080_v53 = vpop.xlane.xlu2 %2079  ;;  %v2067_v20 = vadd.s32 %v2066_v17, %v2064_v0  ;;  %v2100_v56 = vshll.u32 %v2099_v38, 16 }
 0xb65   : > { %2165 = vmin.xlane.f32.xlu2 %v2164_v30  ;;  %v2081_v23 = vcvt.f32.s32 %v2080_v53 }
 0xb66   : > { %v7010_v46 = vsel %vm4252_vm0, %v6718_v1, %v2067_v20  ;;  %vm2127_vm14 = vcmp.eq.s32.totalorder %v6867_v18, %v2067_v20  ;;  %vm2128_vm15 = vcmp.eq.s32.totalorder %v6870_v32, %v2067_v20 }
 0xb67   : > { %v2084_v52 = vadd.s32 %v2083_v11, %v2081_v23  ;;  %v7019_v50 = vsel %vm2127_vm14, 1e+30, %v6727_v43  ;;  %v7022_v44 = vsel %vm2128_vm15, 1e+30, %v6730_v5  ;;  %v10126_v23 = vld [vmem:[#allocation16_spill] sm:$0xff] }
 0xb68   : > { %v2167_v1 = vsel %vm500_vm3, %v7022_v44, inf }
 0xb69   : > { %v7016_v4 = vsel %vm4252_vm0, %v6722_v25, %v2084_v52  ;;  %vm2129_vm2 = vcmp.eq.s32.totalorder %v6879_v47, %v2084_v52  ;;  %vm2130_vm4 = vcmp.eq.s32.totalorder %v6882_v26, %v2084_v52  ;;  %v2168_v51 = vmin.f32 %v7019_v50, %v2167_v1 }
 0xb6a   : > { %v7030_v25 = vsel %vm2129_vm2, 1e+30, %v6737_v8  ;;  %v7033_v43 = vsel %vm2130_vm4, 1e+30, %v6741_v36 }
 0xb6b   : > { %v2171_v13 = vsel %vm500_vm3, %v7033_v43, inf  ;;  %2169 = vmin.xlane.f32.xlu0 %v2168_v51 }
 0xb6c   : > { %v2097_v2 = vpop.xlane.xlu0 %2096  ;;  %v2172_v26 = vmin.f32 %v7030_v25, %v2171_v13 }
 0xb6d   : > { %v2098_v3 = vcvt.f32.s32 %v2097_v2  ;;  %v10128_v2 = vld [vmem:[#allocation15_spill] sm:$0xff] }
 0xb6e   : > { %v2012_v18 = vpop.xlane.xlu1 %2011  ;;  %2173 = vmin.xlane.f32.xlu1 %v2172_v26 }
 0xb6f   : > { %v2101_v32 = vadd.s32 %v2100_v56, %v2098_v3  ;;  %v2013_v5 = vcvt.f32.s32 %v2012_v18 }
 0xb71   : > { %v7039_v47 = vsel %vm4252_vm0, %v6747_v9, %v2101_v32  ;;  %vm2131_vm5 = vcmp.eq.s32.totalorder %v6896_v62, %v2101_v32  ;;  %vm2132_vm7 = vcmp.eq.s32.totalorder %v6899_v7, %v2101_v32  ;;  %v2016_v8 = vadd.s32 %v2015_v55, %v2013_v5 }
 0xb72   : > { %v7045_v36 = vsel %vm2131_vm5, 1e+30, %v6753_v15  ;;  %v7048_v29 = vsel %vm2132_vm7, 1e+30, %v6756_v24 }
 0xb73   : > { %v2175_v9 = vsel %vm500_vm3, %v7048_v29, inf  ;;  %v7055_v57 = vsel %vm4252_vm0, %v6763_v45, %v2016_v8  ;;  %vm2121_vm10 = vcmp.eq.s32.totalorder %v6911_v49, %v2016_v8  ;;  %vm2122_vm12 = vcmp.eq.s32.totalorder %v6914_v14, %v2016_v8 }
 0xb74   : > { %v2176_v15 = vmin.f32 %v7045_v36, %v2175_v9  ;;  %v7061_v62 = vsel %vm2121_vm10, 1e+30, %v6769_v61  ;;  %v7064_v24 = vsel %vm2122_vm12, 1e+30, %v6772_v48  ;;  %v10117_v61 = vld [vmem:[#allocation71_spill] sm:$0xff]  ;;  %v10131_v9 = vld [vmem:[#allocation18_spill] sm:$0xff] }
 0xb75   : > { %v2155_v7 = vsel %vm500_vm3, %v7064_v24, inf  ;;  %v10118_v48 = vld [vmem:[#allocation63_spill] sm:$0xff] }
 0xb76   : > { %2177 = vmin.xlane.f32.xlu2 %v2176_v15  ;;  %v2114_v34 = vpop.xlane.xlu1 %2113  ;;  %v2156_v45 = vmin.f32 %v7061_v62, %v2155_v7 }
 0xb77   : > { %v2115_v27 = vcvt.f32.s32 %v2114_v34 }
 0xb78   : > { %2157 = vmin.xlane.f32.xlu0 %v2156_v45  ;;  %v10132_v45 = vld [vmem:[#allocation17_spill] sm:$0xff] }
 0xb79   : > { %v2118_v49 = vadd.s32 %v2117_v42, %v2115_v27 }
 0xb7b   : > { %v7071_v14 = vsel %vm4252_vm0, %v6779_v35, %v2118_v49  ;;  %vm2133_vm14 = vcmp.eq.s32.totalorder %v6929_v31, %v2118_v49  ;;  %vm2134_vm15 = vcmp.eq.s32.totalorder %v10117_v61, %v2118_v49  ;;  %v10123_v35 = vld [vmem:[#allocation12_spill] sm:$0xff] }
 0xb7c   : > { %v7076_v6 = vsel %vm2133_vm14, 1e+30, %v10118_v48  ;;  %v7079_v60 = vsel %vm2134_vm15, 1e+30, %v10120_v40  ;;  %v10134_v40 = vld [vmem:[#allocation14_spill] sm:$0xff] }
 0xb7d   : > { %10119 = vst [vmem:[#allocation71_spill] sm:$0xff] %v7076_v6  ;;  %v2179_v16 = vsel %vm500_vm3, %v7079_v60, inf }
 0xb7e   : > { %10121 = vst [vmem:[#allocation63_spill] sm:$0xff] %v7079_v60  ;;  %v2180_v30 = vmin.f32 %v7076_v6, %v2179_v16 }
 0xb80   : > { %2181 = vmin.xlane.f32.xlu0 %v2180_v30 }
 0xbce   : > { %v7084_v28 = vpop.xlane.xlu2 %2153 }
 0xbcf   : > { %10122 = vst [vmem:[#allocation55_spill] sm:$0xff] %v7084_v28  ;;  %vm2183_vm2 = vcmp.le.f32.partialorder %v6966_v58, %v7084_v28  ;;  %vm2184_vm4 = vcmp.le.f32.partialorder %v6969_v10, %v7084_v28 }
 0xbd0   : > { %v7091_v31 = vsel %vm2183_vm2, %v10123_v35, 2147483647  ;;  %v7094_v38 = vsel %vm2184_vm4, %v10124_v41, 2147483647 }
 0xbd1   : > { %v2215_v54 = vsel %vm500_vm3, %v7094_v38, 2147483647 }
 0xbd2   : > { %vm2216_vm5 = vcmp.lt.s32.totalorder %v7091_v31, %v2215_v54 }
 0xbd3   : > { %v7100_v17 = vsel %vm2216_vm5, %v7091_v31, %v2215_v54 }
 0xbd4   : > { %v2219_v0 = vshra.s32 %v7100_v17, 16 }
 0xbd6   : > { %v7103_v53 = vcvt.s32.f32 %v2219_v0  ;;  %v7105_v11 = vpop.xlane.xlu1 %2161 }
 0xbd7   : > { %10125 = vst [vmem:[#allocation72_spill] sm:$0xff] %v7105_v11  ;;  %vm2187_vm7 = vcmp.le.f32.partialorder %v6981_v63, %v7105_v11  ;;  %vm2188_vm10 = vcmp.le.f32.partialorder %v6984_v22, %v7105_v11 }
 0xbd8   : > { %2222 = vmin.xlane.f32.xlu1 %v7103_v53  ;;  %v7113_v20 = vsel %vm2187_vm7, %v10126_v23, 2147483647  ;;  %v7116_v56 = vsel %vm2188_vm10, %v10124_v41, 2147483647  ;;  %v7118_v52 = vpop.xlane.xlu2 %2165 }
 0xbd9   : > { %10127 = vst [vmem:[#allocation73_spill] sm:$0xff] %v7118_v52  ;;  %vm2189_vm12 = vcmp.le.f32.partialorder %v6996_v21, %v7118_v52  ;;  %vm2190_vm14 = vcmp.le.f32.partialorder %v6999_v37, %v7118_v52  ;;  %v2249_v19 = vsel %vm500_vm3, %v7116_v56, 2147483647 }
 0xbda   : > { %v7127_v3 = vsel %vm2189_vm12, %v10128_v2, 2147483647  ;;  %v7130_v1 = vsel %vm2190_vm14, %v10124_v41, 2147483647  ;;  %vm2250_vm15 = vcmp.lt.s32.totalorder %v7113_v20, %v2249_v19  ;;  %v2218_v2 = vand.u32 65535, %v7100_v17 }
 0xbdb   : > { %v7134_v18 = vsel %vm2250_vm15, %v7113_v20, %v2249_v19  ;;  %v2266_v32 = vsel %vm500_vm3, %v7130_v1, 2147483647 }
 0xbdc   : > { %v2253_v51 = vshra.s32 %v7134_v18, 16  ;;  %vm2267_vm2 = vcmp.lt.s32.totalorder %v7127_v3, %v2266_v32  ;;  %v2220_v23 = vcvt.s32.f32 %v2218_v2 }
 0xbdd   : > { %v7141_v55 = vsel %vm2267_vm2, %v7127_v3, %v2266_v32 }
 0xbde   : > { %v7143_v5 = vcvt.s32.f32 %v2253_v51  ;;  %v2270_v13 = vshra.s32 %v7141_v55, 16  ;;  %v7150_v8 = vpop.xlane.xlu0 %2169  ;;  %v2269_v35 = vand.u32 65535, %v7141_v55 }
 0xbdf   : > { %10129 = vst [vmem:[#allocation74_spill] sm:$0xff] %v7150_v8  ;;  %vm2191_vm4 = vcmp.le.f32.partialorder %v7019_v50, %v7150_v8  ;;  %vm2192_vm5 = vcmp.le.f32.partialorder %v7022_v44, %v7150_v8 }
 0xbe0   : > { %2256 = vmin.xlane.f32.xlu0 %v7143_v5  ;;  %v7147_v26 = vcvt.s32.f32 %v2270_v13  ;;  %v7159_v15 = vsel %vm2191_vm4, %v10131_v9, 2147483647  ;;  %v7162_v7 = vsel %vm2192_vm5, %v10124_v41, 2147483647 }
 0xbe1   : > { %v7156_v59 = vpop.xlane.xlu1 %2173  ;;  %v2283_v34 = vsel %vm500_vm3, %v7162_v7, 2147483647 }
 0xbe2   : > { %2273 = vmin.xlane.f32.xlu1 %v7147_v26  ;;  %10130 = vst [vmem:[#allocation75_spill] sm:$0xff] %v7156_v59  ;;  %vm2193_vm7 = vcmp.le.f32.partialorder %v7030_v25, %v7156_v59  ;;  %vm2194_vm10 = vcmp.le.f32.partialorder %v7033_v43, %v7156_v59  ;;  %vm2284_vm12 = vcmp.lt.s32.totalorder %v7159_v15, %v2283_v34 }
 0xbe3   : > { %v7171_v42 = vsel %vm2193_vm7, %v10132_v45, 2147483647  ;;  %v7174_v27 = vsel %vm2194_vm10, %v10124_v41, 2147483647  ;;  %v2285_v48 = vsel %vm2284_vm12, %v7159_v15, %v2283_v34  ;;  %v10136_v34 = vld [vmem:[#allocation13_spill] sm:$0xff] }
 0xbe4   : > { %v2300_v61 = vsel %vm500_vm3, %v7174_v27, 2147483647  ;;  %v2287_v0 = vshra.s32 %v2285_v48, 16  ;;  %v2286_v2 = vand.u32 65535, %v2285_v48 }
 0xbe5   : > { %vm2301_vm2 = vcmp.lt.s32.totalorder %v7171_v42, %v2300_v61 }
 0xbe6   : > { %v2302_v54 = vsel %vm2301_vm2, %v7171_v42, %v2300_v61  ;;  %v2289_v13 = vcvt.s32.f32 %v2287_v0 }
 0xbe7   : > { %v2304_v32 = vshra.s32 %v2302_v54, 16 }
 0xbe8   : > { %2290 = vmin.xlane.f32.xlu2 %v2289_v13 }
 0xbe9   : > { %v7177_v49 = vpop.xlane.xlu2 %2177  ;;  %v2306_v61 = vcvt.s32.f32 %v2304_v32 }
 0xbea   : > { %10133 = vst [vmem:[#allocation76_spill] sm:$0xff] %v7177_v49  ;;  %vm2195_vm14 = vcmp.le.f32.partialorder %v7045_v36, %v7177_v49  ;;  %vm2196_vm15 = vcmp.le.f32.partialorder %v7048_v29, %v7177_v49 }
 0xbeb   : > { %v7188_v16 = vsel %vm2195_vm14, %v10134_v40, 2147483647  ;;  %v7191_v30 = vsel %vm2196_vm15, %v10124_v41, 2147483647  ;;  %v7194_v19 = vpop.xlane.xlu0 %2157  ;;  %2307 = vmin.xlane.f32.xlu0 %v2306_v61 }
 0xbec   : > { %10135 = vst [vmem:[#allocation77_spill] sm:$0xff] %v7194_v19  ;;  %v2317_v51 = vsel %vm500_vm3, %v7191_v30, 2147483647  ;;  %vm2185_vm4 = vcmp.le.f32.partialorder %v7061_v62, %v7194_v19  ;;  %vm2186_vm5 = vcmp.le.f32.partialorder %v7064_v24, %v7194_v19 }
 0xbed   : > { %v7203_v49 = vsel %vm2185_vm4, %v10136_v34, 2147483647  ;;  %v7206_v59 = vsel %vm2186_vm5, %v10124_v41, 2147483647  ;;  %vm2318_vm7 = vcmp.lt.s32.totalorder %v7188_v16, %v2317_v51 }
 0xbee   : > { %v2319_v8 = vsel %vm2318_vm7, %v7188_v16, %v2317_v51  ;;  %v2232_v52 = vsel %vm500_vm3, %v7206_v59, 2147483647  ;;  %v10138_v51 = vld [vmem:[#allocation20_spill] sm:$0xff] }
 0xbef   : > { %v2321_v11 = vshra.s32 %v2319_v8, 16  ;;  %vm2233_vm10 = vcmp.lt.s32.totalorder %v7203_v49, %v2232_v52  ;;  %v2320_v55 = vand.u32 65535, %v2319_v8 }
 0xbf0   : > { %v2234_v0 = vsel %vm2233_vm10, %v7203_v49, %v2232_v52 }
 0xbf1   : > { %v2323_v19 = vcvt.s32.f32 %v2321_v11  ;;  %v2236_v28 = vshra.s32 %v2234_v0, 16 }
 0xbf3   : > { %v7214_v34 = vpop.xlane.xlu0 %2181  ;;  %2324 = vmin.xlane.f32.xlu1 %v2323_v19  ;;  %v2238_v32 = vcvt.s32.f32 %v2236_v28 }
 0xbf4   : > { %10137 = vst [vmem:[#allocation78_spill] sm:$0xff] %v7214_v34  ;;  %vm2197_vm12 = vcmp.le.f32.partialorder %v7076_v6, %v7214_v34  ;;  %vm2198_vm14 = vcmp.le.f32.partialorder %v7079_v60, %v7214_v34 }
 0xbf5   : > { %v7221_v40 = vsel %vm2197_vm12, %v10138_v51, 2147483647  ;;  %v7224_v45 = vsel %vm2198_vm14, %v10124_v41, 2147483647  ;;  %2239 = vmin.xlane.f32.xlu2 %v2238_v32  ;;  %v2252_v41 = vand.u32 65535, %v7134_v18 }
 0xbf6   : > { %10139 = vst [vmem:[#allocation79_spill] sm:$0xff] %v7224_v45  ;;  %v2334_v11 = vsel %vm500_vm3, %v7224_v45, 2147483647  ;;  %v2271_v45 = vcvt.s32.f32 %v2269_v35  ;;  %v2235_v35 = vand.u32 65535, %v2234_v0 }
 0xbf7   : > { %vm2335_vm15 = vcmp.lt.s32.totalorder %v7221_v40, %v2334_v11  ;;  %v2254_v6 = vcvt.s32.f32 %v2252_v41 }
 0xbf8   : > { %v2336_v28 = vsel %vm2335_vm15, %v7221_v40, %v2334_v11 }
 0xbf9   : > { %v2338_v52 = vshra.s32 %v2336_v28, 16 }
 0xbfb   : > { %v2340_v9 = vcvt.s32.f32 %v2338_v52 }
 0xbfd   : > { %2341 = vmin.xlane.f32.xlu2 %v2340_v9 }
 0xc4b   : > { %v2223_v34 = vpop.xlane.xlu1 %2222 }
 0xc4c   : > { %vm2224_vm2 = vcmp.eq.f32.partialorder %v7103_v53, %v2223_v34  ;;  %v2303_v53 = vand.u32 65535, %v2302_v54 }
 0xc4d   : > { %v2225_v51 = vsel %vm2224_vm2, %v2220_v23, inf  ;;  %vm4261_vm2 = vcmask 56320  }
 0xc4e   : > { %2226 = vmin.xlane.f32.xlu0 %v2225_v51  ;;  %v2288_v51 = vcvt.s32.f32 %v2286_v2  ;;  %v2305_v41 = vcvt.s32.f32 %v2303_v53  ;;  %v2229_v2 = vcvt.f32.s32 %v2223_v34 }
 0xc53   : > { %v2257_v60 = vpop.xlane.xlu0 %2256 }
 0xc54   : > { %vm2258_vm4 = vcmp.eq.f32.partialorder %v7143_v5, %v2257_v60  ;;  %v2263_v34 = vcvt.f32.s32 %v2257_v60 }
 0xc55   : > { %v2274_v11 = vpop.xlane.xlu1 %2273  ;;  %v2259_v52 = vsel %vm2258_vm4, %v2254_v6, inf }
 0xc56   : > { %vm2275_vm5 = vcmp.eq.f32.partialorder %v7147_v26, %v2274_v11  ;;  %2260 = vmin.xlane.f32.xlu2 %v2259_v52  ;;  %v2237_v52 = vcvt.s32.f32 %v2235_v35 }
 0xc57   : > { %v2276_v17 = vsel %vm2275_vm5, %v2271_v45, inf  ;;  %v2322_v45 = vcvt.s32.f32 %v2320_v55 }
 0xc58   : > { %2277 = vmin.xlane.f32.xlu0 %v2276_v17 }
 0xc5b   : > { %v7236_v23 = vpop.xlane.xlu2 %2290 }
 0xc5c   : > { %vm2292_vm7 = vcmp.eq.f32.partialorder %v2289_v13, %v7236_v23  ;;  %v2337_v13 = vand.u32 65535, %v2336_v28 }
 0xc5d   : > { %v2293_v5 = vsel %vm2292_vm7, %v2288_v51, inf }
 0xc5e   : > { %v7238_v18 = vpop.xlane.xlu0 %2307  ;;  %2294 = vmin.xlane.f32.xlu1 %v2293_v5  ;;  %v2339_v17 = vcvt.s32.f32 %v2337_v13 }
 0xc5f   : > { %vm2309_vm10 = vcmp.eq.f32.partialorder %v2306_v61, %v7238_v18 }
 0xc60   : > { %v2310_v6 = vsel %vm2309_vm10, %v2305_v41, inf }
 0xc61   : > { %2311 = vmin.xlane.f32.xlu2 %v2310_v6  ;;  %v2280_v6 = vcvt.f32.s32 %v2274_v11 }
 0xc66   : > { %v7242_v26 = vpop.xlane.xlu1 %2324 }
 0xc67   : > { %vm2326_vm12 = vcmp.eq.f32.partialorder %v2323_v19, %v7242_v26  ;;  %v2230_v19 = vshll.u32 %v2229_v2, 16 }
 0xc68   : > { %v2327_v48 = vsel %vm2326_vm12, %v2322_v45, inf  ;;  %v7245_v54 = vpop.xlane.xlu2 %2239 }
 0xc69   : > { %2328 = vmin.xlane.f32.xlu0 %v2327_v48  ;;  %vm2241_vm14 = vcmp.eq.f32.partialorder %v2238_v32, %v7245_v54  ;;  %v2281_v48 = vshll.u32 %v2280_v6, 16 }
 0xc6a   : > { %v2242_v8 = vsel %vm2241_vm14, %v2237_v52, inf }
 0xc6b   : > { %2243 = vmin.xlane.f32.xlu1 %v2242_v8 }
 0xc70   : > { %v7248_v61 = vpop.xlane.xlu2 %2341 }
 0xc71   : > { %vm2343_vm15 = vcmp.eq.f32.partialorder %v2340_v9, %v7248_v61 }
 0xc72   : > { %v2344_v0 = vsel %vm2343_vm15, %v2339_v17, inf }
 0xc73   : > { %2345 = vmin.xlane.f32.xlu1 %v2344_v0 }
 0xcc1   : > { %v2227_v53 = vpop.xlane.xlu0 %2226 }
 0xcc2   : > { %v2228_v51 = vcvt.f32.s32 %v2227_v53 }
 0xcc4   : > { %v2231_v41 = vadd.s32 %v2230_v19, %v2228_v51 }
 0xcc6   : > { %v7253_v55 = vsel %vm4261_vm2, %v6961_v33, %v2231_v41  ;;  %vm2351_vm4 = vcmp.eq.s32.totalorder %v7091_v31, %v2231_v41  ;;  %vm2352_vm5 = vcmp.eq.s32.totalorder %v7094_v38, %v2231_v41  ;;  %v2264_v33 = vshll.u32 %v2263_v34, 16 }
 0xcc7   : > { %v7258_v32 = vsel %vm2351_vm4, 1e+30, %v6966_v58  ;;  %v7261_v9 = vsel %vm2352_vm5, 1e+30, %v6969_v10  ;;  %v2246_v34 = vcvt.f32.s32 %v7245_v54 }
 0xcc8   : > { %v2383_v28 = vsel %vm500_vm3, %v7261_v9, inf }
 0xcc9   : > { %v2384_v5 = vmin.f32 %v7258_v32, %v2383_v28  ;;  %v2261_v35 = vpop.xlane.xlu2 %2260 }
 0xcca   : > { %v2262_v45 = vcvt.f32.s32 %v2261_v35  ;;  %v2247_v35 = vshll.u32 %v2246_v34, 16 }
 0xccb   : > { %2385 = vmin.xlane.f32.xlu2 %v2384_v5  ;;  %v2278_v31 = vpop.xlane.xlu0 %2277 }
 0xccc   : > { %v2265_v38 = vadd.s32 %v2264_v33, %v2262_v45  ;;  %v2279_v52 = vcvt.f32.s32 %v2278_v31  ;;  %v2348_v31 = vcvt.f32.s32 %v7248_v61 }
 0xcce   : > { %v7268_v58 = vsel %vm4261_vm2, %v6976_v12, %v2265_v38  ;;  %v2282_v10 = vadd.s32 %v2281_v48, %v2279_v52  ;;  %vm2355_vm7 = vcmp.eq.s32.totalorder %v7113_v20, %v2265_v38  ;;  %vm2356_vm10 = vcmp.eq.s32.totalorder %v7116_v56, %v2265_v38 }
 0xccf   : > { %v7273_v60 = vsel %vm2355_vm7, 1e+30, %v6981_v63  ;;  %v7276_v11 = vsel %vm2356_vm10, 1e+30, %v6984_v22  ;;  %v2297_v56 = vcvt.f32.s32 %v7236_v23  ;;  %v2349_v38 = vshll.u32 %v2348_v31, 16 }
 0xcd0   : > { %v7280_v8 = vsel %vm4261_vm2, %v6988_v39, %v2282_v10  ;;  %v2391_v13 = vsel %vm500_vm3, %v7276_v11, inf  ;;  %vm2357_vm12 = vcmp.eq.s32.totalorder %v7127_v3, %v2282_v10  ;;  %vm2358_vm14 = vcmp.eq.s32.totalorder %v7130_v1, %v2282_v10 }
 0xcd1   : > { %v2392_v12 = vmin.f32 %v7273_v60, %v2391_v13  ;;  %v7288_v20 = vsel %vm2357_vm12, 1e+30, %v6996_v21  ;;  %v7291_v63 = vsel %vm2358_vm14, 1e+30, %v6999_v37  ;;  %v2314_v3 = vcvt.f32.s32 %v7238_v18  ;;  %v2295_v17 = vpop.xlane.xlu1 %2294  ;;  %v10143_v13 = vld [vmem:[#allocation63_spill] sm:$0xff] }
 0xcd2   : > { %v2395_v22 = vsel %vm500_vm3, %v7291_v63, inf  ;;  %v2331_v1 = vcvt.f32.s32 %v7242_v26  ;;  %v2298_v0 = vshll.u32 %v2297_v56, 16  ;;  %v2296_v21 = vcvt.f32.s32 %v2295_v17 }
 0xcd3   : > { %2393 = vmin.xlane.f32.xlu1 %v2392_v12  ;;  %v2396_v39 = vmin.f32 %v7288_v20, %v2395_v22  ;;  %v2315_v53 = vshll.u32 %v2314_v3, 16  ;;  %v10147_v3 = vld [vmem:[#allocation11_spill] sm:$0xff] }
 0xcd4   : > { %v2312_v2 = vpop.xlane.xlu2 %2311  ;;  %v2299_v19 = vadd.s32 %v2298_v0, %v2296_v21  ;;  %v2332_v51 = vshll.u32 %v2331_v1, 16 }
 0xcd5   : > { %2397 = vmin.xlane.f32.xlu2 %v2396_v39  ;;  %v2313_v37 = vcvt.f32.s32 %v2312_v2 }
 0xcd6   : > { %v7302_v28 = vsel %vm4261_vm2, %v7010_v46, %v2299_v19  ;;  %vm2359_vm15 = vcmp.eq.s32.totalorder %v7159_v15, %v2299_v19  ;;  %vm2360_vm4 = vcmp.eq.s32.totalorder %v7162_v7, %v2299_v19 }
 0xcd7   : > { %v2316_v41 = vadd.s32 %v2315_v53, %v2313_v37  ;;  %v7311_v5 = vsel %vm2359_vm15, 1e+30, %v7019_v50  ;;  %v7314_v6 = vsel %vm2360_vm4, 1e+30, %v7022_v44  ;;  %v10149_v37 = vld [vmem:[#allocation16_spill] sm:$0xff] }
 0xcd8   : > { %v2399_v46 = vsel %vm500_vm3, %v7314_v6, inf }
 0xcd9   : > { %v7308_v18 = vsel %vm4261_vm2, %v7016_v4, %v2316_v41  ;;  %vm2361_vm5 = vcmp.eq.s32.totalorder %v7171_v42, %v2316_v41  ;;  %vm2362_vm7 = vcmp.eq.s32.totalorder %v7174_v27, %v2316_v41  ;;  %v2400_v54 = vmin.f32 %v7311_v5, %v2399_v46 }
 0xcda   : > { %v7322_v4 = vsel %vm2361_vm5, 1e+30, %v7030_v25  ;;  %v7325_v50 = vsel %vm2362_vm7, 1e+30, %v7033_v43 }
 0xcdb   : > { %v2403_v33 = vsel %vm500_vm3, %v7325_v50, inf  ;;  %2401 = vmin.xlane.f32.xlu0 %v2400_v54 }
 0xcdc   : > { %v2329_v23 = vpop.xlane.xlu0 %2328  ;;  %v2404_v27 = vmin.f32 %v7322_v4, %v2403_v33 }
 0xcdd   : > { %v2330_v26 = vcvt.f32.s32 %v2329_v23  ;;  %v10151_v23 = vld [vmem:[#allocation15_spill] sm:$0xff] }
 0xcde   : > { %v2244_v15 = vpop.xlane.xlu1 %2243  ;;  %2405 = vmin.xlane.f32.xlu1 %v2404_v27 }
 0xcdf   : > { %v2333_v7 = vadd.s32 %v2332_v51, %v2330_v26  ;;  %v2245_v44 = vcvt.f32.s32 %v2244_v15 }
 0xce1   : > { %v7331_v42 = vsel %vm4261_vm2, %v7039_v47, %v2333_v7  ;;  %vm2363_vm10 = vcmp.eq.s32.totalorder %v7188_v16, %v2333_v7  ;;  %vm2364_vm12 = vcmp.eq.s32.totalorder %v7191_v30, %v2333_v7  ;;  %v2248_v25 = vadd.s32 %v2247_v35, %v2245_v44 }
 0xce2   : > { %v7337_v43 = vsel %vm2363_vm10, 1e+30, %v7045_v36  ;;  %v7340_v45 = vsel %vm2364_vm12, 1e+30, %v7048_v29 }
 0xce3   : > { %v2407_v47 = vsel %vm500_vm3, %v7340_v45, inf  ;;  %v7347_v48 = vsel %vm4261_vm2, %v7055_v57, %v2248_v25  ;;  %vm2353_vm14 = vcmp.eq.s32.totalorder %v7203_v49, %v2248_v25  ;;  %vm2354_vm15 = vcmp.eq.s32.totalorder %v7206_v59, %v2248_v25 }
 0xce4   : > { %v2408_v36 = vmin.f32 %v7337_v43, %v2407_v47  ;;  %v7353_v16 = vsel %vm2353_vm14, 1e+30, %v7061_v62  ;;  %v7356_v29 = vsel %vm2354_vm15, 1e+30, %v7064_v24  ;;  %v10140_v62 = vld [vmem:[#allocation79_spill] sm:$0xff]  ;;  %v10154_v47 = vld [vmem:[#allocation18_spill] sm:$0xff] }
 0xce5   : > { %v2387_v30 = vsel %vm500_vm3, %v7356_v29, inf  ;;  %v10141_v24 = vld [vmem:[#allocation71_spill] sm:$0xff] }
 0xce6   : > { %2409 = vmin.xlane.f32.xlu2 %v2408_v36  ;;  %v2346_v61 = vpop.xlane.xlu1 %2345  ;;  %v2388_v57 = vmin.f32 %v7353_v16, %v2387_v30 }
 0xce7   : > { %v2347_v52 = vcvt.f32.s32 %v2346_v61 }
 0xce8   : > { %2389 = vmin.xlane.f32.xlu0 %v2388_v57  ;;  %v10155_v57 = vld [vmem:[#allocation17_spill] sm:$0xff] }
 0xce9   : > { %v2350_v49 = vadd.s32 %v2349_v38, %v2347_v52 }
 0xceb   : > { %v7363_v59 = vsel %vm4261_vm2, %v7071_v14, %v2350_v49  ;;  %vm2365_vm4 = vcmp.eq.s32.totalorder %v7221_v40, %v2350_v49  ;;  %vm2366_vm5 = vcmp.eq.s32.totalorder %v10140_v62, %v2350_v49  ;;  %v10146_v14 = vld [vmem:[#allocation12_spill] sm:$0xff] }
 0xcec   : > { %v7368_v10 = vsel %vm2365_vm4, 1e+30, %v10141_v24  ;;  %v7371_v12 = vsel %vm2366_vm5, 1e+30, %v10143_v13  ;;  %v10157_v13 = vld [vmem:[#allocation14_spill] sm:$0xff] }
 0xced   : > { %10142 = vst [vmem:[#allocation79_spill] sm:$0xff] %v7368_v10  ;;  %v2411_v22 = vsel %vm500_vm3, %v7371_v12, inf }
 0xcee   : > { %10144 = vst [vmem:[#allocation71_spill] sm:$0xff] %v7371_v12  ;;  %v2412_v39 = vmin.f32 %v7368_v10, %v2411_v22 }
 0xcf0   : > { %2413 = vmin.xlane.f32.xlu0 %v2412_v39 }
 0xd3e   : > { %v7376_v56 = vpop.xlane.xlu2 %2385 }
 0xd3f   : > { %10145 = vst [vmem:[#allocation63_spill] sm:$0xff] %v7376_v56  ;;  %vm2415_vm7 = vcmp.le.f32.partialorder %v7258_v32, %v7376_v56  ;;  %vm2416_vm10 = vcmp.le.f32.partialorder %v7261_v9, %v7376_v56 }
 0xd40   : > { %v7383_v40 = vsel %vm2415_vm7, %v10146_v14, 2147483647  ;;  %v7386_v1 = vsel %vm2416_vm10, %v10147_v3, 2147483647 }
 0xd41   : > { %v2447_v17 = vsel %vm500_vm3, %v7386_v1, 2147483647 }
 0xd42   : > { %vm2448_vm12 = vcmp.lt.s32.totalorder %v7383_v40, %v2447_v17 }
 0xd43   : > { %v7392_v0 = vsel %vm2448_vm12, %v7383_v40, %v2447_v17 }
 0xd44   : > { %v2451_v21 = vshra.s32 %v7392_v0, 16 }
 0xd46   : > { %v7395_v2 = vcvt.s32.f32 %v2451_v21  ;;  %v7397_v53 = vpop.xlane.xlu1 %2393 }
 0xd47   : > { %10148 = vst [vmem:[#allocation80_spill] sm:$0xff] %v7397_v53  ;;  %vm2419_vm14 = vcmp.le.f32.partialorder %v7273_v60, %v7397_v53  ;;  %vm2420_vm15 = vcmp.le.f32.partialorder %v7276_v11, %v7397_v53 }
 0xd48   : > { %2454 = vmin.xlane.f32.xlu1 %v7395_v2  ;;  %v7405_v19 = vsel %vm2419_vm14, %v10149_v37, 2147483647  ;;  %v7408_v51 = vsel %vm2420_vm15, %v10147_v3, 2147483647  ;;  %v7410_v41 = vpop.xlane.xlu2 %2397 }
 0xd49   : > { %10150 = vst [vmem:[#allocation81_spill] sm:$0xff] %v7410_v41  ;;  %vm2421_vm4 = vcmp.le.f32.partialorder %v7288_v20, %v7410_v41  ;;  %vm2422_vm5 = vcmp.le.f32.partialorder %v7291_v63, %v7410_v41  ;;  %v2481_v34 = vsel %vm500_vm3, %v7408_v51, 2147483647 }
 0xd4a   : > { %v7419_v26 = vsel %vm2421_vm4, %v10151_v23, 2147483647  ;;  %v7422_v46 = vsel %vm2422_vm5, %v10147_v3, 2147483647  ;;  %vm2482_vm7 = vcmp.lt.s32.totalorder %v7405_v19, %v2481_v34  ;;  %v2450_v23 = vand.u32 65535, %v7392_v0 }
 0xd4b   : > { %v7426_v15 = vsel %vm2482_vm7, %v7405_v19, %v2481_v34  ;;  %v2498_v7 = vsel %vm500_vm3, %v7422_v46, 2147483647 }
 0xd4c   : > { %v2485_v54 = vshra.s32 %v7426_v15, 16  ;;  %vm2499_vm10 = vcmp.lt.s32.totalorder %v7419_v26, %v2498_v7  ;;  %v2452_v37 = vcvt.s32.f32 %v2450_v23 }
 0xd4d   : > { %v7433_v35 = vsel %vm2499_vm10, %v7419_v26, %v2498_v7 }
 0xd4e   : > { %v7435_v44 = vcvt.s32.f32 %v2485_v54  ;;  %v2502_v33 = vshra.s32 %v7433_v35, 16  ;;  %v7442_v25 = vpop.xlane.xlu0 %2401  ;;  %v2501_v14 = vand.u32 65535, %v7433_v35 }
 0xd4f   : > { %10152 = vst [vmem:[#allocation82_spill] sm:$0xff] %v7442_v25  ;;  %vm2423_vm12 = vcmp.le.f32.partialorder %v7311_v5, %v7442_v25  ;;  %vm2424_vm14 = vcmp.le.f32.partialorder %v7314_v6, %v7442_v25 }
 0xd50   : > { %2488 = vmin.xlane.f32.xlu0 %v7435_v44  ;;  %v7439_v27 = vcvt.s32.f32 %v2502_v33  ;;  %v7451_v36 = vsel %vm2423_vm12, %v10154_v47, 2147483647  ;;  %v7454_v30 = vsel %vm2424_vm14, %v10147_v3, 2147483647 }
 0xd51   : > { %v7448_v31 = vpop.xlane.xlu1 %2405  ;;  %v2515_v61 = vsel %vm500_vm3, %v7454_v30, 2147483647 }
 0xd52   : > { %2505 = vmin.xlane.f32.xlu1 %v7439_v27  ;;  %10153 = vst [vmem:[#allocation83_spill] sm:$0xff] %v7448_v31  ;;  %vm2425_vm15 = vcmp.le.f32.partialorder %v7322_v4, %v7448_v31  ;;  %vm2426_vm4 = vcmp.le.f32.partialorder %v7325_v50, %v7448_v31  ;;  %vm2516_vm5 = vcmp.lt.s32.totalorder %v7451_v36, %v2515_v61 }
 0xd53   : > { %v7463_v38 = vsel %vm2425_vm15, %v10155_v57, 2147483647  ;;  %v7466_v52 = vsel %vm2426_vm4, %v10147_v3, 2147483647  ;;  %v2517_v24 = vsel %vm2516_vm5, %v7451_v36, %v2515_v61  ;;  %v10159_v61 = vld [vmem:[#allocation13_spill] sm:$0xff] }
 0xd54   : > { %v2532_v62 = vsel %vm500_vm3, %v7466_v52, 2147483647  ;;  %v2519_v21 = vshra.s32 %v2517_v24, 16  ;;  %v2518_v23 = vand.u32 65535, %v2517_v24 }
 0xd55   : > { %vm2533_vm12 = vcmp.lt.s32.totalorder %v7463_v38, %v2532_v62 }
 0xd56   : > { %v2534_v17 = vsel %vm2533_vm12, %v7463_v38, %v2532_v62  ;;  %v2521_v33 = vcvt.s32.f32 %v2519_v21 }
 0xd57   : > { %v2536_v7 = vshra.s32 %v2534_v17, 16 }
 0xd58   : > { %2522 = vmin.xlane.f32.xlu2 %v2521_v33 }
 0xd59   : > { %v7469_v49 = vpop.xlane.xlu2 %2409  ;;  %v2538_v62 = vcvt.s32.f32 %v2536_v7 }
 0xd5a   : > { %10156 = vst [vmem:[#allocation84_spill] sm:$0xff] %v7469_v49  ;;  %vm2427_vm7 = vcmp.le.f32.partialorder %v7337_v43, %v7469_v49  ;;  %vm2428_vm10 = vcmp.le.f32.partialorder %v7340_v45, %v7469_v49 }
 0xd5b   : > { %v7480_v22 = vsel %vm2427_vm7, %v10157_v13, 2147483647  ;;  %v7483_v39 = vsel %vm2428_vm10, %v10147_v3, 2147483647  ;;  %v7486_v34 = vpop.xlane.xlu0 %2389  ;;  %2539 = vmin.xlane.f32.xlu0 %v2538_v62 }
 0xd5c   : > { %10158 = vst [vmem:[#allocation85_spill] sm:$0xff] %v7486_v34  ;;  %v2549_v54 = vsel %vm500_vm3, %v7483_v39, 2147483647  ;;  %vm2417_vm14 = vcmp.le.f32.partialorder %v7353_v16, %v7486_v34  ;;  %vm2418_vm15 = vcmp.le.f32.partialorder %v7356_v29, %v7486_v34 }
 0xd5d   : > { %v7495_v49 = vsel %vm2417_vm14, %v10159_v61, 2147483647  ;;  %v7498_v31 = vsel %vm2418_vm15, %v10147_v3, 2147483647  ;;  %vm2550_vm4 = vcmp.lt.s32.totalorder %v7480_v22, %v2549_v54 }
 0xd5e   : > { %v2551_v25 = vsel %vm2550_vm4, %v7480_v22, %v2549_v54  ;;  %v2464_v41 = vsel %vm500_vm3, %v7498_v31, 2147483647  ;;  %v10161_v54 = vld [vmem:[#allocation20_spill] sm:$0xff] }
 0xd5f   : > { %v2553_v53 = vshra.s32 %v2551_v25, 16  ;;  %vm2465_vm5 = vcmp.lt.s32.totalorder %v7495_v49, %v2464_v41  ;;  %v2552_v35 = vand.u32 65535, %v2551_v25 }
 0xd60   : > { %v2466_v21 = vsel %vm2465_vm5, %v7495_v49, %v2464_v41 }
 0xd61   : > { %v2555_v34 = vcvt.s32.f32 %v2553_v53  ;;  %v2468_v56 = vshra.s32 %v2466_v21, 16 }
 0xd63   : > { %v7506_v61 = vpop.xlane.xlu0 %2413  ;;  %2556 = vmin.xlane.f32.xlu1 %v2555_v34  ;;  %v2470_v7 = vcvt.s32.f32 %v2468_v56 }
 0xd64   : > { %10160 = vst [vmem:[#allocation86_spill] sm:$0xff] %v7506_v61  ;;  %vm2429_vm7 = vcmp.le.f32.partialorder %v7368_v10, %v7506_v61  ;;  %vm2430_vm10 = vcmp.le.f32.partialorder %v7371_v12, %v7506_v61 }
 0xd65   : > { %v7513_v13 = vsel %vm2429_vm7, %v10161_v54, 2147483647  ;;  %v7516_v57 = vsel %vm2430_vm10, %v10147_v3, 2147483647  ;;  %2471 = vmin.xlane.f32.xlu2 %v2470_v7  ;;  %v2484_v3 = vand.u32 65535, %v7426_v15 }
 0xd66   : > { %10162 = vst [vmem:[#allocation87_spill] sm:$0xff] %v7516_v57  ;;  %v2566_v53 = vsel %vm500_vm3, %v7516_v57, 2147483647  ;;  %v2503_v57 = vcvt.s32.f32 %v2501_v14  ;;  %v2467_v14 = vand.u32 65535, %v2466_v21 }
 0xd67   : > { %vm2567_vm12 = vcmp.lt.s32.totalorder %v7513_v13, %v2566_v53  ;;  %v2486_v10 = vcvt.s32.f32 %v2484_v3 }
 0xd68   : > { %v2568_v56 = vsel %vm2567_vm12, %v7513_v13, %v2566_v53 }
 0xd69   : > { %v2570_v41 = vshra.s32 %v2568_v56, 16 }
 0xd6b   : > { %v2572_v47 = vcvt.s32.f32 %v2570_v41 }
 0xd6d   : > { %2573 = vmin.xlane.f32.xlu2 %v2572_v47 }
 0xdbb   : > { %v2455_v61 = vpop.xlane.xlu1 %2454 }
 0xdbc   : > { %vm2456_vm14 = vcmp.eq.f32.partialorder %v7395_v2, %v2455_v61  ;;  %v2535_v2 = vand.u32 65535, %v2534_v17 }
 0xdbd   : > { %v2457_v54 = vsel %vm2456_vm14, %v2452_v37, inf }
 0xdbe   : > { %2458 = vmin.xlane.f32.xlu0 %v2457_v54  ;;  %v2520_v54 = vcvt.s32.f32 %v2518_v23  ;;  %v2537_v3 = vcvt.s32.f32 %v2535_v2  ;;  %v2461_v23 = vcvt.f32.s32 %v2455_v61 }
 0xdc3   : > { %v2489_v12 = vpop.xlane.xlu0 %2488 }
 0xdc4   : > { %vm2490_vm15 = vcmp.eq.f32.partialorder %v7435_v44, %v2489_v12 }
 0xdc5   : > { %v2506_v53 = vpop.xlane.xlu1 %2505  ;;  %v2491_v41 = vsel %vm2490_vm15, %v2486_v10, inf }
 0xdc6   : > { %vm2507_vm4 = vcmp.eq.f32.partialorder %v7439_v27, %v2506_v53  ;;  %2492 = vmin.xlane.f32.xlu2 %v2491_v41  ;;  %v2469_v41 = vcvt.s32.f32 %v2467_v14 }
 0xdc7   : > { %v2508_v0 = vsel %vm2507_vm4, %v2503_v57, inf  ;;  %v2554_v57 = vcvt.s32.f32 %v2552_v35 }
 0xdc8   : > { %2509 = vmin.xlane.f32.xlu0 %v2508_v0 }
 0xdcb   : > { %v7528_v37 = vpop.xlane.xlu2 %2522 }
 0xdcc   : > { %vm2524_vm5 = vcmp.eq.f32.partialorder %v2521_v33, %v7528_v37  ;;  %v2569_v33 = vand.u32 65535, %v2568_v56  ;;  %v2495_v56 = vcvt.f32.s32 %v2489_v12 }
 0xdcd   : > { %v2525_v44 = vsel %vm2524_vm5, %v2520_v54, inf }
 0xdce   : > { %v7530_v15 = vpop.xlane.xlu0 %2539  ;;  %2526 = vmin.xlane.f32.xlu1 %v2525_v44  ;;  %v2571_v0 = vcvt.s32.f32 %v2569_v33 }
 0xdcf   : > { %vm2541_vm7 = vcmp.eq.f32.partialorder %v2538_v62, %v7530_v15 }
 0xdd0   : > { %v2542_v10 = vsel %vm2541_vm7, %v2537_v3, inf }
 0xdd1   : > { %2543 = vmin.xlane.f32.xlu2 %v2542_v10  ;;  %v2512_v10 = vcvt.f32.s32 %v2506_v53 }
 0xdd6   : > { %v7534_v27 = vpop.xlane.xlu1 %2556 }
 0xdd7   : > { %vm2558_vm10 = vcmp.eq.f32.partialorder %v2555_v34, %v7534_v27  ;;  %v2462_v34 = vshll.u32 %v2461_v23, 16 }
 0xdd8   : > { %v2559_v24 = vsel %vm2558_vm10, %v2554_v57, inf  ;;  %v7537_v17 = vpop.xlane.xlu2 %2471 }
 0xdd9   : > { %2560 = vmin.xlane.f32.xlu0 %v2559_v24  ;;  %vm2473_vm12 = vcmp.eq.f32.partialorder %v2470_v7, %v7537_v17  ;;  %v2513_v24 = vshll.u32 %v2512_v10, 16 }
 0xdda   : > { %v2474_v25 = vsel %vm2473_vm12, %v2469_v41, inf }
 0xddb   : > { %2475 = vmin.xlane.f32.xlu1 %v2474_v25 }
 0xde0   : > { %v7540_v62 = vpop.xlane.xlu2 %2573 }
 0xde1   : > { %vm2575_vm14 = vcmp.eq.f32.partialorder %v2572_v47, %v7540_v62 }
 0xde2   : > { %v2576_v21 = vsel %vm2575_vm14, %v2571_v0, inf }
 0xde3   : > { %2577 = vmin.xlane.f32.xlu1 %v2576_v21 }
 0xe31   : > { %v2459_v2 = vpop.xlane.xlu0 %2458 }
 0xe32   : > { %v2460_v54 = vcvt.f32.s32 %v2459_v2 }
 0xe34   : > { %v2463_v3 = vadd.s32 %v2462_v34, %v2460_v54 }
 0xe36   : > { %v7545_v35 = vsel %vm296_vm1, %v7253_v55, %v2463_v3  ;;  %vm2583_vm15 = vcmp.eq.s32.totalorder %v7383_v40, %v2463_v3  ;;  %vm2584_vm4 = vcmp.eq.s32.totalorder %v7386_v1, %v2463_v3  ;;  %v2496_v55 = vshll.u32 %v2495_v56, 16 }
 0xe37   : > { %v7550_v7 = vsel %vm2583_vm15, 1e+30, %v7258_v32  ;;  %v7553_v47 = vsel %vm2584_vm4, 1e+30, %v7261_v9  ;;  %v2478_v56 = vcvt.f32.s32 %v7537_v17 }
 0xe38   : > { %v2615_v61 = vsel %vm500_vm3, %v7553_v47, inf }
 0xe39   : > { %v2616_v44 = vmin.f32 %v7550_v7, %v2615_v61  ;;  %v2493_v14 = vpop.xlane.xlu2 %2492 }
 0xe3a   : > { %v2494_v57 = vcvt.f32.s32 %v2493_v14  ;;  %v2479_v14 = vshll.u32 %v2478_v56, 16 }
 0xe3b   : > { %2617 = vmin.xlane.f32.xlu2 %v2616_v44  ;;  %v2510_v40 = vpop.xlane.xlu0 %2509 }
 0xe3c   : > { %v2497_v1 = vadd.s32 %v2496_v55, %v2494_v57  ;;  %v2511_v41 = vcvt.f32.s32 %v2510_v40  ;;  %v2580_v40 = vcvt.f32.s32 %v7540_v62 }
 0xe3e   : > { %v7560_v32 = vsel %vm296_vm1, %v7268_v58, %v2497_v1  ;;  %v2514_v9 = vadd.s32 %v2513_v24, %v2511_v41  ;;  %vm2587_vm5 = vcmp.eq.s32.totalorder %v7405_v19, %v2497_v1  ;;  %vm2588_vm7 = vcmp.eq.s32.totalorder %v7408_v51, %v2497_v1 }
 0xe3f   : > { %v7565_v12 = vsel %vm2587_vm5, 1e+30, %v7273_v60  ;;  %v7568_v53 = vsel %vm2588_vm7, 1e+30, %v7276_v11  ;;  %v2529_v51 = vcvt.f32.s32 %v7528_v37  ;;  %v2581_v1 = vshll.u32 %v2580_v40, 16 }
 0xe40   : > { %v7572_v25 = vsel %vm296_vm1, %v7280_v8, %v2514_v9  ;;  %v2623_v33 = vsel %vm500_vm3, %v7568_v53, inf  ;;  %vm2589_vm10 = vcmp.eq.s32.totalorder %v7419_v26, %v2514_v9  ;;  %vm2590_vm12 = vcmp.eq.s32.totalorder %v7422_v46, %v2514_v9 }
 0xe41   : > { %v2624_v58 = vmin.f32 %v7565_v12, %v2623_v33  ;;  %v7580_v19 = vsel %vm2589_vm10, 1e+30, %v7288_v20  ;;  %v7583_v60 = vsel %vm2590_vm12, 1e+30, %v7291_v63  ;;  %v2546_v26 = vcvt.f32.s32 %v7530_v15  ;;  %v2527_v0 = vpop.xlane.xlu1 %2526  ;;  %v10167_v33 = vld [vmem:[#allocation71_spill] sm:$0xff] }
 0xe42   : > { %v2627_v11 = vsel %vm500_vm3, %v7583_v60, inf  ;;  %v2563_v46 = vcvt.f32.s32 %v7534_v27  ;;  %v2530_v21 = vshll.u32 %v2529_v51, 16  ;;  %v2528_v20 = vcvt.f32.s32 %v2527_v0 }
 0xe43   : > { %2625 = vmin.xlane.f32.xlu1 %v2624_v58  ;;  %v2628_v8 = vmin.f32 %v7580_v19, %v2627_v11  ;;  %v2547_v2 = vshll.u32 %v2546_v26, 16  ;;  %v10171_v26 = vld [vmem:[#allocation11_spill] sm:$0xff] }
 0xe44   : > { %v2544_v23 = vpop.xlane.xlu2 %2543  ;;  %v2531_v34 = vadd.s32 %v2530_v21, %v2528_v20  ;;  %v2564_v54 = vshll.u32 %v2563_v46, 16 }
 0xe45   : > { %2629 = vmin.xlane.f32.xlu2 %v2628_v8  ;;  %v2545_v63 = vcvt.f32.s32 %v2544_v23 }
 0xe46   : > { %v7594_v61 = vsel %vm296_vm1, %v7302_v28, %v2531_v34  ;;  %vm2591_vm14 = vcmp.eq.s32.totalorder %v7451_v36, %v2531_v34  ;;  %vm2592_vm15 = vcmp.eq.s32.totalorder %v7454_v30, %v2531_v34 }
 0xe47   : > { %v2548_v3 = vadd.s32 %v2547_v2, %v2545_v63  ;;  %v7603_v44 = vsel %vm2591_vm14, 1e+30, %v7311_v5  ;;  %v7606_v10 = vsel %vm2592_vm15, 1e+30, %v7314_v6  ;;  %v10173_v63 = vld [vmem:[#allocation16_spill] sm:$0xff] }
 0xe48   : > { %v2631_v28 = vsel %vm500_vm3, %v7606_v10, inf }
 0xe49   : > { %v7600_v15 = vsel %vm296_vm1, %v7308_v18, %v2548_v3  ;;  %vm2593_vm4 = vcmp.eq.s32.totalorder %v7463_v38, %v2548_v3  ;;  %vm2594_vm5 = vcmp.eq.s32.totalorder %v7466_v52, %v2548_v3  ;;  %v2632_v17 = vmin.f32 %v7603_v44, %v2631_v28 }
 0xe4a   : > { %v7614_v18 = vsel %vm2593_vm4, 1e+30, %v7322_v4  ;;  %v7617_v5 = vsel %vm2594_vm5, 1e+30, %v7325_v50 }
 0xe4b   : > { %v2635_v55 = vsel %vm500_vm3, %v7617_v5, inf  ;;  %2633 = vmin.xlane.f32.xlu0 %v2632_v17 }
 0xe4c   : > { %v2561_v37 = vpop.xlane.xlu0 %2560  ;;  %v2636_v52 = vmin.f32 %v7614_v18, %v2635_v55 }
 0xe4d   : > { %v2562_v27 = vcvt.f32.s32 %v2561_v37  ;;  %v10175_v37 = vld [vmem:[#allocation15_spill] sm:$0xff] }
 0xe4e   : > { %v2476_v36 = vpop.xlane.xlu1 %2475  ;;  %2637 = vmin.xlane.f32.xlu1 %v2636_v52 }
 0xe4f   : > { %v2565_v30 = vadd.s32 %v2564_v54, %v2562_v27  ;;  %v2477_v6 = vcvt.f32.s32 %v2476_v36 }
 0xe51   : > { %v7623_v38 = vsel %vm296_vm1, %v7331_v42, %v2565_v30  ;;  %vm2595_vm7 = vcmp.eq.s32.totalorder %v7480_v22, %v2565_v30  ;;  %vm2596_vm10 = vcmp.eq.s32.totalorder %v7483_v39, %v2565_v30  ;;  %v2480_v4 = vadd.s32 %v2479_v14, %v2477_v6 }
 0xe52   : > { %v7629_v50 = vsel %vm2595_vm7, 1e+30, %v7337_v43  ;;  %v7632_v57 = vsel %vm2596_vm10, 1e+30, %v7340_v45 }
 0xe53   : > { %v2639_v42 = vsel %vm500_vm3, %v7632_v57, inf  ;;  %v7639_v24 = vsel %vm296_vm1, %v7347_v48, %v2480_v4  ;;  %vm2585_vm12 = vcmp.eq.s32.totalorder %v7495_v49, %v2480_v4  ;;  %vm2586_vm14 = vcmp.eq.s32.totalorder %v7498_v31, %v2480_v4 }
 0xe54   : > { %v2640_v43 = vmin.f32 %v7629_v50, %v2639_v42  ;;  %v7645_v22 = vsel %vm2585_vm12, 1e+30, %v7353_v16  ;;  %v7648_v45 = vsel %vm2586_vm14, 1e+30, %v7356_v29  ;;  %v10164_v16 = vld [vmem:[#allocation87_spill] sm:$0xff]  ;;  %v10178_v42 = vld [vmem:[#allocation18_spill] sm:$0xff] }
 0xe55   : > { %v2619_v39 = vsel %vm500_vm3, %v7648_v45, inf  ;;  %v10165_v29 = vld [vmem:[#allocation79_spill] sm:$0xff] }
 0xe56   : > { %2641 = vmin.xlane.f32.xlu2 %v2640_v43  ;;  %v2578_v62 = vpop.xlane.xlu1 %2577  ;;  %v2620_v48 = vmin.f32 %v7645_v22, %v2619_v39 }
 0xe57   : > { %v2579_v41 = vcvt.f32.s32 %v2578_v62 }
 0xe58   : > { %2621 = vmin.xlane.f32.xlu0 %v2620_v48  ;;  %v10179_v48 = vld [vmem:[#allocation17_spill] sm:$0xff] }
 0xe59   : > { %v2582_v49 = vadd.s32 %v2581_v1, %v2579_v41 }
 0xe5b   : > { %v7655_v31 = vsel %vm296_vm1, %v7363_v59, %v2582_v49  ;;  %vm2597_vm15 = vcmp.eq.s32.totalorder %v7513_v13, %v2582_v49  ;;  %vm2598_vm4 = vcmp.eq.s32.totalorder %v10164_v16, %v2582_v49  ;;  %v10170_v59 = vld [vmem:[#allocation12_spill] sm:$0xff] }
 0xe5c   : > { %10163 = vst [vmem:[#allocation88_spill] sm:$0xff] %v7655_v31  ;;  %v7660_v9 = vsel %vm2597_vm15, 1e+30, %v10165_v29  ;;  %v7663_v58 = vsel %vm2598_vm4, 1e+30, %v10167_v33 }
 0xe5d   : > { %10166 = vst [vmem:[#allocation87_spill] sm:$0xff] %v7660_v9  ;;  %v2643_v11 = vsel %vm500_vm3, %v7663_v58, inf }
 0xe5e   : > { %10168 = vst [vmem:[#allocation79_spill] sm:$0xff] %v7663_v58  ;;  %v2644_v8 = vmin.f32 %v7660_v9, %v2643_v11  ;;  %v10181_v11 = vld [vmem:[#allocation14_spill] sm:$0xff] }
 0xe60   : > { %2645 = vmin.xlane.f32.xlu0 %v2644_v8 }
 0xeae   : > { %v7668_v51 = vpop.xlane.xlu2 %2617 }
 0xeaf   : > { %10169 = vst [vmem:[#allocation71_spill] sm:$0xff] %v7668_v51  ;;  %vm2647_vm5 = vcmp.le.f32.partialorder %v7550_v7, %v7668_v51  ;;  %vm2648_vm7 = vcmp.le.f32.partialorder %v7553_v47, %v7668_v51 }
 0xeb0   : > { %v7675_v13 = vsel %vm2647_vm5, %v10170_v59, 2147483647  ;;  %v7678_v46 = vsel %vm2648_vm7, %v10171_v26, 2147483647 }
 0xeb1   : > { %v2679_v0 = vsel %vm500_vm3, %v7678_v46, 2147483647 }
 0xeb2   : > { %vm2680_vm10 = vcmp.lt.s32.totalorder %v7675_v13, %v2679_v0 }
 0xeb3   : > { %v7684_v21 = vsel %vm2680_vm10, %v7675_v13, %v2679_v0 }
 0xeb4   : > { %v2683_v20 = vshra.s32 %v7684_v21, 16 }
 0xeb6   : > { %v7687_v23 = vcvt.s32.f32 %v2683_v20  ;;  %v7689_v2 = vpop.xlane.xlu1 %2625 }
 0xeb7   : > { %10172 = vst [vmem:[#allocation89_spill] sm:$0xff] %v7689_v2  ;;  %vm2651_vm12 = vcmp.le.f32.partialorder %v7565_v12, %v7689_v2  ;;  %vm2652_vm14 = vcmp.le.f32.partialorder %v7568_v53, %v7689_v2 }
 0xeb8   : > { %2686 = vmin.xlane.f32.xlu1 %v7687_v23  ;;  %v7697_v34 = vsel %vm2651_vm12, %v10173_v63, 2147483647  ;;  %v7700_v54 = vsel %vm2652_vm14, %v10171_v26, 2147483647  ;;  %v7702_v3 = vpop.xlane.xlu2 %2629 }
 0xeb9   : > { %10174 = vst [vmem:[#allocation90_spill] sm:$0xff] %v7702_v3  ;;  %vm2653_vm15 = vcmp.le.f32.partialorder %v7580_v19, %v7702_v3  ;;  %vm2654_vm4 = vcmp.le.f32.partialorder %v7583_v60, %v7702_v3  ;;  %v2713_v56 = vsel %vm500_vm3, %v7700_v54, 2147483647 }
 0xeba   : > { %v7711_v27 = vsel %vm2653_vm15, %v10175_v37, 2147483647  ;;  %v7714_v28 = vsel %vm2654_vm4, %v10171_v26, 2147483647  ;;  %vm2714_vm5 = vcmp.lt.s32.totalorder %v7697_v34, %v2713_v56  ;;  %v2682_v37 = vand.u32 65535, %v7684_v21 }
 0xebb   : > { %v7718_v36 = vsel %vm2714_vm5, %v7697_v34, %v2713_v56  ;;  %v2730_v30 = vsel %vm500_vm3, %v7714_v28, 2147483647 }
 0xebc   : > { %v2717_v17 = vshra.s32 %v7718_v36, 16  ;;  %vm2731_vm7 = vcmp.lt.s32.totalorder %v7711_v27, %v2730_v30  ;;  %v2684_v63 = vcvt.s32.f32 %v2682_v37 }
 0xebd   : > { %v7725_v14 = vsel %vm2731_vm7, %v7711_v27, %v2730_v30 }
 0xebe   : > { %v7727_v6 = vcvt.s32.f32 %v2717_v17  ;;  %v2734_v55 = vshra.s32 %v7725_v14, 16  ;;  %v7734_v4 = vpop.xlane.xlu0 %2633  ;;  %v2733_v59 = vand.u32 65535, %v7725_v14 }
 0xebf   : > { %10176 = vst [vmem:[#allocation91_spill] sm:$0xff] %v7734_v4  ;;  %vm2655_vm10 = vcmp.le.f32.partialorder %v7603_v44, %v7734_v4  ;;  %vm2656_vm12 = vcmp.le.f32.partialorder %v7606_v10, %v7734_v4 }
 0xec0   : > { %2720 = vmin.xlane.f32.xlu0 %v7727_v6  ;;  %v7731_v52 = vcvt.s32.f32 %v2734_v55  ;;  %v7743_v43 = vsel %vm2655_vm10, %v10178_v42, 2147483647  ;;  %v7746_v39 = vsel %vm2656_vm12, %v10171_v26, 2147483647  ;;  %v2735_v31 = vcvt.s32.f32 %v2733_v59 }
 0xec1   : > { %v7740_v40 = vpop.xlane.xlu1 %2637  ;;  %v2747_v62 = vsel %vm500_vm3, %v7746_v39, 2147483647 }
 0xec2   : > { %2737 = vmin.xlane.f32.xlu1 %v7731_v52  ;;  %10177 = vst [vmem:[#allocation92_spill] sm:$0xff] %v7740_v40  ;;  %vm2657_vm14 = vcmp.le.f32.partialorder %v7614_v18, %v7740_v40  ;;  %vm2658_vm15 = vcmp.le.f32.partialorder %v7617_v5, %v7740_v40  ;;  %vm2748_vm4 = vcmp.lt.s32.totalorder %v7743_v43, %v2747_v62 }
 0xec3   : > { %v7755_v1 = vsel %vm2657_vm14, %v10179_v48, 2147483647  ;;  %v7758_v41 = vsel %vm2658_vm15, %v10171_v26, 2147483647  ;;  %v2749_v29 = vsel %vm2748_vm4, %v7743_v43, %v2747_v62  ;;  %v10183_v62 = vld [vmem:[#allocation13_spill] sm:$0xff] }
 0xec4   : > { %v2764_v16 = vsel %vm500_vm3, %v7758_v41, 2147483647  ;;  %v2751_v33 = vshra.s32 %v2749_v29, 16  ;;  %v2750_v37 = vand.u32 65535, %v2749_v29 }
 0xec5   : > { %vm2765_vm10 = vcmp.lt.s32.totalorder %v7755_v1, %v2764_v16 }
 0xec6   : > { %v2766_v20 = vsel %vm2765_vm10, %v7755_v1, %v2764_v16  ;;  %v2753_v17 = vcvt.s32.f32 %v2751_v33 }
 0xec7   : > { %v2768_v30 = vshra.s32 %v2766_v20, 16 }
 0xec8   : > { %2754 = vmin.xlane.f32.xlu2 %v2753_v17 }
 0xec9   : > { %v7761_v49 = vpop.xlane.xlu2 %2641  ;;  %v2770_v40 = vcvt.s32.f32 %v2768_v30  ;;  %v10185_v30 = vld [vmem:[#allocation20_spill] sm:$0xff] }
 0xeca   : > { %10180 = vst [vmem:[#allocation93_spill] sm:$0xff] %v7761_v49  ;;  %vm2659_vm5 = vcmp.le.f32.partialorder %v7629_v50, %v7761_v49  ;;  %vm2660_vm7 = vcmp.le.f32.partialorder %v7632_v57, %v7761_v49 }
 0xecb   : > { %v7772_v8 = vsel %vm2659_vm5, %v10181_v11, 2147483647  ;;  %v7775_v0 = vsel %vm2660_vm7, %v10171_v26, 2147483647  ;;  %v7778_v56 = vpop.xlane.xlu0 %2621  ;;  %2771 = vmin.xlane.f32.xlu0 %v2770_v40 }
 0xecc   : > { %10182 = vst [vmem:[#allocation94_spill] sm:$0xff] %v7778_v56  ;;  %v2781_v55 = vsel %vm500_vm3, %v7775_v0, 2147483647  ;;  %vm2649_vm12 = vcmp.le.f32.partialorder %v7645_v22, %v7778_v56  ;;  %vm2650_vm14 = vcmp.le.f32.partialorder %v7648_v45, %v7778_v56 }
 0xecd   : > { %vm2782_vm15 = vcmp.lt.s32.totalorder %v7772_v8, %v2781_v55  ;;  %v7788_v49 = vsel %vm2649_vm12, %v10183_v62, 2147483647  ;;  %v7791_v16 = vsel %vm2650_vm14, %v10171_v26, 2147483647 }
 0xece   : > { %v2783_v33 = vsel %vm2782_vm15, %v7772_v8, %v2781_v55  ;;  %v2696_v3 = vsel %vm500_vm3, %v7791_v16, 2147483647 }
 0xecf   : > { %v2785_v4 = vshra.s32 %v2783_v33, 16  ;;  %vm2697_vm4 = vcmp.lt.s32.totalorder %v7788_v49, %v2696_v3 }
 0xed0   : > { %v2698_v2 = vsel %vm2697_vm4, %v7788_v49, %v2696_v3 }
 0xed1   : > { %v2787_v56 = vcvt.s32.f32 %v2785_v4  ;;  %v2700_v51 = vshra.s32 %v2698_v2, 16  ;;  %v2699_v59 = vand.u32 65535, %v2698_v2 }
 0xed3   : > { %2788 = vmin.xlane.f32.xlu1 %v2787_v56  ;;  %v7798_v62 = vpop.xlane.xlu0 %2645  ;;  %v2702_v11 = vcvt.s32.f32 %v2700_v51 }
 0xed4   : > { %10184 = vst [vmem:[#allocation95_spill] sm:$0xff] %v7798_v62  ;;  %vm2661_vm5 = vcmp.le.f32.partialorder %v7660_v9, %v7798_v62  ;;  %vm2662_vm7 = vcmp.le.f32.partialorder %v7663_v58, %v7798_v62 }
 0xed5   : > { %v7805_v55 = vsel %vm2661_vm5, %v10185_v30, 2147483647  ;;  %v7808_v48 = vsel %vm2662_vm7, %v10171_v26, 2147483647  ;;  %2703 = vmin.xlane.f32.xlu2 %v2702_v11  ;;  %v2716_v26 = vand.u32 65535, %v7718_v36  ;;  %v2784_v36 = vand.u32 65535, %v2783_v33 }
 0xed6   : > { %v2798_v3 = vsel %vm500_vm3, %v7808_v48, 2147483647 }
 0xed7   : > { %vm2799_vm10 = vcmp.lt.s32.totalorder %v7805_v55, %v2798_v3  ;;  %v2718_v9 = vcvt.s32.f32 %v2716_v26 }
 0xed8   : > { %v2800_v51 = vsel %vm2799_vm10, %v7805_v55, %v2798_v3 }
 0xed9   : > { %v2802_v4 = vshra.s32 %v2800_v51, 16 }
 0xedb   : > { %v2804_v42 = vcvt.s32.f32 %v2802_v4 }
 0xedd   : > { %2805 = vmin.xlane.f32.xlu2 %v2804_v42 }
 0xf2b   : > { %v2687_v62 = vpop.xlane.xlu1 %2686 }
 0xf2c   : > { %vm2688_vm12 = vcmp.eq.f32.partialorder %v7687_v23, %v2687_v62  ;;  %v2767_v23 = vand.u32 65535, %v2766_v20 }
 0xf2d   : > { %v2689_v30 = vsel %vm2688_vm12, %v2684_v63, inf }
 0xf2e   : > { %2690 = vmin.xlane.f32.xlu0 %v2689_v30  ;;  %v2752_v30 = vcvt.s32.f32 %v2750_v37  ;;  %v2693_v37 = vcvt.f32.s32 %v2687_v62 }
 0xf33   : > { %v2721_v58 = vpop.xlane.xlu0 %2720 }
 0xf34   : > { %vm2722_vm14 = vcmp.eq.f32.partialorder %v7727_v6, %v2721_v58  ;;  %v2769_v6 = vcvt.s32.f32 %v2767_v23  ;;  %v2727_v62 = vcvt.f32.s32 %v2721_v58 }
 0xf35   : > { %v2738_v3 = vpop.xlane.xlu1 %2737  ;;  %v2723_v4 = vsel %vm2722_vm14, %v2718_v9, inf  ;;  %vm9928_vm14 = vcmask 72704  }
 0xf36   : > { %vm2739_vm15 = vcmp.eq.f32.partialorder %v7731_v52, %v2738_v3  ;;  %2724 = vmin.xlane.f32.xlu2 %v2723_v4  ;;  %v2786_v52 = vcvt.s32.f32 %v2784_v36  ;;  %v2801_v4 = vand.u32 65535, %v2800_v51 }
 0xf37   : > { %v2740_v21 = vsel %vm2739_vm15, %v2735_v31, inf }
 0xf38   : > { %2741 = vmin.xlane.f32.xlu0 %v2740_v21 }
 0xf3b   : > { %v7820_v63 = vpop.xlane.xlu2 %2754 }
 0xf3c   : > { %vm2756_vm4 = vcmp.eq.f32.partialorder %v2753_v17, %v7820_v63  ;;  %v2701_v17 = vcvt.s32.f32 %v2699_v59 }
 0xf3d   : > { %v2757_v26 = vsel %vm2756_vm4, %v2752_v30, inf }
 0xf3e   : > { %v7823_v14 = vpop.xlane.xlu0 %2771  ;;  %2758 = vmin.xlane.f32.xlu1 %v2757_v26 }
 0xf3f   : > { %vm2773_vm5 = vcmp.eq.f32.partialorder %v2770_v40, %v7823_v14  ;;  %v2803_v40 = vcvt.s32.f32 %v2801_v4 }
 0xf40   : > { %v2774_v9 = vsel %vm2773_vm5, %v2769_v6, inf }
 0xf41   : > { %2775 = vmin.xlane.f32.xlu2 %v2774_v9  ;;  %v2744_v9 = vcvt.f32.s32 %v2738_v3 }
 0xf46   : > { %v7826_v31 = vpop.xlane.xlu1 %2788 }
 0xf47   : > { %vm2790_vm7 = vcmp.eq.f32.partialorder %v2787_v56, %v7826_v31  ;;  %v2694_v56 = vshll.u32 %v2693_v37, 16 }
 0xf48   : > { %v2791_v29 = vsel %vm2790_vm7, %v2786_v52, inf  ;;  %v7829_v20 = vpop.xlane.xlu2 %2703 }
 0xf49   : > { %2792 = vmin.xlane.f32.xlu0 %v2791_v29  ;;  %vm2705_vm10 = vcmp.eq.f32.partialorder %v2702_v11, %v7829_v20  ;;  %v2745_v29 = vshll.u32 %v2744_v9, 16 }
 0xf4a   : > { %v2706_v33 = vsel %vm2705_vm10, %v2701_v17, inf }
 0xf4b   : > { %2707 = vmin.xlane.f32.xlu1 %v2706_v33 }
 0xf50   : > { %v7832_v21 = vpop.xlane.xlu2 %2805 }
 0xf51   : > { %vm2807_vm12 = vcmp.eq.f32.partialorder %v2804_v42, %v7832_v21 }
 0xf52   : > { %v2808_v2 = vsel %vm2807_vm12, %v2803_v40, inf }
 0xf53   : > { %2809 = vmin.xlane.f32.xlu1 %v2808_v2 }
 0xfa1   : > { %v2691_v23 = vpop.xlane.xlu0 %2690 }
 0xfa2   : > { %v2692_v30 = vcvt.f32.s32 %v2691_v23 }
 0xfa4   : > { %v2695_v36 = vadd.s32 %v2694_v56, %v2692_v30  ;;  %v2710_v30 = vcvt.f32.s32 %v7829_v20 }
 0xfa6   : > { %v7837_v26 = vsel %vm9928_vm14, %v7545_v35, %v2695_v36  ;;  %vm2815_vm15 = vcmp.eq.s32.totalorder %v7675_v13, %v2695_v36  ;;  %vm2816_vm4 = vcmp.eq.s32.totalorder %v7678_v46, %v2695_v36  ;;  %v2728_v35 = vshll.u32 %v2727_v62, 16 }
 0xfa7   : > { %v7842_v11 = vsel %vm2815_vm15, 1e+30, %v7550_v7  ;;  %v7845_v42 = vsel %vm2816_vm4, 1e+30, %v7553_v47 }
 0xfa8   : > { %v2847_v51 = vsel %vm500_vm3, %v7845_v42, inf }
 0xfa9   : > { %v2848_v6 = vmin.f32 %v7842_v11, %v2847_v51  ;;  %v2725_v59 = vpop.xlane.xlu2 %2724 }
 0xfaa   : > { %v2726_v52 = vcvt.f32.s32 %v2725_v59 }
 0xfab   : > { %2849 = vmin.xlane.f32.xlu2 %v2848_v6  ;;  %v2742_v13 = vpop.xlane.xlu0 %2741 }
 0xfac   : > { %v2729_v46 = vadd.s32 %v2728_v35, %v2726_v52  ;;  %v2743_v17 = vcvt.f32.s32 %v2742_v13  ;;  %v2812_v13 = vcvt.f32.s32 %v7832_v21 }
 0xfae   : > { %v7852_v7 = vsel %vm9928_vm14, %v7560_v32, %v2729_v46  ;;  %v2746_v47 = vadd.s32 %v2745_v29, %v2743_v17  ;;  %vm2819_vm5 = vcmp.eq.s32.totalorder %v7697_v34, %v2729_v46  ;;  %vm2820_vm7 = vcmp.eq.s32.totalorder %v7700_v54, %v2729_v46 }
 0xfaf   : > { %v7857_v58 = vsel %vm2819_vm5, 1e+30, %v7565_v12  ;;  %v7860_v3 = vsel %vm2820_vm7, 1e+30, %v7568_v53  ;;  %v2761_v54 = vcvt.f32.s32 %v7820_v63  ;;  %v2813_v46 = vshll.u32 %v2812_v13, 16 }
 0xfb0   : > { %v7864_v33 = vsel %vm9928_vm14, %v7572_v25, %v2746_v47  ;;  %v2855_v4 = vsel %vm500_vm3, %v7860_v3, inf  ;;  %vm2821_vm10 = vcmp.eq.s32.totalorder %v7711_v27, %v2746_v47  ;;  %vm2822_vm12 = vcmp.eq.s32.totalorder %v7714_v28, %v2746_v47 }
 0xfb1   : > { %v2856_v32 = vmin.f32 %v7857_v58, %v2855_v4  ;;  %v7872_v34 = vsel %vm2821_vm10, 1e+30, %v7580_v19  ;;  %v7875_v12 = vsel %vm2822_vm12, 1e+30, %v7583_v60  ;;  %v2778_v27 = vcvt.f32.s32 %v7823_v14  ;;  %v2759_v28 = vpop.xlane.xlu1 %2758  ;;  %v10190_v4 = vld [vmem:[#allocation79_spill] sm:$0xff] }
 0xfb2   : > { %v2859_v53 = vsel %vm500_vm3, %v7875_v12, inf  ;;  %v2762_v40 = vshll.u32 %v2761_v54, 16  ;;  %v2760_v2 = vcvt.f32.s32 %v2759_v28  ;;  %v2795_v19 = vcvt.f32.s32 %v7826_v31 }
 0xfb3   : > { %2857 = vmin.xlane.f32.xlu1 %v2856_v32  ;;  %v2860_v25 = vmin.f32 %v7872_v34, %v2859_v53  ;;  %v2779_v23 = vshll.u32 %v2778_v27, 16  ;;  %v10194_v27 = vld [vmem:[#allocation11_spill] sm:$0xff] }
 0xfb4   : > { %v2776_v37 = vpop.xlane.xlu2 %2775  ;;  %v2763_v60 = vadd.s32 %v2762_v40, %v2760_v2  ;;  %v2796_v63 = vshll.u32 %v2795_v19, 16 }
 0xfb5   : > { %2861 = vmin.xlane.f32.xlu2 %v2860_v25  ;;  %v2777_v56 = vcvt.f32.s32 %v2776_v37 }
 0xfb6   : > { %v7886_v36 = vsel %vm9928_vm14, %v7594_v61, %v2763_v60  ;;  %vm2823_vm15 = vcmp.eq.s32.totalorder %v7743_v43, %v2763_v60  ;;  %vm2824_vm4 = vcmp.eq.s32.totalorder %v7746_v39, %v2763_v60  ;;  %v10196_v60 = vld [vmem:[#allocation16_spill] sm:$0xff] }
 0xfb7   : > { %v2780_v62 = vadd.s32 %v2779_v23, %v2777_v56  ;;  %v7891_v31 = vsel %vm2823_vm15, 1e+30, %v7603_v44  ;;  %v7894_v6 = vsel %vm2824_vm4, 1e+30, %v7606_v10 }
 0xfb8   : > { %v2863_v43 = vsel %vm500_vm3, %v7894_v6, inf }
 0xfb9   : > { %vm2825_vm5 = vcmp.eq.s32.totalorder %v7755_v1, %v2780_v62  ;;  %vm2826_vm7 = vcmp.eq.s32.totalorder %v7758_v41, %v2780_v62  ;;  %v7900_v61 = vsel %vm9928_vm14, %v7600_v15, %v2780_v62  ;;  %v2864_v9 = vmin.f32 %v7891_v31, %v2863_v43 }
 0xfba   : > { %v7906_v44 = vsel %vm2825_vm5, 1e+30, %v7614_v18  ;;  %v7909_v10 = vsel %vm2826_vm7, 1e+30, %v7617_v5  ;;  %v2711_v1 = vshll.u32 %v2710_v30, 16 }
 0xfbb   : > { %v2867_v41 = vsel %vm500_vm3, %v7909_v10, inf  ;;  %2865 = vmin.xlane.f32.xlu0 %v2864_v9 }
 0xfbc   : > { %v2793_v51 = vpop.xlane.xlu0 %2792  ;;  %v2868_v18 = vmin.f32 %v7906_v44, %v2867_v41 }
 0xfbd   : > { %v2794_v14 = vcvt.f32.s32 %v2793_v51 }
 0xfbe   : > { %v2708_v39 = vpop.xlane.xlu1 %2707  ;;  %2869 = vmin.xlane.f32.xlu1 %v2868_v18 }
 0xfbf   : > { %v2797_v20 = vadd.s32 %v2796_v63, %v2794_v14  ;;  %v2709_v59 = vcvt.f32.s32 %v2708_v39  ;;  %v10198_v63 = vld [vmem:[#allocation15_spill] sm:$0xff] }
 0xfc1   : > { %vm2827_vm10 = vcmp.eq.s32.totalorder %v7772_v8, %v2797_v20  ;;  %vm2828_vm12 = vcmp.eq.s32.totalorder %v7775_v0, %v2797_v20  ;;  %v7917_v15 = vsel %vm9928_vm14, %v7623_v38, %v2797_v20  ;;  %v2712_v35 = vadd.s32 %v2711_v1, %v2709_v59 }
 0xfc2   : > { %v7921_v5 = vsel %vm2827_vm10, 1e+30, %v7629_v50  ;;  %v7924_v52 = vsel %vm2828_vm12, 1e+30, %v7632_v57 }
 0xfc3   : > { %v2871_v8 = vsel %vm500_vm3, %v7924_v52, inf  ;;  %v7931_v38 = vsel %vm9928_vm14, %v7639_v24, %v2712_v35  ;;  %vm2817_vm15 = vcmp.eq.s32.totalorder %v7788_v49, %v2712_v35  ;;  %vm2818_vm4 = vcmp.eq.s32.totalorder %v7791_v16, %v2712_v35 }
 0xfc4   : > { %v2872_v50 = vmin.f32 %v7921_v5, %v2871_v8  ;;  %v7937_v0 = vsel %vm2817_vm15, 1e+30, %v7645_v22  ;;  %v7940_v57 = vsel %vm2818_vm4, 1e+30, %v7648_v45  ;;  %v10186_v22 = vld [vmem:[#allocation88_spill] sm:$0xff]  ;;  %v10188_v45 = vld [vmem:[#allocation87_spill] sm:$0xff] }
 0xfc5   : > { %v2851_v21 = vsel %vm500_vm3, %v7940_v57, inf  ;;  %v10201_v8 = vld [vmem:[#allocation18_spill] sm:$0xff] }
 0xfc6   : > { %2873 = vmin.xlane.f32.xlu2 %v2872_v50  ;;  %v2810_v29 = vpop.xlane.xlu1 %2809  ;;  %v2852_v24 = vmin.f32 %v7937_v0, %v2851_v21 }
 0xfc7   : > { %v2811_v17 = vcvt.f32.s32 %v2810_v29 }
 0xfc8   : > { %2853 = vmin.xlane.f32.xlu0 %v2852_v24  ;;  %v10202_v24 = vld [vmem:[#allocation17_spill] sm:$0xff] }
 0xfc9   : > { %v2814_v49 = vadd.s32 %v2813_v46, %v2811_v17 }
 0xfcb   : > { %vm2829_vm5 = vcmp.eq.s32.totalorder %v7805_v55, %v2814_v49  ;;  %vm2830_vm7 = vcmp.eq.s32.totalorder %v7808_v48, %v2814_v49  ;;  %v7949_v16 = vsel %vm9928_vm14, %v10186_v22, %v2814_v49  ;;  %v10193_v48 = vld [vmem:[#allocation12_spill] sm:$0xff] }
 0xfcc   : > { %10187 = vst [vmem:[#allocation88_spill] sm:$0xff] %v7949_v16  ;;  %v7952_v47 = vsel %vm2829_vm5, 1e+30, %v10188_v45  ;;  %v7955_v32 = vsel %vm2830_vm7, 1e+30, %v10190_v4  ;;  %v10204_v4 = vld [vmem:[#allocation14_spill] sm:$0xff] }
 0xfcd   : > { %10189 = vst [vmem:[#allocation87_spill] sm:$0xff] %v7952_v47  ;;  %v2875_v53 = vsel %vm500_vm3, %v7955_v32, inf }
 0xfce   : > { %10191 = vst [vmem:[#allocation79_spill] sm:$0xff] %v7955_v32  ;;  %v2876_v25 = vmin.f32 %v7952_v47, %v2875_v53 }
 0xfd0   : > { %2877 = vmin.xlane.f32.xlu0 %v2876_v25 }
0x101e   : > { %v7960_v54 = vpop.xlane.xlu2 %2849 }
0x101f   : > { %10192 = vst [vmem:[#allocation96_spill] sm:$0xff] %v7960_v54  ;;  %vm2879_vm10 = vcmp.le.f32.partialorder %v7842_v11, %v7960_v54  ;;  %vm2880_vm12 = vcmp.le.f32.partialorder %v7845_v42, %v7960_v54 }
0x1020   : > { %v7967_v55 = vsel %vm2879_vm10, %v10193_v48, 2147483647  ;;  %v7970_v28 = vsel %vm2880_vm12, %v10194_v27, 2147483647 }
0x1021   : > { %v2911_v40 = vsel %vm500_vm3, %v7970_v28, 2147483647 }
0x1022   : > { %vm2912_vm15 = vcmp.lt.s32.totalorder %v7967_v55, %v2911_v40 }
0x1023   : > { %v7976_v2 = vsel %vm2912_vm15, %v7967_v55, %v2911_v40 }
0x1024   : > { %v2915_v19 = vshra.s32 %v7976_v2, 16 }
0x1026   : > { %v7979_v37 = vcvt.s32.f32 %v2915_v19  ;;  %v7981_v23 = vpop.xlane.xlu1 %2857 }
0x1027   : > { %10195 = vst [vmem:[#allocation97_spill] sm:$0xff] %v7981_v23  ;;  %vm2883_vm4 = vcmp.le.f32.partialorder %v7857_v58, %v7981_v23  ;;  %vm2884_vm5 = vcmp.le.f32.partialorder %v7860_v3, %v7981_v23  ;;  %v2914_v23 = vand.u32 65535, %v7976_v2 }
0x1028   : > { %2918 = vmin.xlane.f32.xlu1 %v7979_v37  ;;  %v7989_v56 = vsel %vm2883_vm4, %v10196_v60, 2147483647  ;;  %v7992_v30 = vsel %vm2884_vm5, %v10194_v27, 2147483647  ;;  %v7994_v62 = vpop.xlane.xlu2 %2861 }
0x1029   : > { %10197 = vst [vmem:[#allocation98_spill] sm:$0xff] %v7994_v62  ;;  %v2945_v51 = vsel %vm500_vm3, %v7992_v30, 2147483647  ;;  %vm2885_vm7 = vcmp.le.f32.partialorder %v7872_v34, %v7994_v62  ;;  %vm2886_vm10 = vcmp.le.f32.partialorder %v7875_v12, %v7994_v62  ;;  %v2916_v48 = vcvt.s32.f32 %v2914_v23 }
0x102a   : > { %vm2946_vm12 = vcmp.lt.s32.totalorder %v7989_v56, %v2945_v51  ;;  %v8004_v14 = vsel %vm2885_vm7, %v10198_v63, 2147483647  ;;  %v8007_v43 = vsel %vm2886_vm10, %v10194_v27, 2147483647 }
0x102b   : > { %v2962_v39 = vsel %vm500_vm3, %v8007_v43, 2147483647  ;;  %v8012_v20 = vsel %vm2946_vm12, %v7989_v56, %v2945_v51 }
0x102c   : > { %vm2963_vm15 = vcmp.lt.s32.totalorder %v8004_v14, %v2962_v39  ;;  %v2949_v9 = vshra.s32 %v8012_v20, 16 }
0x102d   : > { %v8017_v1 = vsel %vm2963_vm15, %v8004_v14, %v2962_v39 }
0x102e   : > { %v8019_v59 = vcvt.s32.f32 %v2949_v9  ;;  %v2966_v41 = vshra.s32 %v8017_v1, 16  ;;  %v8026_v35 = vpop.xlane.xlu0 %2865  ;;  %v2965_v54 = vand.u32 65535, %v8017_v1 }
0x102f   : > { %10199 = vst [vmem:[#allocation99_spill] sm:$0xff] %v8026_v35  ;;  %vm2887_vm4 = vcmp.le.f32.partialorder %v7891_v31, %v8026_v35  ;;  %vm2888_vm5 = vcmp.le.f32.partialorder %v7894_v6, %v8026_v35 }
0x1030   : > { %2952 = vmin.xlane.f32.xlu0 %v8019_v59  ;;  %v8023_v18 = vcvt.s32.f32 %v2966_v41  ;;  %v8035_v50 = vsel %vm2887_vm4, %v10201_v8, 2147483647  ;;  %v8038_v21 = vsel %vm2888_vm5, %v10194_v27, 2147483647  ;;  %v10206_v41 = vld [vmem:[#allocation13_spill] sm:$0xff]  ;;  %v2967_v16 = vcvt.s32.f32 %v2965_v54 }
0x1031   : > { %v8032_v13 = vpop.xlane.xlu1 %2869  ;;  %v2979_v29 = vsel %vm500_vm3, %v8038_v21, 2147483647 }
0x1032   : > { %2969 = vmin.xlane.f32.xlu1 %v8023_v18  ;;  %10200 = vst [vmem:[#allocation100_spill] sm:$0xff] %v8032_v13  ;;  %vm2889_vm7 = vcmp.le.f32.partialorder %v7906_v44, %v8032_v13  ;;  %vm2890_vm10 = vcmp.le.f32.partialorder %v7909_v10, %v8032_v13  ;;  %vm2980_vm12 = vcmp.lt.s32.totalorder %v8035_v50, %v2979_v29 }
0x1033   : > { %v8047_v46 = vsel %vm2889_vm7, %v10202_v24, 2147483647  ;;  %v8050_v17 = vsel %vm2890_vm10, %v10194_v27, 2147483647  ;;  %v8058_v45 = vsel %vm2980_vm12, %v8035_v50, %v2979_v29 }
0x1034   : > { %v2996_v49 = vsel %vm500_vm3, %v8050_v17, 2147483647  ;;  %v2983_v19 = vshra.s32 %v8058_v45, 16 }
0x1035   : > { %vm2997_vm15 = vcmp.lt.s32.totalorder %v8047_v46, %v2996_v49 }
0x1036   : > { %v2998_v40 = vsel %vm2997_vm15, %v8047_v46, %v2996_v49  ;;  %v2985_v13 = vcvt.s32.f32 %v2983_v19  ;;  %v10208_v19 = vld [vmem:[#allocation20_spill] sm:$0xff] }
0x1037   : > { %v3000_v9 = vshra.s32 %v2998_v40, 16 }
0x1038   : > { %2986 = vmin.xlane.f32.xlu2 %v2985_v13 }
0x1039   : > { %v8055_v22 = vpop.xlane.xlu2 %2873 }
0x103a   : > { %10203 = vst [vmem:[#allocation101_spill] sm:$0xff] %v8055_v22  ;;  %vm2891_vm4 = vcmp.le.f32.partialorder %v7921_v5, %v8055_v22  ;;  %vm2892_vm5 = vcmp.le.f32.partialorder %v7924_v52, %v8055_v22  ;;  %v3002_v22 = vcvt.s32.f32 %v3000_v9 }
0x103b   : > { %v8066_v53 = vsel %vm2891_vm4, %v10204_v4, 2147483647  ;;  %v8069_v25 = vsel %vm2892_vm5, %v10194_v27, 2147483647  ;;  %v8075_v39 = vpop.xlane.xlu0 %2853 }
0x103c   : > { %v3013_v51 = vsel %vm500_vm3, %v8069_v25, 2147483647  ;;  %10205 = vst [vmem:[#allocation102_spill] sm:$0xff] %v8075_v39  ;;  %vm2881_vm10 = vcmp.le.f32.partialorder %v7937_v0, %v8075_v39  ;;  %vm2882_vm12 = vcmp.le.f32.partialorder %v7940_v57, %v8075_v39  ;;  %3003 = vmin.xlane.f32.xlu0 %v3002_v22 }
0x103d   : > { %vm3014_vm7 = vcmp.lt.s32.totalorder %v8066_v53, %v3013_v51  ;;  %v8083_v29 = vsel %vm2881_vm10, %v10206_v41, 2147483647  ;;  %v8086_v49 = vsel %vm2882_vm12, %v10194_v27, 2147483647 }
0x103e   : > { %v2928_v4 = vsel %vm500_vm3, %v8086_v49, 2147483647  ;;  %v3015_v8 = vsel %vm3014_vm7, %v8066_v53, %v3013_v51 }
0x103f   : > { %vm2929_vm15 = vcmp.lt.s32.totalorder %v8083_v29, %v2928_v4  ;;  %v3017_v24 = vshra.s32 %v3015_v8, 16 }
0x1040   : > { %v2930_v39 = vsel %vm2929_vm15, %v8083_v29, %v2928_v4 }
0x1041   : > { %v3019_v35 = vcvt.s32.f32 %v3017_v24  ;;  %v2932_v41 = vshra.s32 %v2930_v39, 16 }
0x1043   : > { %v8093_v63 = vpop.xlane.xlu0 %2877  ;;  %3020 = vmin.xlane.f32.xlu1 %v3019_v35  ;;  %v2934_v60 = vcvt.s32.f32 %v2932_v41 }
0x1044   : > { %10207 = vst [vmem:[#allocation103_spill] sm:$0xff] %v8093_v63  ;;  %vm2893_vm4 = vcmp.le.f32.partialorder %v7952_v47, %v8093_v63  ;;  %vm2894_vm5 = vcmp.le.f32.partialorder %v7955_v32, %v8093_v63 }
0x1045   : > { %v8100_v51 = vsel %vm2893_vm4, %v10208_v19, 2147483647  ;;  %v8103_v9 = vsel %vm2894_vm5, %v10194_v27, 2147483647  ;;  %2935 = vmin.xlane.f32.xlu2 %v2934_v60  ;;  %v2948_v27 = vand.u32 65535, %v8012_v20 }
0x1046   : > { %v3030_v24 = vsel %vm500_vm3, %v8103_v9, 2147483647 }
0x1047   : > { %vm3031_vm7 = vcmp.lt.s32.totalorder %v8100_v51, %v3030_v24  ;;  %v2950_v47 = vcvt.s32.f32 %v2948_v27  ;;  %v3016_v27 = vand.u32 65535, %v3015_v8 }
0x1048   : > { %v3032_v4 = vsel %vm3031_vm7, %v8100_v51, %v3030_v24 }
0x1049   : > { %v3034_v41 = vshra.s32 %v3032_v4, 16  ;;  %v3033_v8 = vand.u32 65535, %v3032_v4 }
0x104b   : > { %v3036_v62 = vcvt.s32.f32 %v3034_v41 }
0x104d   : > { %3037 = vmin.xlane.f32.xlu2 %v3036_v62 }
0x109b   : > { %v2919_v63 = vpop.xlane.xlu1 %2918 }
0x109c   : > { %vm2920_vm10 = vcmp.eq.f32.partialorder %v7979_v37, %v2919_v63  ;;  %v2982_v37 = vand.u32 65535, %v8058_v45 }
0x109d   : > { %v2921_v19 = vsel %vm2920_vm10, %v2916_v48, inf  ;;  %v2999_v48 = vand.u32 65535, %v2998_v40 }
0x109e   : > { %2922 = vmin.xlane.f32.xlu0 %v2921_v19  ;;  %v2984_v1 = vcvt.s32.f32 %v2982_v37 }
0x109f   : > { %v3001_v19 = vcvt.s32.f32 %v2999_v48 }
0x10a3   : > { %v2953_v32 = vpop.xlane.xlu0 %2952 }
0x10a4   : > { %vm2954_vm12 = vcmp.eq.f32.partialorder %v8019_v59, %v2953_v32  ;;  %v3018_v59 = vcvt.s32.f32 %v3016_v27 }
0x10a5   : > { %v2970_v24 = vpop.xlane.xlu1 %2969  ;;  %v2955_v41 = vsel %vm2954_vm12, %v2950_v47, inf }
0x10a6   : > { %vm2971_vm15 = vcmp.eq.f32.partialorder %v8023_v18, %v2970_v24  ;;  %2956 = vmin.xlane.f32.xlu2 %v2955_v41  ;;  %v2931_v18 = vand.u32 65535, %v2930_v39  ;;  %v2925_v39 = vcvt.f32.s32 %v2919_v63  ;;  %v2959_v63 = vcvt.f32.s32 %v2953_v32 }
0x10a7   : > { %v2972_v2 = vsel %vm2971_vm15, %v2967_v16, inf  ;;  %vm9936_vm15 = vcmask 80896  }
0x10a8   : > { %2973 = vmin.xlane.f32.xlu0 %v2972_v2  ;;  %v2933_v41 = vcvt.s32.f32 %v2931_v18  ;;  %v3035_v2 = vcvt.s32.f32 %v3033_v8 }
0x10ab   : > { %v8116_v23 = vpop.xlane.xlu2 %2986 }
0x10ac   : > { %vm2988_vm4 = vcmp.eq.f32.partialorder %v2985_v13, %v8116_v23 }
0x10ad   : > { %v2989_v47 = vsel %vm2988_vm4, %v2984_v1, inf }
0x10ae   : > { %2990 = vmin.xlane.f32.xlu1 %v2989_v47 }
0x10af   : > { %v8118_v20 = vpop.xlane.xlu0 %3003 }
0x10b0   : > { %vm3005_vm5 = vcmp.eq.f32.partialorder %v3002_v22, %v8118_v20 }
0x10b1   : > { %v3006_v54 = vsel %vm3005_vm5, %v3001_v19, inf }
0x10b2   : > { %3007 = vmin.xlane.f32.xlu2 %v3006_v54  ;;  %v2976_v54 = vcvt.f32.s32 %v2970_v24 }
0x10b6   : > { %v8122_v16 = vpop.xlane.xlu1 %3020 }
0x10b7   : > { %vm3022_vm7 = vcmp.eq.f32.partialorder %v3019_v35, %v8122_v16  ;;  %v2926_v35 = vshll.u32 %v2925_v39, 16  ;;  %v3027_v8 = vcvt.f32.s32 %v8122_v16 }
0x10b8   : > { %v3023_v45 = vsel %vm3022_vm7, %v3018_v59, inf  ;;  %v8125_v40 = vpop.xlane.xlu2 %2935 }
0x10b9   : > { %3024 = vmin.xlane.f32.xlu0 %v3023_v45  ;;  %vm2937_vm10 = vcmp.eq.f32.partialorder %v2934_v60, %v8125_v40 }
0x10ba   : > { %v2938_v13 = vsel %vm2937_vm10, %v2933_v41, inf }
0x10bb   : > { %2939 = vmin.xlane.f32.xlu1 %v2938_v13 }
0x10c0   : > { %v8128_v22 = vpop.xlane.xlu2 %3037 }
0x10c1   : > { %vm3039_vm12 = vcmp.eq.f32.partialorder %v3036_v62, %v8128_v22 }
0x10c2   : > { %v3040_v37 = vsel %vm3039_vm12, %v3035_v2, inf }
0x10c3   : > { %3041 = vmin.xlane.f32.xlu1 %v3040_v37 }
0x1111   : > { %v2923_v48 = vpop.xlane.xlu0 %2922 }
0x1112   : > { %v2924_v1 = vcvt.f32.s32 %v2923_v48 }
0x1114   : > { %v2927_v19 = vadd.s32 %v2926_v35, %v2924_v1 }
0x1116   : > { %vm3047_vm4 = vcmp.eq.s32.totalorder %v7967_v55, %v2927_v19  ;;  %vm3048_vm5 = vcmp.eq.s32.totalorder %v7970_v28, %v2927_v19  ;;  %v8135_v60 = vsel %vm9936_vm15, %v7837_v26, %v2927_v19  ;;  %v2960_v28 = vshll.u32 %v2959_v63, 16 }
0x1117   : > { %v8138_v4 = vsel %vm3047_vm4, 1e+30, %v7842_v11  ;;  %v8141_v62 = vsel %vm3048_vm5, 1e+30, %v7845_v42  ;;  %v2977_v26 = vshll.u32 %v2976_v54, 16  ;;  %v3028_v19 = vshll.u32 %v3027_v8, 16 }
0x1118   : > { %v3079_v27 = vsel %vm500_vm3, %v8141_v62, inf  ;;  %v2942_v63 = vcvt.f32.s32 %v8125_v40 }
0x1119   : > { %v3080_v47 = vmin.f32 %v8138_v4, %v3079_v27  ;;  %v2957_v55 = vpop.xlane.xlu2 %2956 }
0x111a   : > { %v2958_v59 = vcvt.f32.s32 %v2957_v55  ;;  %v2943_v54 = vshll.u32 %v2942_v63, 16 }
0x111b   : > { %3081 = vmin.xlane.f32.xlu2 %v3080_v47  ;;  %v2974_v18 = vpop.xlane.xlu0 %2973 }
0x111c   : > { %v2961_v45 = vadd.s32 %v2960_v28, %v2958_v59  ;;  %v2975_v41 = vcvt.f32.s32 %v2974_v18  ;;  %v3044_v18 = vcvt.f32.s32 %v8128_v22 }
0x111e   : > { %vm3051_vm7 = vcmp.eq.s32.totalorder %v7989_v56, %v2961_v45  ;;  %vm3052_vm10 = vcmp.eq.s32.totalorder %v7992_v30, %v2961_v45  ;;  %v8150_v11 = vsel %vm9936_vm15, %v7852_v7, %v2961_v45  ;;  %v2978_v42 = vadd.s32 %v2977_v26, %v2975_v41 }
0x111f   : > { %v8153_v32 = vsel %vm3051_vm7, 1e+30, %v7857_v58  ;;  %v8156_v24 = vsel %vm3052_vm10, 1e+30, %v7860_v3 }
0x1120   : > { %vm3053_vm12 = vcmp.eq.s32.totalorder %v8004_v14, %v2978_v42  ;;  %vm3054_vm4 = vcmp.eq.s32.totalorder %v8007_v43, %v2978_v42  ;;  %v8162_v56 = vsel %vm9936_vm15, %v7864_v33, %v2978_v42  ;;  %v3087_v30 = vsel %vm500_vm3, %v8156_v24, inf }
0x1121   : > { %v3088_v7 = vmin.f32 %v8153_v32, %v3087_v30  ;;  %v8168_v13 = vsel %vm3053_vm12, 1e+30, %v7872_v34  ;;  %v8171_v58 = vsel %vm3054_vm4, 1e+30, %v7875_v12  ;;  %v2993_v33 = vcvt.f32.s32 %v8116_v23  ;;  %v2991_v2 = vpop.xlane.xlu1 %2990  ;;  %v10213_v30 = vld [vmem:[#allocation79_spill] sm:$0xff] }
0x1122   : > { %v3091_v3 = vsel %vm500_vm3, %v8171_v58, inf  ;;  %v3010_v43 = vcvt.f32.s32 %v8118_v20  ;;  %v2992_v48 = vcvt.f32.s32 %v2991_v2  ;;  %v10218_v2 = vld [vmem:[#allocation23_spill] sm:$0xff] }
0x1123   : > { %3089 = vmin.xlane.f32.xlu1 %v3088_v7  ;;  %v3092_v14 = vmin.f32 %v8168_v13, %v3091_v3  ;;  %v2994_v34 = vshll.u32 %v2993_v33, 16  ;;  %v10215_v33 = vld [vmem:[#allocation29_spill] sm:$0xff] }
0x1124   : > { %v3011_v39 = vshll.u32 %v3010_v43, 16  ;;  %v10217_v43 = vld [vmem:[#allocation40_spill] sm:$0xff] }
0x1125   : > { %3093 = vmin.xlane.f32.xlu2 %v3092_v14  ;;  %v3008_v37 = vpop.xlane.xlu2 %3007  ;;  %v2995_v35 = vadd.s32 %v2994_v34, %v2992_v48  ;;  %v10219_v34 = vld [vmem:[#allocation21_spill] sm:$0xff]  ;;  %v10220_v48 = vld [vmem:[#allocation38_spill] sm:$0xff] }
0x1126   : > { %v3009_v12 = vcvt.f32.s32 %v3008_v37 }
0x1127   : > { %vm3055_vm5 = vcmp.eq.s32.totalorder %v8035_v50, %v2995_v35  ;;  %vm3056_vm7 = vcmp.eq.s32.totalorder %v8038_v21, %v2995_v35  ;;  %v8184_v23 = vsel %vm9936_vm15, %v7886_v36, %v2995_v35  ;;  %v10221_v35 = vld [vmem:[#allocation39_spill] sm:$0xff] }
0x1128   : > { %v3012_v1 = vadd.s32 %v3011_v39, %v3009_v12  ;;  %v8193_v40 = vsel %vm3055_vm5, 1e+30, %v7891_v31  ;;  %v8196_v50 = vsel %vm3056_vm7, 1e+30, %v7894_v6 }
0x112a   : > { %vm3057_vm10 = vcmp.eq.s32.totalorder %v8047_v46, %v3012_v1  ;;  %vm3058_vm12 = vcmp.eq.s32.totalorder %v8050_v17, %v3012_v1  ;;  %v8190_v20 = vsel %vm9936_vm15, %v7900_v61, %v3012_v1  ;;  %v3095_v17 = vsel %vm500_vm3, %v8196_v50, inf }
0x112b   : > { %v8199_v21 = vsel %vm3057_vm10, 1e+30, %v7906_v44  ;;  %v8202_v36 = vsel %vm3058_vm12, 1e+30, %v7909_v10  ;;  %v3096_v55 = vmin.f32 %v8193_v40, %v3095_v17  ;;  %v10225_v17 = vld [vmem:[#allocation96_spill] sm:$0xff] }
0x112c   : > { %v3025_v27 = vpop.xlane.xlu0 %3024  ;;  %v3099_v61 = vsel %vm500_vm3, %v8202_v36, inf }
0x112d   : > { %v3026_v16 = vcvt.f32.s32 %v3025_v27  ;;  %v3100_v6 = vmin.f32 %v8199_v21, %v3099_v61  ;;  %3097 = vmin.xlane.f32.xlu0 %v3096_v55  ;;  %v10223_v27 = vld [vmem:[#allocation63_spill] sm:$0xff]  ;;  %v10227_v55 = vld [vmem:[#allocation6_spill] sm:$0xff] }
0x112e   : > { %v2940_v46 = vpop.xlane.xlu1 %2939 }
0x112f   : > { %v3029_v47 = vadd.s32 %v3028_v19, %v3026_v16  ;;  %v2941_v31 = vcvt.f32.s32 %v2940_v46  ;;  %3101 = vmin.xlane.f32.xlu1 %v3100_v6  ;;  %v10222_v19 = vld [vmem:[#allocation55_spill] sm:$0xff] }
0x1130   : > { %v10224_v46 = vld [vmem:[#allocation71_spill] sm:$0xff] }
0x1131   : > { %vm3059_vm4 = vcmp.eq.s32.totalorder %v8066_v53, %v3029_v47  ;;  %vm3060_vm5 = vcmp.eq.s32.totalorder %v8069_v25, %v3029_v47  ;;  %v8214_v44 = vsel %vm9936_vm15, %v7917_v15, %v3029_v47  ;;  %v2944_v10 = vadd.s32 %v2943_v54, %v2941_v31  ;;  %v10226_v31 = vld [vmem:[#allocation30_spill] sm:$0xff] }
0x1132   : > { %v8217_v28 = vsel %vm3059_vm4, 1e+30, %v7921_v5  ;;  %v8220_v59 = vsel %vm3060_vm5, 1e+30, %v7924_v52  ;;  %vm9935_vm5 = vcmask 89088   ;;  %v4210_v6 = vsel %vm4207_vm8, %v10227_v55, %v10226_v31  ;;  %v10246_v55 = vld [vmem:[#allocation89_spill] sm:$0xff] }
0x1133   : > { %v3103_v53 = vsel %vm500_vm3, %v8220_v59, inf  ;;  %vm3049_vm7 = vcmp.eq.s32.totalorder %v8083_v29, %v2944_v10  ;;  %vm3050_vm10 = vcmp.eq.s32.totalorder %v8086_v49, %v2944_v10  ;;  %v8229_v15 = vsel %vm9936_vm15, %v7931_v38, %v2944_v10  ;;  %v10209_v38 = vld [vmem:[#allocation88_spill] sm:$0xff] }
0x1134   : > { %v3104_v25 = vmin.f32 %v8217_v28, %v3103_v53  ;;  %v8233_v5 = vsel %vm3049_vm7, 1e+30, %v7937_v0  ;;  %v8236_v52 = vsel %vm3050_vm10, 1e+30, %v7940_v57  ;;  %v3045_v49 = vshll.u32 %v3044_v18, 16  ;;  %v10211_v57 = vld [vmem:[#allocation87_spill] sm:$0xff] }
0x1135   : > { %v3083_v22 = vsel %vm500_vm3, %v8236_v52, inf  ;;  %v10229_v18 = vld [vmem:[#allocation41_spill] sm:$0xff] }
0x1136   : > { %3105 = vmin.xlane.f32.xlu2 %v3104_v25  ;;  %v3042_v26 = vpop.xlane.xlu1 %3041  ;;  %v3084_v29 = vmin.f32 %v8233_v5, %v3083_v22  ;;  %v4219_v53 = vsel %vm4216_vm9, %v4210_v6, %v10229_v18  ;;  %v10230_v25 = vld [vmem:[#allocation12_spill] sm:$0xff]  ;;  %v10247_v18 = vld [vmem:[#allocation81_spill] sm:$0xff] }
0x1137   : > { %v3043_v45 = vcvt.f32.s32 %v3042_v26  ;;  %v10231_v26 = vld [vmem:[#allocation11_spill] sm:$0xff] }
0x1138   : > { %3085 = vmin.xlane.f32.xlu0 %v3084_v29 }
0x1139   : > { %v3046_v41 = vadd.s32 %v3045_v49, %v3043_v45  ;;  %v10232_v49 = vld [vmem:[#allocation31_spill] sm:$0xff]  ;;  %v10233_v45 = vld [vmem:[#allocation5_spill] sm:$0xff] }
0x113b   : > { %vm3061_vm12 = vcmp.eq.s32.totalorder %v8100_v51, %v3046_v41  ;;  %vm3062_vm4 = vcmp.eq.s32.totalorder %v8103_v9, %v3046_v41  ;;  %v8245_v0 = vsel %vm9936_vm15, %v10209_v38, %v3046_v41  ;;  %v10216_v51 = vld [vmem:[#allocation7_spill] sm:$0xff]  ;;  %v4211_v41 = vsel %vm4207_vm8, %v10233_v45, %v10232_v49  ;;  %v10234_v38 = vld [vmem:[#allocation25_spill] sm:$0xff] }
0x113c   : > { %10210 = vst [vmem:[#allocation88_spill] sm:$0xff] %v8245_v0  ;;  %v8248_v42 = vsel %vm3061_vm12, 1e+30, %v10211_v57  ;;  %v8251_v7 = vsel %vm3062_vm4, 1e+30, %v10213_v30  ;;  %v4208_v9 = vsel %vm4207_vm8, %v10216_v51, %v10215_v33  ;;  %v4228_v57 = vsel %vm4225_vm6, %v4219_v53, %v10234_v38  ;;  %v10236_v33 = vld [vmem:[#allocation22_spill] sm:$0xff] }
0x113d   : > { %10212 = vst [vmem:[#allocation87_spill] sm:$0xff] %v8248_v42  ;;  %v3107_v3 = vsel %vm500_vm3, %v8251_v7, inf  ;;  %v4217_v8 = vsel %vm4216_vm9, %v4208_v9, %v10217_v43  ;;  %v4237_v51 = vsel %vm4234_vm13, %v4228_v57, %v10236_v33  ;;  %v10237_v9 = vld [vmem:[#allocation26_spill] sm:$0xff]  ;;  %v10248_v49 = vld [vmem:[#allocation97_spill] sm:$0xff]  ;;  %v10252_v33 = vld [vmem:[#allocation16_spill] sm:$0xff] }
0x113e   : > { %10214 = vst [vmem:[#allocation79_spill] sm:$0xff] %v8251_v7  ;;  %v3108_v14 = vmin.f32 %v8248_v42, %v3107_v3  ;;  %v4226_v37 = vsel %vm4225_vm6, %v4217_v8, %v10218_v2  ;;  %v10235_v3 = vld [vmem:[#allocation42_spill] sm:$0xff]  ;;  %v10238_v8 = vld [vmem:[#allocation56_spill] sm:$0xff] }
0x113f   : > { %v4235_v39 = vsel %vm4234_vm13, %v4226_v37, %v10219_v34  ;;  %v4246_v2 = vsel %vm4243_vm11, %v4237_v51, %v10238_v8  ;;  %v10239_v34 = vld [vmem:[#allocation49_spill] sm:$0xff]  ;;  %v10249_v38 = vld [vmem:[#allocation90_spill] sm:$0xff] }
0x1140   : > { %3109 = vmin.xlane.f32.xlu0 %v3108_v14  ;;  %v4244_v12 = vsel %vm4243_vm11, %v4235_v39, %v10220_v48  ;;  %v4220_v14 = vsel %vm4216_vm9, %v4211_v41, %v10235_v3  ;;  %v10240_v48 = vld [vmem:[#allocation64_spill] sm:$0xff]  ;;  %v10251_v3 = vld [vmem:[#allocation98_spill] sm:$0xff] }
0x1141   : > { %v4253_v1 = vsel %vm4252_vm0, %v4244_v12, %v10221_v35  ;;  %v4229_v43 = vsel %vm4225_vm6, %v4220_v14, %v10237_v9  ;;  %v4255_v12 = vsel %vm4252_vm0, %v4246_v2, %v10240_v48 }
0x1142   : > { %v4262_v63 = vsel %vm4261_vm2, %v4253_v1, %v10222_v19  ;;  %v4238_v39 = vsel %vm4234_vm13, %v4229_v43, %v10239_v34  ;;  %v10241_v1 = vld [vmem:[#allocation57_spill] sm:$0xff]  ;;  %v10254_v34 = vld [vmem:[#allocation15_spill] sm:$0xff] }
0x1143   : > { %v4270_v16 = vsel %vm296_vm1, %v4262_v63, %v10223_v27  ;;  %v4247_v19 = vsel %vm4243_vm11, %v4238_v39, %v10241_v1  ;;  %v10242_v63 = vld [vmem:[#allocation72_spill] sm:$0xff] }
0x1144   : > { %v4279_v47 = vsel %vm9928_vm14, %v4270_v16, %v10224_v46  ;;  %v4264_v27 = vsel %vm4261_vm2, %v4255_v12, %v10242_v63  ;;  %v10243_v16 = vld [vmem:[#allocation65_spill] sm:$0xff] }
0x1145   : > { %v4288_v61 = vsel %vm9936_vm15, %v4279_v47, %v10225_v17  ;;  %v4256_v46 = vsel %vm4252_vm0, %v4247_v19, %v10243_v16  ;;  %v10244_v47 = vld [vmem:[#allocation80_spill] sm:$0xff] }
0x1146   : > { %v4272_v17 = vsel %vm296_vm1, %v4264_v27, %v10244_v47  ;;  %v10256_v47 = vld [vmem:[#allocation10_spill] sm:$0xff] }
0x1147   : > { %v4281_v6 = vsel %vm9928_vm14, %v4272_v17, %v10246_v55  ;;  %v10258_v55 = vld [vmem:[#allocation24_spill] sm:$0xff] }
0x1148   : > { %v4290_v45 = vsel %vm9936_vm15, %v4281_v6, %v10248_v49  ;;  %v10260_v49 = vld [vmem:[#allocation35_spill] sm:$0xff] }
0x118e   : > { %v3082_v54 = vpop.xlane.xlu2 %3081 }
0x118f   : > { %vm3111_vm7 = vcmp.le.f32.partialorder %v8138_v4, %v3082_v54  ;;  %vm3112_vm10 = vcmp.le.f32.partialorder %v8141_v62, %v3082_v54  ;;  %v8283_v10 = vsel %vm9935_vm5, %v4288_v61, %v3082_v54  ;;  %v10245_v54 = vld [vmem:[#allocation73_spill] sm:$0xff] }
0x1190   : > { %10228 = vst [vmem:[#allocation29_spill] sm:$0xff] %v8283_v10  ;;  %v8288_v22 = vsel %vm3111_vm7, %v10230_v25, 2147483647  ;;  %v8291_v29 = vsel %vm3112_vm10, %v10231_v26, 2147483647  ;;  %v4265_v31 = vsel %vm4261_vm2, %v4256_v46, %v10245_v54  ;;  %v10255_v46 = vld [vmem:[#allocation32_spill] sm:$0xff] }
0x1191   : > { %v3143_v30 = vsel %vm500_vm3, %v8291_v29, 2147483647  ;;  %v4273_v53 = vsel %vm296_vm1, %v4265_v31, %v10247_v18  ;;  %v4212_v17 = vsel %vm4207_vm8, %v10256_v47, %v10255_v46  ;;  %v10257_v54 = vld [vmem:[#allocation43_spill] sm:$0xff]  ;;  %v10259_v18 = vld [vmem:[#allocation50_spill] sm:$0xff]  ;;  %v10267_v47 = vld [vmem:[#allocation53_spill] sm:$0xff] }
0x1192   : > { %vm3144_vm12 = vcmp.lt.s32.totalorder %v8288_v22, %v3143_v30  ;;  %v4282_v57 = vsel %vm9928_vm14, %v4273_v53, %v10249_v38  ;;  %v4221_v31 = vsel %vm4216_vm9, %v4212_v17, %v10257_v54  ;;  %v10262_v38 = vld [vmem:[#allocation58_spill] sm:$0xff] }
0x1193   : > { %v8310_v37 = vsel %vm3144_vm12, %v8288_v22, %v3143_v30  ;;  %v4291_v14 = vsel %vm9936_vm15, %v4282_v57, %v10251_v3  ;;  %v4230_v6 = vsel %vm4225_vm6, %v4221_v31, %v10258_v55  ;;  %v10263_v3 = vld [vmem:[#allocation46_spill] sm:$0xff]  ;;  %v10269_v55 = vld [vmem:[#allocation61_spill] sm:$0xff] }
0x1194   : > { %v3147_v35 = vshra.s32 %v8310_v37, 16  ;;  %v4239_v53 = vsel %vm4234_vm13, %v4230_v6, %v10259_v18  ;;  %v10268_v54 = vld [vmem:[#allocation82_spill] sm:$0xff]  ;;  %v10270_v18 = vld [vmem:[#allocation91_spill] sm:$0xff] }
0x1195   : > { %v4248_v57 = vsel %vm4243_vm11, %v4239_v53, %v10262_v38 }
0x1196   : > { %v8325_v61 = vcvt.s32.f32 %v3147_v35  ;;  %v3090_v41 = vpop.xlane.xlu1 %3089 }
0x1197   : > { %vm3115_vm4 = vcmp.le.f32.partialorder %v8153_v32, %v3090_v41  ;;  %vm3116_vm7 = vcmp.le.f32.partialorder %v8156_v24, %v3090_v41  ;;  %v8341_v30 = vsel %vm9935_vm5, %v4290_v45, %v3090_v41  ;;  %v10261_v45 = vld [vmem:[#allocation4_spill] sm:$0xff] }
0x1198   : > { %3150 = vmin.xlane.f32.xlu1 %v8325_v61  ;;  %10250 = vst [vmem:[#allocation7_spill] sm:$0xff] %v8341_v30  ;;  %v8346_v51 = vsel %vm3115_vm4, %v10252_v33, 2147483647  ;;  %v8349_v9 = vsel %vm3116_vm7, %v10231_v26, 2147483647  ;;  %v3094_v43 = vpop.xlane.xlu2 %3093  ;;  %v4209_v41 = vsel %vm4207_vm8, %v10261_v45, %v10260_v49  ;;  %v3146_v30 = vand.u32 65535, %v8310_v37 }
0x1199   : > { %v3177_v8 = vsel %vm500_vm3, %v8349_v9, 2147483647  ;;  %vm3117_vm10 = vcmp.le.f32.partialorder %v8168_v13, %v3094_v43  ;;  %vm3118_vm12 = vcmp.le.f32.partialorder %v8171_v58, %v3094_v43  ;;  %v8356_v2 = vsel %vm9935_vm5, %v4291_v14, %v3094_v43  ;;  %v10264_v43 = vld [vmem:[#allocation66_spill] sm:$0xff] }
0x119a   : > { %10253 = vst [vmem:[#allocation40_spill] sm:$0xff] %v8356_v2  ;;  %vm3178_vm14 = vcmp.lt.s32.totalorder %v8346_v51, %v3177_v8  ;;  %v8360_v39 = vsel %vm3117_vm10, %v10254_v34, 2147483647  ;;  %v8363_v48 = vsel %vm3118_vm12, %v10231_v26, 2147483647  ;;  %v4218_v14 = vsel %vm4216_vm9, %v4209_v41, %v10263_v3  ;;  %v10273_v41 = vld [vmem:[#allocation99_spill] sm:$0xff] }
0x119b   : > { %v3194_v12 = vsel %vm500_vm3, %v8363_v48, 2147483647  ;;  %v8368_v35 = vsel %vm3178_vm14, %v8346_v51, %v3177_v8  ;;  %v4257_v8 = vsel %vm4252_vm0, %v4248_v57, %v10264_v43  ;;  %vm10271_vm14 = vcmask 72704   ;;  %v10274_v57 = vld [vmem:[#allocation17_spill] sm:$0xff]  ;;  %v10275_v43 = vld [vmem:[#allocation18_spill] sm:$0xff] }
0x119c   : > { %vm3195_vm4 = vcmp.lt.s32.totalorder %v8360_v39, %v3194_v12  ;;  %v3181_v1 = vshra.s32 %v8368_v35, 16  ;;  %v3148_v25 = vcvt.s32.f32 %v3146_v30 }
0x119d   : > { %v8373_v19 = vsel %vm3195_vm4, %v8360_v39, %v3194_v12  ;;  %v10265_v12 = vld [vmem:[#allocation28_spill] sm:$0xff] }
0x119e   : > { %v8375_v63 = vcvt.s32.f32 %v3181_v1  ;;  %v3198_v27 = vshra.s32 %v8373_v19, 16  ;;  %v4227_v1 = vsel %vm4225_vm6, %v4218_v14, %v10265_v12  ;;  %v10276_v12 = vld [vmem:[#allocation69_spill] sm:$0xff]  ;;  %v3197_v10 = vand.u32 65535, %v8373_v19 }
0x119f   : > { %v4236_v17 = vsel %vm4234_vm13, %v4227_v1, %v10267_v47 }
0x11a0   : > { %3184 = vmin.xlane.f32.xlu0 %v8375_v63  ;;  %v8379_v16 = vcvt.s32.f32 %v3198_v27  ;;  %v10266_v27 = vld [vmem:[#allocation74_spill] sm:$0xff]  ;;  %v4245_v6 = vsel %vm4243_vm11, %v4236_v17, %v10269_v55  ;;  %v3098_v45 = vpop.xlane.xlu0 %3097  ;;  %v10278_v17 = vld [vmem:[#allocation77_spill] sm:$0xff]  ;;  %v3199_v0 = vcvt.s32.f32 %v3197_v10 }
0x11a1   : > { %v4266_v46 = vsel %vm4261_vm2, %v4257_v8, %v10266_v27  ;;  %vm3119_vm12 = vcmp.le.f32.partialorder %v8193_v40, %v3098_v45  ;;  %vm3120_vm4 = vcmp.le.f32.partialorder %v8196_v50, %v3098_v45  ;;  %v4254_v1 = vsel %vm4252_vm0, %v4245_v6, %v10276_v12  ;;  %v10280_v6 = vld [vmem:[#allocation85_spill] sm:$0xff] }
0x11a2   : > { %3201 = vmin.xlane.f32.xlu1 %v8379_v16  ;;  %v4274_v31 = vsel %vm296_vm1, %v4266_v46, %v10268_v54  ;;  %v8412_v49 = vpop.xlane.xlu1 %3101  ;;  %v8429_v8 = vsel %vm3119_vm12, %v10275_v43, 2147483647  ;;  %v8436_v46 = vsel %vm3120_vm4, %v10231_v26, 2147483647  ;;  %v4263_v54 = vsel %vm4261_vm2, %v4254_v1, %v10278_v17  ;;  %v10282_v1 = vld [vmem:[#allocation94_spill] sm:$0xff] }
0x11a3   : > { %v4283_v53 = vsel %vm10271_vm14, %v4274_v31, %v10270_v18  ;;  %10272 = vst [vmem:[#allocation23_spill] sm:$0xff] %v8412_v49  ;;  %vm3121_vm7 = vcmp.le.f32.partialorder %v8199_v21, %v8412_v49  ;;  %vm3122_vm10 = vcmp.le.f32.partialorder %v8202_v36, %v8412_v49  ;;  %v3211_v31 = vsel %vm500_vm3, %v8436_v46, 2147483647  ;;  %v10284_v49 = vld [vmem:[#allocation102_spill] sm:$0xff] }
0x11a4   : > { %v4292_v38 = vsel %vm9936_vm15, %v4283_v53, %v10273_v41  ;;  %v8422_v3 = vsel %vm3121_vm7, %v10274_v57, 2147483647  ;;  %v8425_v14 = vsel %vm3122_vm10, %v10231_v26, 2147483647  ;;  %v4271_v18 = vsel %vm296_vm1, %v4263_v54, %v10280_v6  ;;  %v10281_v53 = vld [vmem:[#allocation14_spill] sm:$0xff] }
0x11a5   : > { %v3228_v27 = vsel %vm500_vm3, %v8425_v14, 2147483647  ;;  %v8439_v47 = vsel %vm9935_vm5, %v4292_v38, %v3098_v45  ;;  %vm3212_vm7 = vcmp.lt.s32.totalorder %v8429_v8, %v3211_v31  ;;  %vm10283_vm4 = vcmask 72704  }
0x11a6   : > { %10277 = vst [vmem:[#allocation21_spill] sm:$0xff] %v8439_v47  ;;  %vm3229_vm14 = vcmp.lt.s32.totalorder %v8422_v3, %v3228_v27  ;;  %v8463_v12 = vsel %vm3212_vm7, %v8429_v8, %v3211_v31  ;;  %v4280_v17 = vsel %vm10283_vm4, %v4271_v18, %v10282_v1  ;;  %v10286_v18 = vld [vmem:[#allocation13_spill] sm:$0xff] }
0x11a7   : > { %v3230_v38 = vsel %vm3229_vm14, %v8422_v3, %v3228_v27 }
0x11a8   : > { %v3232_v6 = vshra.s32 %v3230_v38, 16  ;;  %v3231_v30 = vand.u32 65535, %v3230_v38 }
0x11a9   : > { %v8446_v55 = vpop.xlane.xlu2 %3105 }
0x11aa   : > { %10279 = vst [vmem:[#allocation38_spill] sm:$0xff] %v8446_v55  ;;  %vm3123_vm10 = vcmp.le.f32.partialorder %v8217_v28, %v8446_v55  ;;  %vm3124_vm12 = vcmp.le.f32.partialorder %v8220_v59, %v8446_v55  ;;  %v3215_v55 = vshra.s32 %v8463_v12, 16  ;;  %v3234_v31 = vcvt.s32.f32 %v3232_v6 }
0x11ab   : > { %v8456_v45 = vsel %vm3123_vm10, %v10281_v53, 2147483647  ;;  %v8459_v41 = vsel %vm3124_vm12, %v10231_v26, 2147483647  ;;  %v4289_v53 = vsel %vm9936_vm15, %v4280_v17, %v10284_v49  ;;  %v3086_v57 = vpop.xlane.xlu0 %3085 }
0x11ac   : > { %v3245_v54 = vsel %vm500_vm3, %v8459_v41, 2147483647  ;;  %vm3113_vm14 = vcmp.le.f32.partialorder %v8233_v5, %v3086_v57  ;;  %vm3114_vm7 = vcmp.le.f32.partialorder %v8236_v52, %v3086_v57  ;;  %v8476_v27 = vsel %vm9935_vm5, %v4289_v53, %v3086_v57  ;;  %3235 = vmin.xlane.f32.xlu0 %v3234_v31 }
0x11ad   : > { %vm3246_vm10 = vcmp.lt.s32.totalorder %v8456_v45, %v3245_v54  ;;  %10285 = vst [vmem:[#allocation39_spill] sm:$0xff] %v8476_v27  ;;  %v8479_v1 = vsel %vm3113_vm14, %v10286_v18, 2147483647  ;;  %v8482_v43 = vsel %vm3114_vm7, %v10231_v26, 2147483647  ;;  %v3217_v47 = vcvt.s32.f32 %v3215_v55  ;;  %v10288_v55 = vld [vmem:[#allocation20_spill] sm:$0xff] }
0x11ae   : > { %v3247_v49 = vsel %vm3246_vm10, %v8456_v45, %v3245_v54  ;;  %v3160_v17 = vsel %vm500_vm3, %v8482_v43, 2147483647 }
0x11af   : > { %v3249_v34 = vshra.s32 %v3247_v49, 16  ;;  %vm3161_vm12 = vcmp.lt.s32.totalorder %v8479_v1, %v3160_v17  ;;  %3218 = vmin.xlane.f32.xlu2 %v3217_v47 }
0x11b0   : > { %v3162_v53 = vsel %vm3161_vm12, %v8479_v1, %v3160_v17 }
0x11b1   : > { %v3251_v57 = vcvt.s32.f32 %v3249_v34  ;;  %v3164_v6 = vshra.s32 %v3162_v53, 16 }
0x11b3   : > { %3252 = vmin.xlane.f32.xlu1 %v3251_v57  ;;  %v8489_v18 = vpop.xlane.xlu0 %3109  ;;  %v3166_v27 = vcvt.s32.f32 %v3164_v6 }
0x11b4   : > { %10287 = vst [vmem:[#allocation55_spill] sm:$0xff] %v8489_v18  ;;  %vm3125_vm4 = vcmp.le.f32.partialorder %v8248_v42, %v8489_v18  ;;  %vm3126_vm10 = vcmp.le.f32.partialorder %v8251_v7, %v8489_v18 }
0x11b5   : > { %v8496_v54 = vsel %vm3125_vm4, %v10288_v55, 2147483647  ;;  %v8499_v2 = vsel %vm3126_vm10, %v10231_v26, 2147483647  ;;  %v3180_v26 = vand.u32 65535, %v8368_v35  ;;  %v3233_v35 = vcvt.s32.f32 %v3231_v30 }
0x11b6   : > { %v3262_v34 = vsel %vm500_vm3, %v8499_v2, 2147483647 }
0x11b7   : > { %vm3263_vm14 = vcmp.lt.s32.totalorder %v8496_v54, %v3262_v34  ;;  %3167 = vmin.xlane.f32.xlu2 %v3166_v27  ;;  %v3182_v42 = vcvt.s32.f32 %v3180_v26 }
0x11b8   : > { %v3264_v17 = vsel %vm3263_vm14, %v8496_v54, %v3262_v34 }
0x11b9   : > { %v3266_v6 = vshra.s32 %v3264_v17, 16 }
0x11bb   : > { %v3268_v33 = vcvt.s32.f32 %v3266_v6 }
0x11bf   : > { %3269 = vmin.xlane.f32.xlu2 %v3268_v33 }
0x120b   : > { %v3151_v18 = vpop.xlane.xlu1 %3150 }
0x120c   : > { %vm3152_vm7 = vcmp.eq.f32.partialorder %v8325_v61, %v3151_v18 }
0x120d   : > { %v3153_v55 = vsel %vm3152_vm7, %v3148_v25, inf  ;;  %v3214_v25 = vand.u32 65535, %v8463_v12 }
0x120e   : > { %3154 = vmin.xlane.f32.xlu0 %v3153_v55  ;;  %v3248_v55 = vand.u32 65535, %v3247_v49 }
0x120f   : > { %v3216_v26 = vcvt.s32.f32 %v3214_v25  ;;  %v3157_v25 = vcvt.f32.s32 %v3151_v18 }
0x1213   : > { %v3185_v7 = vpop.xlane.xlu0 %3184 }
0x1214   : > { %vm3186_vm12 = vcmp.eq.f32.partialorder %v8375_v63, %v3185_v7  ;;  %v3250_v63 = vcvt.s32.f32 %v3248_v55 }
0x1215   : > { %v3202_v34 = vpop.xlane.xlu1 %3201  ;;  %v3187_v6 = vsel %vm3186_vm12, %v3182_v42, inf }
0x1216   : > { %vm3203_vm4 = vcmp.eq.f32.partialorder %v8379_v16, %v3202_v34  ;;  %3188 = vmin.xlane.f32.xlu2 %v3187_v6  ;;  %v3163_v16 = vand.u32 65535, %v3162_v53  ;;  %v3158_v53 = vshll.u32 %v3157_v25, 16 }
0x1217   : > { %v3204_v37 = vsel %vm3203_vm4, %v3199_v0, inf }
0x1218   : > { %3205 = vmin.xlane.f32.xlu0 %v3204_v37  ;;  %v3165_v49 = vcvt.s32.f32 %v3163_v16 }
0x121f   : > { %v8512_v61 = vpop.xlane.xlu0 %3235 }
0x1220   : > { %vm3237_vm10 = vcmp.eq.f32.partialorder %v3234_v31, %v8512_v61 }
0x1221   : > { %v3238_v42 = vsel %vm3237_vm10, %v3233_v35, inf }
0x1222   : > { %v8514_v19 = vpop.xlane.xlu2 %3218  ;;  %3239 = vmin.xlane.f32.xlu2 %v3238_v42 }
0x1223   : > { %vm3220_vm14 = vcmp.eq.f32.partialorder %v3217_v47, %v8514_v19  ;;  %v3265_v47 = vand.u32 65535, %v3264_v17 }
0x1224   : > { %v3221_v10 = vsel %vm3220_vm14, %v3216_v26, inf  ;;  %v3191_v26 = vcvt.f32.s32 %v3185_v7 }
0x1225   : > { %3222 = vmin.xlane.f32.xlu1 %v3221_v10  ;;  %v3267_v37 = vcvt.s32.f32 %v3265_v47  ;;  %v3208_v10 = vcvt.f32.s32 %v3202_v34 }
0x1226   : > { %v8518_v0 = vpop.xlane.xlu1 %3252 }
0x1227   : > { %vm3254_vm7 = vcmp.eq.f32.partialorder %v3251_v57, %v8518_v0  ;;  %v3259_v47 = vcvt.f32.s32 %v8518_v0 }
0x1228   : > { %v3255_v38 = vsel %vm3254_vm7, %v3250_v63, inf }
0x1229   : > { %3256 = vmin.xlane.f32.xlu0 %v3255_v38 }
0x122a   : > { %v8521_v12 = vpop.xlane.xlu2 %3167 }
0x122b   : > { %vm3169_vm12 = vcmp.eq.f32.partialorder %v3166_v27, %v8521_v12 }
0x122c   : > { %v3170_v31 = vsel %vm3169_vm12, %v3165_v49, inf }
0x122d   : > { %3171 = vmin.xlane.f32.xlu1 %v3170_v31 }
0x1232   : > { %v8524_v6 = vpop.xlane.xlu2 %3269 }
0x1233   : > { %vm3271_vm4 = vcmp.eq.f32.partialorder %v3268_v33, %v8524_v6 }
0x1234   : > { %v3272_v30 = vsel %vm3271_vm4, %v3267_v37, inf }
0x1235   : > { %3273 = vmin.xlane.f32.xlu1 %v3272_v30 }
0x1281   : > { %v3155_v57 = vpop.xlane.xlu0 %3154 }
0x1282   : > { %v3156_v35 = vcvt.f32.s32 %v3155_v57 }
0x1284   : > { %v3159_v55 = vadd.s32 %v3158_v53, %v3156_v35  ;;  %v3260_v35 = vshll.u32 %v3259_v47, 16 }
0x1286   : > { %vm3279_vm10 = vcmp.eq.s32.totalorder %v8288_v22, %v3159_v55  ;;  %vm3280_vm14 = vcmp.eq.s32.totalorder %v8291_v29, %v3159_v55  ;;  %v8531_v27 = vsel %vm9935_vm5, %v8135_v60, %v3159_v55  ;;  %v3192_v29 = vshll.u32 %v3191_v26, 16 }
0x1287   : > { %v8534_v17 = vsel %vm3279_vm10, 1e+30, %v8138_v4  ;;  %v8537_v33 = vsel %vm3280_vm14, 1e+30, %v8141_v62  ;;  %v3209_v60 = vshll.u32 %v3208_v10, 16  ;;  %v3174_v55 = vcvt.f32.s32 %v8521_v12 }
0x1288   : > { %v3311_v18 = vsel %vm500_vm3, %v8537_v33, inf }
0x1289   : > { %v3312_v42 = vmin.f32 %v8534_v17, %v3311_v18  ;;  %v3189_v22 = vpop.xlane.xlu2 %3188 }
0x128a   : > { %v3190_v63 = vcvt.f32.s32 %v3189_v22 }
0x128b   : > { %3313 = vmin.xlane.f32.xlu2 %v3312_v42  ;;  %v3206_v16 = vpop.xlane.xlu0 %3205 }
0x128c   : > { %v3193_v38 = vadd.s32 %v3192_v29, %v3190_v63  ;;  %v3207_v49 = vcvt.f32.s32 %v3206_v16  ;;  %v3276_v63 = vcvt.f32.s32 %v8524_v6 }
0x128e   : > { %vm3283_vm7 = vcmp.eq.s32.totalorder %v8346_v51, %v3193_v38  ;;  %vm3284_vm12 = vcmp.eq.s32.totalorder %v8349_v9, %v3193_v38  ;;  %v8546_v4 = vsel %vm9935_vm5, %v8150_v11, %v3193_v38  ;;  %v3210_v62 = vadd.s32 %v3209_v60, %v3207_v49 }
0x128f   : > { %v8549_v7 = vsel %vm3283_vm7, 1e+30, %v8153_v32  ;;  %v8552_v34 = vsel %vm3284_vm12, 1e+30, %v8156_v24 }
0x1290   : > { %vm3285_vm4 = vcmp.eq.s32.totalorder %v8360_v39, %v3210_v62  ;;  %vm3286_vm10 = vcmp.eq.s32.totalorder %v8363_v48, %v3210_v62  ;;  %v8558_v51 = vsel %vm9935_vm5, %v8162_v56, %v3210_v62  ;;  %v3319_v9 = vsel %vm500_vm3, %v8552_v34, inf }
0x1291   : > { %v3320_v11 = vmin.f32 %v8549_v7, %v3319_v9  ;;  %v8564_v31 = vsel %vm3285_vm4, 1e+30, %v8168_v13  ;;  %v8567_v32 = vsel %vm3286_vm10, 1e+30, %v8171_v58  ;;  %v3242_v56 = vcvt.f32.s32 %v8512_v61  ;;  %v10293_v9 = vld [vmem:[#allocation79_spill] sm:$0xff] }
0x1292   : > { %v3323_v24 = vsel %vm500_vm3, %v8567_v32, inf  ;;  %v3225_v48 = vcvt.f32.s32 %v8514_v19 }
0x1293   : > { %3321 = vmin.xlane.f32.xlu1 %v3320_v11  ;;  %v3324_v39 = vmin.f32 %v8564_v31, %v3323_v24  ;;  %v3243_v30 = vshll.u32 %v3242_v56, 16 }
0x1294   : > { %v3226_v57 = vshll.u32 %v3225_v48, 16  ;;  %v10297_v48 = vld [vmem:[#allocation12_spill] sm:$0xff] }
0x1295   : > { %3325 = vmin.xlane.f32.xlu2 %v3324_v39  ;;  %v3240_v37 = vpop.xlane.xlu2 %3239 }
0x1296   : > { %v3241_v25 = vcvt.f32.s32 %v3240_v37  ;;  %v10298_v37 = vld [vmem:[#allocation11_spill] sm:$0xff] }
0x1298   : > { %v3223_v13 = vpop.xlane.xlu1 %3222  ;;  %v3244_v53 = vadd.s32 %v3243_v30, %v3241_v25 }
0x1299   : > { %v3224_v58 = vcvt.f32.s32 %v3223_v13 }
0x129a   : > { %vm3289_vm14 = vcmp.eq.s32.totalorder %v8422_v3, %v3244_v53  ;;  %vm3290_vm7 = vcmp.eq.s32.totalorder %v8425_v14, %v3244_v53  ;;  %v8580_v61 = vsel %vm9935_vm5, %v8190_v20, %v3244_v53 }
0x129b   : > { %v3227_v26 = vadd.s32 %v3226_v57, %v3224_v58  ;;  %v8589_v12 = vsel %vm3289_vm14, 1e+30, %v8199_v21  ;;  %v8598_v20 = vsel %vm3290_vm7, 1e+30, %v8202_v36 }
0x129c   : > { %v3257_v18 = vpop.xlane.xlu0 %3256 }
0x129d   : > { %v3258_v19 = vcvt.f32.s32 %v3257_v18  ;;  %vm3287_vm12 = vcmp.eq.s32.totalorder %v8429_v8, %v3227_v26  ;;  %vm3288_vm4 = vcmp.eq.s32.totalorder %v8436_v46, %v3227_v26  ;;  %v8586_v0 = vsel %vm9935_vm5, %v8184_v23, %v3227_v26  ;;  %v10301_v26 = vld [vmem:[#allocation16_spill] sm:$0xff] }
0x129e   : > { %v8592_v3 = vsel %vm3287_vm12, 1e+30, %v8193_v40  ;;  %v8595_v14 = vsel %vm3288_vm4, 1e+30, %v8196_v50  ;;  %v3175_v8 = vshll.u32 %v3174_v55, 16  ;;  %v3331_v23 = vsel %vm500_vm3, %v8598_v20, inf }
0x129f   : > { %v3261_v42 = vadd.s32 %v3260_v35, %v3258_v19  ;;  %v3327_v46 = vsel %vm500_vm3, %v8595_v14, inf  ;;  %v3332_v36 = vmin.f32 %v8589_v12, %v3331_v23  ;;  %v10299_v35 = vld [vmem:[#allocation7_spill] sm:$0xff] }
0x12a0   : > { %v3172_v10 = vpop.xlane.xlu1 %3171  ;;  %v3328_v50 = vmin.f32 %v8592_v3, %v3327_v46  ;;  %v10302_v46 = vld [vmem:[#allocation40_spill] sm:$0xff] }
0x12a1   : > { %vm3291_vm10 = vcmp.eq.s32.totalorder %v8456_v45, %v3261_v42  ;;  %vm3292_vm14 = vcmp.eq.s32.totalorder %v8459_v41, %v3261_v42  ;;  %v8608_v40 = vsel %vm9935_vm5, %v8214_v44, %v3261_v42  ;;  %v3173_v21 = vcvt.f32.s32 %v3172_v10  ;;  %3333 = vmin.xlane.f32.xlu1 %v3332_v36  ;;  %v10304_v10 = vld [vmem:[#allocation15_spill] sm:$0xff] }
0x12a2   : > { %v8613_v22 = vsel %vm3291_vm10, 1e+30, %v8217_v28  ;;  %v8616_v29 = vsel %vm3292_vm14, 1e+30, %v8220_v59  ;;  %3329 = vmin.xlane.f32.xlu0 %v3328_v50  ;;  %vm9944_vm14 = vcmask 97280  }
0x12a3   : > { %v3335_v45 = vsel %vm500_vm3, %v8616_v29, inf  ;;  %v3176_v41 = vadd.s32 %v3175_v8, %v3173_v21 }
0x12a4   : > { %v3336_v44 = vmin.f32 %v8613_v22, %v3335_v45 }
0x12a5   : > { %vm3281_vm7 = vcmp.eq.s32.totalorder %v8479_v1, %v3176_v41  ;;  %vm3282_vm12 = vcmp.eq.s32.totalorder %v8482_v43, %v3176_v41  ;;  %v8626_v28 = vsel %vm9935_vm5, %v8229_v15, %v3176_v41  ;;  %v3277_v1 = vshll.u32 %v3276_v63, 16  ;;  %v10289_v15 = vld [vmem:[#allocation88_spill] sm:$0xff] }
0x12a6   : > { %3337 = vmin.xlane.f32.xlu2 %v3336_v44  ;;  %v8629_v59 = vsel %vm3281_vm7, 1e+30, %v8233_v5  ;;  %v8632_v16 = vsel %vm3282_vm12, 1e+30, %v8236_v52  ;;  %v10291_v52 = vld [vmem:[#allocation87_spill] sm:$0xff] }
0x12a7   : > { %v3315_v60 = vsel %vm500_vm3, %v8632_v16, inf }
0x12a8   : > { %v3274_v38 = vpop.xlane.xlu1 %3273  ;;  %v3316_v6 = vmin.f32 %v8629_v59, %v3315_v60 }
0x12a9   : > { %v3275_v49 = vcvt.f32.s32 %v3274_v38 }
0x12aa   : > { %3317 = vmin.xlane.f32.xlu0 %v3316_v6 }
0x12ab   : > { %v3278_v43 = vadd.s32 %v3277_v1, %v3275_v49  ;;  %v10306_v49 = vld [vmem:[#allocation21_spill] sm:$0xff] }
0x12ad   : > { %vm3293_vm4 = vcmp.eq.s32.totalorder %v8496_v54, %v3278_v43  ;;  %vm3294_vm10 = vcmp.eq.s32.totalorder %v8499_v2, %v3278_v43  ;;  %v8641_v5 = vsel %vm9935_vm5, %v10289_v15, %v3278_v43  ;;  %v10295_v2 = vld [vmem:[#allocation29_spill] sm:$0xff]  ;;  %v10308_v15 = vld [vmem:[#allocation18_spill] sm:$0xff] }
0x12ae   : > { %10290 = vst [vmem:[#allocation63_spill] sm:$0xff] %v8641_v5  ;;  %v8644_v62 = vsel %vm3293_vm4, 1e+30, %v10291_v52  ;;  %v8647_v11 = vsel %vm3294_vm10, 1e+30, %v10293_v9  ;;  %v10309_v9 = vld [vmem:[#allocation17_spill] sm:$0xff] }
0x12af   : > { %10292 = vst [vmem:[#allocation71_spill] sm:$0xff] %v8644_v62  ;;  %v3339_v24 = vsel %vm500_vm3, %v8647_v11, inf }
0x12b0   : > { %10294 = vst [vmem:[#allocation96_spill] sm:$0xff] %v8647_v11  ;;  %v3340_v39 = vmin.f32 %v8644_v62, %v3339_v24 }
0x12b2   : > { %3341 = vmin.xlane.f32.xlu0 %v3340_v39 }
0x12fe   : > { %v3314_v54 = vpop.xlane.xlu2 %3313 }
0x12ff   : > { %vm3343_vm7 = vcmp.le.f32.partialorder %v8534_v17, %v3314_v54  ;;  %vm3344_vm12 = vcmp.le.f32.partialorder %v8537_v33, %v3314_v54  ;;  %v8656_v56 = vsel %vm9944_vm14, %v10295_v2, %v3314_v54 }
0x1300   : > { %10296 = vst [vmem:[#allocation30_spill] sm:$0xff] %v8656_v56  ;;  %v8659_v47 = vsel %vm3343_vm7, %v10297_v48, 2147483647  ;;  %v8662_v30 = vsel %vm3344_vm12, %v10298_v37, 2147483647 }
0x1301   : > { %v3375_v13 = vsel %vm500_vm3, %v8662_v30, 2147483647 }
0x1302   : > { %vm3376_vm4 = vcmp.lt.s32.totalorder %v8659_v47, %v3375_v13 }
0x1303   : > { %v8668_v25 = vsel %vm3376_vm4, %v8659_v47, %v3375_v13 }
0x1304   : > { %v3379_v57 = vshra.s32 %v8668_v25, 16 }
0x1306   : > { %v8671_v58 = vcvt.s32.f32 %v3379_v57  ;;  %v3322_v53 = vpop.xlane.xlu1 %3321 }
0x1307   : > { %vm3347_vm10 = vcmp.le.f32.partialorder %v8549_v7, %v3322_v53  ;;  %vm3348_vm7 = vcmp.le.f32.partialorder %v8552_v34, %v3322_v53  ;;  %v8678_v55 = vsel %vm9944_vm14, %v10299_v35, %v3322_v53  ;;  %v10311_v53 = vld [vmem:[#allocation14_spill] sm:$0xff] }
0x1308   : > { %3382 = vmin.xlane.f32.xlu1 %v8671_v58  ;;  %10300 = vst [vmem:[#allocation6_spill] sm:$0xff] %v8678_v55  ;;  %v8681_v18 = vsel %vm3347_vm10, %v10301_v26, 2147483647  ;;  %v8684_v19 = vsel %vm3348_vm7, %v10298_v37, 2147483647  ;;  %v3326_v42 = vpop.xlane.xlu2 %3325  ;;  %v3378_v55 = vand.u32 65535, %v8668_v25 }
0x1309   : > { %v3409_v8 = vsel %vm500_vm3, %v8684_v19, 2147483647  ;;  %vm3349_vm12 = vcmp.le.f32.partialorder %v8564_v31, %v3326_v42  ;;  %vm3350_vm4 = vcmp.le.f32.partialorder %v8567_v32, %v3326_v42  ;;  %v8692_v23 = vsel %vm9944_vm14, %v10302_v46, %v3326_v42 }
0x130a   : > { %10303 = vst [vmem:[#allocation41_spill] sm:$0xff] %v8692_v23  ;;  %vm3410_vm5 = vcmp.lt.s32.totalorder %v8681_v18, %v3409_v8  ;;  %v8696_v50 = vsel %vm3349_vm12, %v10304_v10, 2147483647  ;;  %v8699_v21 = vsel %vm3350_vm4, %v10298_v37, 2147483647  ;;  %v3380_v48 = vcvt.s32.f32 %v3378_v55 }
0x130b   : > { %v3426_v36 = vsel %vm500_vm3, %v8699_v21, 2147483647  ;;  %v8704_v45 = vsel %vm3410_vm5, %v8681_v18, %v3409_v8 }
0x130c   : > { %vm3427_vm10 = vcmp.lt.s32.totalorder %v8696_v50, %v3426_v36  ;;  %v3413_v41 = vshra.s32 %v8704_v45, 16 }
0x130d   : > { %v8709_v44 = vsel %vm3427_vm10, %v8696_v50, %v3426_v36 }
0x130e   : > { %v8711_v63 = vcvt.s32.f32 %v3413_v41  ;;  %v3430_v60 = vshra.s32 %v8709_v44, 16  ;;  %v3429_v56 = vand.u32 65535, %v8709_v44 }
0x1310   : > { %3416 = vmin.xlane.f32.xlu0 %v8711_v63  ;;  %v8715_v38 = vcvt.s32.f32 %v3430_v60  ;;  %v3431_v5 = vcvt.s32.f32 %v3429_v56 }
0x1312   : > { %3433 = vmin.xlane.f32.xlu1 %v8715_v38 }
0x1314   : > { %v8718_v1 = vpop.xlane.xlu1 %3333 }
0x1315   : > { %v3330_v6 = vpop.xlane.xlu0 %3329  ;;  %10305 = vst [vmem:[#allocation31_spill] sm:$0xff] %v8718_v1  ;;  %vm3353_vm12 = vcmp.le.f32.partialorder %v8589_v12, %v8718_v1  ;;  %vm3354_vm4 = vcmp.le.f32.partialorder %v8598_v20, %v8718_v1 }
0x1316   : > { %vm3351_vm5 = vcmp.le.f32.partialorder %v8592_v3, %v3330_v6  ;;  %vm3352_vm7 = vcmp.le.f32.partialorder %v8595_v14, %v3330_v6  ;;  %v8724_v43 = vsel %vm9944_vm14, %v10306_v49, %v3330_v6  ;;  %v8734_v24 = vsel %vm3353_vm12, %v10309_v9, 2147483647  ;;  %v10314_v9 = vld [vmem:[#allocation13_spill] sm:$0xff] }
0x1317   : > { %10307 = vst [vmem:[#allocation5_spill] sm:$0xff] %v8724_v43  ;;  %v8731_v52 = vsel %vm3351_vm5, %v10308_v15, 2147483647  ;;  %v8737_v39 = vsel %vm3354_vm4, %v10298_v37, 2147483647 }
0x1318   : > { %v8740_v54 = vsel %vm3352_vm7, %v10298_v37, 2147483647  ;;  %v3460_v13 = vsel %vm500_vm3, %v8737_v39, 2147483647 }
0x1319   : > { %v8742_v2 = vpop.xlane.xlu2 %3337  ;;  %v3443_v57 = vsel %vm500_vm3, %v8740_v54, 2147483647  ;;  %vm3461_vm12 = vcmp.lt.s32.totalorder %v8734_v24, %v3460_v13 }
0x131a   : > { %10310 = vst [vmem:[#allocation25_spill] sm:$0xff] %v8742_v2  ;;  %vm3355_vm10 = vcmp.le.f32.partialorder %v8613_v22, %v8742_v2  ;;  %vm3356_vm5 = vcmp.le.f32.partialorder %v8616_v29, %v8742_v2  ;;  %vm3444_vm4 = vcmp.lt.s32.totalorder %v8731_v52, %v3443_v57  ;;  %v3462_v46 = vsel %vm3461_vm12, %v8734_v24, %v3460_v13  ;;  %v10312_v2 = vld [vmem:[#allocation39_spill] sm:$0xff] }
0x131b   : > { %v8755_v35 = vsel %vm3355_vm10, %v10311_v53, 2147483647  ;;  %v8758_v42 = vsel %vm3356_vm5, %v10298_v37, 2147483647  ;;  %v3445_v36 = vsel %vm3444_vm4, %v8731_v52, %v3443_v57  ;;  %v3464_v41 = vshra.s32 %v3462_v46, 16 }
0x131c   : > { %v3477_v8 = vsel %vm500_vm3, %v8758_v42, 2147483647  ;;  %v3447_v60 = vshra.s32 %v3445_v36, 16  ;;  %v3463_v55 = vand.u32 65535, %v3462_v46 }
0x131d   : > { %vm3478_vm7 = vcmp.lt.s32.totalorder %v8755_v35, %v3477_v8  ;;  %v3318_v6 = vpop.xlane.xlu0 %3317  ;;  %v3466_v53 = vcvt.s32.f32 %v3464_v41 }
0x131e   : > { %v3479_v49 = vsel %vm3478_vm7, %v8755_v35, %v3477_v8  ;;  %vm3345_vm10 = vcmp.le.f32.partialorder %v8629_v59, %v3318_v6  ;;  %vm3346_vm15 = vcmp.le.f32.partialorder %v8632_v16, %v3318_v6  ;;  %v8770_v1 = vsel %vm9944_vm14, %v10312_v2, %v3318_v6 }
0x131f   : > { %10313 = vst [vmem:[#allocation42_spill] sm:$0xff] %v8770_v1  ;;  %v8773_v13 = vsel %vm3345_vm10, %v10314_v9, 2147483647  ;;  %v8776_v57 = vsel %vm3346_vm15, %v10298_v37, 2147483647  ;;  %v3449_v15 = vcvt.s32.f32 %v3447_v60  ;;  %v3481_v43 = vshra.s32 %v3479_v49, 16  ;;  %3467 = vmin.xlane.f32.xlu0 %v3466_v53 }
0x1320   : > { %v3392_v8 = vsel %vm500_vm3, %v8776_v57, 2147483647  ;;  %v10316_v60 = vld [vmem:[#allocation20_spill] sm:$0xff] }
0x1321   : > { %vm3393_vm5 = vcmp.lt.s32.totalorder %v8773_v13, %v3392_v8  ;;  %3450 = vmin.xlane.f32.xlu2 %v3449_v15  ;;  %v3483_v10 = vcvt.s32.f32 %v3481_v43 }
0x1322   : > { %v3394_v2 = vsel %vm3393_vm5, %v8773_v13, %v3392_v8 }
0x1323   : > { %3484 = vmin.xlane.f32.xlu1 %v3483_v10  ;;  %v3396_v41 = vshra.s32 %v3394_v2, 16 }
0x1325   : > { %v8782_v6 = vpop.xlane.xlu0 %3341  ;;  %v3398_v9 = vcvt.s32.f32 %v3396_v41 }
0x1326   : > { %10315 = vst [vmem:[#allocation22_spill] sm:$0xff] %v8782_v6  ;;  %vm3357_vm15 = vcmp.le.f32.partialorder %v8644_v62, %v8782_v6  ;;  %vm3358_vm12 = vcmp.le.f32.partialorder %v8647_v11, %v8782_v6 }
0x1327   : > { %v8789_v1 = vsel %vm3357_vm15, %v10316_v60, 2147483647  ;;  %v8792_v23 = vsel %vm3358_vm12, %v10298_v37, 2147483647  ;;  %v3412_v37 = vand.u32 65535, %v8704_v45  ;;  %v3465_v45 = vcvt.s32.f32 %v3463_v55 }
0x1328   : > { %10317 = vst [vmem:[#allocation26_spill] sm:$0xff] %v8792_v23  ;;  %v3494_v43 = vsel %vm500_vm3, %v8792_v23, 2147483647 }
0x1329   : > { %vm3495_vm4 = vcmp.lt.s32.totalorder %v8789_v1, %v3494_v43  ;;  %3399 = vmin.xlane.f32.xlu2 %v3398_v9  ;;  %v3414_v62 = vcvt.s32.f32 %v3412_v37 }
0x132a   : > { %v3496_v8 = vsel %vm3495_vm4, %v8789_v1, %v3494_v43 }
0x132b   : > { %v3498_v41 = vshra.s32 %v3496_v8, 16 }
0x132d   : > { %v3500_v26 = vcvt.s32.f32 %v3498_v41 }
0x1331   : > { %3501 = vmin.xlane.f32.xlu2 %v3500_v26 }
0x137b   : > { %v3383_v6 = vpop.xlane.xlu1 %3382 }
0x137c   : > { %vm3384_vm7 = vcmp.eq.f32.partialorder %v8671_v58, %v3383_v6  ;;  %v3446_v58 = vand.u32 65535, %v3445_v36  ;;  %v3389_v55 = vcvt.f32.s32 %v3383_v6 }
0x137d   : > { %v3385_v60 = vsel %vm3384_vm7, %v3380_v48, inf  ;;  %v3480_v48 = vand.u32 65535, %v3479_v49 }
0x137e   : > { %3386 = vmin.xlane.f32.xlu0 %v3385_v60  ;;  %v3448_v37 = vcvt.s32.f32 %v3446_v58  ;;  %v3390_v58 = vshll.u32 %v3389_v55, 16 }
0x1383   : > { %v3417_v11 = vpop.xlane.xlu0 %3416 }
0x1384   : > { %vm3418_vm10 = vcmp.eq.f32.partialorder %v8711_v63, %v3417_v11 }
0x1385   : > { %v3434_v43 = vpop.xlane.xlu1 %3433  ;;  %v3419_v41 = vsel %vm3418_vm10, %v3414_v62, inf }
0x1386   : > { %vm3435_vm5 = vcmp.eq.f32.partialorder %v8715_v38, %v3434_v43  ;;  %3420 = vmin.xlane.f32.xlu2 %v3419_v41  ;;  %v3395_v38 = vand.u32 65535, %v3394_v2 }
0x1387   : > { %v3436_v25 = vsel %vm3435_vm5, %v3431_v5, inf  ;;  %v3482_v5 = vcvt.s32.f32 %v3480_v48 }
0x1388   : > { %3437 = vmin.xlane.f32.xlu0 %v3436_v25  ;;  %v3397_v36 = vcvt.s32.f32 %v3395_v38 }
0x1392   : > { %v8804_v60 = vpop.xlane.xlu0 %3467 }
0x1393   : > { %vm3469_vm15 = vcmp.eq.f32.partialorder %v3466_v53, %v8804_v60 }
0x1394   : > { %v8806_v23 = vpop.xlane.xlu2 %3450  ;;  %v3470_v56 = vsel %vm3469_vm15, %v3465_v45, inf  ;;  %v3423_v45 = vcvt.f32.s32 %v3417_v11 }
0x1395   : > { %vm3452_vm12 = vcmp.eq.f32.partialorder %v3449_v15, %v8806_v23  ;;  %3471 = vmin.xlane.f32.xlu2 %v3470_v56  ;;  %v3497_v15 = vand.u32 65535, %v3496_v8  ;;  %v3440_v56 = vcvt.f32.s32 %v3434_v43 }
0x1396   : > { %v3453_v62 = vsel %vm3452_vm12, %v3448_v37, inf  ;;  %v8810_v44 = vpop.xlane.xlu1 %3484 }
0x1397   : > { %3454 = vmin.xlane.f32.xlu1 %v3453_v62  ;;  %vm3486_vm4 = vcmp.eq.f32.partialorder %v3483_v10, %v8810_v44  ;;  %v3499_v41 = vcvt.s32.f32 %v3497_v15 }
0x1398   : > { %v3487_v63 = vsel %vm3486_vm4, %v3482_v5, inf }
0x1399   : > { %3488 = vmin.xlane.f32.xlu0 %v3487_v63 }
0x139c   : > { %v8813_v46 = vpop.xlane.xlu2 %3399 }
0x139d   : > { %vm3401_vm7 = vcmp.eq.f32.partialorder %v3398_v9, %v8813_v46 }
0x139e   : > { %v3402_v53 = vsel %vm3401_vm7, %v3397_v36, inf }
0x139f   : > { %3403 = vmin.xlane.f32.xlu1 %v3402_v53  ;;  %v3491_v53 = vcvt.f32.s32 %v8810_v44 }
0x13a4   : > { %v8816_v49 = vpop.xlane.xlu2 %3501 }
0x13a5   : > { %vm3503_vm10 = vcmp.eq.f32.partialorder %v3500_v26, %v8816_v49 }
0x13a6   : > { %v3504_v25 = vsel %vm3503_vm10, %v3499_v41, inf }
0x13a7   : > { %3505 = vmin.xlane.f32.xlu1 %v3504_v25 }
0x13f1   : > { %v3387_v10 = vpop.xlane.xlu0 %3386 }
0x13f2   : > { %v3388_v2 = vcvt.f32.s32 %v3387_v10 }
0x13f4   : > { %v3391_v48 = vadd.s32 %v3390_v58, %v3388_v2  ;;  %v3492_v2 = vshll.u32 %v3491_v53, 16  ;;  %v10327_v53 = vld [vmem:[#allocation12_spill] sm:$0xff] }
0x13f6   : > { %vm3511_vm5 = vcmp.eq.s32.totalorder %v8659_v47, %v3391_v48  ;;  %vm3512_vm15 = vcmp.eq.s32.totalorder %v8662_v30, %v3391_v48  ;;  %v8823_v9 = vsel %vm9944_vm14, %v8531_v27, %v3391_v48  ;;  %v3424_v30 = vshll.u32 %v3423_v45, 16 }
0x13f7   : > { %v8826_v8 = vsel %vm3511_vm5, 1e+30, %v8534_v17  ;;  %v8829_v26 = vsel %vm3512_vm15, 1e+30, %v8537_v33  ;;  %v3441_v27 = vshll.u32 %v3440_v56, 16 }
0x13f8   : > { %v3543_v6 = vsel %vm500_vm3, %v8829_v26, inf }
0x13f9   : > { %v3544_v37 = vmin.f32 %v8826_v8, %v3543_v6  ;;  %v3421_v47 = vpop.xlane.xlu2 %3420  ;;  %v3406_v6 = vcvt.f32.s32 %v8813_v46 }
0x13fa   : > { %v3422_v62 = vcvt.f32.s32 %v3421_v47 }
0x13fb   : > { %3545 = vmin.xlane.f32.xlu2 %v3544_v37  ;;  %v3438_v5 = vpop.xlane.xlu0 %3437 }
0x13fc   : > { %v3425_v63 = vadd.s32 %v3424_v30, %v3422_v62  ;;  %v3439_v38 = vcvt.f32.s32 %v3438_v5 }
0x13fe   : > { %vm3515_vm12 = vcmp.eq.s32.totalorder %v8681_v18, %v3425_v63  ;;  %vm3516_vm4 = vcmp.eq.s32.totalorder %v8684_v19, %v3425_v63  ;;  %v8838_v17 = vsel %vm9944_vm14, %v8546_v4, %v3425_v63  ;;  %v3442_v33 = vadd.s32 %v3441_v27, %v3439_v38  ;;  %v10319_v38 = vld [vmem:[#allocation63_spill] sm:$0xff] }
0x13ff   : > { %v8841_v11 = vsel %vm3515_vm12, 1e+30, %v8549_v7  ;;  %v8844_v43 = vsel %vm3516_vm4, 1e+30, %v8552_v34 }
0x1400   : > { %vm3517_vm7 = vcmp.eq.s32.totalorder %v8696_v50, %v3442_v33  ;;  %vm3518_vm10 = vcmp.eq.s32.totalorder %v8699_v21, %v3442_v33  ;;  %v8850_v18 = vsel %vm9944_vm14, %v8558_v51, %v3442_v33  ;;  %v3551_v19 = vsel %vm500_vm3, %v8844_v43, inf }
0x1401   : > { %v3552_v4 = vmin.f32 %v8841_v11, %v3551_v19  ;;  %v8856_v36 = vsel %vm3517_vm7, 1e+30, %v8564_v31  ;;  %v8859_v7 = vsel %vm3518_vm10, 1e+30, %v8567_v32  ;;  %v3474_v51 = vcvt.f32.s32 %v8804_v60  ;;  %v10323_v19 = vld [vmem:[#allocation96_spill] sm:$0xff] }
0x1402   : > { %v3555_v34 = vsel %vm500_vm3, %v8859_v7, inf  ;;  %v3457_v21 = vcvt.f32.s32 %v8806_v23 }
0x1403   : > { %3553 = vmin.xlane.f32.xlu1 %v3552_v4  ;;  %v3556_v50 = vmin.f32 %v8856_v36, %v3555_v34  ;;  %v3475_v41 = vshll.u32 %v3474_v51, 16  ;;  %v10325_v51 = vld [vmem:[#allocation30_spill] sm:$0xff] }
0x1404   : > { %v3458_v55 = vshll.u32 %v3457_v21, 16 }
0x1405   : > { %3557 = vmin.xlane.f32.xlu2 %v3556_v50 }
0x1408   : > { %v3472_v15 = vpop.xlane.xlu2 %3471 }
0x1409   : > { %v3473_v25 = vcvt.f32.s32 %v3472_v15 }
0x140a   : > { %v3455_v31 = vpop.xlane.xlu1 %3454 }
0x140b   : > { %v3456_v32 = vcvt.f32.s32 %v3455_v31  ;;  %v3476_v10 = vadd.s32 %v3475_v41, %v3473_v25  ;;  %v10328_v41 = vld [vmem:[#allocation11_spill] sm:$0xff] }
0x140c   : > { %v3489_v58 = vpop.xlane.xlu0 %3488 }
0x140d   : > { %v3459_v48 = vadd.s32 %v3458_v55, %v3456_v32  ;;  %v3490_v45 = vcvt.f32.s32 %v3489_v58  ;;  %vm3521_vm5 = vcmp.eq.s32.totalorder %v8734_v24, %v3476_v10  ;;  %vm3522_vm15 = vcmp.eq.s32.totalorder %v8737_v39, %v3476_v10 }
0x140e   : > { %v8872_v23 = vsel %vm9944_vm14, %v8580_v61, %v3476_v10  ;;  %v8887_v39 = vsel %vm3521_vm5, 1e+30, %v8589_v12 }
0x140f   : > { %vm3519_vm12 = vcmp.eq.s32.totalorder %v8731_v52, %v3459_v48  ;;  %vm3520_vm4 = vcmp.eq.s32.totalorder %v8740_v54, %v3459_v48  ;;  %v8878_v60 = vsel %vm9944_vm14, %v8586_v0, %v3459_v48  ;;  %v3493_v44 = vadd.s32 %v3492_v2, %v3490_v45  ;;  %v10329_v2 = vld [vmem:[#allocation6_spill] sm:$0xff]  ;;  %v10331_v45 = vld [vmem:[#allocation16_spill] sm:$0xff] }
0x1410   : > { %v8881_v37 = vsel %vm3519_vm12, 1e+30, %v8592_v3  ;;  %v8884_v24 = vsel %vm3520_vm4, 1e+30, %v8595_v14  ;;  %v8899_v14 = vsel %vm3522_vm15, 1e+30, %v8598_v20 }
0x1411   : > { %vm3523_vm7 = vcmp.eq.s32.totalorder %v8755_v35, %v3493_v44  ;;  %vm3524_vm10 = vcmp.eq.s32.totalorder %v8758_v42, %v3493_v44  ;;  %v8893_v61 = vsel %vm9944_vm14, %v8608_v40, %v3493_v44  ;;  %v3559_v0 = vsel %vm500_vm3, %v8884_v24, inf }
0x1412   : > { %v3404_v52 = vpop.xlane.xlu1 %3403  ;;  %v3560_v3 = vmin.f32 %v8881_v37, %v3559_v0  ;;  %v8902_v12 = vsel %vm3523_vm7, 1e+30, %v8613_v22  ;;  %v8905_v54 = vsel %vm3524_vm10, 1e+30, %v8616_v29  ;;  %v3407_v35 = vshll.u32 %v3406_v6, 16 }
0x1413   : > { %v3405_v42 = vcvt.f32.s32 %v3404_v52  ;;  %v3563_v40 = vsel %vm500_vm3, %v8899_v14, inf  ;;  %v3567_v46 = vsel %vm500_vm3, %v8905_v54, inf  ;;  %v3508_v22 = vcvt.f32.s32 %v8816_v49 }
0x1414   : > { %3561 = vmin.xlane.f32.xlu0 %v3560_v3  ;;  %v3564_v56 = vmin.f32 %v8887_v39, %v3563_v40  ;;  %v3568_v20 = vmin.f32 %v8902_v12, %v3567_v46  ;;  %vm4314_vm7 = vcmask 105472   ;;  %v10332_v3 = vld [vmem:[#allocation41_spill] sm:$0xff] }
0x1415   : > { %v3408_v47 = vadd.s32 %v3407_v35, %v3405_v42  ;;  %v3509_v63 = vshll.u32 %v3508_v22, 16  ;;  %v10334_v42 = vld [vmem:[#allocation15_spill] sm:$0xff] }
0x1416   : > { %3565 = vmin.xlane.f32.xlu1 %v3564_v56  ;;  %3569 = vmin.xlane.f32.xlu2 %v3568_v20 }
0x1417   : > { %vm3513_vm5 = vcmp.eq.s32.totalorder %v8773_v13, %v3408_v47  ;;  %vm3514_vm15 = vcmp.eq.s32.totalorder %v8776_v57, %v3408_v47  ;;  %v8918_v29 = vsel %vm9944_vm14, %v8626_v28, %v3408_v47  ;;  %v10318_v28 = vld [vmem:[#allocation26_spill] sm:$0xff] }
0x1418   : > { %v8921_v30 = vsel %vm3513_vm5, 1e+30, %v8629_v59  ;;  %v8924_v62 = vsel %vm3514_vm15, 1e+30, %v8632_v16  ;;  %v10321_v16 = vld [vmem:[#allocation71_spill] sm:$0xff] }
0x1419   : > { %v3547_v5 = vsel %vm500_vm3, %v8924_v62, inf }
0x141a   : > { %v3506_v27 = vpop.xlane.xlu1 %3505  ;;  %v3548_v49 = vmin.f32 %v8921_v30, %v3547_v5 }
0x141b   : > { %v3507_v13 = vcvt.f32.s32 %v3506_v27 }
0x141c   : > { %3549 = vmin.xlane.f32.xlu0 %v3548_v49 }
0x141d   : > { %v3510_v57 = vadd.s32 %v3509_v63, %v3507_v13  ;;  %v10335_v13 = vld [vmem:[#allocation5_spill] sm:$0xff] }
0x141f   : > { %vm3525_vm12 = vcmp.eq.s32.totalorder %v8789_v1, %v3510_v57  ;;  %vm3526_vm4 = vcmp.eq.s32.totalorder %v10318_v28, %v3510_v57  ;;  %v8933_v59 = vsel %vm9944_vm14, %v10319_v38, %v3510_v57  ;;  %v10338_v38 = vld [vmem:[#allocation18_spill] sm:$0xff] }
0x1420   : > { %10320 = vst [vmem:[#allocation56_spill] sm:$0xff] %v8933_v59  ;;  %v8936_v33 = vsel %vm3525_vm12, 1e+30, %v10321_v16  ;;  %v8939_v4 = vsel %vm3526_vm4, 1e+30, %v10323_v19 }
0x1421   : > { %10322 = vst [vmem:[#allocation49_spill] sm:$0xff] %v8936_v33  ;;  %v3571_v34 = vsel %vm500_vm3, %v8939_v4, inf }
0x1422   : > { %10324 = vst [vmem:[#allocation64_spill] sm:$0xff] %v8939_v4  ;;  %v3572_v50 = vmin.f32 %v8936_v33, %v3571_v34 }
0x1424   : > { %3573 = vmin.xlane.f32.xlu0 %v3572_v50 }
0x146e   : > { %v3546_v1 = vpop.xlane.xlu2 %3545 }
0x146f   : > { %vm3575_vm10 = vcmp.le.f32.partialorder %v8826_v8, %v3546_v1  ;;  %vm3576_vm5 = vcmp.le.f32.partialorder %v8829_v26, %v3546_v1  ;;  %v8948_v21 = vsel %vm4314_vm7, %v10325_v51, %v3546_v1  ;;  %v10340_v1 = vld [vmem:[#allocation17_spill] sm:$0xff] }
0x1470   : > { %10326 = vst [vmem:[#allocation57_spill] sm:$0xff] %v8948_v21  ;;  %v8951_v15 = vsel %vm3575_vm10, %v10327_v53, 2147483647  ;;  %v8954_v31 = vsel %vm3576_vm5, %v10328_v41, 2147483647 }
0x1471   : > { %v3607_v25 = vsel %vm500_vm3, %v8954_v31, 2147483647 }
0x1472   : > { %vm3608_vm15 = vcmp.lt.s32.totalorder %v8951_v15, %v3607_v25 }
0x1473   : > { %v8960_v55 = vsel %vm3608_vm15, %v8951_v15, %v3607_v25 }
0x1474   : > { %v3611_v32 = vshra.s32 %v8960_v55, 16 }
0x1476   : > { %v8963_v10 = vcvt.s32.f32 %v3611_v32  ;;  %v3554_v58 = vpop.xlane.xlu1 %3553 }
0x1477   : > { %vm3579_vm12 = vcmp.le.f32.partialorder %v8841_v11, %v3554_v58  ;;  %vm3580_vm4 = vcmp.le.f32.partialorder %v8844_v43, %v3554_v58  ;;  %v8970_v48 = vsel %vm4314_vm7, %v10329_v2, %v3554_v58  ;;  %v10341_v58 = vld [vmem:[#allocation14_spill] sm:$0xff] }
0x1478   : > { %3614 = vmin.xlane.f32.xlu1 %v8963_v10  ;;  %10330 = vst [vmem:[#allocation72_spill] sm:$0xff] %v8970_v48  ;;  %v8973_v6 = vsel %vm3579_vm12, %v10331_v45, 2147483647  ;;  %v8976_v44 = vsel %vm3580_vm4, %v10328_v41, 2147483647  ;;  %v3558_v0 = vpop.xlane.xlu2 %3557  ;;  %v3610_v48 = vand.u32 65535, %v8960_v55 }
0x1479   : > { %v3641_v52 = vsel %vm500_vm3, %v8976_v44, 2147483647  ;;  %vm3581_vm10 = vcmp.le.f32.partialorder %v8856_v36, %v3558_v0  ;;  %vm3582_vm5 = vcmp.le.f32.partialorder %v8859_v7, %v3558_v0  ;;  %v8984_v35 = vsel %vm4314_vm7, %v10332_v3, %v3558_v0 }
0x147a   : > { %10333 = vst [vmem:[#allocation65_spill] sm:$0xff] %v8984_v35  ;;  %vm3642_vm15 = vcmp.lt.s32.totalorder %v8973_v6, %v3641_v52  ;;  %v8988_v40 = vsel %vm3581_vm10, %v10334_v42, 2147483647  ;;  %v8991_v46 = vsel %vm3582_vm5, %v10328_v41, 2147483647  ;;  %v3612_v53 = vcvt.s32.f32 %v3610_v48 }
0x147b   : > { %v3658_v56 = vsel %vm500_vm3, %v8991_v46, 2147483647  ;;  %v8996_v20 = vsel %vm3642_vm15, %v8973_v6, %v3641_v52 }
0x147c   : > { %vm3659_vm12 = vcmp.lt.s32.totalorder %v8988_v40, %v3658_v56  ;;  %v3645_v47 = vshra.s32 %v8996_v20, 16 }
0x147d   : > { %v9001_v22 = vsel %vm3659_vm12, %v8988_v40, %v3658_v56 }
0x147e   : > { %v9003_v5 = vcvt.s32.f32 %v3645_v47  ;;  %v3662_v27 = vshra.s32 %v9001_v22, 16  ;;  %v3661_v21 = vand.u32 65535, %v9001_v22 }
0x1480   : > { %3648 = vmin.xlane.f32.xlu0 %v9003_v5  ;;  %v9007_v49 = vcvt.s32.f32 %v3662_v27  ;;  %v3663_v59 = vcvt.s32.f32 %v3661_v21 }
0x1482   : > { %3665 = vmin.xlane.f32.xlu1 %v9007_v49 }
0x1487   : > { %v3562_v63 = vpop.xlane.xlu0 %3561 }
0x1488   : > { %vm3583_vm4 = vcmp.le.f32.partialorder %v8881_v37, %v3562_v63  ;;  %vm3584_vm10 = vcmp.le.f32.partialorder %v8884_v24, %v3562_v63  ;;  %v9014_v57 = vsel %vm4314_vm7, %v10335_v13, %v3562_v63  ;;  %v10342_v13 = vld [vmem:[#allocation42_spill] sm:$0xff] }
0x1489   : > { %10336 = vst [vmem:[#allocation80_spill] sm:$0xff] %v9014_v57  ;;  %v9016_v28 = vpop.xlane.xlu1 %3565  ;;  %v9019_v16 = vsel %vm3583_vm4, %v10338_v38, 2147483647  ;;  %v9022_v19 = vsel %vm3584_vm10, %v10328_v41, 2147483647  ;;  %v9024_v34 = vpop.xlane.xlu2 %3569 }
0x148a   : > { %10337 = vst [vmem:[#allocation73_spill] sm:$0xff] %v9016_v28  ;;  %vm3585_vm5 = vcmp.le.f32.partialorder %v8887_v39, %v9016_v28  ;;  %vm3586_vm15 = vcmp.le.f32.partialorder %v8899_v14, %v9016_v28  ;;  %v3675_v50 = vsel %vm500_vm3, %v9022_v19, 2147483647  ;;  %vm3587_vm4 = vcmp.le.f32.partialorder %v8902_v12, %v9024_v34 }
0x148b   : > { %10339 = vst [vmem:[#allocation89_spill] sm:$0xff] %v9024_v34  ;;  %v9033_v51 = vsel %vm3585_vm5, %v10340_v1, 2147483647  ;;  %v9036_v25 = vsel %vm3586_vm15, %v10328_v41, 2147483647  ;;  %vm3676_vm12 = vcmp.lt.s32.totalorder %v9019_v16, %v3675_v50  ;;  %vm3588_vm10 = vcmp.le.f32.partialorder %v8905_v54, %v9024_v34 }
0x148c   : > { %v3692_v32 = vsel %vm500_vm3, %v9036_v25, 2147483647  ;;  %v9046_v2 = vsel %vm3587_vm4, %v10341_v58, 2147483647  ;;  %v9050_v0 = vsel %vm3588_vm10, %v10328_v41, 2147483647  ;;  %v3677_v52 = vsel %vm3676_vm12, %v9019_v16, %v3675_v50 }
0x148d   : > { %vm3693_vm5 = vcmp.lt.s32.totalorder %v9033_v51, %v3692_v32  ;;  %v3709_v3 = vsel %vm500_vm3, %v9050_v0, 2147483647  ;;  %v3679_v47 = vshra.s32 %v3677_v52, 16  ;;  %v10344_v50 = vld [vmem:[#allocation13_spill] sm:$0xff]  ;;  %v3678_v48 = vand.u32 65535, %v3677_v52 }
0x148e   : > { %v3694_v56 = vsel %vm3693_vm5, %v9033_v51, %v3692_v32  ;;  %vm3710_vm15 = vcmp.lt.s32.totalorder %v9046_v2, %v3709_v3 }
0x148f   : > { %v3550_v27 = vpop.xlane.xlu0 %3549  ;;  %v3696_v63 = vshra.s32 %v3694_v56, 16  ;;  %v3681_v28 = vcvt.s32.f32 %v3679_v47  ;;  %v3711_v38 = vsel %vm3710_vm15, %v9046_v2, %v3709_v3  ;;  %v10346_v3 = vld [vmem:[#allocation20_spill] sm:$0xff] }
0x1490   : > { %vm3577_vm4 = vcmp.le.f32.partialorder %v8921_v30, %v3550_v27  ;;  %vm3578_vm14 = vcmp.le.f32.partialorder %v8924_v62, %v3550_v27  ;;  %v9061_v34 = vsel %vm4314_vm7, %v10342_v13, %v3550_v27  ;;  %v3713_v42 = vshra.s32 %v3711_v38, 16 }
0x1491   : > { %10343 = vst [vmem:[#allocation81_spill] sm:$0xff] %v9061_v34  ;;  %v9064_v58 = vsel %vm3577_vm4, %v10344_v50, 2147483647  ;;  %v9067_v57 = vsel %vm3578_vm14, %v10328_v41, 2147483647  ;;  %v3698_v32 = vcvt.s32.f32 %v3696_v63  ;;  %3682 = vmin.xlane.f32.xlu2 %v3681_v28 }
0x1492   : > { %v3624_v1 = vsel %vm500_vm3, %v9067_v57, 2147483647  ;;  %v3715_v27 = vcvt.s32.f32 %v3713_v42 }
0x1493   : > { %vm3625_vm12 = vcmp.lt.s32.totalorder %v9064_v58, %v3624_v1  ;;  %3699 = vmin.xlane.f32.xlu0 %v3698_v32 }
0x1494   : > { %v3626_v47 = vsel %vm3625_vm12, %v9064_v58, %v3624_v1  ;;  %3716 = vmin.xlane.f32.xlu1 %v3715_v27 }
0x1495   : > { %v3628_v13 = vshra.s32 %v3626_v47, 16 }
0x1497   : > { %v9074_v50 = vpop.xlane.xlu0 %3573  ;;  %v3630_v34 = vcvt.s32.f32 %v3628_v13 }
0x1498   : > { %10345 = vst [vmem:[#allocation97_spill] sm:$0xff] %v9074_v50  ;;  %vm3589_vm14 = vcmp.le.f32.partialorder %v8936_v33, %v9074_v50  ;;  %vm3590_vm10 = vcmp.le.f32.partialorder %v8939_v4, %v9074_v50 }
0x1499   : > { %v9081_v63 = vsel %vm3589_vm14, %v10346_v3, 2147483647  ;;  %v9084_v35 = vsel %vm3590_vm10, %v10328_v41, 2147483647  ;;  %3631 = vmin.xlane.f32.xlu2 %v3630_v34  ;;  %v3644_v41 = vand.u32 65535, %v8996_v20  ;;  %v3712_v20 = vand.u32 65535, %v3711_v38 }
0x149a   : > { %v3726_v42 = vsel %vm500_vm3, %v9084_v35, 2147483647 }
0x149b   : > { %vm3727_vm5 = vcmp.lt.s32.totalorder %v9081_v63, %v3726_v42  ;;  %v3646_v33 = vcvt.s32.f32 %v3644_v41 }
0x149c   : > { %v3728_v1 = vsel %vm3727_vm5, %v9081_v63, %v3726_v42 }
0x149d   : > { %v3730_v13 = vshra.s32 %v3728_v1, 16 }
0x149f   : > { %v3732_v45 = vcvt.s32.f32 %v3730_v13 }
0x14a1   : > { %3733 = vmin.xlane.f32.xlu2 %v3732_v45 }
0x14eb   : > { %v3615_v50 = vpop.xlane.xlu1 %3614 }
0x14ec   : > { %vm3616_vm15 = vcmp.eq.f32.partialorder %v8963_v10, %v3615_v50  ;;  %v3695_v10 = vand.u32 65535, %v3694_v56 }
0x14ed   : > { %v3617_v3 = vsel %vm3616_vm15, %v3612_v53, inf }
0x14ee   : > { %3618 = vmin.xlane.f32.xlu0 %v3617_v3  ;;  %v3680_v3 = vcvt.s32.f32 %v3678_v48  ;;  %v3697_v41 = vcvt.s32.f32 %v3695_v10 }
0x14f3   : > { %v3649_v4 = vpop.xlane.xlu0 %3648 }
0x14f4   : > { %vm3650_vm4 = vcmp.eq.f32.partialorder %v9003_v5, %v3649_v4 }
0x14f5   : > { %v3666_v42 = vpop.xlane.xlu1 %3665  ;;  %v3651_v13 = vsel %vm3650_vm4, %v3646_v33, inf }
0x14f6   : > { %vm3667_vm12 = vcmp.eq.f32.partialorder %v9007_v49, %v3666_v42  ;;  %3652 = vmin.xlane.f32.xlu2 %v3651_v13  ;;  %v3627_v49 = vand.u32 65535, %v3626_v47  ;;  %v3621_v47 = vcvt.f32.s32 %v3615_v50 }
0x14f7   : > { %v3668_v55 = vsel %vm3667_vm12, %v3663_v59, inf  ;;  %v3714_v59 = vcvt.s32.f32 %v3712_v20 }
0x14f8   : > { %3669 = vmin.xlane.f32.xlu0 %v3668_v55 }
0x1504   : > { %v9096_v53 = vpop.xlane.xlu2 %3682 }
0x1505   : > { %vm3684_vm14 = vcmp.eq.f32.partialorder %v3681_v28, %v9096_v53  ;;  %v3629_v28 = vcvt.s32.f32 %v3627_v49 }
0x1506   : > { %v9099_v22 = vpop.xlane.xlu0 %3699  ;;  %v3685_v21 = vsel %vm3684_vm14, %v3680_v3, inf }
0x1507   : > { %vm3701_vm10 = vcmp.eq.f32.partialorder %v3698_v32, %v9099_v22  ;;  %3686 = vmin.xlane.f32.xlu1 %v3685_v21  ;;  %v9102_v5 = vpop.xlane.xlu1 %3716  ;;  %v3729_v32 = vand.u32 65535, %v3728_v1 }
0x1508   : > { %v3702_v33 = vsel %vm3701_vm10, %v3697_v41, inf  ;;  %vm3718_vm5 = vcmp.eq.f32.partialorder %v3715_v27, %v9102_v5  ;;  %v3622_v27 = vshll.u32 %v3621_v47, 16  ;;  %v3655_v41 = vcvt.f32.s32 %v3649_v4 }
0x1509   : > { %3703 = vmin.xlane.f32.xlu2 %v3702_v33  ;;  %v3719_v52 = vsel %vm3718_vm5, %v3714_v59, inf  ;;  %v3731_v55 = vcvt.s32.f32 %v3729_v32  ;;  %v3672_v33 = vcvt.f32.s32 %v3666_v42  ;;  %v3723_v32 = vcvt.f32.s32 %v9102_v5 }
0x150a   : > { %3720 = vmin.xlane.f32.xlu0 %v3719_v52 }
0x150c   : > { %v9105_v38 = vpop.xlane.xlu2 %3631 }
0x150d   : > { %vm3633_vm15 = vcmp.eq.f32.partialorder %v3630_v34, %v9105_v38 }
0x150e   : > { %v3634_v56 = vsel %vm3633_vm15, %v3629_v28, inf }
0x150f   : > { %3635 = vmin.xlane.f32.xlu1 %v3634_v56 }
0x1514   : > { %v9108_v13 = vpop.xlane.xlu2 %3733 }
0x1515   : > { %vm3735_vm4 = vcmp.eq.f32.partialorder %v3732_v45, %v9108_v13 }
0x1516   : > { %v3736_v48 = vsel %vm3735_vm4, %v3731_v55, inf }
0x1517   : > { %3737 = vmin.xlane.f32.xlu1 %v3736_v48 }
0x1561   : > { %v3619_v10 = vpop.xlane.xlu0 %3618 }
0x1562   : > { %v3620_v3 = vcvt.f32.s32 %v3619_v10 }
0x1564   : > { %v3623_v20 = vadd.s32 %v3622_v27, %v3620_v3  ;;  %v3724_v3 = vshll.u32 %v3723_v32, 16 }
0x1566   : > { %vm3743_vm12 = vcmp.eq.s32.totalorder %v8951_v15, %v3623_v20  ;;  %vm3744_vm14 = vcmp.eq.s32.totalorder %v8954_v31, %v3623_v20  ;;  %v9115_v34 = vsel %vm4314_vm7, %v8823_v9, %v3623_v20  ;;  %v3656_v31 = vshll.u32 %v3655_v41, 16 }
0x1567   : > { %v9118_v1 = vsel %vm3743_vm12, 1e+30, %v8826_v8  ;;  %v9121_v45 = vsel %vm3744_vm14, 1e+30, %v8829_v26  ;;  %v3673_v9 = vshll.u32 %v3672_v33, 16  ;;  %v3638_v20 = vcvt.f32.s32 %v9105_v38 }
0x1568   : > { %v3775_v50 = vsel %vm500_vm3, %v9121_v45, inf }
0x1569   : > { %v3776_v21 = vmin.f32 %v9118_v1, %v3775_v50  ;;  %v3653_v15 = vpop.xlane.xlu2 %3652 }
0x156a   : > { %v3654_v59 = vcvt.f32.s32 %v3653_v15 }
0x156b   : > { %3777 = vmin.xlane.f32.xlu2 %v3776_v21  ;;  %v3670_v49 = vpop.xlane.xlu0 %3669 }
0x156c   : > { %v3657_v52 = vadd.s32 %v3656_v31, %v3654_v59  ;;  %v3671_v28 = vcvt.f32.s32 %v3670_v49 }
0x156e   : > { %vm3747_vm10 = vcmp.eq.s32.totalorder %v8973_v6, %v3657_v52  ;;  %vm3748_vm5 = vcmp.eq.s32.totalorder %v8976_v44, %v3657_v52  ;;  %v9130_v8 = vsel %vm4314_vm7, %v8838_v17, %v3657_v52  ;;  %v3674_v26 = vadd.s32 %v3673_v9, %v3671_v28 }
0x156f   : > { %v9133_v4 = vsel %vm3747_vm10, 1e+30, %v8841_v11  ;;  %v9136_v42 = vsel %vm3748_vm5, 1e+30, %v8844_v43 }
0x1570   : > { %vm3749_vm15 = vcmp.eq.s32.totalorder %v8988_v40, %v3674_v26  ;;  %vm3750_vm4 = vcmp.eq.s32.totalorder %v8991_v46, %v3674_v26  ;;  %v9142_v6 = vsel %vm4314_vm7, %v8850_v18, %v3674_v26  ;;  %v3783_v44 = vsel %vm500_vm3, %v9136_v42, inf }
0x1571   : > { %v3784_v17 = vmin.f32 %v9133_v4, %v3783_v44  ;;  %v9148_v56 = vsel %vm3749_vm15, 1e+30, %v8856_v36  ;;  %v9151_v11 = vsel %vm3750_vm4, 1e+30, %v8859_v7  ;;  %v3689_v18 = vcvt.f32.s32 %v9096_v53  ;;  %v10350_v44 = vld [vmem:[#allocation64_spill] sm:$0xff] }
0x1572   : > { %v3787_v43 = vsel %vm500_vm3, %v9151_v11, inf  ;;  %v3706_v46 = vcvt.f32.s32 %v9099_v22 }
0x1573   : > { %3785 = vmin.xlane.f32.xlu1 %v3784_v17  ;;  %v3788_v40 = vmin.f32 %v9148_v56, %v3787_v43  ;;  %v3690_v48 = vshll.u32 %v3689_v18, 16 }
0x1574   : > { %v3707_v10 = vshll.u32 %v3706_v46, 16  ;;  %v10354_v46 = vld [vmem:[#allocation12_spill] sm:$0xff] }
0x1575   : > { %3789 = vmin.xlane.f32.xlu2 %v3788_v40 }
0x157a   : > { %v3687_v55 = vpop.xlane.xlu1 %3686 }
0x157b   : > { %v3688_v36 = vcvt.f32.s32 %v3687_v55  ;;  %v10355_v55 = vld [vmem:[#allocation11_spill] sm:$0xff] }
0x157c   : > { %v3704_v47 = vpop.xlane.xlu2 %3703 }
0x157d   : > { %v3705_v7 = vcvt.f32.s32 %v3704_v47  ;;  %v3691_v27 = vadd.s32 %v3690_v48, %v3688_v36  ;;  %v3721_v50 = vpop.xlane.xlu0 %3720 }
0x157e   : > { %v3722_v22 = vcvt.f32.s32 %v3721_v50 }
0x157f   : > { %v3708_v41 = vadd.s32 %v3707_v10, %v3705_v7  ;;  %vm3751_vm12 = vcmp.eq.s32.totalorder %v9019_v16, %v3691_v27  ;;  %vm3752_vm14 = vcmp.eq.s32.totalorder %v9022_v19, %v3691_v27  ;;  %v9164_v53 = vsel %vm4314_vm7, %v8878_v60, %v3691_v27 }
0x1580   : > { %v9173_v38 = vsel %vm3751_vm12, 1e+30, %v8881_v37  ;;  %v3725_v21 = vadd.s32 %v3724_v3, %v3722_v22  ;;  %v9176_v16 = vsel %vm3752_vm14, 1e+30, %v8884_v24  ;;  %v10356_v3 = vld [vmem:[#allocation72_spill] sm:$0xff] }
0x1581   : > { %vm3753_vm10 = vcmp.eq.s32.totalorder %v9033_v51, %v3708_v41  ;;  %vm3754_vm5 = vcmp.eq.s32.totalorder %v9036_v25, %v3708_v41  ;;  %v9170_v5 = vsel %vm4314_vm7, %v8872_v23, %v3708_v41  ;;  %v3639_v51 = vshll.u32 %v3638_v20, 16  ;;  %v10358_v41 = vld [vmem:[#allocation16_spill] sm:$0xff] }
0x1582   : > { %v9179_v19 = vsel %vm3753_vm10, 1e+30, %v8887_v39  ;;  %v9182_v60 = vsel %vm3754_vm5, 1e+30, %v8899_v14  ;;  %v3636_v33 = vpop.xlane.xlu1 %3635  ;;  %v3791_v25 = vsel %vm500_vm3, %v9176_v16, inf  ;;  %vm3755_vm15 = vcmp.eq.s32.totalorder %v9046_v2, %v3725_v21 }
0x1583   : > { %v3795_v23 = vsel %vm500_vm3, %v9182_v60, inf  ;;  %v3637_v37 = vcvt.f32.s32 %v3636_v33  ;;  %vm3756_vm4 = vcmp.eq.s32.totalorder %v9050_v0, %v3725_v21  ;;  %v9192_v24 = vsel %vm4314_vm7, %v8893_v61, %v3725_v21  ;;  %v10359_v33 = vld [vmem:[#allocation65_spill] sm:$0xff] }
0x1584   : > { %v3792_v39 = vmin.f32 %v9173_v38, %v3791_v25  ;;  %v3796_v14 = vmin.f32 %v9179_v19, %v3795_v23  ;;  %v9197_v15 = vsel %vm3755_vm15, 1e+30, %v8902_v12  ;;  %v9200_v31 = vsel %vm3756_vm4, 1e+30, %v8905_v54  ;;  %v10361_v23 = vld [vmem:[#allocation15_spill] sm:$0xff] }
0x1585   : > { %v3640_v59 = vadd.s32 %v3639_v51, %v3637_v37  ;;  %v3799_v2 = vsel %vm500_vm3, %v9200_v31, inf  ;;  %v3740_v61 = vcvt.f32.s32 %v9108_v13  ;;  %vm9959_vm15 = vcmask 113664  }
0x1586   : > { %3793 = vmin.xlane.f32.xlu0 %v3792_v39  ;;  %3797 = vmin.xlane.f32.xlu1 %v3796_v14  ;;  %v3800_v0 = vmin.f32 %v9197_v15, %v3799_v2 }
0x1587   : > { %vm3745_vm12 = vcmp.eq.s32.totalorder %v9064_v58, %v3640_v59  ;;  %vm3746_vm14 = vcmp.eq.s32.totalorder %v9067_v57, %v3640_v59  ;;  %v9210_v12 = vsel %vm4314_vm7, %v8918_v29, %v3640_v59  ;;  %v3741_v58 = vshll.u32 %v3740_v61, 16  ;;  %v10347_v29 = vld [vmem:[#allocation56_spill] sm:$0xff] }
0x1588   : > { %v9213_v54 = vsel %vm3745_vm12, 1e+30, %v8921_v30  ;;  %v9216_v49 = vsel %vm3746_vm14, 1e+30, %v8924_v62  ;;  %3801 = vmin.xlane.f32.xlu2 %v3800_v0  ;;  %v10348_v62 = vld [vmem:[#allocation49_spill] sm:$0xff] }
0x1589   : > { %v3779_v9 = vsel %vm500_vm3, %v9216_v49, inf }
0x158a   : > { %v3738_v52 = vpop.xlane.xlu1 %3737  ;;  %v3780_v13 = vmin.f32 %v9213_v54, %v3779_v9 }
0x158b   : > { %v3739_v28 = vcvt.f32.s32 %v3738_v52 }
0x158d   : > { %v3742_v57 = vadd.s32 %v3741_v58, %v3739_v28  ;;  %v10363_v28 = vld [vmem:[#allocation17_spill] sm:$0xff] }
0x158e   : > { %3781 = vmin.xlane.f32.xlu0 %v3780_v13 }
0x158f   : > { %vm3757_vm10 = vcmp.eq.s32.totalorder %v9081_v63, %v3742_v57  ;;  %vm3758_vm5 = vcmp.eq.s32.totalorder %v9084_v35, %v3742_v57  ;;  %v9225_v30 = vsel %vm4314_vm7, %v10347_v29, %v3742_v57  ;;  %v10352_v35 = vld [vmem:[#allocation57_spill] sm:$0xff] }
0x1590   : > { %v9228_v26 = vsel %vm3757_vm10, 1e+30, %v10348_v62  ;;  %v9231_v17 = vsel %vm3758_vm5, 1e+30, %v10350_v44  ;;  %v10364_v62 = vld [vmem:[#allocation18_spill] sm:$0xff] }
0x1591   : > { %10349 = vst [vmem:[#allocation90_spill] sm:$0xff] %v9228_v26  ;;  %v3803_v43 = vsel %vm500_vm3, %v9231_v17, inf }
0x1592   : > { %10351 = vst [vmem:[#allocation98_spill] sm:$0xff] %v9231_v17  ;;  %v3804_v40 = vmin.f32 %v9228_v26, %v3803_v43 }
0x1596   : > { %3805 = vmin.xlane.f32.xlu0 %v3804_v40 }
0x15de   : > { %v3778_v63 = vpop.xlane.xlu2 %3777 }
0x15df   : > { %vm3807_vm4 = vcmp.le.f32.partialorder %v9118_v1, %v3778_v63  ;;  %vm3808_vm12 = vcmp.le.f32.partialorder %v9121_v45, %v3778_v63  ;;  %v9240_v18 = vsel %vm9959_vm15, %v10352_v35, %v3778_v63  ;;  %v10366_v35 = vld [vmem:[#allocation80_spill] sm:$0xff] }
0x15e0   : > { %10353 = vst [vmem:[#allocation32_spill] sm:$0xff] %v9240_v18  ;;  %v9243_v32 = vsel %vm3807_vm4, %v10354_v46, 2147483647  ;;  %v9246_v48 = vsel %vm3808_vm12, %v10355_v55, 2147483647 }
0x15e1   : > { %v3839_v36 = vsel %vm500_vm3, %v9246_v48, 2147483647 }
0x15e2   : > { %vm3840_vm14 = vcmp.lt.s32.totalorder %v9243_v32, %v3839_v36 }
0x15e3   : > { %v9252_v47 = vsel %vm3840_vm14, %v9243_v32, %v3839_v36 }
0x15e4   : > { %v3843_v10 = vshra.s32 %v9252_v47, 16 }
0x15e6   : > { %v9255_v7 = vcvt.s32.f32 %v3843_v10  ;;  %v3786_v27 = vpop.xlane.xlu1 %3785 }
0x15e7   : > { %vm3811_vm10 = vcmp.le.f32.partialorder %v9133_v4, %v3786_v27  ;;  %vm3812_vm5 = vcmp.le.f32.partialorder %v9136_v42, %v3786_v27  ;;  %v9262_v20 = vsel %vm9959_vm15, %v10356_v3, %v3786_v27  ;;  %v10368_v27 = vld [vmem:[#allocation14_spill] sm:$0xff] }
0x15e8   : > { %3846 = vmin.xlane.f32.xlu1 %v9255_v7  ;;  %10357 = vst [vmem:[#allocation10_spill] sm:$0xff] %v9262_v20  ;;  %v9265_v50 = vsel %vm3811_vm10, %v10358_v41, 2147483647  ;;  %v9268_v22 = vsel %vm3812_vm5, %v10355_v55, 2147483647  ;;  %v3790_v21 = vpop.xlane.xlu2 %3789  ;;  %v3842_v20 = vand.u32 65535, %v9252_v47 }
0x15e9   : > { %v3873_v51 = vsel %vm500_vm3, %v9268_v22, 2147483647  ;;  %vm3813_vm4 = vcmp.le.f32.partialorder %v9148_v56, %v3790_v21  ;;  %vm3814_vm12 = vcmp.le.f32.partialorder %v9151_v11, %v3790_v21  ;;  %v9276_v25 = vsel %vm9959_vm15, %v10359_v33, %v3790_v21 }
0x15ea   : > { %10360 = vst [vmem:[#allocation43_spill] sm:$0xff] %v9276_v25  ;;  %vm3874_vm14 = vcmp.lt.s32.totalorder %v9265_v50, %v3873_v51  ;;  %v9280_v37 = vsel %vm3813_vm4, %v10361_v23, 2147483647  ;;  %v9283_v39 = vsel %vm3814_vm12, %v10355_v55, 2147483647  ;;  %v3844_v46 = vcvt.s32.f32 %v3842_v20 }
0x15eb   : > { %v3890_v14 = vsel %vm500_vm3, %v9283_v39, 2147483647  ;;  %v9288_v59 = vsel %vm3874_vm14, %v9265_v50, %v3873_v51 }
0x15ec   : > { %vm3891_vm10 = vcmp.lt.s32.totalorder %v9280_v37, %v3890_v14  ;;  %v3877_v2 = vshra.s32 %v9288_v59, 16 }
0x15ed   : > { %v9293_v0 = vsel %vm3891_vm10, %v9280_v37, %v3890_v14 }
0x15ee   : > { %v9295_v61 = vcvt.s32.f32 %v3877_v2  ;;  %v3894_v9 = vshra.s32 %v9293_v0, 16  ;;  %v3893_v18 = vand.u32 65535, %v9293_v0 }
0x15f0   : > { %3880 = vmin.xlane.f32.xlu0 %v9295_v61  ;;  %v9299_v52 = vcvt.s32.f32 %v3894_v9 }
0x15f2   : > { %3897 = vmin.xlane.f32.xlu1 %v9299_v52 }
0x15f9   : > { %v9302_v13 = vpop.xlane.xlu1 %3797  ;;  %v3794_v58 = vpop.xlane.xlu0 %3793 }
0x15fa   : > { %10362 = vst [vmem:[#allocation24_spill] sm:$0xff] %v9302_v13  ;;  %vm3817_vm5 = vcmp.le.f32.partialorder %v9179_v19, %v9302_v13  ;;  %vm3818_vm4 = vcmp.le.f32.partialorder %v9182_v60, %v9302_v13  ;;  %vm3815_vm12 = vcmp.le.f32.partialorder %v9173_v38, %v3794_v58  ;;  %vm3816_vm14 = vcmp.le.f32.partialorder %v9176_v16, %v3794_v58 }
0x15fb   : > { %v9310_v57 = vsel %vm3817_vm5, %v10363_v28, 2147483647  ;;  %v9313_v29 = vsel %vm3818_vm4, %v10355_v55, 2147483647  ;;  %v9317_v44 = vsel %vm3815_vm12, %v10364_v62, 2147483647  ;;  %v9319_v43 = vpop.xlane.xlu2 %3801  ;;  %v9328_v36 = vsel %vm9959_vm15, %v10366_v35, %v3794_v58 }
0x15fc   : > { %10365 = vst [vmem:[#allocation50_spill] sm:$0xff] %v9319_v43  ;;  %v3924_v40 = vsel %vm500_vm3, %v9313_v29, 2147483647  ;;  %v9324_v63 = vsel %vm3816_vm14, %v10355_v55, 2147483647  ;;  %vm3819_vm10 = vcmp.le.f32.partialorder %v9197_v15, %v9319_v43  ;;  %vm3820_vm4 = vcmp.le.f32.partialorder %v9200_v31, %v9319_v43  ;;  %v10369_v43 = vld [vmem:[#allocation81_spill] sm:$0xff] }
0x15fd   : > { %10367 = vst [vmem:[#allocation35_spill] sm:$0xff] %v9328_v36  ;;  %vm3925_vm5 = vcmp.lt.s32.totalorder %v9310_v57, %v3924_v40  ;;  %v3907_v10 = vsel %vm500_vm3, %v9324_v63, 2147483647  ;;  %v9338_v3 = vsel %vm3819_vm10, %v10368_v27, 2147483647  ;;  %v10371_v36 = vld [vmem:[#allocation13_spill] sm:$0xff] }
0x15fe   : > { %vm3908_vm12 = vcmp.lt.s32.totalorder %v9317_v44, %v3907_v10  ;;  %v9342_v21 = vsel %vm3820_vm4, %v10355_v55, 2147483647  ;;  %v3926_v51 = vsel %vm3925_vm5, %v9310_v57, %v3924_v40 }
0x15ff   : > { %v3941_v33 = vsel %vm500_vm3, %v9342_v21, 2147483647  ;;  %v3928_v14 = vshra.s32 %v3926_v51, 16  ;;  %v3909_v2 = vsel %vm3908_vm12, %v9317_v44, %v3907_v10  ;;  %v3927_v20 = vand.u32 65535, %v3926_v51 }
0x1600   : > { %vm3942_vm14 = vcmp.lt.s32.totalorder %v9338_v3, %v3941_v33  ;;  %v3911_v9 = vshra.s32 %v3909_v2, 16 }
0x1601   : > { %v3782_v58 = vpop.xlane.xlu0 %3781  ;;  %v3930_v35 = vcvt.s32.f32 %v3928_v14  ;;  %v3943_v27 = vsel %vm3942_vm14, %v9338_v3, %v3941_v33 }
0x1602   : > { %vm3809_vm10 = vcmp.le.f32.partialorder %v9213_v54, %v3782_v58  ;;  %vm3810_vm4 = vcmp.le.f32.partialorder %v9216_v49, %v3782_v58  ;;  %v9354_v40 = vsel %vm9959_vm15, %v10369_v43, %v3782_v58  ;;  %v3913_v62 = vcvt.s32.f32 %v3911_v9 }
0x1603   : > { %10370 = vst [vmem:[#allocation4_spill] sm:$0xff] %v9354_v40  ;;  %v9357_v28 = vsel %vm3809_vm10, %v10371_v36, 2147483647  ;;  %v9360_v10 = vsel %vm3810_vm4, %v10355_v55, 2147483647  ;;  %3931 = vmin.xlane.f32.xlu0 %v3930_v35  ;;  %v3945_v13 = vshra.s32 %v3943_v27, 16 }
0x1604   : > { %v3856_v33 = vsel %vm500_vm3, %v9360_v10, 2147483647  ;;  %3914 = vmin.xlane.f32.xlu2 %v3913_v62  ;;  %v10373_v36 = vld [vmem:[#allocation20_spill] sm:$0xff] }
0x1605   : > { %vm3857_vm5 = vcmp.lt.s32.totalorder %v9357_v28, %v3856_v33  ;;  %v3947_v14 = vcvt.s32.f32 %v3945_v13 }
0x1606   : > { %v3858_v23 = vsel %vm3857_vm5, %v9357_v28, %v3856_v33 }
0x1607   : > { %3948 = vmin.xlane.f32.xlu1 %v3947_v14  ;;  %v3860_v43 = vshra.s32 %v3858_v23, 16 }
0x1609   : > { %v9366_v9 = vpop.xlane.xlu0 %3805  ;;  %v3862_v58 = vcvt.s32.f32 %v3860_v43 }
0x160a   : > { %10372 = vst [vmem:[#allocation58_spill] sm:$0xff] %v9366_v9  ;;  %vm3821_vm12 = vcmp.le.f32.partialorder %v9228_v26, %v9366_v9  ;;  %vm3822_vm14 = vcmp.le.f32.partialorder %v9231_v17, %v9366_v9 }
0x160b   : > { %v9373_v40 = vsel %vm3821_vm12, %v10373_v36, 2147483647  ;;  %v9376_v25 = vsel %vm3822_vm14, %v10355_v55, 2147483647  ;;  %v3876_v55 = vand.u32 65535, %v9288_v59  ;;  %v3944_v59 = vand.u32 65535, %v3943_v27 }
0x160c   : > { %10374 = vst [vmem:[#allocation46_spill] sm:$0xff] %v9373_v40  ;;  %v3958_v13 = vsel %vm500_vm3, %v9376_v25, 2147483647  ;;  %3863 = vmin.xlane.f32.xlu2 %v3862_v58 }
0x160d   : > { %10375 = vst [vmem:[#allocation66_spill] sm:$0xff] %v9376_v25  ;;  %vm3959_vm10 = vcmp.lt.s32.totalorder %v9373_v40, %v3958_v13  ;;  %v3878_v26 = vcvt.s32.f32 %v3876_v55  ;;  %v3895_v25 = vcvt.s32.f32 %v3893_v18 }
0x160e   : > { %v3960_v33 = vsel %vm3959_vm10, %v9373_v40, %v3958_v13 }
0x160f   : > { %v3962_v43 = vshra.s32 %v3960_v33, 16 }
0x1611   : > { %v3964_v41 = vcvt.s32.f32 %v3962_v43 }
0x1614   : > { %3965 = vmin.xlane.f32.xlu2 %v3964_v41 }
0x165b   : > { %v3847_v9 = vpop.xlane.xlu1 %3846 }
0x165c   : > { %vm3848_vm4 = vcmp.eq.f32.partialorder %v9255_v7, %v3847_v9  ;;  %v3910_v7 = vand.u32 65535, %v3909_v2 }
0x165d   : > { %v3849_v36 = vsel %vm3848_vm4, %v3844_v46, inf }
0x165e   : > { %3850 = vmin.xlane.f32.xlu0 %v3849_v36  ;;  %v3929_v36 = vcvt.s32.f32 %v3927_v20  ;;  %v3912_v55 = vcvt.s32.f32 %v3910_v7  ;;  %v3853_v20 = vcvt.f32.s32 %v3847_v9 }
0x1663   : > { %v3881_v17 = vpop.xlane.xlu0 %3880 }
0x1664   : > { %vm3882_vm5 = vcmp.eq.f32.partialorder %v9295_v61, %v3881_v17  ;;  %v3859_v61 = vand.u32 65535, %v3858_v23  ;;  %v3854_v23 = vshll.u32 %v3853_v20, 16 }
0x1665   : > { %v3898_v13 = vpop.xlane.xlu1 %3897  ;;  %v3883_v43 = vsel %vm3882_vm5, %v3878_v26, inf }
0x1666   : > { %vm3899_vm12 = vcmp.eq.f32.partialorder %v9299_v52, %v3898_v13  ;;  %3884 = vmin.xlane.f32.xlu2 %v3883_v43  ;;  %v3861_v51 = vcvt.s32.f32 %v3859_v61 }
0x1667   : > { %v3900_v47 = vsel %vm3899_vm12, %v3895_v25, inf  ;;  %v3946_v25 = vcvt.s32.f32 %v3944_v59 }
0x1668   : > { %3901 = vmin.xlane.f32.xlu0 %v3900_v47 }
0x1676   : > { %v9388_v46 = vpop.xlane.xlu0 %3931 }
0x1677   : > { %v9390_v40 = vpop.xlane.xlu2 %3914  ;;  %vm3933_vm14 = vcmp.eq.f32.partialorder %v3930_v35, %v9388_v46 }
0x1678   : > { %vm3916_vm10 = vcmp.eq.f32.partialorder %v3913_v62, %v9390_v40  ;;  %v3934_v18 = vsel %vm3933_vm14, %v3929_v36, inf  ;;  %v3961_v62 = vand.u32 65535, %v3960_v33  ;;  %v3887_v33 = vcvt.f32.s32 %v3881_v17 }
0x1679   : > { %v3917_v26 = vsel %vm3916_vm10, %v3912_v55, inf  ;;  %3935 = vmin.xlane.f32.xlu2 %v3934_v18  ;;  %v3904_v18 = vcvt.f32.s32 %v3898_v13 }
0x167a   : > { %3918 = vmin.xlane.f32.xlu1 %v3917_v26  ;;  %v9394_v0 = vpop.xlane.xlu1 %3948  ;;  %v3963_v43 = vcvt.s32.f32 %v3961_v62 }
0x167b   : > { %vm3950_vm4 = vcmp.eq.f32.partialorder %v3947_v14, %v9394_v0  ;;  %v3905_v61 = vshll.u32 %v3904_v18, 16 }
0x167c   : > { %v3951_v52 = vsel %vm3950_vm4, %v3946_v25, inf }
0x167d   : > { %3952 = vmin.xlane.f32.xlu0 %v3951_v52 }
0x167f   : > { %v9397_v27 = vpop.xlane.xlu2 %3863 }
0x1680   : > { %vm3865_vm5 = vcmp.eq.f32.partialorder %v3862_v58, %v9397_v27 }
0x1681   : > { %v3866_v2 = vsel %vm3865_vm5, %v3861_v51, inf }
0x1682   : > { %3867 = vmin.xlane.f32.xlu1 %v3866_v2 }
0x1687   : > { %v9400_v35 = vpop.xlane.xlu2 %3965 }
0x1688   : > { %vm3967_vm12 = vcmp.eq.f32.partialorder %v3964_v41, %v9400_v35 }
0x1689   : > { %v3968_v47 = vsel %vm3967_vm12, %v3963_v43, inf }
0x168a   : > { %3969 = vmin.xlane.f32.xlu1 %v3968_v47 }
0x16d1   : > { %v3851_v14 = vpop.xlane.xlu0 %3850 }
0x16d2   : > { %v3852_v7 = vcvt.f32.s32 %v3851_v14 }
0x16d4   : > { %v3855_v36 = vadd.s32 %v3854_v23, %v3852_v7  ;;  %v3870_v7 = vcvt.f32.s32 %v9397_v27 }
0x16d6   : > { %v9405_v59 = vsel %vm9959_vm15, %v9115_v34, %v3855_v36  ;;  %vm3975_vm14 = vcmp.eq.s32.totalorder %v9243_v32, %v3855_v36  ;;  %vm3976_vm10 = vcmp.eq.s32.totalorder %v9246_v48, %v3855_v36  ;;  %v3888_v34 = vshll.u32 %v3887_v33, 16 }
0x16d7   : > { %v9410_v58 = vsel %vm3975_vm14, 1e+30, %v9118_v1  ;;  %v9413_v41 = vsel %vm3976_vm10, 1e+30, %v9121_v45 }
0x16d8   : > { %v4007_v9 = vsel %vm500_vm3, %v9413_v41, inf }
0x16d9   : > { %v4008_v55 = vmin.f32 %v9410_v58, %v4007_v9  ;;  %v3885_v26 = vpop.xlane.xlu2 %3884 }
0x16da   : > { %v3886_v25 = vcvt.f32.s32 %v3885_v26 }
0x16db   : > { %4009 = vmin.xlane.f32.xlu2 %v4008_v55  ;;  %v3902_v32 = vpop.xlane.xlu0 %3901 }
0x16dc   : > { %v3889_v48 = vadd.s32 %v3888_v34, %v3886_v25  ;;  %v3903_v52 = vcvt.f32.s32 %v3902_v32 }
0x16de   : > { %v9420_v1 = vsel %vm9959_vm15, %v9130_v8, %v3889_v48  ;;  %v3906_v45 = vadd.s32 %v3905_v61, %v3903_v52  ;;  %vm3979_vm4 = vcmp.eq.s32.totalorder %v9265_v50, %v3889_v48  ;;  %vm3980_vm5 = vcmp.eq.s32.totalorder %v9268_v22, %v3889_v48 }
0x16df   : > { %v9425_v17 = vsel %vm3979_vm4, 1e+30, %v9133_v4  ;;  %v9428_v13 = vsel %vm3980_vm5, 1e+30, %v9136_v42  ;;  %v3938_v22 = vcvt.f32.s32 %v9388_v46 }
0x16e0   : > { %v9432_v51 = vsel %vm9959_vm15, %v9142_v6, %v3906_v45  ;;  %v4015_v2 = vsel %vm500_vm3, %v9428_v13, inf  ;;  %vm3981_vm12 = vcmp.eq.s32.totalorder %v9280_v37, %v3906_v45  ;;  %vm3982_vm14 = vcmp.eq.s32.totalorder %v9283_v39, %v3906_v45 }
0x16e1   : > { %v4016_v8 = vmin.f32 %v9425_v17, %v4015_v2  ;;  %v9440_v50 = vsel %vm3981_vm12, 1e+30, %v9148_v56  ;;  %v9443_v4 = vsel %vm3982_vm14, 1e+30, %v9151_v11  ;;  %v3921_v37 = vcvt.f32.s32 %v9390_v40  ;;  %v10379_v2 = vld [vmem:[#allocation98_spill] sm:$0xff] }
0x16e2   : > { %v4019_v42 = vsel %vm500_vm3, %v9443_v4, inf  ;;  %v3955_v39 = vcvt.f32.s32 %v9394_v0  ;;  %v3939_v43 = vshll.u32 %v3938_v22, 16 }
0x16e3   : > { %4017 = vmin.xlane.f32.xlu1 %v4016_v8  ;;  %v4020_v6 = vmin.f32 %v9440_v50, %v4019_v42  ;;  %v3922_v20 = vshll.u32 %v3921_v37, 16 }
0x16e4   : > { %v3956_v23 = vshll.u32 %v3955_v39, 16  ;;  %v10381_v39 = vld [vmem:[#allocation12_spill] sm:$0xff] }
0x16e5   : > { %4021 = vmin.xlane.f32.xlu2 %v4020_v6 }
0x16ec   : > { %v3936_v62 = vpop.xlane.xlu2 %3935 }
0x16ed   : > { %v3919_v56 = vpop.xlane.xlu1 %3918  ;;  %v3937_v47 = vcvt.f32.s32 %v3936_v62 }
0x16ee   : > { %v3920_v11 = vcvt.f32.s32 %v3919_v56 }
0x16ef   : > { %v3940_v14 = vadd.s32 %v3939_v43, %v3937_v47  ;;  %v10382_v43 = vld [vmem:[#allocation11_spill] sm:$0xff] }
0x16f0   : > { %v3923_v36 = vadd.s32 %v3922_v20, %v3920_v11  ;;  %v3953_v33 = vpop.xlane.xlu0 %3952 }
0x16f1   : > { %v9454_v9 = vsel %vm9959_vm15, %v9170_v5, %v3940_v14  ;;  %v3954_v46 = vcvt.f32.s32 %v3953_v33  ;;  %vm3985_vm10 = vcmp.eq.s32.totalorder %v9310_v57, %v3940_v14  ;;  %vm3986_vm4 = vcmp.eq.s32.totalorder %v9313_v29, %v3940_v14 }
0x16f2   : > { %v9460_v40 = vsel %vm9959_vm15, %v9164_v53, %v3923_v36  ;;  %vm3983_vm5 = vcmp.eq.s32.totalorder %v9317_v44, %v3923_v36  ;;  %vm3984_vm12 = vcmp.eq.s32.totalorder %v9324_v63, %v3923_v36  ;;  %v9465_v0 = vsel %vm3985_vm10, 1e+30, %v9179_v19 }
0x16f3   : > { %v3957_v27 = vadd.s32 %v3956_v23, %v3954_v46  ;;  %v9468_v5 = vsel %vm3983_vm5, 1e+30, %v9173_v38  ;;  %v9471_v55 = vsel %vm3984_vm12, 1e+30, %v9176_v16  ;;  %v9474_v57 = vsel %vm3986_vm4, 1e+30, %v9182_v60 }
0x16f4   : > { %v4023_v53 = vsel %vm500_vm3, %v9471_v55, inf  ;;  %v4027_v29 = vsel %vm500_vm3, %v9474_v57, inf  ;;  %v3871_v16 = vshll.u32 %v3870_v7, 16  ;;  %v10384_v7 = vld [vmem:[#allocation16_spill] sm:$0xff] }
0x16f5   : > { %v3868_v44 = vpop.xlane.xlu1 %3867  ;;  %v9482_v19 = vsel %vm9959_vm15, %v9192_v24, %v3957_v27  ;;  %v4024_v38 = vmin.f32 %v9468_v5, %v4023_v53  ;;  %v4028_v63 = vmin.f32 %v9465_v0, %v4027_v29  ;;  %vm3987_vm14 = vcmp.eq.s32.totalorder %v9338_v3, %v3957_v27  ;;  %v10385_v53 = vld [vmem:[#allocation43_spill] sm:$0xff] }
0x16f6   : > { %v3869_v60 = vcvt.f32.s32 %v3868_v44  ;;  %vm3988_vm10 = vcmp.eq.s32.totalorder %v9342_v21, %v3957_v27  ;;  %v9489_v18 = vsel %vm3987_vm14, 1e+30, %v9197_v15  ;;  %v3972_v3 = vcvt.f32.s32 %v9400_v35 }
0x16f7   : > { %4025 = vmin.xlane.f32.xlu0 %v4024_v38  ;;  %4029 = vmin.xlane.f32.xlu1 %v4028_v63  ;;  %v9492_v26 = vsel %vm3988_vm10, 1e+30, %v9200_v31  ;;  %vm4332_vm10 = vcmask 121856  }
0x16f8   : > { %v3872_v24 = vadd.s32 %v3871_v16, %v3869_v60  ;;  %v4031_v34 = vsel %vm500_vm3, %v9492_v26, inf  ;;  %v3973_v48 = vshll.u32 %v3972_v3, 16 }
0x16f9   : > { %v4032_v25 = vmin.f32 %v9489_v18, %v4031_v34  ;;  %v10387_v34 = vld [vmem:[#allocation33_spill] sm:$0xff] }
0x16fa   : > { %v9500_v32 = vsel %vm9959_vm15, %v9210_v12, %v3872_v24  ;;  %vm3977_vm4 = vcmp.eq.s32.totalorder %v9357_v28, %v3872_v24  ;;  %vm3978_vm5 = vcmp.eq.s32.totalorder %v9360_v10, %v3872_v24  ;;  %v10377_v10 = vld [vmem:[#allocation66_spill] sm:$0xff] }
0x16fb   : > { %v9505_v15 = vsel %vm3977_vm4, 1e+30, %v9213_v54  ;;  %v9508_v31 = vsel %vm3978_vm5, 1e+30, %v9216_v49  ;;  %4033 = vmin.xlane.f32.xlu2 %v4032_v25  ;;  %v10376_v54 = vld [vmem:[#allocation46_spill] sm:$0xff]  ;;  %v10388_v25 = vld [vmem:[#allocation8_spill] sm:$0xff] }
0x16fc   : > { %v4011_v21 = vsel %vm500_vm3, %v9508_v31, inf  ;;  %v10378_v49 = vld [vmem:[#allocation90_spill] sm:$0xff]  ;;  %v4213_v3 = vsel %vm4207_vm8, %v10388_v25, %v10387_v34  ;;  %v10409_v34 = vld [vmem:[#allocation100_spill] sm:$0xff] }
0x16fd   : > { %v3970_v61 = vpop.xlane.xlu1 %3969  ;;  %v4012_v35 = vmin.f32 %v9505_v15, %v4011_v21  ;;  %v10389_v21 = vld [vmem:[#allocation44_spill] sm:$0xff] }
0x16fe   : > { %v3971_v12 = vcvt.f32.s32 %v3970_v61  ;;  %v4222_v61 = vsel %vm4216_vm9, %v4213_v3, %v10389_v21  ;;  %v10411_v3 = vld [vmem:[#allocation47_spill] sm:$0xff] }
0x16ff   : > { %4013 = vmin.xlane.f32.xlu0 %v4012_v35  ;;  %v10390_v35 = vld [vmem:[#allocation34_spill] sm:$0xff] }
0x1700   : > { %v3974_v52 = vadd.s32 %v3973_v48, %v3971_v12  ;;  %v10391_v48 = vld [vmem:[#allocation9_spill] sm:$0xff] }
0x1701   : > { %v4214_v12 = vsel %vm4207_vm8, %v10391_v48, %v10390_v35  ;;  %v10414_v48 = vld [vmem:[#allocation23_spill] sm:$0xff] }
0x1702   : > { %v9515_v28 = vsel %vm9959_vm15, %v9225_v30, %v3974_v52  ;;  %vm3989_vm12 = vcmp.eq.s32.totalorder %v10376_v54, %v3974_v52  ;;  %vm3990_vm14 = vcmp.eq.s32.totalorder %v10377_v10, %v3974_v52  ;;  %v10380_v30 = vld [vmem:[#allocation32_spill] sm:$0xff]  ;;  %v10392_v52 = vld [vmem:[#allocation27_spill] sm:$0xff]  ;;  %v10393_v10 = vld [vmem:[#allocation45_spill] sm:$0xff] }
0x1703   : > { %v9520_v45 = vsel %vm3989_vm12, 1e+30, %v10378_v49  ;;  %v9523_v8 = vsel %vm3990_vm14, 1e+30, %v10379_v2  ;;  %v4231_v54 = vsel %vm4225_vm6, %v4222_v61, %v10392_v52  ;;  %v4223_v49 = vsel %vm4216_vm9, %v4214_v12, %v10393_v10  ;;  %v10394_v2 = vld [vmem:[#allocation51_spill] sm:$0xff]  ;;  %v10412_v61 = vld [vmem:[#allocation93_spill] sm:$0xff] }
0x1704   : > { %v4035_v42 = vsel %vm500_vm3, %v9523_v8, inf  ;;  %v10416_v52 = vld [vmem:[#allocation48_spill] sm:$0xff]  ;;  %v10417_v10 = vld [vmem:[#allocation101_spill] sm:$0xff] }
0x1705   : > { %v4036_v6 = vmin.f32 %v9520_v45, %v4035_v42  ;;  %v4240_v42 = vsel %vm4234_vm13, %v4231_v54, %v10394_v2  ;;  %v10419_v2 = vld [vmem:[#allocation31_spill] sm:$0xff] }
0x1707   : > { %4037 = vmin.xlane.f32.xlu0 %v4036_v6  ;;  %v10395_v6 = vld [vmem:[#allocation37_spill] sm:$0xff] }
0x174e   : > { %v4010_v22 = vpop.xlane.xlu2 %4009 }
0x174f   : > { %vm4039_vm4 = vcmp.le.f32.partialorder %v9410_v58, %v4010_v22  ;;  %vm4040_vm5 = vcmp.le.f32.partialorder %v9413_v41, %v4010_v22  ;;  %v4333_v37 = vsel %vm4332_vm10, %v10380_v30, %v4010_v22  ;;  %v10383_v41 = vld [vmem:[#allocation10_spill] sm:$0xff]  ;;  %v4232_v22 = vsel %vm4225_vm6, %v4223_v49, %v10395_v6  ;;  %v10396_v30 = vld [vmem:[#allocation59_spill] sm:$0xff] }
0x1750   : > { %v4055_v62 = vsel %vm4039_vm4, %v10381_v39, 2147483647  ;;  %v4056_v56 = vsel %vm4040_vm5, %v10382_v43, 2147483647  ;;  %4461 = vst.msk [vmem:[#allocation2] sm:$0xff] %vm500_vm3, %v4333_v37  ;;  %v4249_v37 = vsel %vm4243_vm11, %v4240_v42, %v10396_v30  ;;  %v10397_v39 = vld [vmem:[#allocation52_spill] sm:$0xff] }
0x1751   : > { %v4071_v47 = vsel %vm500_vm3, %v4056_v56, 2147483647  ;;  %v10398_v56 = vld [vmem:[#allocation67_spill] sm:$0xff]  ;;  %v10421_v6 = vld [vmem:[#allocation54_spill] sm:$0xff] }
0x1752   : > { %vm4072_vm12 = vcmp.lt.s32.totalorder %v4055_v62, %v4071_v47  ;;  %v10422_v30 = vld [vmem:[#allocation38_spill] sm:$0xff] }
0x1753   : > { %v9536_v20 = vsel %vm4072_vm12, %v4055_v62, %v4071_v47  ;;  %v4241_v62 = vsel %vm4234_vm13, %v4232_v22, %v10397_v39  ;;  %v4258_v47 = vsel %vm4252_vm0, %v4249_v37, %v10398_v56  ;;  %v10424_v39 = vld [vmem:[#allocation73_spill] sm:$0xff]  ;;  %v10425_v56 = vld [vmem:[#allocation62_spill] sm:$0xff] }
0x1754   : > { %v4075_v11 = vshra.s32 %v9536_v20, 16 }
0x1756   : > { %v9539_v14 = vcvt.s32.f32 %v4075_v11  ;;  %v4018_v58 = vpop.xlane.xlu1 %4017  ;;  %v10399_v11 = vld [vmem:[#allocation60_spill] sm:$0xff] }
0x1757   : > { %vm4043_vm14 = vcmp.le.f32.partialorder %v9425_v17, %v4018_v58  ;;  %vm4044_vm4 = vcmp.le.f32.partialorder %v9428_v13, %v4018_v58  ;;  %v4335_v23 = vsel %vm4332_vm10, %v10383_v41, %v4018_v58  ;;  %v10386_v13 = vld [vmem:[#allocation15_spill] sm:$0xff]  ;;  %v4250_v58 = vsel %vm4243_vm11, %v4241_v62, %v10399_v11  ;;  %v10426_v11 = vld [vmem:[#allocation25_spill] sm:$0xff] }
0x1758   : > { %4078 = vmin.xlane.f32.xlu1 %v9539_v14  ;;  %v4059_v36 = vsel %vm4043_vm14, %v10384_v7, 2147483647  ;;  %v4060_v33 = vsel %vm4044_vm4, %v10382_v43, 2147483647  ;;  %4463 = vst.msk [vmem:[#allocation2 + $0x10] sm:$0xff] %vm500_vm3, %v4335_v23  ;;  %v4022_v46 = vpop.xlane.xlu2 %4021  ;;  %v10400_v41 = vld [vmem:[#allocation75_spill] sm:$0xff] }
0x1759   : > { %v4105_v27 = vsel %vm500_vm3, %v4060_v33, 2147483647  ;;  %vm4045_vm5 = vcmp.le.f32.partialorder %v9440_v50, %v4022_v46  ;;  %vm4046_vm12 = vcmp.le.f32.partialorder %v9443_v4, %v4022_v46  ;;  %v4336_v17 = vsel %vm4332_vm10, %v10385_v53, %v4022_v46  ;;  %v10401_v7 = vld [vmem:[#allocation68_spill] sm:$0xff]  ;;  %v10402_v33 = vld [vmem:[#allocation83_spill] sm:$0xff] }
0x175a   : > { %vm4106_vm15 = vcmp.lt.s32.totalorder %v4059_v36, %v4105_v27  ;;  %v4061_v29 = vsel %vm4045_vm5, %v10386_v13, 2147483647  ;;  %v4062_v44 = vsel %vm4046_vm12, %v10382_v43, 2147483647  ;;  %4464 = vst.msk [vmem:[#allocation2 + $0x18] sm:$0xff] %vm500_vm3, %v4336_v17  ;;  %v4267_v23 = vsel %vm4261_vm2, %v4258_v47, %v10400_v41  ;;  %v10404_v17 = vld [vmem:[#allocation92_spill] sm:$0xff] }
0x175b   : > { %v4122_v38 = vsel %vm500_vm3, %v4062_v44, 2147483647  ;;  %v9558_v63 = vsel %vm4106_vm15, %v4059_v36, %v4105_v27  ;;  %v4259_v36 = vsel %vm4252_vm0, %v4250_v58, %v10401_v7  ;;  %v4275_v46 = vsel %vm296_vm1, %v4267_v23, %v10402_v33  ;;  %v10403_v27 = vld [vmem:[#allocation76_spill] sm:$0xff]  ;;  %v10407_v44 = vld [vmem:[#allocation19_spill] sm:$0xff] }
0x175c   : > { %vm4123_vm14 = vcmp.lt.s32.totalorder %v4061_v29, %v4122_v38  ;;  %v4109_v16 = vshra.s32 %v9558_v63, 16  ;;  %v4268_v53 = vsel %vm4261_vm2, %v4259_v36, %v10403_v27  ;;  %vm10405_vm15 = vcmask 72704   ;;  %v10428_v41 = vld [vmem:[#allocation24_spill] sm:$0xff] }
0x175d   : > { %v9561_v50 = vsel %vm4123_vm14, %v4061_v29, %v4122_v38  ;;  %v4284_v13 = vsel %vm10405_vm15, %v4275_v46, %v10404_v17  ;;  %v10406_v29 = vld [vmem:[#allocation36_spill] sm:$0xff]  ;;  %vm10410_vm4 = vcmask 80896   ;;  %vm10413_vm5 = vmmov %vm10405_vm15  ;;  %vm10415_vm12 = vcmask 89088   ;;  %v10430_v46 = vld [vmem:[#allocation17_spill] sm:$0xff] }
0x175e   : > { %v9563_v4 = vcvt.s32.f32 %v4109_v16  ;;  %v4126_v60 = vshra.s32 %v9561_v50, 16  ;;  %v4215_v38 = vsel %vm4207_vm8, %v10407_v44, %v10406_v29  ;;  %v10408_v16 = vld [vmem:[#allocation84_spill] sm:$0xff]  ;;  %v4293_v25 = vsel %vm10410_vm4, %v4284_v13, %v10409_v34  ;;  %vm10418_vm8 = vmmov %vm10410_vm4  ;;  %v10431_v17 = vld [vmem:[#allocation35_spill] sm:$0xff] }
0x175f   : > { %v4224_v21 = vsel %vm4216_vm9, %v4215_v38, %v10411_v3  ;;  %v4302_v12 = vsel %vm10415_vm12, %v4293_v25, %v10414_v48  ;;  %vm10420_vm14 = vcmask 97280   ;;  %vm10423_vm9 = vmmov %vm10415_vm12  ;;  %vm10429_vm15 = vcmask 113664   ;;  %v10432_v29 = vld [vmem:[#allocation89_spill] sm:$0xff]  ;;  %v10433_v44 = vld [vmem:[#allocation18_spill] sm:$0xff] }
0x1760   : > { %4112 = vmin.xlane.f32.xlu0 %v9563_v4  ;;  %v9567_v24 = vcvt.s32.f32 %v4126_v60  ;;  %v4276_v60 = vsel %vm296_vm1, %v4268_v53, %v10408_v16  ;;  %v4233_v54 = vsel %vm4225_vm6, %v4224_v21, %v10416_v52  ;;  %v4311_v42 = vsel %vm10420_vm14, %v4302_v12, %v10419_v2  ;;  %vm10427_vm6 = vmmov %vm10420_vm14  ;;  %v10434_v16 = vld [vmem:[#allocation70_spill] sm:$0xff] }
0x1761   : > { %v4285_v35 = vsel %vm10413_vm5, %v4276_v60, %v10412_v61  ;;  %v4242_v22 = vsel %vm4234_vm13, %v4233_v54, %v10421_v6  ;;  %v4320_v62 = vsel %vm4314_vm7, %v4311_v42, %v10424_v39  ;;  %v10435_v34 = vld [vmem:[#allocation50_spill] sm:$0xff]  ;;  %vm10436_vm12 = vmmov %vm10429_vm15  ;;  %v10441_v39 = vld [vmem:[#allocation13_spill] sm:$0xff] }
0x1762   : > { %4129 = vmin.xlane.f32.xlu1 %v9567_v24  ;;  %v4294_v49 = vsel %vm10418_vm8, %v4285_v35, %v10417_v10  ;;  %v4251_v47 = vsel %vm4243_vm11, %v4242_v22, %v10425_v56  ;;  %v4329_v23 = vsel %vm10429_vm15, %v4320_v62, %v10428_v41  ;;  %v10437_v61 = vld [vmem:[#allocation14_spill] sm:$0xff]  ;;  %v10440_v22 = vld [vmem:[#allocation4_spill] sm:$0xff] }
0x1763   : > { %v4303_v37 = vsel %vm10423_vm9, %v4294_v49, %v10422_v30  ;;  %v4260_v60 = vsel %vm4252_vm0, %v4251_v47, %v10434_v16  ;;  %v10438_v54 = vld [vmem:[#allocation78_spill] sm:$0xff] }
0x1764   : > { %v4312_v58 = vsel %vm10427_vm6, %v4303_v37, %v10426_v11  ;;  %v4269_v10 = vsel %vm4261_vm2, %v4260_v60, %v10438_v54  ;;  %v10439_v2 = vld [vmem:[#allocation86_spill] sm:$0xff]  ;;  %vm10445_vm2 = vcmask 80896   ;;  %v10452_v60 = vld [vmem:[#allocation20_spill] sm:$0xff]  ;;  %v4125_v54 = vand.u32 65535, %v9561_v50 }
0x1765   : > { %v4277_v42 = vsel %vm296_vm1, %v4269_v10, %v10439_v2  ;;  %vm10443_vm1 = vcmask 72704  }
0x176a   : > { %v4030_v7 = vpop.xlane.xlu1 %4029  ;;  %v4026_v36 = vpop.xlane.xlu0 %4025 }
0x176b   : > { %vm4049_vm4 = vcmp.le.f32.partialorder %v9465_v0, %v4030_v7  ;;  %vm4050_vm13 = vcmp.le.f32.partialorder %v9474_v57, %v4030_v7  ;;  %v4338_v33 = vsel %vm4332_vm10, %v4329_v23, %v4030_v7  ;;  %vm4047_vm5 = vcmp.le.f32.partialorder %v9468_v5, %v4026_v36  ;;  %v10444_v23 = vld [vmem:[#allocation103_spill] sm:$0xff] }
0x176c   : > { %v4065_v27 = vsel %vm4049_vm4, %v10430_v46, 2147483647  ;;  %v4066_v53 = vsel %vm4050_vm13, %v10382_v43, 2147483647  ;;  %4466 = vst.msk [vmem:[#allocation2 + $0x28] sm:$0xff] %vm500_vm3, %v4338_v33  ;;  %vm4048_vm11 = vcmp.le.f32.partialorder %v9471_v55, %v4026_v36  ;;  %v4337_v13 = vsel %vm4332_vm10, %v10431_v17, %v4026_v36  ;;  %v10446_v36 = vld [vmem:[#allocation55_spill] sm:$0xff] }
0x176d   : > { %v4321_v0 = vsel %vm4314_vm7, %v4312_v58, %v10432_v29  ;;  %v4156_v57 = vsel %vm500_vm3, %v4066_v53, 2147483647  ;;  %v4063_v38 = vsel %vm4047_vm5, %v10433_v44, 2147483647  ;;  %v4064_v5 = vsel %vm4048_vm11, %v10382_v43, 2147483647 }
0x176e   : > { %v4330_v25 = vsel %vm10436_vm12, %v4321_v0, %v10435_v34  ;;  %vm4157_vm8 = vcmp.lt.s32.totalorder %v4065_v27, %v4156_v57  ;;  %v4139_v55 = vsel %vm500_vm3, %v4064_v5, 2147483647  ;;  %4465 = vst.msk [vmem:[#allocation2 + $0x20] sm:$0xff] %vm500_vm3, %v4337_v13  ;;  %v4034_v3 = vpop.xlane.xlu2 %4033  ;;  %v10442_v58 = vld [vmem:[#allocation95_spill] sm:$0xff]  ;;  %vm10447_vm5 = vcmask 89088   ;;  %v10448_v53 = vld [vmem:[#allocation22_spill] sm:$0xff] }
0x176f   : > { %vm4140_vm14 = vcmp.lt.s32.totalorder %v4063_v38, %v4139_v55  ;;  %vm4051_vm9 = vcmp.le.f32.partialorder %v9489_v18, %v4034_v3  ;;  %vm4052_vm6 = vcmp.le.f32.partialorder %v9492_v26, %v4034_v3  ;;  %v4339_v21 = vsel %vm4332_vm10, %v4330_v25, %v4034_v3  ;;  %v10450_v29 = vld [vmem:[#allocation97_spill] sm:$0xff] }
0x1770   : > { %v4067_v35 = vsel %vm4051_vm9, %v10437_v61, 2147483647  ;;  %v4068_v48 = vsel %vm4052_vm6, %v10382_v43, 2147483647  ;;  %4467 = vst.msk [vmem:[#allocation2 + $0x30] sm:$0xff] %vm500_vm3, %v4339_v21  ;;  %v9662_v12 = vsel %vm4157_vm8, %v4065_v27, %v4156_v57  ;;  %v9664_v52 = vsel %vm4140_vm14, %v4063_v38, %v4139_v55  ;;  %v10451_v57 = vld [vmem:[#allocation58_spill] sm:$0xff] }
0x1771   : > { %v4173_v49 = vsel %vm500_vm3, %v4068_v48, 2147483647  ;;  %v4160_v18 = vshra.s32 %v9662_v12, 16  ;;  %v4143_v26 = vshra.s32 %v9664_v52, 16  ;;  %v4286_v41 = vsel %vm10443_vm1, %v4277_v42, %v10442_v58 }
0x1772   : > { %vm4174_vm0 = vcmp.lt.s32.totalorder %v4067_v35, %v4173_v49  ;;  %v4014_v6 = vpop.xlane.xlu0 %4013  ;;  %v4295_v7 = vsel %vm10445_vm2, %v4286_v41, %v10444_v23  ;;  %vm10449_vm11 = vcmask 97280   ;;  %v4142_v42 = vand.u32 65535, %v9664_v52 }
0x1773   : > { %vm4041_vm15 = vcmp.le.f32.partialorder %v9505_v15, %v4014_v6  ;;  %vm4042_vm4 = vcmp.le.f32.partialorder %v9508_v31, %v4014_v6  ;;  %v4334_v30 = vsel %vm4332_vm10, %v10440_v22, %v4014_v6  ;;  %v9677_v37 = vcvt.s32.f32 %v4160_v18 }
0x1774   : > { %v4057_v62 = vsel %vm4041_vm15, %v10441_v39, 2147483647  ;;  %v4058_v56 = vsel %vm4042_vm4, %v10382_v43, 2147483647  ;;  %4462 = vst.msk [vmem:[#allocation2 + $0x8] sm:$0xff] %vm500_vm3, %v4334_v30  ;;  %v4145_v47 = vcvt.s32.f32 %v4143_v26  ;;  %v9682_v11 = vsel %vm4174_vm0, %v4067_v35, %v4173_v49 }
0x1775   : > { %v4088_v15 = vsel %vm500_vm3, %v4058_v56, 2147483647  ;;  %4163 = vmin.xlane.f32.xlu0 %v9677_v37  ;;  %v4177_v31 = vshra.s32 %v9682_v11, 16  ;;  %v4304_v33 = vsel %vm10447_vm5, %v4295_v7, %v10446_v36  ;;  %v4127_v26 = vcvt.s32.f32 %v4125_v54 }
0x1776   : > { %vm4089_vm13 = vcmp.lt.s32.totalorder %v4057_v62, %v4088_v15  ;;  %4146 = vmin.xlane.f32.xlu2 %v4145_v47  ;;  %v4313_v17 = vsel %vm10449_vm11, %v4304_v33, %v10448_v53  ;;  %v4176_v50 = vand.u32 65535, %v9682_v11 }
0x1777   : > { %v4179_v46 = vcvt.s32.f32 %v4177_v31  ;;  %v4090_v27 = vsel %vm4089_vm13, %v4057_v62, %v4088_v15  ;;  %v4322_v0 = vsel %vm4314_vm7, %v4313_v17, %v10450_v29 }
0x1778   : > { %v4092_v13 = vshra.s32 %v4090_v27, 16  ;;  %v4331_v44 = vsel %vm10436_vm12, %v4322_v0, %v10451_v57  ;;  %v4178_v62 = vcvt.s32.f32 %v4176_v50  ;;  %v4091_v56 = vand.u32 65535, %v4090_v27 }
0x1779   : > { %4180 = vmin.xlane.f32.xlu1 %v4179_v46 }
0x177a   : > { %v4038_v38 = vpop.xlane.xlu0 %4037  ;;  %v4094_v5 = vcvt.s32.f32 %v4092_v13  ;;  %v4093_v58 = vcvt.s32.f32 %v4091_v56 }
0x177b   : > { %vm4053_vm8 = vcmp.le.f32.partialorder %v9520_v45, %v4038_v38  ;;  %vm4054_vm14 = vcmp.le.f32.partialorder %v9523_v8, %v4038_v38  ;;  %v4340_v16 = vsel %vm4332_vm10, %v4331_v44, %v4038_v38  ;;  %v4074_v45 = vand.u32 65535, %v9536_v20 }
0x177c   : > { %v4069_v34 = vsel %vm4053_vm8, %v10452_v60, 2147483647  ;;  %v4070_v25 = vsel %vm4054_vm14, %v10382_v43, 2147483647  ;;  %4468 = vst.msk [vmem:[#allocation2 + $0x38] sm:$0xff] %vm500_vm3, %v4340_v16  ;;  %v4108_v43 = vand.u32 65535, %v9558_v63 }
0x177d   : > { %v4190_v55 = vsel %vm500_vm3, %v4070_v25, 2147483647  ;;  %v4076_v8 = vcvt.s32.f32 %v4074_v45 }
0x177e   : > { %vm4191_vm7 = vcmp.lt.s32.totalorder %v4069_v34, %v4190_v55  ;;  %4095 = vmin.xlane.f32.xlu2 %v4094_v5  ;;  %v4110_v49 = vcvt.s32.f32 %v4108_v43 }
0x177f   : > { %v4192_v3 = vsel %vm4191_vm7, %v4069_v34, %v4190_v55 }
0x1780   : > { %v4194_v21 = vshra.s32 %v4192_v3, 16  ;;  %v4193_v11 = vand.u32 65535, %v4192_v3 }
0x1782   : > { %v4196_v61 = vcvt.s32.f32 %v4194_v21 }
0x1786   : > { %4197 = vmin.xlane.f32.xlu2 %v4196_v61 }
0x17cb   : > { %v4079_v35 = vpop.xlane.xlu1 %4078 }
0x17cc   : > { %vm4080_vm9 = vcmp.eq.f32.partialorder %v9539_v14, %v4079_v35  ;;  %v4159_v14 = vand.u32 65535, %v9662_v12  ;;  %v4085_v31 = vcvt.f32.s32 %v4079_v35 }
0x17cd   : > { %v4081_v48 = vsel %vm4080_vm9, %v4076_v8, inf }
0x17ce   : > { %4082 = vmin.xlane.f32.xlu0 %v4081_v48  ;;  %v4161_v63 = vcvt.s32.f32 %v4159_v14  ;;  %v4086_v7 = vshll.u32 %v4085_v31, 16 }
0x17d3   : > { %v4113_v10 = vpop.xlane.xlu0 %4112 }
0x17d4   : > { %vm4114_vm6 = vcmp.eq.f32.partialorder %v9563_v4, %v4113_v10  ;;  %v4144_v4 = vcvt.s32.f32 %v4142_v42  ;;  %v4119_v27 = vcvt.f32.s32 %v4113_v10 }
0x17d5   : > { %v4130_v18 = vpop.xlane.xlu1 %4129  ;;  %v4115_v2 = vsel %vm4114_vm6, %v4110_v49, inf }
0x17d6   : > { %vm4131_vm0 = vcmp.eq.f32.partialorder %v9567_v24, %v4130_v18  ;;  %4116 = vmin.xlane.f32.xlu2 %v4115_v2  ;;  %v4136_v53 = vcvt.f32.s32 %v4130_v18  ;;  %v4120_v13 = vshll.u32 %v4119_v27, 16 }
0x17d7   : > { %v4132_v20 = vsel %vm4131_vm0, %v4127_v26, inf }
0x17d8   : > { %4133 = vmin.xlane.f32.xlu0 %v4132_v20  ;;  %v4137_v57 = vshll.u32 %v4136_v53, 16 }
0x17e8   : > { %v4164_v6 = vpop.xlane.xlu0 %4163 }
0x17e9   : > { %v4147_v22 = vpop.xlane.xlu2 %4146  ;;  %vm4165_vm15 = vcmp.eq.f32.partialorder %v9677_v37, %v4164_v6  ;;  %v4195_v37 = vcvt.s32.f32 %v4193_v11  ;;  %v4170_v60 = vcvt.f32.s32 %v4164_v6 }
0x17ea   : > { %vm4148_vm4 = vcmp.eq.f32.partialorder %v4145_v47, %v4147_v22  ;;  %v4166_v30 = vsel %vm4165_vm15, %v4161_v63, inf  ;;  %v4153_v34 = vcvt.f32.s32 %v4147_v22 }
0x17eb   : > { %v4149_v39 = vsel %vm4148_vm4, %v4144_v4, inf  ;;  %4167 = vmin.xlane.f32.xlu2 %v4166_v30  ;;  %v4171_v55 = vshll.u32 %v4170_v60, 16 }
0x17ec   : > { %4150 = vmin.xlane.f32.xlu1 %v4149_v39  ;;  %v4181_v24 = vpop.xlane.xlu1 %4180  ;;  %v4154_v45 = vshll.u32 %v4153_v34, 16 }
0x17ed   : > { %vm4182_vm1 = vcmp.eq.f32.partialorder %v4179_v46, %v4181_v24  ;;  %v4187_v3 = vcvt.f32.s32 %v4181_v24 }
0x17ee   : > { %v4183_v12 = vsel %vm4182_vm1, %v4178_v62, inf }
0x17ef   : > { %4184 = vmin.xlane.f32.xlu0 %v4183_v12  ;;  %v4188_v43 = vshll.u32 %v4187_v3, 16 }
0x17f1   : > { %v4096_v52 = vpop.xlane.xlu2 %4095 }
0x17f2   : > { %vm4097_vm2 = vcmp.eq.f32.partialorder %v4094_v5, %v4096_v52 }
0x17f3   : > { %v4098_v41 = vsel %vm4097_vm2, %v4093_v58, inf }
0x17f4   : > { %4099 = vmin.xlane.f32.xlu1 %v4098_v41 }
0x17f9   : > { %v4198_v15 = vpop.xlane.xlu2 %4197 }
0x17fa   : > { %vm4199_vm13 = vcmp.eq.f32.partialorder %v4196_v61, %v4198_v15 }
0x17fb   : > { %v4200_v47 = vsel %vm4199_vm13, %v4195_v37, inf }
0x17fc   : > { %4201 = vmin.xlane.f32.xlu1 %v4200_v47 }
0x1841   : > { %v4083_v23 = vpop.xlane.xlu0 %4082 }
0x1842   : > { %v4084_v36 = vcvt.f32.s32 %v4083_v23 }
0x1844   : > { %v4087_v33 = vadd.s32 %v4086_v7, %v4084_v36 }
0x1846   : > { %v4453_v46 = vsel %vm4332_vm10, %v9405_v59, %v4087_v33 }
0x1847   : > { %4469 = vst.msk [vmem:[#allocation3] sm:$0xff] %vm500_vm3, %v4453_v46 }
0x1849   : > { %v4117_v17 = vpop.xlane.xlu2 %4116 }
0x184a   : > { %v4118_v29 = vcvt.f32.s32 %v4117_v17 }
0x184b   : > { %v4134_v0 = vpop.xlane.xlu0 %4133 }
0x184c   : > { %v4121_v44 = vadd.s32 %v4120_v13, %v4118_v29  ;;  %v4135_v38 = vcvt.f32.s32 %v4134_v0 }
0x184e   : > { %v4455_v5 = vsel %vm4332_vm10, %v9420_v1, %v4121_v44  ;;  %v4138_v16 = vadd.s32 %v4137_v57, %v4135_v38 }
0x184f   : > { %4471 = vst.msk [vmem:[#allocation3 + $0x10] sm:$0xff] %vm500_vm3, %v4455_v5 }
0x1850   : > { %v4456_v59 = vsel %vm4332_vm10, %v9432_v51, %v4138_v16  ;;  %v4102_v51 = vcvt.f32.s32 %v4096_v52 }
0x1851   : > { %4472 = vst.msk [vmem:[#allocation3 + $0x18] sm:$0xff] %vm500_vm3, %v4456_v59 }
0x1852   : > { %v4103_v20 = vshll.u32 %v4102_v51, 16 }
0x185e   : > { %v4168_v25 = vpop.xlane.xlu2 %4167 }
0x185f   : > { %v4151_v21 = vpop.xlane.xlu1 %4150  ;;  %v4169_v61 = vcvt.f32.s32 %v4168_v25 }
0x1860   : > { %v4152_v35 = vcvt.f32.s32 %v4151_v21 }
0x1861   : > { %v4172_v8 = vadd.s32 %v4171_v55, %v4169_v61 }
0x1862   : > { %v4155_v48 = vadd.s32 %v4154_v45, %v4152_v35  ;;  %v4185_v1 = vpop.xlane.xlu0 %4184 }
0x1863   : > { %v4458_v54 = vsel %vm4332_vm10, %v9454_v9, %v4172_v8  ;;  %v4186_v10 = vcvt.f32.s32 %v4185_v1  ;;  %v4204_v9 = vcvt.f32.s32 %v4198_v15 }
0x1864   : > { %v4457_v49 = vsel %vm4332_vm10, %v9460_v40, %v4155_v48  ;;  %4474 = vst.msk [vmem:[#allocation3 + $0x28] sm:$0xff] %vm500_vm3, %v4458_v54 }
0x1865   : > { %4473 = vst.msk [vmem:[#allocation3 + $0x20] sm:$0xff] %vm500_vm3, %v4457_v49  ;;  %v4189_v18 = vadd.s32 %v4188_v43, %v4186_v10  ;;  %v4205_v63 = vshll.u32 %v4204_v9, 16 }
0x1867   : > { %v4100_v26 = vpop.xlane.xlu1 %4099  ;;  %v4459_v2 = vsel %vm4332_vm10, %v9482_v19, %v4189_v18 }
0x1868   : > { %v4101_v14 = vcvt.f32.s32 %v4100_v26  ;;  %4475 = vst.msk [vmem:[#allocation3 + $0x30] sm:$0xff] %vm500_vm3, %v4459_v2 }
0x186a   : > { %v4104_v42 = vadd.s32 %v4103_v20, %v4101_v14 }
0x186c   : > { %v4454_v6 = vsel %vm4332_vm10, %v9500_v32, %v4104_v42 }
0x186d   : > { %4470 = vst.msk [vmem:[#allocation3 + $0x8] sm:$0xff] %vm500_vm3, %v4454_v6 }
0x186f   : > { %v4202_v40 = vpop.xlane.xlu1 %4201 }
0x1870   : > { %v4203_v50 = vcvt.f32.s32 %v4202_v40 }
0x1871   : > { %4480 = sbr.rel (%p4612_p8) target bundleno = 6270 (0x187e), region = 44 }
0x1872   : > { %v4206_v22 = vadd.s32 %v4205_v63, %v4203_v50 }
0x1874   : > { %v4460_v4 = vsel %vm4332_vm10, %v9515_v28, %v4206_v22 }
0x1875   : > { %4476 = vst.msk [vmem:[#allocation3 + $0x38] sm:$0xff] %vm500_vm3, %v4460_v4 }
0x1876   : > { %4481 = vst.msk [vmem:[%s4792_s14] sm:$0xff] %vm500_vm3, %v4453_v46 }
0x1877   : > { %4482 = vst.msk [vmem:[%s4792_s14 + $0x8] sm:$0xff] %vm500_vm3, %v4454_v6 }
0x1878   : > { %4483 = vst.msk [vmem:[%s4792_s14 + $0x10] sm:$0xff] %vm500_vm3, %v4455_v5 }
0x1879   : > { %4484 = vst.msk [vmem:[%s4792_s14 + $0x18] sm:$0xff] %vm500_vm3, %v4456_v59 }
0x187a   : > { %4485 = vst.msk [vmem:[%s4792_s14 + $0x20] sm:$0xff] %vm500_vm3, %v4457_v49 }
0x187b   : > { %4486 = vst.msk [vmem:[%s4792_s14 + $0x28] sm:$0xff] %vm500_vm3, %v4458_v54 }
0x187c   : > { %4487 = vst.msk [vmem:[%s4792_s14 + $0x30] sm:$0xff] %vm500_vm3, %v4459_v2 }
0x187d   : > { %4488 = vst.msk [vmem:[%s4792_s14 + $0x38] sm:$0xff] %vm500_vm3, %v4460_v4 }
0x187e PF: > { %s14_s19 = sadd.s32 1, %s4704_s19   ;;  %s10453_s15 = smov %s4696_s17 }
0x187f   : > { %p11_p9 = scmp.ge.s32.totalorder %s14_s19, 10   ;;  %s10454_s16 = smov %s4700_s18 }
0x1880   : > { %s10455_s17 = smov %s10458_s20  ;;  %s10456_s18 = smov %s10462_s21 }
0x1881   :  { %13 = sbr.rel (!%p11_p9) target bundleno = 3 (0x3), region = 83 }

</bundles_post_ra>
